<compile_context>
chip_gen: v5e
topology: v5e:2x2
jax: 0.10.0
libtpu: 0.0.40
codegen_flags: <defaults>
</compile_context>

<pallas_src>
import math
import numpy as np
import jax
import jax.numpy as jnp
from jax.experimental import pallas as pl
from jax.experimental.pallas import tpu as pltpu

# ----------------------------- configuration -------------------------------
OBS_DIM = 12
SKILL_DIM = 6
HIDDEN = 32
N_LAYER = 3
N_HEAD = 4
HEAD_DIM = HIDDEN // N_HEAD
BATCH = 2
SEQ = 8
MAX_EP_LEN = 100
N_POSITIONS = 1024
LN_EPS = 1e-5
MASK_VALUE = float(np.finfo(np.float32).min)   # reference only (HF-style where-mask)
NEG_BIAS = -1e30                               # finite additive mask used in kernel


# ----------------------------- shared math ---------------------------------
def _layernorm(x, g, b, eps=LN_EPS):
    mu = jnp.mean(x, axis=-1, keepdims=True)
    xc = x - mu
    var = jnp.mean(xc * xc, axis=-1, keepdims=True)
    return xc * jax.lax.rsqrt(var + eps) * g + b


def _gelu(x):
    # TODO(synk): HF GPT2 'gelu' is the exact erf-GELU; erf lowering in Mosaic is
    # not guaranteed, so the numerically-very-close tanh approximation is used.
    c = math.sqrt(2.0 / math.pi)
    return 0.5 * x * (1.0 + jnp.tanh(c * (x + 0.044715 * x * x * x)))


# ------------------------------- kernel -------------------------------------
def dt_kernel(
    obs_ref, skills_ref, rtg_ref, temb_ref, wpe_ref, bias_ref,
    wr_ref, br_ref, wo_ref, bo_ref, ws_ref, bs_ref,
    eln_g_ref, eln_b_ref,
    ln1_g_ref, ln1_b_ref, attn_w_ref, attn_b_ref, aproj_w_ref, aproj_b_ref,
    ln2_g_ref, ln2_b_ref, fc_w_ref, fc_b_ref, mproj_w_ref, mproj_b_ref,
    lnf_g_ref, lnf_b_ref,
    pskill_w_ref, pskill_b_ref, pret_w_ref, pret_b_ref,
    out_ref,
):
    f32 = jnp.float32
    cdt = jnp.bfloat16                  # MXU operand dtype; accumulation stays f32
    R = obs_ref.shape[0]                # B * S rows per token type
    inv_sqrt_d = 1.0 / math.sqrt(HEAD_DIM)

    obs = obs_ref[...]                  # (R, obs_dim)
    skills = skills_ref[...]            # (R, skill_dim)
    rtg = rtg_ref[...]                  # (R, 1)
    temb = temb_ref[...]                # (R, H) timestep embeddings (gathered outside)

    # --- input embeddings + timestep embedding ---
    r_emb = rtg * wr_ref[...] + br_ref[...] + temb                       # Linear(1,H)
    o_emb = (jnp.dot(obs.astype(cdt), wo_ref[...], preferred_element_type=f32)
             + bo_ref[...] + temb)
    s_emb = (jnp.dot(skills.astype(cdt), ws_ref[...], preferred_element_type=f32)
             + bs_ref[...] + temb)

    # Grouped token layout [R-tokens | obs-tokens | skill-tokens]; the original
    # interleaved (R_t, o_t, s_t) order is realized via the permuted positional
    # rows (wpe_ref) and the permuted block-causal mask (bias_ref).
    x = jnp.concatenate([r_emb, o_emb, s_emb], axis=0)                   # (3R, H)
    x = _layernorm(x, eln_g_ref[...], eln_b_ref[...])                    # embed_ln
    x = x + wpe_ref[...]                                                 # GPT2 wpe rows

    bias = bias_ref[...]                                                 # (3R,3R) 0/-1e30

    # --- GPT2 blocks (static unroll; tensors are tiny, no spill pressure) ---
    for l in range(N_LAYER):
        # causal multi-head self-attention, all heads in one batched dot_general
        h = _layernorm(x, ln1_g_ref[l], ln1_b_ref[l])
        qkv = (jnp.dot(h.astype(cdt), attn_w_ref[l], preferred_element_type=f32)
               + attn_b_ref[l])                                          # (3R, 3H)
        q = qkv[:, :HIDDEN].astype(cdt)
        k = qkv[:, HIDDEN:2 * HIDDEN].astype(cdt)
        v = qkv[:, 2 * HIDDEN:].astype(cdt)

        def split_heads(z):                                              # (3R,H)->(NH,3R,HD)
            return jnp.stack(
                [z[:, hd * HEAD_DIM:(hd + 1) * HEAD_DIM] for hd in range(N_HEAD)],
                axis=0)

        qh, kh, vh = split_heads(q), split_heads(k), split_heads(v)
        scores = jnp.einsum("hqd,hkd->hqk", qh, kh,
                            preferred_element_type=f32) * inv_sqrt_d     # (NH,3R,3R)
        scores = scores + bias[None]                                     # block-causal
        scores = scores - jnp.max(scores, axis=-1, keepdims=True)
        p = jnp.exp(scores)
        p = p * pl.reciprocal(jnp.sum(p, axis=-1, keepdims=True), approx=True)
        ctx = jnp.einsum("hqk,hkd->hqd", p.astype(cdt), vh,
                         preferred_element_type=f32)                     # (NH,3R,HD)
        ctx2d = jnp.concatenate([ctx[hd] for hd in range(N_HEAD)], axis=-1)
        attn_out = (jnp.dot(ctx2d.astype(cdt), aproj_w_ref[l],
                            preferred_element_type=f32) + aproj_b_ref[l])
        x = x + attn_out

        # MLP
        h2 = _layernorm(x, ln2_g_ref[l], ln2_b_ref[l])
        ff = (jnp.dot(h2.astype(cdt), fc_w_ref[l], preferred_element_type=f32)
              + fc_b_ref[l])
        ff = _gelu(ff)
        ff = (jnp.dot(ff.astype(cdt), mproj_w_ref[l], preferred_element_type=f32)
              + mproj_b_ref[l])
        x = x + ff

    x = _layernorm(x, lnf_g_ref[...], lnf_b_ref[...])                    # ln_f

    # --- prediction heads on obs / skill token rows (static sublane slices) ---
    x_obs = x[R:2 * R]
    x_skill = x[2 * R:3 * R]
    skill_preds = (jnp.dot(x_obs.astype(cdt), pskill_w_ref[...],
                           preferred_element_type=f32) + pskill_b_ref[...])   # (R,6)
    ret_preds = (jnp.dot(x_skill.astype(cdt), pret_w_ref[...],
                         preferred_element_type=f32) + pret_b_ref[...])       # (R,1)
    # single merged lane-contiguous output store
    out_ref[...] = jnp.concatenate([skill_preds, ret_preds], axis=-1)


# ------------------------------ wrapper --------------------------------------
def skill_dt_forward(p, obs, skills, rtg, timesteps):
    B, S, _ = obs.shape
    R = B * S
    bf = jnp.bfloat16

    # Glue (cheap XLA ops outside the kernel): flatten batch into rows (b,t),
    # gather timestep embeddings, gather permuted positional rows, and build the
    # block-diagonal (per-batch) causal mask in the grouped token order.
    obs_f = obs.reshape(R, OBS_DIM)
    skills_f = skills.reshape(R, SKILL_DIM)
    rtg_f = rtg.reshape(R, 1)
    temb_f = jnp.take(p["wte_time"], timesteps, axis=0).reshape(R, HIDDEN)

    tau = np.repeat(np.arange(3), R)                  # token type per grouped row
    b_idx = np.tile(np.repeat(np.arange(B), S), 3)    # batch element per row
    t_idx = np.tile(np.arange(S), 3 * B)              # timestep per row
    pos = 3 * t_idx + tau                             # original interleaved position
    allowed = (b_idx[:, None] == b_idx[None, :]) & (pos[:, None] >= pos[None, :])
    mask_bias = jnp.asarray(np.where(allowed, 0.0, NEG_BIAS).astype(np.float32))
    wpe_perm = jnp.take(p["wpe"], jnp.asarray(pos, dtype=jnp.int32), axis=0)

    ins = [
        obs_f, skills_f, rtg_f, temb_f, wpe_perm, mask_bias,
        p["wr"], p["br"], p["wo"].astype(bf), p["bo"], p["ws"].astype(bf), p["bs"],
        p["eln_g"], p["eln_b"],
        p["ln1_g"], p["ln1_b"], p["attn_w"].astype(bf), p["attn_b"],
        p["aproj_w"].astype(bf), p["aproj_b"],
        p["ln2_g"], p["ln2_b"], p["fc_w"].astype(bf), p["fc_b"],
        p["mproj_w"].astype(bf), p["mproj_b"],
        p["lnf_g"], p["lnf_b"],
        p["pskill_w"].astype(bf), p["pskill_b"],
        p["pret_w"].astype(bf), p["pret_b"],
    ]

    def full_spec(a):
        nd = a.ndim
        return pl.BlockSpec(a.shape, lambda i, _nd=nd: (0,) * _nd)

    fn = pl.pallas_call(
        dt_kernel,
        out_shape=jax.ShapeDtypeStruct((R, SKILL_DIM + 1), jnp.float32),
        grid_spec=pltpu.PrefetchScalarGridSpec(
            num_scalar_prefetch=0,
            grid=(1,),
            in_specs=[full_spec(a) for a in ins],
            out_specs=pl.BlockSpec((R, SKILL_DIM + 1), lambda i: (0, 0)),
        ),
        compiler_params=pltpu.CompilerParams(
            dimension_semantics=("arbitrary",)),
    )
    out = fn(*ins)                                    # (R, skill_dim + 1)
    out = out.reshape(B, S, SKILL_DIM + 1)
    return out[..., :SKILL_DIM], out[..., SKILL_DIM:]


# --------------------------- parameter init ----------------------------------
def init_params(key):
    keys = iter(jax.random.split(key, 16))

    def nrm(shape, scale=0.02):
        return (scale * jax.random.normal(next(keys), shape)).astype(jnp.float32)

    H, L = HIDDEN, N_LAYER
    p = {}
    p["wte_time"] = nrm((MAX_EP_LEN, H))           # embed_timestep table
    p["wpe"] = nrm((N_POSITIONS, H))               # GPT2 positional table
    p["wr"] = nrm((1, H)); p["br"] = jnp.zeros((1, H), jnp.float32)
    p["wo"] = nrm((OBS_DIM, H)); p["bo"] = jnp.zeros((1, H), jnp.float32)
    p["ws"] = nrm((SKILL_DIM, H)); p["bs"] = jnp.zeros((1, H), jnp.float32)
    p["eln_g"] = jnp.ones((1, H), jnp.float32); p["eln_b"] = jnp.zeros((1, H), jnp.float32)
    p["ln1_g"] = jnp.ones((L, 1, H), jnp.float32); p["ln1_b"] = jnp.zeros((L, 1, H), jnp.float32)
    p["attn_w"] = nrm((L, H, 3 * H)); p["attn_b"] = jnp.zeros((L, 1, 3 * H), jnp.float32)
    p["aproj_w"] = nrm((L, H, H)); p["aproj_b"] = jnp.zeros((L, 1, H), jnp.float32)
    p["ln2_g"] = jnp.ones((L, 1, H), jnp.float32); p["ln2_b"] = jnp.zeros((L, 1, H), jnp.float32)
    p["fc_w"] = nrm((L, H, 4 * H)); p["fc_b"] = jnp.zeros((L, 1, 4 * H), jnp.float32)
    p["mproj_w"] = nrm((L, 4 * H, H)); p["mproj_b"] = jnp.zeros((L, 1, H), jnp.float32)
    p["lnf_g"] = jnp.ones((1, H), jnp.float32); p["lnf_b"] = jnp.zeros((1, H), jnp.float32)
    p["pskill_w"] = nrm((H, SKILL_DIM)); p["pskill_b"] = jnp.zeros((1, SKILL_DIM), jnp.float32)
    p["pret_w"] = nrm((H, 1)); p["pret_b"] = jnp.zeros((1, 1), jnp.float32)
    return p


# ------------------------- pure-JAX reference --------------------------------
def reference_forward(p, obs, skills, rtg, timesteps):
    B, S, _ = obs.shape
    T = 3 * S
    temb = p["wte_time"][timesteps]
    r = rtg * p["wr"] + p["br"] + temb
    o = obs @ p["wo"] + p["bo"] + temb
    s = skills @ p["ws"] + p["bs"] + temb
    x = jnp.stack([r, o, s], axis=2).reshape(B, T, HIDDEN)
    x = _layernorm(x, p["eln_g"], p["eln_b"])
    x = x + p["wpe"][:T]
    causal = jnp.asarray(np.tril(np.ones((T, T), bool)))
    for l in range(N_LAYER):
        h = _layernorm(x, p["ln1_g"][l], p["ln1_b"][l])
        qkv = h @ p["attn_w"][l] + p["attn_b"][l]
        q, k, v = jnp.split(qkv, 3, axis=-1)

        def heads(z):
            return z.reshape(B, T, N_HEAD, HEAD_DIM).transpose(0, 2, 1, 3)

        q, k, v = heads(q), heads(k), heads(v)
        scores = jnp.einsum("bhqd,bhkd->bhqk", q, k) / math.sqrt(HEAD_DIM)
        scores = jnp.where(causal, scores, MASK_VALUE)
        probs = jax.nn.softmax(scores, axis=-1)
        ctx = jnp.einsum("bhqk,bhkd->bhqd", probs, v)
        ctx = ctx.transpose(0, 2, 1, 3).reshape(B, T, HIDDEN)
        x = x + ctx @ p["aproj_w"][l] + p["aproj_b"][l]
        h2 = _layernorm(x, p["ln2_g"][l], p["ln2_b"][l])
        ff = _gelu(h2 @ p["fc_w"][l] + p["fc_b"][l])
        x = x + ff @ p["mproj_w"][l] + p["mproj_b"][l]
    x = _layernorm(x, p["lnf_g"], p["lnf_b"])
    x = x.reshape(B, S, 3, HIDDEN)
    skill_preds = x[:, :, 1] @ p["pskill_w"] + p["pskill_b"]
    return_preds = x[:, :, 2] @ p["pret_w"] + p["pret_b"]
    return skill_preds, return_preds


# --------------------------------- main ---------------------------------------
if __name__ == "__main__":
    key = jax.random.PRNGKey(0)
    kp, ko, ks_, kr = jax.random.split(key, 4)
    params = init_params(kp)

    obs = jax.random.normal(ko, (BATCH, SEQ, OBS_DIM), jnp.float32)
    skills = jax.random.normal(ks_, (BATCH, SEQ, SKILL_DIM), jnp.float32)
    returns_to_go = jax.random.normal(kr, (BATCH, SEQ, 1), jnp.float32)
    timesteps = jnp.tile(jnp.arange(SEQ, dtype=jnp.int32)[None, :], (BATCH, 1))

    skill_preds, return_preds = skill_dt_forward(
        params, obs, skills, returns_to_go, timesteps)
    jax.block_until_ready((skill_preds, return_preds))

    assert skill_preds.shape == (BATCH, SEQ, SKILL_DIM)
    assert return_preds.shape == (BATCH, SEQ, 1)

    ref_skill, ref_ret = reference_forward(
        params, obs, skills, returns_to_go, timesteps)
    d_skill = float(jnp.max(jnp.abs(skill_preds - ref_skill)))
    d_ret = float(jnp.max(jnp.abs(return_preds - ref_ret)))
    assert d_skill < 5e-2 and d_ret < 5e-2, (d_skill, d_ret)

    print("KERNEL_OK")
</pallas_src>

<mosaic_0001>
module attributes {stable_mosaic.version = 11 : i64} {
  func.func @dt_kernel(%arg0: i32, %arg1: memref<16x12xf32, #tpu.memory_space<vmem>>, %arg2: memref<16x6xf32, #tpu.memory_space<vmem>>, %arg3: memref<16x1xf32, #tpu.memory_space<vmem>>, %arg4: memref<16x32xf32, #tpu.memory_space<vmem>>, %arg5: memref<48x32xf32, #tpu.memory_space<vmem>>, %arg6: memref<48x48xf32, #tpu.memory_space<vmem>>, %arg7: memref<1x32xf32, #tpu.memory_space<vmem>>, %arg8: memref<1x32xf32, #tpu.memory_space<vmem>>, %arg9: memref<12x32xbf16, #tpu.memory_space<vmem>>, %arg10: memref<1x32xf32, #tpu.memory_space<vmem>>, %arg11: memref<6x32xbf16, #tpu.memory_space<vmem>>, %arg12: memref<1x32xf32, #tpu.memory_space<vmem>>, %arg13: memref<1x32xf32, #tpu.memory_space<vmem>>, %arg14: memref<1x32xf32, #tpu.memory_space<vmem>>, %arg15: memref<3x1x32xf32, #tpu.memory_space<vmem>>, %arg16: memref<3x1x32xf32, #tpu.memory_space<vmem>>, %arg17: memref<3x32x96xbf16, #tpu.memory_space<vmem>>, %arg18: memref<3x1x96xf32, #tpu.memory_space<vmem>>, %arg19: memref<3x32x32xbf16, #tpu.memory_space<vmem>>, %arg20: memref<3x1x32xf32, #tpu.memory_space<vmem>>, %arg21: memref<3x1x32xf32, #tpu.memory_space<vmem>>, %arg22: memref<3x1x32xf32, #tpu.memory_space<vmem>>, %arg23: memref<3x32x128xbf16, #tpu.memory_space<vmem>>, %arg24: memref<3x1x128xf32, #tpu.memory_space<vmem>>, %arg25: memref<3x128x32xbf16, #tpu.memory_space<vmem>>, %arg26: memref<3x1x32xf32, #tpu.memory_space<vmem>>, %arg27: memref<1x32xf32, #tpu.memory_space<vmem>>, %arg28: memref<1x32xf32, #tpu.memory_space<vmem>>, %arg29: memref<32x6xbf16, #tpu.memory_space<vmem>>, %arg30: memref<1x6xf32, #tpu.memory_space<vmem>>, %arg31: memref<32x1xbf16, #tpu.memory_space<vmem>>, %arg32: memref<1x1xf32, #tpu.memory_space<vmem>>, %arg33: memref<16x7xf32, #tpu.memory_space<vmem>>) attributes {dimension_semantics = [#tpu.dimension_semantics<arbitrary>], iteration_bounds = array<i64: 1>, scalar_prefetch = 0 : i64, scratch_operands = 0 : i64, tpu.core_type = #tpu.core_type<tc>, window_params = [{pipeline_mode = #tpu.pipeline_mode<synchronous>, transform_indices = @transform_0, window_bounds = array<i64: 16, 12>}, {pipeline_mode = #tpu.pipeline_mode<synchronous>, transform_indices = @transform_1, window_bounds = array<i64: 16, 6>}, {pipeline_mode = #tpu.pipeline_mode<synchronous>, transform_indices = @transform_2, window_bounds = array<i64: 16, 1>}, {pipeline_mode = #tpu.pipeline_mode<synchronous>, transform_indices = @transform_3, window_bounds = array<i64: 16, 32>}, {pipeline_mode = #tpu.pipeline_mode<synchronous>, transform_indices = @transform_4, window_bounds = array<i64: 48, 32>}, {pipeline_mode = #tpu.pipeline_mode<synchronous>, transform_indices = @transform_5, window_bounds = array<i64: 48, 48>}, {pipeline_mode = #tpu.pipeline_mode<synchronous>, transform_indices = @transform_6, window_bounds = array<i64: 1, 32>}, {pipeline_mode = #tpu.pipeline_mode<synchronous>, transform_indices = @transform_7, window_bounds = array<i64: 1, 32>}, {pipeline_mode = #tpu.pipeline_mode<synchronous>, transform_indices = @transform_8, window_bounds = array<i64: 12, 32>}, {pipeline_mode = #tpu.pipeline_mode<synchronous>, transform_indices = @transform_9, window_bounds = array<i64: 1, 32>}, {pipeline_mode = #tpu.pipeline_mode<synchronous>, transform_indices = @transform_10, window_bounds = array<i64: 6, 32>}, {pipeline_mode = #tpu.pipeline_mode<synchronous>, transform_indices = @transform_11, window_bounds = array<i64: 1, 32>}, {pipeline_mode = #tpu.pipeline_mode<synchronous>, transform_indices = @transform_12, window_bounds = array<i64: 1, 32>}, {pipeline_mode = #tpu.pipeline_mode<synchronous>, transform_indices = @transform_13, window_bounds = array<i64: 1, 32>}, {pipeline_mode = #tpu.pipeline_mode<synchronous>, transform_indices = @transform_14, window_bounds = array<i64: 3, 1, 32>}, {pipeline_mode = #tpu.pipeline_mode<synchronous>, transform_indices = @transform_15, window_bounds = array<i64: 3, 1, 32>}, {pipeline_mode = #tpu.pipeline_mode<synchronous>, transform_indices = @transform_16, window_bounds = array<i64: 3, 32, 96>}, {pipeline_mode = #tpu.pipeline_mode<synchronous>, transform_indices = @transform_17, window_bounds = array<i64: 3, 1, 96>}, {pipeline_mode = #tpu.pipeline_mode<synchronous>, transform_indices = @transform_18, window_bounds = array<i64: 3, 32, 32>}, {pipeline_mode = #tpu.pipeline_mode<synchronous>, transform_indices = @transform_19, window_bounds = array<i64: 3, 1, 32>}, {pipeline_mode = #tpu.pipeline_mode<synchronous>, transform_indices = @transform_20, window_bounds = array<i64: 3, 1, 32>}, {pipeline_mode = #tpu.pipeline_mode<synchronous>, transform_indices = @transform_21, window_bounds = array<i64: 3, 1, 32>}, {pipeline_mode = #tpu.pipeline_mode<synchronous>, transform_indices = @transform_22, window_bounds = array<i64: 3, 32, 128>}, {pipeline_mode = #tpu.pipeline_mode<synchronous>, transform_indices = @transform_23, window_bounds = array<i64: 3, 1, 128>}, {pipeline_mode = #tpu.pipeline_mode<synchronous>, transform_indices = @transform_24, window_bounds = array<i64: 3, 128, 32>}, {pipeline_mode = #tpu.pipeline_mode<synchronous>, transform_indices = @transform_25, window_bounds = array<i64: 3, 1, 32>}, {pipeline_mode = #tpu.pipeline_mode<synchronous>, transform_indices = @transform_26, window_bounds = array<i64: 1, 32>}, {pipeline_mode = #tpu.pipeline_mode<synchronous>, transform_indices = @transform_27, window_bounds = array<i64: 1, 32>}, {pipeline_mode = #tpu.pipeline_mode<synchronous>, transform_indices = @transform_28, window_bounds = array<i64: 32, 6>}, {pipeline_mode = #tpu.pipeline_mode<synchronous>, transform_indices = @transform_29, window_bounds = array<i64: 1, 6>}, {pipeline_mode = #tpu.pipeline_mode<synchronous>, transform_indices = @transform_30, window_bounds = array<i64: 32, 1>}, {pipeline_mode = #tpu.pipeline_mode<synchronous>, transform_indices = @transform_31, window_bounds = array<i64: 1, 1>}, {pipeline_mode = #tpu.pipeline_mode<synchronous>, transform_indices = @transform_32, window_bounds = array<i64: 16, 7>}]} {
    %c0 = arith.constant 0 : index
    %c0_0 = arith.constant 0 : index
    %0 = vector.load %arg1[%c0, %c0_0] : memref<16x12xf32, #tpu.memory_space<vmem>>, vector<16x12xf32>
    %c0_1 = arith.constant 0 : index
    %c0_2 = arith.constant 0 : index
    %1 = vector.load %arg2[%c0_1, %c0_2] : memref<16x6xf32, #tpu.memory_space<vmem>>, vector<16x6xf32>
    %c0_3 = arith.constant 0 : index
    %c0_4 = arith.constant 0 : index
    %2 = vector.load %arg3[%c0_3, %c0_4] : memref<16x1xf32, #tpu.memory_space<vmem>>, vector<16x1xf32>
    %c0_5 = arith.constant 0 : index
    %c0_6 = arith.constant 0 : index
    %3 = vector.load %arg4[%c0_5, %c0_6] : memref<16x32xf32, #tpu.memory_space<vmem>>, vector<16x32xf32>
    %c0_7 = arith.constant 0 : index
    %c0_8 = arith.constant 0 : index
    %4 = vector.load %arg7[%c0_7, %c0_8] : memref<1x32xf32, #tpu.memory_space<vmem>>, vector<1x32xf32>
    %5 = vector.broadcast %2 : vector<16x1xf32> to vector<16x32xf32>
    %6 = vector.broadcast %4 : vector<1x32xf32> to vector<16x32xf32>
    %7 = arith.mulf %5, %6 : vector<16x32xf32>
    %c0_9 = arith.constant 0 : index
    %c0_10 = arith.constant 0 : index
    %8 = vector.load %arg8[%c0_9, %c0_10] : memref<1x32xf32, #tpu.memory_space<vmem>>, vector<1x32xf32>
    %9 = vector.broadcast %8 : vector<1x32xf32> to vector<16x32xf32>
    %10 = arith.addf %7, %9 : vector<16x32xf32>
    %11 = arith.addf %10, %3 : vector<16x32xf32>
    %12 = arith.truncf %0 : vector<16x12xf32> to vector<16x12xbf16>
    %c0_11 = arith.constant 0 : index
    %c0_12 = arith.constant 0 : index
    %13 = vector.load %arg9[%c0_11, %c0_12] : memref<12x32xbf16, #tpu.memory_space<vmem>>, vector<12x32xbf16>
    %cst = arith.constant dense<0.000000e+00> : vector<16x32xf32>
    %14 = tpu.matmul %12, %13, %cst {dimension_numbers = #tpu.dot_dimension_numbers<[1], [0], [0], [1], [0, 0, 1, 1], [], []>} : vector<16x12xbf16>, vector<12x32xbf16>, vector<16x32xf32> -> vector<16x32xf32>
    %c0_13 = arith.constant 0 : index
    %c0_14 = arith.constant 0 : index
    %15 = vector.load %arg10[%c0_13, %c0_14] : memref<1x32xf32, #tpu.memory_space<vmem>>, vector<1x32xf32>
    %16 = vector.broadcast %15 : vector<1x32xf32> to vector<16x32xf32>
    %17 = arith.addf %14, %16 : vector<16x32xf32>
    %18 = arith.addf %17, %3 : vector<16x32xf32>
    %19 = arith.truncf %1 : vector<16x6xf32> to vector<16x6xbf16>
    %c0_15 = arith.constant 0 : index
    %c0_16 = arith.constant 0 : index
    %20 = vector.load %arg11[%c0_15, %c0_16] : memref<6x32xbf16, #tpu.memory_space<vmem>>, vector<6x32xbf16>
    %cst_17 = arith.constant dense<0.000000e+00> : vector<16x32xf32>
    %21 = tpu.matmul %19, %20, %cst_17 {dimension_numbers = #tpu.dot_dimension_numbers<[1], [0], [0], [1], [0, 0, 1, 1], [], []>} : vector<16x6xbf16>, vector<6x32xbf16>, vector<16x32xf32> -> vector<16x32xf32>
    %c0_18 = arith.constant 0 : index
    %c0_19 = arith.constant 0 : index
    %22 = vector.load %arg12[%c0_18, %c0_19] : memref<1x32xf32, #tpu.memory_space<vmem>>, vector<1x32xf32>
    %23 = vector.broadcast %22 : vector<1x32xf32> to vector<16x32xf32>
    %24 = arith.addf %21, %23 : vector<16x32xf32>
    %25 = arith.addf %24, %3 : vector<16x32xf32>
    %26 = tpu.concatenate %11, %18, %25 in 0 : vector<16x32xf32>, vector<16x32xf32>, vector<16x32xf32> -> vector<48x32xf32>
    %c0_20 = arith.constant 0 : index
    %c0_21 = arith.constant 0 : index
    %27 = vector.load %arg13[%c0_20, %c0_21] : memref<1x32xf32, #tpu.memory_space<vmem>>, vector<1x32xf32>
    %c0_22 = arith.constant 0 : index
    %c0_23 = arith.constant 0 : index
    %28 = vector.load %arg14[%c0_22, %c0_23] : memref<1x32xf32, #tpu.memory_space<vmem>>, vector<1x32xf32>
    %cst_24 = arith.constant dense<0.000000e+00> : vector<48xf32>
    %29 = vector.multi_reduction <add>, %26, %cst_24 [1] : vector<48x32xf32> to vector<48xf32>
    %30 = vector.shape_cast %29 : vector<48xf32> to vector<48x1xf32>
    %cst_25 = arith.constant 3.200000e+01 : f32
    %31 = vector.broadcast %cst_25 : f32 to vector<48x1xf32>
    %32 = arith.divf %30, %31 : vector<48x1xf32>
    %33 = vector.broadcast %32 : vector<48x1xf32> to vector<48x32xf32>
    %34 = arith.subf %26, %33 : vector<48x32xf32>
    %35 = arith.mulf %34, %34 : vector<48x32xf32>
    %cst_26 = arith.constant dense<0.000000e+00> : vector<48xf32>
    %36 = vector.multi_reduction <add>, %35, %cst_26 [1] : vector<48x32xf32> to vector<48xf32>
    %37 = vector.shape_cast %36 : vector<48xf32> to vector<48x1xf32>
    %cst_27 = arith.constant 3.200000e+01 : f32
    %38 = vector.broadcast %cst_27 : f32 to vector<48x1xf32>
    %39 = arith.divf %37, %38 : vector<48x1xf32>
    %cst_28 = arith.constant 9.99999974E-6 : f32
    %40 = vector.broadcast %cst_28 : f32 to vector<48x1xf32>
    %41 = arith.addf %39, %40 : vector<48x1xf32>
    %42 = math.rsqrt %41 : vector<48x1xf32>
    %43 = vector.broadcast %42 : vector<48x1xf32> to vector<48x32xf32>
    %44 = arith.mulf %34, %43 : vector<48x32xf32>
    %45 = vector.broadcast %27 : vector<1x32xf32> to vector<48x32xf32>
    %46 = arith.mulf %44, %45 : vector<48x32xf32>
    %47 = vector.broadcast %28 : vector<1x32xf32> to vector<48x32xf32>
    %48 = arith.addf %46, %47 : vector<48x32xf32>
    %c0_29 = arith.constant 0 : index
    %c0_30 = arith.constant 0 : index
    %49 = vector.load %arg5[%c0_29, %c0_30] : memref<48x32xf32, #tpu.memory_space<vmem>>, vector<48x32xf32>
    %50 = arith.addf %48, %49 : vector<48x32xf32>
    %c0_31 = arith.constant 0 : index
    %c0_32 = arith.constant 0 : index
    %51 = vector.load %arg6[%c0_31, %c0_32] : memref<48x48xf32, #tpu.memory_space<vmem>>, vector<48x48xf32>
    %c0_33 = arith.constant 0 : index
    %c0_34 = arith.constant 0 : index
    %c0_35 = arith.constant 0 : index
    %52 = vector.load %arg15[%c0_33, %c0_34, %c0_35] : memref<3x1x32xf32, #tpu.memory_space<vmem>>, vector<1x1x32xf32>
    %53 = vector.shape_cast %52 : vector<1x1x32xf32> to vector<1x32xf32>
    %c0_36 = arith.constant 0 : index
    %c0_37 = arith.constant 0 : index
    %c0_38 = arith.constant 0 : index
    %54 = vector.load %arg16[%c0_36, %c0_37, %c0_38] : memref<3x1x32xf32, #tpu.memory_space<vmem>>, vector<1x1x32xf32>
    %55 = vector.shape_cast %54 : vector<1x1x32xf32> to vector<1x32xf32>
    %cst_39 = arith.constant dense<0.000000e+00> : vector<48xf32>
    %56 = vector.multi_reduction <add>, %50, %cst_39 [1] : vector<48x32xf32> to vector<48xf32>
    %57 = vector.shape_cast %56 : vector<48xf32> to vector<48x1xf32>
    %cst_40 = arith.constant 3.200000e+01 : f32
    %58 = vector.broadcast %cst_40 : f32 to vector<48x1xf32>
    %59 = arith.divf %57, %58 : vector<48x1xf32>
    %60 = vector.broadcast %59 : vector<48x1xf32> to vector<48x32xf32>
    %61 = arith.subf %50, %60 : vector<48x32xf32>
    %62 = arith.mulf %61, %61 : vector<48x32xf32>
    %cst_41 = arith.constant dense<0.000000e+00> : vector<48xf32>
    %63 = vector.multi_reduction <add>, %62, %cst_41 [1] : vector<48x32xf32> to vector<48xf32>
    %64 = vector.shape_cast %63 : vector<48xf32> to vector<48x1xf32>
    %cst_42 = arith.constant 3.200000e+01 : f32
    %65 = vector.broadcast %cst_42 : f32 to vector<48x1xf32>
    %66 = arith.divf %64, %65 : vector<48x1xf32>
    %cst_43 = arith.constant 9.99999974E-6 : f32
    %67 = vector.broadcast %cst_43 : f32 to vector<48x1xf32>
    %68 = arith.addf %66, %67 : vector<48x1xf32>
    %69 = math.rsqrt %68 : vector<48x1xf32>
    %70 = vector.broadcast %69 : vector<48x1xf32> to vector<48x32xf32>
    %71 = arith.mulf %61, %70 : vector<48x32xf32>
    %72 = vector.broadcast %53 : vector<1x32xf32> to vector<48x32xf32>
    %73 = arith.mulf %71, %72 : vector<48x32xf32>
    %74 = vector.broadcast %55 : vector<1x32xf32> to vector<48x32xf32>
    %75 = arith.addf %73, %74 : vector<48x32xf32>
    %76 = arith.truncf %75 : vector<48x32xf32> to vector<48x32xbf16>
    %c0_44 = arith.constant 0 : index
    %c0_45 = arith.constant 0 : index
    %c0_46 = arith.constant 0 : index
    %77 = vector.load %arg17[%c0_44, %c0_45, %c0_46] : memref<3x32x96xbf16, #tpu.memory_space<vmem>>, vector<1x32x96xbf16>
    %78 = vector.shape_cast %77 : vector<1x32x96xbf16> to vector<32x96xbf16>
    %cst_47 = arith.constant dense<0.000000e+00> : vector<48x96xf32>
    %79 = tpu.matmul %76, %78, %cst_47 {dimension_numbers = #tpu.dot_dimension_numbers<[1], [0], [0], [1], [0, 0, 1, 1], [], []>} : vector<48x32xbf16>, vector<32x96xbf16>, vector<48x96xf32> -> vector<48x96xf32>
    %c0_48 = arith.constant 0 : index
    %c0_49 = arith.constant 0 : index
    %c0_50 = arith.constant 0 : index
    %80 = vector.load %arg18[%c0_48, %c0_49, %c0_50] : memref<3x1x96xf32, #tpu.memory_space<vmem>>, vector<1x1x96xf32>
    %81 = vector.shape_cast %80 : vector<1x1x96xf32> to vector<1x96xf32>
    %82 = vector.broadcast %81 : vector<1x96xf32> to vector<48x96xf32>
    %83 = arith.addf %79, %82 : vector<48x96xf32>
    %84 = vector.extract_strided_slice %83 {offsets = [0, 0], sizes = [48, 32], strides = [1, 1]} : vector<48x96xf32> to vector<48x32xf32>
    %85 = arith.truncf %84 : vector<48x32xf32> to vector<48x32xbf16>
    %86 = vector.extract_strided_slice %83 {offsets = [0, 32], sizes = [48, 32], strides = [1, 1]} : vector<48x96xf32> to vector<48x32xf32>
    %87 = arith.truncf %86 : vector<48x32xf32> to vector<48x32xbf16>
    %88 = vector.extract_strided_slice %83 {offsets = [0, 64], sizes = [48, 32], strides = [1, 1]} : vector<48x96xf32> to vector<48x32xf32>
    %89 = arith.truncf %88 : vector<48x32xf32> to vector<48x32xbf16>
    %90 = vector.extract_strided_slice %85 {offsets = [0, 0], sizes = [48, 8], strides = [1, 1]} : vector<48x32xbf16> to vector<48x8xbf16>
    %91 = vector.extract_strided_slice %85 {offsets = [0, 8], sizes = [48, 8], strides = [1, 1]} : vector<48x32xbf16> to vector<48x8xbf16>
    %92 = vector.extract_strided_slice %85 {offsets = [0, 16], sizes = [48, 8], strides = [1, 1]} : vector<48x32xbf16> to vector<48x8xbf16>
    %93 = vector.extract_strided_slice %85 {offsets = [0, 24], sizes = [48, 8], strides = [1, 1]} : vector<48x32xbf16> to vector<48x8xbf16>
    %94 = vector.shape_cast %90 : vector<48x8xbf16> to vector<1x48x8xbf16>
    %95 = vector.shape_cast %91 : vector<48x8xbf16> to vector<1x48x8xbf16>
    %96 = vector.shape_cast %92 : vector<48x8xbf16> to vector<1x48x8xbf16>
    %97 = vector.shape_cast %93 : vector<48x8xbf16> to vector<1x48x8xbf16>
    %98 = tpu.concatenate %94, %95, %96, %97 in 0 : vector<1x48x8xbf16>, vector<1x48x8xbf16>, vector<1x48x8xbf16>, vector<1x48x8xbf16> -> vector<4x48x8xbf16>
    %99 = vector.extract_strided_slice %87 {offsets = [0, 0], sizes = [48, 8], strides = [1, 1]} : vector<48x32xbf16> to vector<48x8xbf16>
    %100 = vector.extract_strided_slice %87 {offsets = [0, 8], sizes = [48, 8], strides = [1, 1]} : vector<48x32xbf16> to vector<48x8xbf16>
    %101 = vector.extract_strided_slice %87 {offsets = [0, 16], sizes = [48, 8], strides = [1, 1]} : vector<48x32xbf16> to vector<48x8xbf16>
    %102 = vector.extract_strided_slice %87 {offsets = [0, 24], sizes = [48, 8], strides = [1, 1]} : vector<48x32xbf16> to vector<48x8xbf16>
    %103 = vector.shape_cast %99 : vector<48x8xbf16> to vector<1x48x8xbf16>
    %104 = vector.shape_cast %100 : vector<48x8xbf16> to vector<1x48x8xbf16>
    %105 = vector.shape_cast %101 : vector<48x8xbf16> to vector<1x48x8xbf16>
    %106 = vector.shape_cast %102 : vector<48x8xbf16> to vector<1x48x8xbf16>
    %107 = tpu.concatenate %103, %104, %105, %106 in 0 : vector<1x48x8xbf16>, vector<1x48x8xbf16>, vector<1x48x8xbf16>, vector<1x48x8xbf16> -> vector<4x48x8xbf16>
    %108 = vector.extract_strided_slice %89 {offsets = [0, 0], sizes = [48, 8], strides = [1, 1]} : vector<48x32xbf16> to vector<48x8xbf16>
    %109 = vector.extract_strided_slice %89 {offsets = [0, 8], sizes = [48, 8], strides = [1, 1]} : vector<48x32xbf16> to vector<48x8xbf16>
    %110 = vector.extract_strided_slice %89 {offsets = [0, 16], sizes = [48, 8], strides = [1, 1]} : vector<48x32xbf16> to vector<48x8xbf16>
    %111 = vector.extract_strided_slice %89 {offsets = [0, 24], sizes = [48, 8], strides = [1, 1]} : vector<48x32xbf16> to vector<48x8xbf16>
    %112 = vector.shape_cast %108 : vector<48x8xbf16> to vector<1x48x8xbf16>
    %113 = vector.shape_cast %109 : vector<48x8xbf16> to vector<1x48x8xbf16>
    %114 = vector.shape_cast %110 : vector<48x8xbf16> to vector<1x48x8xbf16>
    %115 = vector.shape_cast %111 : vector<48x8xbf16> to vector<1x48x8xbf16>
    %116 = tpu.concatenate %112, %113, %114, %115 in 0 : vector<1x48x8xbf16>, vector<1x48x8xbf16>, vector<1x48x8xbf16>, vector<1x48x8xbf16> -> vector<4x48x8xbf16>
    "tpu.trace_start"() <{level = 10 : i32, message = "hqd,hkd->hqk"}> : () -> ()
    %cst_51 = arith.constant dense<0.000000e+00> : vector<4x48x48xf32>
    %117 = tpu.matmul %98, %107, %cst_51 {dimension_numbers = #tpu.dot_dimension_numbers<[2], [2], [1], [1], [0, 0, 0, 1, 1, 1], [0], [0]>} : vector<4x48x8xbf16>, vector<4x48x8xbf16>, vector<4x48x48xf32> -> vector<4x48x48xf32>
    "tpu.trace_stop"() : () -> ()
    %cst_52 = arith.constant 0.353553385 : f32
    %118 = vector.broadcast %cst_52 : f32 to vector<4x48x48xf32>
    %119 = arith.mulf %117, %118 : vector<4x48x48xf32>
    %120 = vector.shape_cast %51 : vector<48x48xf32> to vector<1x48x48xf32>
    %121 = vector.broadcast %120 : vector<1x48x48xf32> to vector<4x48x48xf32>
    %122 = arith.addf %119, %121 : vector<4x48x48xf32>
    %cst_53 = arith.constant dense<0xFF800000> : vector<4x48xf32>
    %123 = vector.multi_reduction <maximumf>, %122, %cst_53 [2] : vector<4x48x48xf32> to vector<4x48xf32>
    %124 = vector.shape_cast %123 : vector<4x48xf32> to vector<4x48x1xf32>
    %125 = vector.broadcast %124 : vector<4x48x1xf32> to vector<4x48x48xf32>
    %126 = arith.subf %122, %125 : vector<4x48x48xf32>
    %127 = math.exp %126 : vector<4x48x48xf32>
    %cst_54 = arith.constant dense<0.000000e+00> : vector<4x48xf32>
    %128 = vector.multi_reduction <add>, %127, %cst_54 [2] : vector<4x48x48xf32> to vector<4x48xf32>
    %129 = vector.shape_cast %128 : vector<4x48xf32> to vector<4x48x1xf32>
    %130 = tpu.reciprocal %129 {approx = true} : vector<4x48x1xf32> -> vector<4x48x1xf32>
    %131 = vector.broadcast %130 : vector<4x48x1xf32> to vector<4x48x48xf32>
    %132 = arith.mulf %127, %131 : vector<4x48x48xf32>
    %133 = arith.truncf %132 : vector<4x48x48xf32> to vector<4x48x48xbf16>
    "tpu.trace_start"() <{level = 10 : i32, message = "hqk,hkd->hqd"}> : () -> ()
    %cst_55 = arith.constant dense<0.000000e+00> : vector<4x48x8xf32>
    %134 = tpu.matmul %133, %116, %cst_55 {dimension_numbers = #tpu.dot_dimension_numbers<[2], [1], [1], [2], [0, 0, 0, 1, 1, 2], [0], [0]>} : vector<4x48x48xbf16>, vector<4x48x8xbf16>, vector<4x48x8xf32> -> vector<4x48x8xf32>
    "tpu.trace_stop"() : () -> ()
    %135 = vector.extract_strided_slice %134 {offsets = [0, 0, 0], sizes = [1, 48, 8], strides = [1, 1, 1]} : vector<4x48x8xf32> to vector<1x48x8xf32>
    %136 = vector.shape_cast %135 : vector<1x48x8xf32> to vector<48x8xf32>
    %137 = vector.extract_strided_slice %134 {offsets = [1, 0, 0], sizes = [1, 48, 8], strides = [1, 1, 1]} : vector<4x48x8xf32> to vector<1x48x8xf32>
    %138 = vector.shape_cast %137 : vector<1x48x8xf32> to vector<48x8xf32>
    %139 = vector.extract_strided_slice %134 {offsets = [2, 0, 0], sizes = [1, 48, 8], strides = [1, 1, 1]} : vector<4x48x8xf32> to vector<1x48x8xf32>
    %140 = vector.shape_cast %139 : vector<1x48x8xf32> to vector<48x8xf32>
    %141 = vector.extract_strided_slice %134 {offsets = [3, 0, 0], sizes = [1, 48, 8], strides = [1, 1, 1]} : vector<4x48x8xf32> to vector<1x48x8xf32>
    %142 = vector.shape_cast %141 : vector<1x48x8xf32> to vector<48x8xf32>
    %143 = tpu.concatenate %136, %138, %140, %142 in 1 : vector<48x8xf32>, vector<48x8xf32>, vector<48x8xf32>, vector<48x8xf32> -> vector<48x32xf32>
    %144 = arith.truncf %143 : vector<48x32xf32> to vector<48x32xbf16>
    %c0_56 = arith.constant 0 : index
    %c0_57 = arith.constant 0 : index
    %c0_58 = arith.constant 0 : index
    %145 = vector.load %arg19[%c0_56, %c0_57, %c0_58] : memref<3x32x32xbf16, #tpu.memory_space<vmem>>, vector<1x32x32xbf16>
    %146 = vector.shape_cast %145 : vector<1x32x32xbf16> to vector<32x32xbf16>
    %cst_59 = arith.constant dense<0.000000e+00> : vector<48x32xf32>
    %147 = tpu.matmul %144, %146, %cst_59 {dimension_numbers = #tpu.dot_dimension_numbers<[1], [0], [0], [1], [0, 0, 1, 1], [], []>} : vector<48x32xbf16>, vector<32x32xbf16>, vector<48x32xf32> -> vector<48x32xf32>
    %c0_60 = arith.constant 0 : index
    %c0_61 = arith.constant 0 : index
    %c0_62 = arith.constant 0 : index
    %148 = vector.load %arg20[%c0_60, %c0_61, %c0_62] : memref<3x1x32xf32, #tpu.memory_space<vmem>>, vector<1x1x32xf32>
    %149 = vector.shape_cast %148 : vector<1x1x32xf32> to vector<1x32xf32>
    %150 = vector.broadcast %149 : vector<1x32xf32> to vector<48x32xf32>
    %151 = arith.addf %147, %150 : vector<48x32xf32>
    %152 = arith.addf %50, %151 : vector<48x32xf32>
    %c0_63 = arith.constant 0 : index
    %c0_64 = arith.constant 0 : index
    %c0_65 = arith.constant 0 : index
    %153 = vector.load %arg21[%c0_63, %c0_64, %c0_65] : memref<3x1x32xf32, #tpu.memory_space<vmem>>, vector<1x1x32xf32>
    %154 = vector.shape_cast %153 : vector<1x1x32xf32> to vector<1x32xf32>
    %c0_66 = arith.constant 0 : index
    %c0_67 = arith.constant 0 : index
    %c0_68 = arith.constant 0 : index
    %155 = vector.load %arg22[%c0_66, %c0_67, %c0_68] : memref<3x1x32xf32, #tpu.memory_space<vmem>>, vector<1x1x32xf32>
    %156 = vector.shape_cast %155 : vector<1x1x32xf32> to vector<1x32xf32>
    %cst_69 = arith.constant dense<0.000000e+00> : vector<48xf32>
    %157 = vector.multi_reduction <add>, %152, %cst_69 [1] : vector<48x32xf32> to vector<48xf32>
    %158 = vector.shape_cast %157 : vector<48xf32> to vector<48x1xf32>
    %cst_70 = arith.constant 3.200000e+01 : f32
    %159 = vector.broadcast %cst_70 : f32 to vector<48x1xf32>
    %160 = arith.divf %158, %159 : vector<48x1xf32>
    %161 = vector.broadcast %160 : vector<48x1xf32> to vector<48x32xf32>
    %162 = arith.subf %152, %161 : vector<48x32xf32>
    %163 = arith.mulf %162, %162 : vector<48x32xf32>
    %cst_71 = arith.constant dense<0.000000e+00> : vector<48xf32>
    %164 = vector.multi_reduction <add>, %163, %cst_71 [1] : vector<48x32xf32> to vector<48xf32>
    %165 = vector.shape_cast %164 : vector<48xf32> to vector<48x1xf32>
    %cst_72 = arith.constant 3.200000e+01 : f32
    %166 = vector.broadcast %cst_72 : f32 to vector<48x1xf32>
    %167 = arith.divf %165, %166 : vector<48x1xf32>
    %cst_73 = arith.constant 9.99999974E-6 : f32
    %168 = vector.broadcast %cst_73 : f32 to vector<48x1xf32>
    %169 = arith.addf %167, %168 : vector<48x1xf32>
    %170 = math.rsqrt %169 : vector<48x1xf32>
    %171 = vector.broadcast %170 : vector<48x1xf32> to vector<48x32xf32>
    %172 = arith.mulf %162, %171 : vector<48x32xf32>
    %173 = vector.broadcast %154 : vector<1x32xf32> to vector<48x32xf32>
    %174 = arith.mulf %172, %173 : vector<48x32xf32>
    %175 = vector.broadcast %156 : vector<1x32xf32> to vector<48x32xf32>
    %176 = arith.addf %174, %175 : vector<48x32xf32>
    %177 = arith.truncf %176 : vector<48x32xf32> to vector<48x32xbf16>
    %c0_74 = arith.constant 0 : index
    %c0_75 = arith.constant 0 : index
    %c0_76 = arith.constant 0 : index
    %178 = vector.load %arg23[%c0_74, %c0_75, %c0_76] : memref<3x32x128xbf16, #tpu.memory_space<vmem>>, vector<1x32x128xbf16>
    %179 = vector.shape_cast %178 : vector<1x32x128xbf16> to vector<32x128xbf16>
    %cst_77 = arith.constant dense<0.000000e+00> : vector<48x128xf32>
    %180 = tpu.matmul %177, %179, %cst_77 {dimension_numbers = #tpu.dot_dimension_numbers<[1], [0], [0], [1], [0, 0, 1, 1], [], []>} : vector<48x32xbf16>, vector<32x128xbf16>, vector<48x128xf32> -> vector<48x128xf32>
    %c0_78 = arith.constant 0 : index
    %c0_79 = arith.constant 0 : index
    %c0_80 = arith.constant 0 : index
    %181 = vector.load %arg24[%c0_78, %c0_79, %c0_80] : memref<3x1x128xf32, #tpu.memory_space<vmem>>, vector<1x1x128xf32>
    %182 = vector.shape_cast %181 : vector<1x1x128xf32> to vector<1x128xf32>
    %183 = vector.broadcast %182 : vector<1x128xf32> to vector<48x128xf32>
    %184 = arith.addf %180, %183 : vector<48x128xf32>
    %cst_81 = arith.constant 5.000000e-01 : f32
    %185 = vector.broadcast %cst_81 : f32 to vector<48x128xf32>
    %186 = arith.mulf %185, %184 : vector<48x128xf32>
    %cst_82 = arith.constant 4.471500e-02 : f32
    %187 = vector.broadcast %cst_82 : f32 to vector<48x128xf32>
    %188 = arith.mulf %187, %184 : vector<48x128xf32>
    %189 = arith.mulf %188, %184 : vector<48x128xf32>
    %190 = arith.mulf %189, %184 : vector<48x128xf32>
    %191 = arith.addf %184, %190 : vector<48x128xf32>
    %cst_83 = arith.constant 0.797884583 : f32
    %192 = vector.broadcast %cst_83 : f32 to vector<48x128xf32>
    %193 = arith.mulf %192, %191 : vector<48x128xf32>
    %194 = math.tanh %193 : vector<48x128xf32>
    %cst_84 = arith.constant 1.000000e+00 : f32
    %195 = vector.broadcast %cst_84 : f32 to vector<48x128xf32>
    %196 = arith.addf %195, %194 : vector<48x128xf32>
    %197 = arith.mulf %186, %196 : vector<48x128xf32>
    %198 = arith.truncf %197 : vector<48x128xf32> to vector<48x128xbf16>
    %c0_85 = arith.constant 0 : index
    %c0_86 = arith.constant 0 : index
    %c0_87 = arith.constant 0 : index
    %199 = vector.load %arg25[%c0_85, %c0_86, %c0_87] : memref<3x128x32xbf16, #tpu.memory_space<vmem>>, vector<1x128x32xbf16>
    %200 = vector.shape_cast %199 : vector<1x128x32xbf16> to vector<128x32xbf16>
    %cst_88 = arith.constant dense<0.000000e+00> : vector<48x32xf32>
    %201 = tpu.matmul %198, %200, %cst_88 {dimension_numbers = #tpu.dot_dimension_numbers<[1], [0], [0], [1], [0, 0, 1, 1], [], []>} : vector<48x128xbf16>, vector<128x32xbf16>, vector<48x32xf32> -> vector<48x32xf32>
    %c0_89 = arith.constant 0 : index
    %c0_90 = arith.constant 0 : index
    %c0_91 = arith.constant 0 : index
    %202 = vector.load %arg26[%c0_89, %c0_90, %c0_91] : memref<3x1x32xf32, #tpu.memory_space<vmem>>, vector<1x1x32xf32>
    %203 = vector.shape_cast %202 : vector<1x1x32xf32> to vector<1x32xf32>
    %204 = vector.broadcast %203 : vector<1x32xf32> to vector<48x32xf32>
    %205 = arith.addf %201, %204 : vector<48x32xf32>
    %206 = arith.addf %152, %205 : vector<48x32xf32>
    %c1 = arith.constant 1 : index
    %c0_92 = arith.constant 0 : index
    %c0_93 = arith.constant 0 : index
    %207 = vector.load %arg15[%c1, %c0_92, %c0_93] : memref<3x1x32xf32, #tpu.memory_space<vmem>>, vector<1x1x32xf32>
    %208 = vector.shape_cast %207 : vector<1x1x32xf32> to vector<1x32xf32>
    %c1_94 = arith.constant 1 : index
    %c0_95 = arith.constant 0 : index
    %c0_96 = arith.constant 0 : index
    %209 = vector.load %arg16[%c1_94, %c0_95, %c0_96] : memref<3x1x32xf32, #tpu.memory_space<vmem>>, vector<1x1x32xf32>
    %210 = vector.shape_cast %209 : vector<1x1x32xf32> to vector<1x32xf32>
    %cst_97 = arith.constant dense<0.000000e+00> : vector<48xf32>
    %211 = vector.multi_reduction <add>, %206, %cst_97 [1] : vector<48x32xf32> to vector<48xf32>
    %212 = vector.shape_cast %211 : vector<48xf32> to vector<48x1xf32>
    %cst_98 = arith.constant 3.200000e+01 : f32
    %213 = vector.broadcast %cst_98 : f32 to vector<48x1xf32>
    %214 = arith.divf %212, %213 : vector<48x1xf32>
    %215 = vector.broadcast %214 : vector<48x1xf32> to vector<48x32xf32>
    %216 = arith.subf %206, %215 : vector<48x32xf32>
    %217 = arith.mulf %216, %216 : vector<48x32xf32>
    %cst_99 = arith.constant dense<0.000000e+00> : vector<48xf32>
    %218 = vector.multi_reduction <add>, %217, %cst_99 [1] : vector<48x32xf32> to vector<48xf32>
    %219 = vector.shape_cast %218 : vector<48xf32> to vector<48x1xf32>
    %cst_100 = arith.constant 3.200000e+01 : f32
    %220 = vector.broadcast %cst_100 : f32 to vector<48x1xf32>
    %221 = arith.divf %219, %220 : vector<48x1xf32>
    %cst_101 = arith.constant 9.99999974E-6 : f32
    %222 = vector.broadcast %cst_101 : f32 to vector<48x1xf32>
    %223 = arith.addf %221, %222 : vector<48x1xf32>
    %224 = math.rsqrt %223 : vector<48x1xf32>
    %225 = vector.broadcast %224 : vector<48x1xf32> to vector<48x32xf32>
    %226 = arith.mulf %216, %225 : vector<48x32xf32>
    %227 = vector.broadcast %208 : vector<1x32xf32> to vector<48x32xf32>
    %228 = arith.mulf %226, %227 : vector<48x32xf32>
    %229 = vector.broadcast %210 : vector<1x32xf32> to vector<48x32xf32>
    %230 = arith.addf %228, %229 : vector<48x32xf32>
    %231 = arith.truncf %230 : vector<48x32xf32> to vector<48x32xbf16>
    %c1_102 = arith.constant 1 : index
    %c0_103 = arith.constant 0 : index
    %c0_104 = arith.constant 0 : index
    %232 = vector.load %arg17[%c1_102, %c0_103, %c0_104] : memref<3x32x96xbf16, #tpu.memory_space<vmem>>, vector<1x32x96xbf16>
    %233 = vector.shape_cast %232 : vector<1x32x96xbf16> to vector<32x96xbf16>
    %cst_105 = arith.constant dense<0.000000e+00> : vector<48x96xf32>
    %234 = tpu.matmul %231, %233, %cst_105 {dimension_numbers = #tpu.dot_dimension_numbers<[1], [0], [0], [1], [0, 0, 1, 1], [], []>} : vector<48x32xbf16>, vector<32x96xbf16>, vector<48x96xf32> -> vector<48x96xf32>
    %c1_106 = arith.constant 1 : index
    %c0_107 = arith.constant 0 : index
    %c0_108 = arith.constant 0 : index
    %235 = vector.load %arg18[%c1_106, %c0_107, %c0_108] : memref<3x1x96xf32, #tpu.memory_space<vmem>>, vector<1x1x96xf32>
    %236 = vector.shape_cast %235 : vector<1x1x96xf32> to vector<1x96xf32>
    %237 = vector.broadcast %236 : vector<1x96xf32> to vector<48x96xf32>
    %238 = arith.addf %234, %237 : vector<48x96xf32>
    %239 = vector.extract_strided_slice %238 {offsets = [0, 0], sizes = [48, 32], strides = [1, 1]} : vector<48x96xf32> to vector<48x32xf32>
    %240 = arith.truncf %239 : vector<48x32xf32> to vector<48x32xbf16>
    %241 = vector.extract_strided_slice %238 {offsets = [0, 32], sizes = [48, 32], strides = [1, 1]} : vector<48x96xf32> to vector<48x32xf32>
    %242 = arith.truncf %241 : vector<48x32xf32> to vector<48x32xbf16>
    %243 = vector.extract_strided_slice %238 {offsets = [0, 64], sizes = [48, 32], strides = [1, 1]} : vector<48x96xf32> to vector<48x32xf32>
    %244 = arith.truncf %243 : vector<48x32xf32> to vector<48x32xbf16>
    %245 = vector.extract_strided_slice %240 {offsets = [0, 0], sizes = [48, 8], strides = [1, 1]} : vector<48x32xbf16> to vector<48x8xbf16>
    %246 = vector.extract_strided_slice %240 {offsets = [0, 8], sizes = [48, 8], strides = [1, 1]} : vector<48x32xbf16> to vector<48x8xbf16>
    %247 = vector.extract_strided_slice %240 {offsets = [0, 16], sizes = [48, 8], strides = [1, 1]} : vector<48x32xbf16> to vector<48x8xbf16>
    %248 = vector.extract_strided_slice %240 {offsets = [0, 24], sizes = [48, 8], strides = [1, 1]} : vector<48x32xbf16> to vector<48x8xbf16>
    %249 = vector.shape_cast %245 : vector<48x8xbf16> to vector<1x48x8xbf16>
    %250 = vector.shape_cast %246 : vector<48x8xbf16> to vector<1x48x8xbf16>
    %251 = vector.shape_cast %247 : vector<48x8xbf16> to vector<1x48x8xbf16>
    %252 = vector.shape_cast %248 : vector<48x8xbf16> to vector<1x48x8xbf16>
    %253 = tpu.concatenate %249, %250, %251, %252 in 0 : vector<1x48x8xbf16>, vector<1x48x8xbf16>, vector<1x48x8xbf16>, vector<1x48x8xbf16> -> vector<4x48x8xbf16>
    %254 = vector.extract_strided_slice %242 {offsets = [0, 0], sizes = [48, 8], strides = [1, 1]} : vector<48x32xbf16> to vector<48x8xbf16>
    %255 = vector.extract_strided_slice %242 {offsets = [0, 8], sizes = [48, 8], strides = [1, 1]} : vector<48x32xbf16> to vector<48x8xbf16>
    %256 = vector.extract_strided_slice %242 {offsets = [0, 16], sizes = [48, 8], strides = [1, 1]} : vector<48x32xbf16> to vector<48x8xbf16>
    %257 = vector.extract_strided_slice %242 {offsets = [0, 24], sizes = [48, 8], strides = [1, 1]} : vector<48x32xbf16> to vector<48x8xbf16>
    %258 = vector.shape_cast %254 : vector<48x8xbf16> to vector<1x48x8xbf16>
    %259 = vector.shape_cast %255 : vector<48x8xbf16> to vector<1x48x8xbf16>
    %260 = vector.shape_cast %256 : vector<48x8xbf16> to vector<1x48x8xbf16>
    %261 = vector.shape_cast %257 : vector<48x8xbf16> to vector<1x48x8xbf16>
    %262 = tpu.concatenate %258, %259, %260, %261 in 0 : vector<1x48x8xbf16>, vector<1x48x8xbf16>, vector<1x48x8xbf16>, vector<1x48x8xbf16> -> vector<4x48x8xbf16>
    %263 = vector.extract_strided_slice %244 {offsets = [0, 0], sizes = [48, 8], strides = [1, 1]} : vector<48x32xbf16> to vector<48x8xbf16>
    %264 = vector.extract_strided_slice %244 {offsets = [0, 8], sizes = [48, 8], strides = [1, 1]} : vector<48x32xbf16> to vector<48x8xbf16>
    %265 = vector.extract_strided_slice %244 {offsets = [0, 16], sizes = [48, 8], strides = [1, 1]} : vector<48x32xbf16> to vector<48x8xbf16>
    %266 = vector.extract_strided_slice %244 {offsets = [0, 24], sizes = [48, 8], strides = [1, 1]} : vector<48x32xbf16> to vector<48x8xbf16>
    %267 = vector.shape_cast %263 : vector<48x8xbf16> to vector<1x48x8xbf16>
    %268 = vector.shape_cast %264 : vector<48x8xbf16> to vector<1x48x8xbf16>
    %269 = vector.shape_cast %265 : vector<48x8xbf16> to vector<1x48x8xbf16>
    %270 = vector.shape_cast %266 : vector<48x8xbf16> to vector<1x48x8xbf16>
    %271 = tpu.concatenate %267, %268, %269, %270 in 0 : vector<1x48x8xbf16>, vector<1x48x8xbf16>, vector<1x48x8xbf16>, vector<1x48x8xbf16> -> vector<4x48x8xbf16>
    "tpu.trace_start"() <{level = 10 : i32, message = "hqd,hkd->hqk"}> : () -> ()
    %cst_109 = arith.constant dense<0.000000e+00> : vector<4x48x48xf32>
    %272 = tpu.matmul %253, %262, %cst_109 {dimension_numbers = #tpu.dot_dimension_numbers<[2], [2], [1], [1], [0, 0, 0, 1, 1, 1], [0], [0]>} : vector<4x48x8xbf16>, vector<4x48x8xbf16>, vector<4x48x48xf32> -> vector<4x48x48xf32>
    "tpu.trace_stop"() : () -> ()
    %cst_110 = arith.constant 0.353553385 : f32
    %273 = vector.broadcast %cst_110 : f32 to vector<4x48x48xf32>
    %274 = arith.mulf %272, %273 : vector<4x48x48xf32>
    %275 = vector.shape_cast %51 : vector<48x48xf32> to vector<1x48x48xf32>
    %276 = vector.broadcast %275 : vector<1x48x48xf32> to vector<4x48x48xf32>
    %277 = arith.addf %274, %276 : vector<4x48x48xf32>
    %cst_111 = arith.constant dense<0xFF800000> : vector<4x48xf32>
    %278 = vector.multi_reduction <maximumf>, %277, %cst_111 [2] : vector<4x48x48xf32> to vector<4x48xf32>
    %279 = vector.shape_cast %278 : vector<4x48xf32> to vector<4x48x1xf32>
    %280 = vector.broadcast %279 : vector<4x48x1xf32> to vector<4x48x48xf32>
    %281 = arith.subf %277, %280 : vector<4x48x48xf32>
    %282 = math.exp %281 : vector<4x48x48xf32>
    %cst_112 = arith.constant dense<0.000000e+00> : vector<4x48xf32>
    %283 = vector.multi_reduction <add>, %282, %cst_112 [2] : vector<4x48x48xf32> to vector<4x48xf32>
    %284 = vector.shape_cast %283 : vector<4x48xf32> to vector<4x48x1xf32>
    %285 = tpu.reciprocal %284 {approx = true} : vector<4x48x1xf32> -> vector<4x48x1xf32>
    %286 = vector.broadcast %285 : vector<4x48x1xf32> to vector<4x48x48xf32>
    %287 = arith.mulf %282, %286 : vector<4x48x48xf32>
    %288 = arith.truncf %287 : vector<4x48x48xf32> to vector<4x48x48xbf16>
    "tpu.trace_start"() <{level = 10 : i32, message = "hqk,hkd->hqd"}> : () -> ()
    %cst_113 = arith.constant dense<0.000000e+00> : vector<4x48x8xf32>
    %289 = tpu.matmul %288, %271, %cst_113 {dimension_numbers = #tpu.dot_dimension_numbers<[2], [1], [1], [2], [0, 0, 0, 1, 1, 2], [0], [0]>} : vector<4x48x48xbf16>, vector<4x48x8xbf16>, vector<4x48x8xf32> -> vector<4x48x8xf32>
    "tpu.trace_stop"() : () -> ()
    %290 = vector.extract_strided_slice %289 {offsets = [0, 0, 0], sizes = [1, 48, 8], strides = [1, 1, 1]} : vector<4x48x8xf32> to vector<1x48x8xf32>
    %291 = vector.shape_cast %290 : vector<1x48x8xf32> to vector<48x8xf32>
    %292 = vector.extract_strided_slice %289 {offsets = [1, 0, 0], sizes = [1, 48, 8], strides = [1, 1, 1]} : vector<4x48x8xf32> to vector<1x48x8xf32>
    %293 = vector.shape_cast %292 : vector<1x48x8xf32> to vector<48x8xf32>
    %294 = vector.extract_strided_slice %289 {offsets = [2, 0, 0], sizes = [1, 48, 8], strides = [1, 1, 1]} : vector<4x48x8xf32> to vector<1x48x8xf32>
    %295 = vector.shape_cast %294 : vector<1x48x8xf32> to vector<48x8xf32>
    %296 = vector.extract_strided_slice %289 {offsets = [3, 0, 0], sizes = [1, 48, 8], strides = [1, 1, 1]} : vector<4x48x8xf32> to vector<1x48x8xf32>
    %297 = vector.shape_cast %296 : vector<1x48x8xf32> to vector<48x8xf32>
    %298 = tpu.concatenate %291, %293, %295, %297 in 1 : vector<48x8xf32>, vector<48x8xf32>, vector<48x8xf32>, vector<48x8xf32> -> vector<48x32xf32>
    %299 = arith.truncf %298 : vector<48x32xf32> to vector<48x32xbf16>
    %c1_114 = arith.constant 1 : index
    %c0_115 = arith.constant 0 : index
    %c0_116 = arith.constant 0 : index
    %300 = vector.load %arg19[%c1_114, %c0_115, %c0_116] : memref<3x32x32xbf16, #tpu.memory_space<vmem>>, vector<1x32x32xbf16>
    %301 = vector.shape_cast %300 : vector<1x32x32xbf16> to vector<32x32xbf16>
    %cst_117 = arith.constant dense<0.000000e+00> : vector<48x32xf32>
    %302 = tpu.matmul %299, %301, %cst_117 {dimension_numbers = #tpu.dot_dimension_numbers<[1], [0], [0], [1], [0, 0, 1, 1], [], []>} : vector<48x32xbf16>, vector<32x32xbf16>, vector<48x32xf32> -> vector<48x32xf32>
    %c1_118 = arith.constant 1 : index
    %c0_119 = arith.constant 0 : index
    %c0_120 = arith.constant 0 : index
    %303 = vector.load %arg20[%c1_118, %c0_119, %c0_120] : memref<3x1x32xf32, #tpu.memory_space<vmem>>, vector<1x1x32xf32>
    %304 = vector.shape_cast %303 : vector<1x1x32xf32> to vector<1x32xf32>
    %305 = vector.broadcast %304 : vector<1x32xf32> to vector<48x32xf32>
    %306 = arith.addf %302, %305 : vector<48x32xf32>
    %307 = arith.addf %206, %306 : vector<48x32xf32>
    %c1_121 = arith.constant 1 : index
    %c0_122 = arith.constant 0 : index
    %c0_123 = arith.constant 0 : index
    %308 = vector.load %arg21[%c1_121, %c0_122, %c0_123] : memref<3x1x32xf32, #tpu.memory_space<vmem>>, vector<1x1x32xf32>
    %309 = vector.shape_cast %308 : vector<1x1x32xf32> to vector<1x32xf32>
    %c1_124 = arith.constant 1 : index
    %c0_125 = arith.constant 0 : index
    %c0_126 = arith.constant 0 : index
    %310 = vector.load %arg22[%c1_124, %c0_125, %c0_126] : memref<3x1x32xf32, #tpu.memory_space<vmem>>, vector<1x1x32xf32>
    %311 = vector.shape_cast %310 : vector<1x1x32xf32> to vector<1x32xf32>
    %cst_127 = arith.constant dense<0.000000e+00> : vector<48xf32>
    %312 = vector.multi_reduction <add>, %307, %cst_127 [1] : vector<48x32xf32> to vector<48xf32>
    %313 = vector.shape_cast %312 : vector<48xf32> to vector<48x1xf32>
    %cst_128 = arith.constant 3.200000e+01 : f32
    %314 = vector.broadcast %cst_128 : f32 to vector<48x1xf32>
    %315 = arith.divf %313, %314 : vector<48x1xf32>
    %316 = vector.broadcast %315 : vector<48x1xf32> to vector<48x32xf32>
    %317 = arith.subf %307, %316 : vector<48x32xf32>
    %318 = arith.mulf %317, %317 : vector<48x32xf32>
    %cst_129 = arith.constant dense<0.000000e+00> : vector<48xf32>
    %319 = vector.multi_reduction <add>, %318, %cst_129 [1] : vector<48x32xf32> to vector<48xf32>
    %320 = vector.shape_cast %319 : vector<48xf32> to vector<48x1xf32>
    %cst_130 = arith.constant 3.200000e+01 : f32
    %321 = vector.broadcast %cst_130 : f32 to vector<48x1xf32>
    %322 = arith.divf %320, %321 : vector<48x1xf32>
    %cst_131 = arith.constant 9.99999974E-6 : f32
    %323 = vector.broadcast %cst_131 : f32 to vector<48x1xf32>
    %324 = arith.addf %322, %323 : vector<48x1xf32>
    %325 = math.rsqrt %324 : vector<48x1xf32>
    %326 = vector.broadcast %325 : vector<48x1xf32> to vector<48x32xf32>
    %327 = arith.mulf %317, %326 : vector<48x32xf32>
    %328 = vector.broadcast %309 : vector<1x32xf32> to vector<48x32xf32>
    %329 = arith.mulf %327, %328 : vector<48x32xf32>
    %330 = vector.broadcast %311 : vector<1x32xf32> to vector<48x32xf32>
    %331 = arith.addf %329, %330 : vector<48x32xf32>
    %332 = arith.truncf %331 : vector<48x32xf32> to vector<48x32xbf16>
    %c1_132 = arith.constant 1 : index
    %c0_133 = arith.constant 0 : index
    %c0_134 = arith.constant 0 : index
    %333 = vector.load %arg23[%c1_132, %c0_133, %c0_134] : memref<3x32x128xbf16, #tpu.memory_space<vmem>>, vector<1x32x128xbf16>
    %334 = vector.shape_cast %333 : vector<1x32x128xbf16> to vector<32x128xbf16>
    %cst_135 = arith.constant dense<0.000000e+00> : vector<48x128xf32>
    %335 = tpu.matmul %332, %334, %cst_135 {dimension_numbers = #tpu.dot_dimension_numbers<[1], [0], [0], [1], [0, 0, 1, 1], [], []>} : vector<48x32xbf16>, vector<32x128xbf16>, vector<48x128xf32> -> vector<48x128xf32>
    %c1_136 = arith.constant 1 : index
    %c0_137 = arith.constant 0 : index
    %c0_138 = arith.constant 0 : index
    %336 = vector.load %arg24[%c1_136, %c0_137, %c0_138] : memref<3x1x128xf32, #tpu.memory_space<vmem>>, vector<1x1x128xf32>
    %337 = vector.shape_cast %336 : vector<1x1x128xf32> to vector<1x128xf32>
    %338 = vector.broadcast %337 : vector<1x128xf32> to vector<48x128xf32>
    %339 = arith.addf %335, %338 : vector<48x128xf32>
    %cst_139 = arith.constant 5.000000e-01 : f32
    %340 = vector.broadcast %cst_139 : f32 to vector<48x128xf32>
    %341 = arith.mulf %340, %339 : vector<48x128xf32>
    %cst_140 = arith.constant 4.471500e-02 : f32
    %342 = vector.broadcast %cst_140 : f32 to vector<48x128xf32>
    %343 = arith.mulf %342, %339 : vector<48x128xf32>
    %344 = arith.mulf %343, %339 : vector<48x128xf32>
    %345 = arith.mulf %344, %339 : vector<48x128xf32>
    %346 = arith.addf %339, %345 : vector<48x128xf32>
    %cst_141 = arith.constant 0.797884583 : f32
    %347 = vector.broadcast %cst_141 : f32 to vector<48x128xf32>
    %348 = arith.mulf %347, %346 : vector<48x128xf32>
    %349 = math.tanh %348 : vector<48x128xf32>
    %cst_142 = arith.constant 1.000000e+00 : f32
    %350 = vector.broadcast %cst_142 : f32 to vector<48x128xf32>
    %351 = arith.addf %350, %349 : vector<48x128xf32>
    %352 = arith.mulf %341, %351 : vector<48x128xf32>
    %353 = arith.truncf %352 : vector<48x128xf32> to vector<48x128xbf16>
    %c1_143 = arith.constant 1 : index
    %c0_144 = arith.constant 0 : index
    %c0_145 = arith.constant 0 : index
    %354 = vector.load %arg25[%c1_143, %c0_144, %c0_145] : memref<3x128x32xbf16, #tpu.memory_space<vmem>>, vector<1x128x32xbf16>
    %355 = vector.shape_cast %354 : vector<1x128x32xbf16> to vector<128x32xbf16>
    %cst_146 = arith.constant dense<0.000000e+00> : vector<48x32xf32>
    %356 = tpu.matmul %353, %355, %cst_146 {dimension_numbers = #tpu.dot_dimension_numbers<[1], [0], [0], [1], [0, 0, 1, 1], [], []>} : vector<48x128xbf16>, vector<128x32xbf16>, vector<48x32xf32> -> vector<48x32xf32>
    %c1_147 = arith.constant 1 : index
    %c0_148 = arith.constant 0 : index
    %c0_149 = arith.constant 0 : index
    %357 = vector.load %arg26[%c1_147, %c0_148, %c0_149] : memref<3x1x32xf32, #tpu.memory_space<vmem>>, vector<1x1x32xf32>
    %358 = vector.shape_cast %357 : vector<1x1x32xf32> to vector<1x32xf32>
    %359 = vector.broadcast %358 : vector<1x32xf32> to vector<48x32xf32>
    %360 = arith.addf %356, %359 : vector<48x32xf32>
    %361 = arith.addf %307, %360 : vector<48x32xf32>
    %c2 = arith.constant 2 : index
    %c0_150 = arith.constant 0 : index
    %c0_151 = arith.constant 0 : index
    %362 = vector.load %arg15[%c2, %c0_150, %c0_151] : memref<3x1x32xf32, #tpu.memory_space<vmem>>, vector<1x1x32xf32>
    %363 = vector.shape_cast %362 : vector<1x1x32xf32> to vector<1x32xf32>
    %c2_152 = arith.constant 2 : index
    %c0_153 = arith.constant 0 : index
    %c0_154 = arith.constant 0 : index
    %364 = vector.load %arg16[%c2_152, %c0_153, %c0_154] : memref<3x1x32xf32, #tpu.memory_space<vmem>>, vector<1x1x32xf32>
    %365 = vector.shape_cast %364 : vector<1x1x32xf32> to vector<1x32xf32>
    %cst_155 = arith.constant dense<0.000000e+00> : vector<48xf32>
    %366 = vector.multi_reduction <add>, %361, %cst_155 [1] : vector<48x32xf32> to vector<48xf32>
    %367 = vector.shape_cast %366 : vector<48xf32> to vector<48x1xf32>
    %cst_156 = arith.constant 3.200000e+01 : f32
    %368 = vector.broadcast %cst_156 : f32 to vector<48x1xf32>
    %369 = arith.divf %367, %368 : vector<48x1xf32>
    %370 = vector.broadcast %369 : vector<48x1xf32> to vector<48x32xf32>
    %371 = arith.subf %361, %370 : vector<48x32xf32>
    %372 = arith.mulf %371, %371 : vector<48x32xf32>
    %cst_157 = arith.constant dense<0.000000e+00> : vector<48xf32>
    %373 = vector.multi_reduction <add>, %372, %cst_157 [1] : vector<48x32xf32> to vector<48xf32>
    %374 = vector.shape_cast %373 : vector<48xf32> to vector<48x1xf32>
    %cst_158 = arith.constant 3.200000e+01 : f32
    %375 = vector.broadcast %cst_158 : f32 to vector<48x1xf32>
    %376 = arith.divf %374, %375 : vector<48x1xf32>
    %cst_159 = arith.constant 9.99999974E-6 : f32
    %377 = vector.broadcast %cst_159 : f32 to vector<48x1xf32>
    %378 = arith.addf %376, %377 : vector<48x1xf32>
    %379 = math.rsqrt %378 : vector<48x1xf32>
    %380 = vector.broadcast %379 : vector<48x1xf32> to vector<48x32xf32>
    %381 = arith.mulf %371, %380 : vector<48x32xf32>
    %382 = vector.broadcast %363 : vector<1x32xf32> to vector<48x32xf32>
    %383 = arith.mulf %381, %382 : vector<48x32xf32>
    %384 = vector.broadcast %365 : vector<1x32xf32> to vector<48x32xf32>
    %385 = arith.addf %383, %384 : vector<48x32xf32>
    %386 = arith.truncf %385 : vector<48x32xf32> to vector<48x32xbf16>
    %c2_160 = arith.constant 2 : index
    %c0_161 = arith.constant 0 : index
    %c0_162 = arith.constant 0 : index
    %387 = vector.load %arg17[%c2_160, %c0_161, %c0_162] : memref<3x32x96xbf16, #tpu.memory_space<vmem>>, vector<1x32x96xbf16>
    %388 = vector.shape_cast %387 : vector<1x32x96xbf16> to vector<32x96xbf16>
    %cst_163 = arith.constant dense<0.000000e+00> : vector<48x96xf32>
    %389 = tpu.matmul %386, %388, %cst_163 {dimension_numbers = #tpu.dot_dimension_numbers<[1], [0], [0], [1], [0, 0, 1, 1], [], []>} : vector<48x32xbf16>, vector<32x96xbf16>, vector<48x96xf32> -> vector<48x96xf32>
    %c2_164 = arith.constant 2 : index
    %c0_165 = arith.constant 0 : index
    %c0_166 = arith.constant 0 : index
    %390 = vector.load %arg18[%c2_164, %c0_165, %c0_166] : memref<3x1x96xf32, #tpu.memory_space<vmem>>, vector<1x1x96xf32>
    %391 = vector.shape_cast %390 : vector<1x1x96xf32> to vector<1x96xf32>
    %392 = vector.broadcast %391 : vector<1x96xf32> to vector<48x96xf32>
    %393 = arith.addf %389, %392 : vector<48x96xf32>
    %394 = vector.extract_strided_slice %393 {offsets = [0, 0], sizes = [48, 32], strides = [1, 1]} : vector<48x96xf32> to vector<48x32xf32>
    %395 = arith.truncf %394 : vector<48x32xf32> to vector<48x32xbf16>
    %396 = vector.extract_strided_slice %393 {offsets = [0, 32], sizes = [48, 32], strides = [1, 1]} : vector<48x96xf32> to vector<48x32xf32>
    %397 = arith.truncf %396 : vector<48x32xf32> to vector<48x32xbf16>
    %398 = vector.extract_strided_slice %393 {offsets = [0, 64], sizes = [48, 32], strides = [1, 1]} : vector<48x96xf32> to vector<48x32xf32>
    %399 = arith.truncf %398 : vector<48x32xf32> to vector<48x32xbf16>
    %400 = vector.extract_strided_slice %395 {offsets = [0, 0], sizes = [48, 8], strides = [1, 1]} : vector<48x32xbf16> to vector<48x8xbf16>
    %401 = vector.extract_strided_slice %395 {offsets = [0, 8], sizes = [48, 8], strides = [1, 1]} : vector<48x32xbf16> to vector<48x8xbf16>
    %402 = vector.extract_strided_slice %395 {offsets = [0, 16], sizes = [48, 8], strides = [1, 1]} : vector<48x32xbf16> to vector<48x8xbf16>
    %403 = vector.extract_strided_slice %395 {offsets = [0, 24], sizes = [48, 8], strides = [1, 1]} : vector<48x32xbf16> to vector<48x8xbf16>
    %404 = vector.shape_cast %400 : vector<48x8xbf16> to vector<1x48x8xbf16>
    %405 = vector.shape_cast %401 : vector<48x8xbf16> to vector<1x48x8xbf16>
    %406 = vector.shape_cast %402 : vector<48x8xbf16> to vector<1x48x8xbf16>
    %407 = vector.shape_cast %403 : vector<48x8xbf16> to vector<1x48x8xbf16>
    %408 = tpu.concatenate %404, %405, %406, %407 in 0 : vector<1x48x8xbf16>, vector<1x48x8xbf16>, vector<1x48x8xbf16>, vector<1x48x8xbf16> -> vector<4x48x8xbf16>
    %409 = vector.extract_strided_slice %397 {offsets = [0, 0], sizes = [48, 8], strides = [1, 1]} : vector<48x32xbf16> to vector<48x8xbf16>
    %410 = vector.extract_strided_slice %397 {offsets = [0, 8], sizes = [48, 8], strides = [1, 1]} : vector<48x32xbf16> to vector<48x8xbf16>
    %411 = vector.extract_strided_slice %397 {offsets = [0, 16], sizes = [48, 8], strides = [1, 1]} : vector<48x32xbf16> to vector<48x8xbf16>
    %412 = vector.extract_strided_slice %397 {offsets = [0, 24], sizes = [48, 8], strides = [1, 1]} : vector<48x32xbf16> to vector<48x8xbf16>
    %413 = vector.shape_cast %409 : vector<48x8xbf16> to vector<1x48x8xbf16>
    %414 = vector.shape_cast %410 : vector<48x8xbf16> to vector<1x48x8xbf16>
    %415 = vector.shape_cast %411 : vector<48x8xbf16> to vector<1x48x8xbf16>
    %416 = vector.shape_cast %412 : vector<48x8xbf16> to vector<1x48x8xbf16>
    %417 = tpu.concatenate %413, %414, %415, %416 in 0 : vector<1x48x8xbf16>, vector<1x48x8xbf16>, vector<1x48x8xbf16>, vector<1x48x8xbf16> -> vector<4x48x8xbf16>
    %418 = vector.extract_strided_slice %399 {offsets = [0, 0], sizes = [48, 8], strides = [1, 1]} : vector<48x32xbf16> to vector<48x8xbf16>
    %419 = vector.extract_strided_slice %399 {offsets = [0, 8], sizes = [48, 8], strides = [1, 1]} : vector<48x32xbf16> to vector<48x8xbf16>
    %420 = vector.extract_strided_slice %399 {offsets = [0, 16], sizes = [48, 8], strides = [1, 1]} : vector<48x32xbf16> to vector<48x8xbf16>
    %421 = vector.extract_strided_slice %399 {offsets = [0, 24], sizes = [48, 8], strides = [1, 1]} : vector<48x32xbf16> to vector<48x8xbf16>
    %422 = vector.shape_cast %418 : vector<48x8xbf16> to vector<1x48x8xbf16>
    %423 = vector.shape_cast %419 : vector<48x8xbf16> to vector<1x48x8xbf16>
    %424 = vector.shape_cast %420 : vector<48x8xbf16> to vector<1x48x8xbf16>
    %425 = vector.shape_cast %421 : vector<48x8xbf16> to vector<1x48x8xbf16>
    %426 = tpu.concatenate %422, %423, %424, %425 in 0 : vector<1x48x8xbf16>, vector<1x48x8xbf16>, vector<1x48x8xbf16>, vector<1x48x8xbf16> -> vector<4x48x8xbf16>
    "tpu.trace_start"() <{level = 10 : i32, message = "hqd,hkd->hqk"}> : () -> ()
    %cst_167 = arith.constant dense<0.000000e+00> : vector<4x48x48xf32>
    %427 = tpu.matmul %408, %417, %cst_167 {dimension_numbers = #tpu.dot_dimension_numbers<[2], [2], [1], [1], [0, 0, 0, 1, 1, 1], [0], [0]>} : vector<4x48x8xbf16>, vector<4x48x8xbf16>, vector<4x48x48xf32> -> vector<4x48x48xf32>
    "tpu.trace_stop"() : () -> ()
    %cst_168 = arith.constant 0.353553385 : f32
    %428 = vector.broadcast %cst_168 : f32 to vector<4x48x48xf32>
    %429 = arith.mulf %427, %428 : vector<4x48x48xf32>
    %430 = vector.shape_cast %51 : vector<48x48xf32> to vector<1x48x48xf32>
    %431 = vector.broadcast %430 : vector<1x48x48xf32> to vector<4x48x48xf32>
    %432 = arith.addf %429, %431 : vector<4x48x48xf32>
    %cst_169 = arith.constant dense<0xFF800000> : vector<4x48xf32>
    %433 = vector.multi_reduction <maximumf>, %432, %cst_169 [2] : vector<4x48x48xf32> to vector<4x48xf32>
    %434 = vector.shape_cast %433 : vector<4x48xf32> to vector<4x48x1xf32>
    %435 = vector.broadcast %434 : vector<4x48x1xf32> to vector<4x48x48xf32>
    %436 = arith.subf %432, %435 : vector<4x48x48xf32>
    %437 = math.exp %436 : vector<4x48x48xf32>
    %cst_170 = arith.constant dense<0.000000e+00> : vector<4x48xf32>
    %438 = vector.multi_reduction <add>, %437, %cst_170 [2] : vector<4x48x48xf32> to vector<4x48xf32>
    %439 = vector.shape_cast %438 : vector<4x48xf32> to vector<4x48x1xf32>
    %440 = tpu.reciprocal %439 {approx = true} : vector<4x48x1xf32> -> vector<4x48x1xf32>
    %441 = vector.broadcast %440 : vector<4x48x1xf32> to vector<4x48x48xf32>
    %442 = arith.mulf %437, %441 : vector<4x48x48xf32>
    %443 = arith.truncf %442 : vector<4x48x48xf32> to vector<4x48x48xbf16>
    "tpu.trace_start"() <{level = 10 : i32, message = "hqk,hkd->hqd"}> : () -> ()
    %cst_171 = arith.constant dense<0.000000e+00> : vector<4x48x8xf32>
    %444 = tpu.matmul %443, %426, %cst_171 {dimension_numbers = #tpu.dot_dimension_numbers<[2], [1], [1], [2], [0, 0, 0, 1, 1, 2], [0], [0]>} : vector<4x48x48xbf16>, vector<4x48x8xbf16>, vector<4x48x8xf32> -> vector<4x48x8xf32>
    "tpu.trace_stop"() : () -> ()
    %445 = vector.extract_strided_slice %444 {offsets = [0, 0, 0], sizes = [1, 48, 8], strides = [1, 1, 1]} : vector<4x48x8xf32> to vector<1x48x8xf32>
    %446 = vector.shape_cast %445 : vector<1x48x8xf32> to vector<48x8xf32>
    %447 = vector.extract_strided_slice %444 {offsets = [1, 0, 0], sizes = [1, 48, 8], strides = [1, 1, 1]} : vector<4x48x8xf32> to vector<1x48x8xf32>
    %448 = vector.shape_cast %447 : vector<1x48x8xf32> to vector<48x8xf32>
    %449 = vector.extract_strided_slice %444 {offsets = [2, 0, 0], sizes = [1, 48, 8], strides = [1, 1, 1]} : vector<4x48x8xf32> to vector<1x48x8xf32>
    %450 = vector.shape_cast %449 : vector<1x48x8xf32> to vector<48x8xf32>
    %451 = vector.extract_strided_slice %444 {offsets = [3, 0, 0], sizes = [1, 48, 8], strides = [1, 1, 1]} : vector<4x48x8xf32> to vector<1x48x8xf32>
    %452 = vector.shape_cast %451 : vector<1x48x8xf32> to vector<48x8xf32>
    %453 = tpu.concatenate %446, %448, %450, %452 in 1 : vector<48x8xf32>, vector<48x8xf32>, vector<48x8xf32>, vector<48x8xf32> -> vector<48x32xf32>
    %454 = arith.truncf %453 : vector<48x32xf32> to vector<48x32xbf16>
    %c2_172 = arith.constant 2 : index
    %c0_173 = arith.constant 0 : index
    %c0_174 = arith.constant 0 : index
    %455 = vector.load %arg19[%c2_172, %c0_173, %c0_174] : memref<3x32x32xbf16, #tpu.memory_space<vmem>>, vector<1x32x32xbf16>
    %456 = vector.shape_cast %455 : vector<1x32x32xbf16> to vector<32x32xbf16>
    %cst_175 = arith.constant dense<0.000000e+00> : vector<48x32xf32>
    %457 = tpu.matmul %454, %456, %cst_175 {dimension_numbers = #tpu.dot_dimension_numbers<[1], [0], [0], [1], [0, 0, 1, 1], [], []>} : vector<48x32xbf16>, vector<32x32xbf16>, vector<48x32xf32> -> vector<48x32xf32>
    %c2_176 = arith.constant 2 : index
    %c0_177 = arith.constant 0 : index
    %c0_178 = arith.constant 0 : index
    %458 = vector.load %arg20[%c2_176, %c0_177, %c0_178] : memref<3x1x32xf32, #tpu.memory_space<vmem>>, vector<1x1x32xf32>
    %459 = vector.shape_cast %458 : vector<1x1x32xf32> to vector<1x32xf32>
    %460 = vector.broadcast %459 : vector<1x32xf32> to vector<48x32xf32>
    %461 = arith.addf %457, %460 : vector<48x32xf32>
    %462 = arith.addf %361, %461 : vector<48x32xf32>
    %c2_179 = arith.constant 2 : index
    %c0_180 = arith.constant 0 : index
    %c0_181 = arith.constant 0 : index
    %463 = vector.load %arg21[%c2_179, %c0_180, %c0_181] : memref<3x1x32xf32, #tpu.memory_space<vmem>>, vector<1x1x32xf32>
    %464 = vector.shape_cast %463 : vector<1x1x32xf32> to vector<1x32xf32>
    %c2_182 = arith.constant 2 : index
    %c0_183 = arith.constant 0 : index
    %c0_184 = arith.constant 0 : index
    %465 = vector.load %arg22[%c2_182, %c0_183, %c0_184] : memref<3x1x32xf32, #tpu.memory_space<vmem>>, vector<1x1x32xf32>
    %466 = vector.shape_cast %465 : vector<1x1x32xf32> to vector<1x32xf32>
    %cst_185 = arith.constant dense<0.000000e+00> : vector<48xf32>
    %467 = vector.multi_reduction <add>, %462, %cst_185 [1] : vector<48x32xf32> to vector<48xf32>
    %468 = vector.shape_cast %467 : vector<48xf32> to vector<48x1xf32>
    %cst_186 = arith.constant 3.200000e+01 : f32
    %469 = vector.broadcast %cst_186 : f32 to vector<48x1xf32>
    %470 = arith.divf %468, %469 : vector<48x1xf32>
    %471 = vector.broadcast %470 : vector<48x1xf32> to vector<48x32xf32>
    %472 = arith.subf %462, %471 : vector<48x32xf32>
    %473 = arith.mulf %472, %472 : vector<48x32xf32>
    %cst_187 = arith.constant dense<0.000000e+00> : vector<48xf32>
    %474 = vector.multi_reduction <add>, %473, %cst_187 [1] : vector<48x32xf32> to vector<48xf32>
    %475 = vector.shape_cast %474 : vector<48xf32> to vector<48x1xf32>
    %cst_188 = arith.constant 3.200000e+01 : f32
    %476 = vector.broadcast %cst_188 : f32 to vector<48x1xf32>
    %477 = arith.divf %475, %476 : vector<48x1xf32>
    %cst_189 = arith.constant 9.99999974E-6 : f32
    %478 = vector.broadcast %cst_189 : f32 to vector<48x1xf32>
    %479 = arith.addf %477, %478 : vector<48x1xf32>
    %480 = math.rsqrt %479 : vector<48x1xf32>
    %481 = vector.broadcast %480 : vector<48x1xf32> to vector<48x32xf32>
    %482 = arith.mulf %472, %481 : vector<48x32xf32>
    %483 = vector.broadcast %464 : vector<1x32xf32> to vector<48x32xf32>
    %484 = arith.mulf %482, %483 : vector<48x32xf32>
    %485 = vector.broadcast %466 : vector<1x32xf32> to vector<48x32xf32>
    %486 = arith.addf %484, %485 : vector<48x32xf32>
    %487 = arith.truncf %486 : vector<48x32xf32> to vector<48x32xbf16>
    %c2_190 = arith.constant 2 : index
    %c0_191 = arith.constant 0 : index
    %c0_192 = arith.constant 0 : index
    %488 = vector.load %arg23[%c2_190, %c0_191, %c0_192] : memref<3x32x128xbf16, #tpu.memory_space<vmem>>, vector<1x32x128xbf16>
    %489 = vector.shape_cast %488 : vector<1x32x128xbf16> to vector<32x128xbf16>
    %cst_193 = arith.constant dense<0.000000e+00> : vector<48x128xf32>
    %490 = tpu.matmul %487, %489, %cst_193 {dimension_numbers = #tpu.dot_dimension_numbers<[1], [0], [0], [1], [0, 0, 1, 1], [], []>} : vector<48x32xbf16>, vector<32x128xbf16>, vector<48x128xf32> -> vector<48x128xf32>
    %c2_194 = arith.constant 2 : index
    %c0_195 = arith.constant 0 : index
    %c0_196 = arith.constant 0 : index
    %491 = vector.load %arg24[%c2_194, %c0_195, %c0_196] : memref<3x1x128xf32, #tpu.memory_space<vmem>>, vector<1x1x128xf32>
    %492 = vector.shape_cast %491 : vector<1x1x128xf32> to vector<1x128xf32>
    %493 = vector.broadcast %492 : vector<1x128xf32> to vector<48x128xf32>
    %494 = arith.addf %490, %493 : vector<48x128xf32>
    %cst_197 = arith.constant 5.000000e-01 : f32
    %495 = vector.broadcast %cst_197 : f32 to vector<48x128xf32>
    %496 = arith.mulf %495, %494 : vector<48x128xf32>
    %cst_198 = arith.constant 4.471500e-02 : f32
    %497 = vector.broadcast %cst_198 : f32 to vector<48x128xf32>
    %498 = arith.mulf %497, %494 : vector<48x128xf32>
    %499 = arith.mulf %498, %494 : vector<48x128xf32>
    %500 = arith.mulf %499, %494 : vector<48x128xf32>
    %501 = arith.addf %494, %500 : vector<48x128xf32>
    %cst_199 = arith.constant 0.797884583 : f32
    %502 = vector.broadcast %cst_199 : f32 to vector<48x128xf32>
    %503 = arith.mulf %502, %501 : vector<48x128xf32>
    %504 = math.tanh %503 : vector<48x128xf32>
    %cst_200 = arith.constant 1.000000e+00 : f32
    %505 = vector.broadcast %cst_200 : f32 to vector<48x128xf32>
    %506 = arith.addf %505, %504 : vector<48x128xf32>
    %507 = arith.mulf %496, %506 : vector<48x128xf32>
    %508 = arith.truncf %507 : vector<48x128xf32> to vector<48x128xbf16>
    %c2_201 = arith.constant 2 : index
    %c0_202 = arith.constant 0 : index
    %c0_203 = arith.constant 0 : index
    %509 = vector.load %arg25[%c2_201, %c0_202, %c0_203] : memref<3x128x32xbf16, #tpu.memory_space<vmem>>, vector<1x128x32xbf16>
    %510 = vector.shape_cast %509 : vector<1x128x32xbf16> to vector<128x32xbf16>
    %cst_204 = arith.constant dense<0.000000e+00> : vector<48x32xf32>
    %511 = tpu.matmul %508, %510, %cst_204 {dimension_numbers = #tpu.dot_dimension_numbers<[1], [0], [0], [1], [0, 0, 1, 1], [], []>} : vector<48x128xbf16>, vector<128x32xbf16>, vector<48x32xf32> -> vector<48x32xf32>
    %c2_205 = arith.constant 2 : index
    %c0_206 = arith.constant 0 : index
    %c0_207 = arith.constant 0 : index
    %512 = vector.load %arg26[%c2_205, %c0_206, %c0_207] : memref<3x1x32xf32, #tpu.memory_space<vmem>>, vector<1x1x32xf32>
    %513 = vector.shape_cast %512 : vector<1x1x32xf32> to vector<1x32xf32>
    %514 = vector.broadcast %513 : vector<1x32xf32> to vector<48x32xf32>
    %515 = arith.addf %511, %514 : vector<48x32xf32>
    %516 = arith.addf %462, %515 : vector<48x32xf32>
    %c0_208 = arith.constant 0 : index
    %c0_209 = arith.constant 0 : index
    %517 = vector.load %arg27[%c0_208, %c0_209] : memref<1x32xf32, #tpu.memory_space<vmem>>, vector<1x32xf32>
    %c0_210 = arith.constant 0 : index
    %c0_211 = arith.constant 0 : index
    %518 = vector.load %arg28[%c0_210, %c0_211] : memref<1x32xf32, #tpu.memory_space<vmem>>, vector<1x32xf32>
    %cst_212 = arith.constant dense<0.000000e+00> : vector<48xf32>
    %519 = vector.multi_reduction <add>, %516, %cst_212 [1] : vector<48x32xf32> to vector<48xf32>
    %520 = vector.shape_cast %519 : vector<48xf32> to vector<48x1xf32>
    %cst_213 = arith.constant 3.200000e+01 : f32
    %521 = vector.broadcast %cst_213 : f32 to vector<48x1xf32>
    %522 = arith.divf %520, %521 : vector<48x1xf32>
    %523 = vector.broadcast %522 : vector<48x1xf32> to vector<48x32xf32>
    %524 = arith.subf %516, %523 : vector<48x32xf32>
    %525 = arith.mulf %524, %524 : vector<48x32xf32>
    %cst_214 = arith.constant dense<0.000000e+00> : vector<48xf32>
    %526 = vector.multi_reduction <add>, %525, %cst_214 [1] : vector<48x32xf32> to vector<48xf32>
    %527 = vector.shape_cast %526 : vector<48xf32> to vector<48x1xf32>
    %cst_215 = arith.constant 3.200000e+01 : f32
    %528 = vector.broadcast %cst_215 : f32 to vector<48x1xf32>
    %529 = arith.divf %527, %528 : vector<48x1xf32>
    %cst_216 = arith.constant 9.99999974E-6 : f32
    %530 = vector.broadcast %cst_216 : f32 to vector<48x1xf32>
    %531 = arith.addf %529, %530 : vector<48x1xf32>
    %532 = math.rsqrt %531 : vector<48x1xf32>
    %533 = vector.broadcast %532 : vector<48x1xf32> to vector<48x32xf32>
    %534 = arith.mulf %524, %533 : vector<48x32xf32>
    %535 = vector.broadcast %517 : vector<1x32xf32> to vector<48x32xf32>
    %536 = arith.mulf %534, %535 : vector<48x32xf32>
    %537 = vector.broadcast %518 : vector<1x32xf32> to vector<48x32xf32>
    %538 = arith.addf %536, %537 : vector<48x32xf32>
    %539 = vector.extract_strided_slice %538 {offsets = [16, 0], sizes = [16, 32], strides = [1, 1]} : vector<48x32xf32> to vector<16x32xf32>
    %540 = vector.extract_strided_slice %538 {offsets = [32, 0], sizes = [16, 32], strides = [1, 1]} : vector<48x32xf32> to vector<16x32xf32>
    %541 = arith.truncf %539 : vector<16x32xf32> to vector<16x32xbf16>
    %c0_217 = arith.constant 0 : index
    %c0_218 = arith.constant 0 : index
    %542 = vector.load %arg29[%c0_217, %c0_218] : memref<32x6xbf16, #tpu.memory_space<vmem>>, vector<32x6xbf16>
    %cst_219 = arith.constant dense<0.000000e+00> : vector<16x6xf32>
    %543 = tpu.matmul %541, %542, %cst_219 {dimension_numbers = #tpu.dot_dimension_numbers<[1], [0], [0], [1], [0, 0, 1, 1], [], []>} : vector<16x32xbf16>, vector<32x6xbf16>, vector<16x6xf32> -> vector<16x6xf32>
    %c0_220 = arith.constant 0 : index
    %c0_221 = arith.constant 0 : index
    %544 = vector.load %arg30[%c0_220, %c0_221] : memref<1x6xf32, #tpu.memory_space<vmem>>, vector<1x6xf32>
    %545 = vector.broadcast %544 : vector<1x6xf32> to vector<16x6xf32>
    %546 = arith.addf %543, %545 : vector<16x6xf32>
    %547 = arith.truncf %540 : vector<16x32xf32> to vector<16x32xbf16>
    %c0_222 = arith.constant 0 : index
    %c0_223 = arith.constant 0 : index
    %548 = vector.load %arg31[%c0_222, %c0_223] : memref<32x1xbf16, #tpu.memory_space<vmem>>, vector<32x1xbf16>
    %cst_224 = arith.constant dense<0.000000e+00> : vector<16x1xf32>
    %549 = tpu.matmul %547, %548, %cst_224 {dimension_numbers = #tpu.dot_dimension_numbers<[1], [0], [0], [1], [0, 0, 1, 1], [], []>} : vector<16x32xbf16>, vector<32x1xbf16>, vector<16x1xf32> -> vector<16x1xf32>
    %c0_225 = arith.constant 0 : index
    %c0_226 = arith.constant 0 : index
    %550 = vector.load %arg32[%c0_225, %c0_226] : memref<1x1xf32, #tpu.memory_space<vmem>>, vector<1x1xf32>
    %551 = vector.broadcast %550 : vector<1x1xf32> to vector<16x1xf32>
    %552 = arith.addf %549, %551 : vector<16x1xf32>
    %553 = tpu.concatenate %546, %552 in 1 : vector<16x6xf32>, vector<16x1xf32> -> vector<16x7xf32>
    %c0_227 = arith.constant 0 : index
    %c0_228 = arith.constant 0 : index
    %554 = vector.load %arg33[%c0_227, %c0_228] : memref<16x7xf32, #tpu.memory_space<vmem>>, vector<16x7xf32>
    tpu.vector_store %arg33[%c0_227, %c0_228], %553 {strides = array<i32>} : memref<16x7xf32, #tpu.memory_space<vmem>>, vector<16x7xf32>,
    return
  }
  func.func @transform_0(%arg0: i32) -> (i32, i32) {
    %c0_i32 = arith.constant 0 : i32
    %c0_i32_0 = arith.constant 0 : i32
    %c0_i32_1 = arith.constant 0 : i32
    return %c0_i32, %c0_i32_0 : i32, i32
  }
  func.func @transform_1(%arg0: i32) -> (i32, i32) {
    %c0_i32 = arith.constant 0 : i32
    %c0_i32_0 = arith.constant 0 : i32
    %c0_i32_1 = arith.constant 0 : i32
    return %c0_i32, %c0_i32_0 : i32, i32
  }
  func.func @transform_2(%arg0: i32) -> (i32, i32) {
    %c0_i32 = arith.constant 0 : i32
    %c0_i32_0 = arith.constant 0 : i32
    %c0_i32_1 = arith.constant 0 : i32
    return %c0_i32, %c0_i32_0 : i32, i32
  }
  func.func @transform_3(%arg0: i32) -> (i32, i32) {
    %c0_i32 = arith.constant 0 : i32
    %c0_i32_0 = arith.constant 0 : i32
    %c0_i32_1 = arith.constant 0 : i32
    return %c0_i32, %c0_i32_0 : i32, i32
  }
  func.func @transform_4(%arg0: i32) -> (i32, i32) {
    %c0_i32 = arith.constant 0 : i32
    %c0_i32_0 = arith.constant 0 : i32
    %c0_i32_1 = arith.constant 0 : i32
    return %c0_i32, %c0_i32_0 : i32, i32
  }
  func.func @transform_5(%arg0: i32) -> (i32, i32) {
    %c0_i32 = arith.constant 0 : i32
    %c0_i32_0 = arith.constant 0 : i32
    %c0_i32_1 = arith.constant 0 : i32
    return %c0_i32, %c0_i32_0 : i32, i32
  }
  func.func @transform_6(%arg0: i32) -> (i32, i32) {
    %c0_i32 = arith.constant 0 : i32
    %c0_i32_0 = arith.constant 0 : i32
    %c0_i32_1 = arith.constant 0 : i32
    return %c0_i32, %c0_i32_0 : i32, i32
  }
  func.func @transform_7(%arg0: i32) -> (i32, i32) {
    %c0_i32 = arith.constant 0 : i32
    %c0_i32_0 = arith.constant 0 : i32
    %c0_i32_1 = arith.constant 0 : i32
    return %c0_i32, %c0_i32_0 : i32, i32
  }
  func.func @transform_8(%arg0: i32) -> (i32, i32) {
    %c0_i32 = arith.constant 0 : i32
    %c0_i32_0 = arith.constant 0 : i32
    %c0_i32_1 = arith.constant 0 : i32
    return %c0_i32, %c0_i32_0 : i32, i32
  }
  func.func @transform_9(%arg0: i32) -> (i32, i32) {
    %c0_i32 = arith.constant 0 : i32
    %c0_i32_0 = arith.constant 0 : i32
    %c0_i32_1 = arith.constant 0 : i32
    return %c0_i32, %c0_i32_0 : i32, i32
  }
  func.func @transform_10(%arg0: i32) -> (i32, i32) {
    %c0_i32 = arith.constant 0 : i32
    %c0_i32_0 = arith.constant 0 : i32
    %c0_i32_1 = arith.constant 0 : i32
    return %c0_i32, %c0_i32_0 : i32, i32
  }
  func.func @transform_11(%arg0: i32) -> (i32, i32) {
    %c0_i32 = arith.constant 0 : i32
    %c0_i32_0 = arith.constant 0 : i32
    %c0_i32_1 = arith.constant 0 : i32
    return %c0_i32, %c0_i32_0 : i32, i32
  }
  func.func @transform_12(%arg0: i32) -> (i32, i32) {
    %c0_i32 = arith.constant 0 : i32
    %c0_i32_0 = arith.constant 0 : i32
    %c0_i32_1 = arith.constant 0 : i32
    return %c0_i32, %c0_i32_0 : i32, i32
  }
  func.func @transform_13(%arg0: i32) -> (i32, i32) {
    %c0_i32 = arith.constant 0 : i32
    %c0_i32_0 = arith.constant 0 : i32
    %c0_i32_1 = arith.constant 0 : i32
    return %c0_i32, %c0_i32_0 : i32, i32
  }
  func.func @transform_14(%arg0: i32) -> (i32, i32, i32) {
    %c0_i32 = arith.constant 0 : i32
    %c0_i32_0 = arith.constant 0 : i32
    %c0_i32_1 = arith.constant 0 : i32
    %c0_i32_2 = arith.constant 0 : i32
    return %c0_i32, %c0_i32_0, %c0_i32_1 : i32, i32, i32
  }
  func.func @transform_15(%arg0: i32) -> (i32, i32, i32) {
    %c0_i32 = arith.constant 0 : i32
    %c0_i32_0 = arith.constant 0 : i32
    %c0_i32_1 = arith.constant 0 : i32
    %c0_i32_2 = arith.constant 0 : i32
    return %c0_i32, %c0_i32_0, %c0_i32_1 : i32, i32, i32
  }
  func.func @transform_16(%arg0: i32) -> (i32, i32, i32) {
    %c0_i32 = arith.constant 0 : i32
    %c0_i32_0 = arith.constant 0 : i32
    %c0_i32_1 = arith.constant 0 : i32
    %c0_i32_2 = arith.constant 0 : i32
    return %c0_i32, %c0_i32_0, %c0_i32_1 : i32, i32, i32
  }
  func.func @transform_17(%arg0: i32) -> (i32, i32, i32) {
    %c0_i32 = arith.constant 0 : i32
    %c0_i32_0 = arith.constant 0 : i32
    %c0_i32_1 = arith.constant 0 : i32
    %c0_i32_2 = arith.constant 0 : i32
    return %c0_i32, %c0_i32_0, %c0_i32_1 : i32, i32, i32
  }
  func.func @transform_18(%arg0: i32) -> (i32, i32, i32) {
    %c0_i32 = arith.constant 0 : i32
    %c0_i32_0 = arith.constant 0 : i32
    %c0_i32_1 = arith.constant 0 : i32
    %c0_i32_2 = arith.constant 0 : i32
    return %c0_i32, %c0_i32_0, %c0_i32_1 : i32, i32, i32
  }
  func.func @transform_19(%arg0: i32) -> (i32, i32, i32) {
    %c0_i32 = arith.constant 0 : i32
    %c0_i32_0 = arith.constant 0 : i32
    %c0_i32_1 = arith.constant 0 : i32
    %c0_i32_2 = arith.constant 0 : i32
    return %c0_i32, %c0_i32_0, %c0_i32_1 : i32, i32, i32
  }
  func.func @transform_20(%arg0: i32) -> (i32, i32, i32) {
    %c0_i32 = arith.constant 0 : i32
    %c0_i32_0 = arith.constant 0 : i32
    %c0_i32_1 = arith.constant 0 : i32
    %c0_i32_2 = arith.constant 0 : i32
    return %c0_i32, %c0_i32_0, %c0_i32_1 : i32, i32, i32
  }
  func.func @transform_21(%arg0: i32) -> (i32, i32, i32) {
    %c0_i32 = arith.constant 0 : i32
    %c0_i32_0 = arith.constant 0 : i32
    %c0_i32_1 = arith.constant 0 : i32
    %c0_i32_2 = arith.constant 0 : i32
    return %c0_i32, %c0_i32_0, %c0_i32_1 : i32, i32, i32
  }
  func.func @transform_22(%arg0: i32) -> (i32, i32, i32) {
    %c0_i32 = arith.constant 0 : i32
    %c0_i32_0 = arith.constant 0 : i32
    %c0_i32_1 = arith.constant 0 : i32
    %c0_i32_2 = arith.constant 0 : i32
    return %c0_i32, %c0_i32_0, %c0_i32_1 : i32, i32, i32
  }
  func.func @transform_23(%arg0: i32) -> (i32, i32, i32) {
    %c0_i32 = arith.constant 0 : i32
    %c0_i32_0 = arith.constant 0 : i32
    %c0_i32_1 = arith.constant 0 : i32
    %c0_i32_2 = arith.constant 0 : i32
    return %c0_i32, %c0_i32_0, %c0_i32_1 : i32, i32, i32
  }
  func.func @transform_24(%arg0: i32) -> (i32, i32, i32) {
    %c0_i32 = arith.constant 0 : i32
    %c0_i32_0 = arith.constant 0 : i32
    %c0_i32_1 = arith.constant 0 : i32
    %c0_i32_2 = arith.constant 0 : i32
    return %c0_i32, %c0_i32_0, %c0_i32_1 : i32, i32, i32
  }
  func.func @transform_25(%arg0: i32) -> (i32, i32, i32) {
    %c0_i32 = arith.constant 0 : i32
    %c0_i32_0 = arith.constant 0 : i32
    %c0_i32_1 = arith.constant 0 : i32
    %c0_i32_2 = arith.constant 0 : i32
    return %c0_i32, %c0_i32_0, %c0_i32_1 : i32, i32, i32
  }
  func.func @transform_26(%arg0: i32) -> (i32, i32) {
    %c0_i32 = arith.constant 0 : i32
    %c0_i32_0 = arith.constant 0 : i32
    %c0_i32_1 = arith.constant 0 : i32
    return %c0_i32, %c0_i32_0 : i32, i32
  }
  func.func @transform_27(%arg0: i32) -> (i32, i32) {
    %c0_i32 = arith.constant 0 : i32
    %c0_i32_0 = arith.constant 0 : i32
    %c0_i32_1 = arith.constant 0 : i32
    return %c0_i32, %c0_i32_0 : i32, i32
  }
  func.func @transform_28(%arg0: i32) -> (i32, i32) {
    %c0_i32 = arith.constant 0 : i32
    %c0_i32_0 = arith.constant 0 : i32
    %c0_i32_1 = arith.constant 0 : i32
    return %c0_i32, %c0_i32_0 : i32, i32
  }
  func.func @transform_29(%arg0: i32) -> (i32, i32) {
    %c0_i32 = arith.constant 0 : i32
    %c0_i32_0 = arith.constant 0 : i32
    %c0_i32_1 = arith.constant 0 : i32
    return %c0_i32, %c0_i32_0 : i32, i32
  }
  func.func @transform_30(%arg0: i32) -> (i32, i32) {
    %c0_i32 = arith.constant 0 : i32
    %c0_i32_0 = arith.constant 0 : i32
    %c0_i32_1 = arith.constant 0 : i32
    return %c0_i32, %c0_i32_0 : i32, i32
  }
  func.func @transform_31(%arg0: i32) -> (i32, i32) {
    %c0_i32 = arith.constant 0 : i32
    %c0_i32_0 = arith.constant 0 : i32
    %c0_i32_1 = arith.constant 0 : i32
    return %c0_i32, %c0_i32_0 : i32, i32
  }
  func.func @transform_32(%arg0: i32) -> (i32, i32) {
    %c0_i32 = arith.constant 0 : i32
    %c0_i32_0 = arith.constant 0 : i32
    %c0_i32_1 = arith.constant 0 : i32
    return %c0_i32, %c0_i32_0 : i32, i32
  }
}

</mosaic_0001>

<bundles_post_ra>
// kernel: tpu_custom_call.1
= control target key start
LH: loop header
LB: loop body
LE: loop exit
PB: predicated region body
PF: predicated region fallthrough
CT: control target
= control target key end

     0   :  { %v6406_v0 = vmov 0   ;;  %s6407_s3 = smov 2   ;;  %s6408_s7 = smov 10   ;;  %vm215_vm0 = vcmask 1042432   ;;  %vm185_vm1 = vcmask 1045504   ;;  %vm211_vm2 = vcmask 48128   ;;  %s8826_s0 = inlined_call_operand.smem [shape: u32[33], index: -1, kind: input, shape index: {}] }
   0x1   :  { %5806 = vset.pattern.permute.xlu0 %v6406_v0  ;;  %s6453_s6 = sld [smem:[%s8826_s0 + %s6407_s3]]   ;;  %s6409_s11 = smov 8   ;;  %vm181_vm3 = vcmask 97280   ;;  %vm237_vm4 = vcmask 261120   ;;  %v6416_v47 = vmov 32.0  }
   0x2   :  { %s5332_s10 = sld [smem:[%s8826_s0 + %s6408_s7]]   ;;  %s6410_s15 = smov 1   ;;  %5976 = vrcp.f32 %v6416_v47 }
   0x3   :  { %s5330_s14 = sld [smem:[%s8826_s0 + %s6409_s11]]   ;;  %s6411_s22 = smov 6  }
   0x4   :  { %s5323_s18 = sld [smem:[%s8826_s0 + %s6410_s15]]   ;;  %s6412_s26 = smov 7  }
   0x5   :  { %s1_s21 = sld [smem:[%s8826_s0]]   ;;  %s6413_s30 = smov 11  }
   0x6   :  { %s6472_s25 = sld [smem:[%s8826_s0 + %s6411_s22]]   ;;  %s6414_s4 = smov 9  }
   0x7   :  { %v141_v1 = vld [vmem:[%s6453_s6] sm:$0xff]  ;;  %s5329_s29 = sld [smem:[%s8826_s0 + %s6412_s26]]   ;;  %v142_v14 = vld [vmem:[%s6453_s6 + $0x8] sm:$0xff]  ;;  %s6415_s9 = smov 3  }
   0x8   :  { %148 = vperm.xlu0 %5806, %v141_v1   ;;  %v206_v2 = vld [vmem:[%s5332_s10] sm:$0x7]  ;;  %s6481_s3 = sld [smem:[%s8826_s0 + %s6413_s30]]   ;;  %v5977_v48 = vpop.eup %5976  ;;  %s6417_s6 = smov 12  }
   0x9   :  { %v217_v3 = vsel %vm215_vm0, %v206_v2, 0  ;;  %v5357_v4 = vld [vmem:[%s5330_s14] sm:$0xf]  ;;  %v5718_v5 = vld [vmem:[%s5330_s14] sm:$0x30]  ;;  %s6486_s8 = sld [smem:[%s8826_s0 + %s6414_s4]]   ;;  %v257_v49 = vmul.f32 32.0, %v5977_v48  ;;  %vm261_vm5 = vweird.f32 %v5977_v48 }
   0xa   :  { %226 = vmatpush.bf16.msra.mxu1 %v217_v3  ;;  %v5358_v6 = vor.u32 %v5718_v5, %v5357_v4  ;;  %v139_v7 = vld [vmem:[%s5323_s18] sm:$0xff]  ;;  %v140_v8 = vld [vmem:[%s5323_s18 + $0x8] sm:$0xff]  ;;  %s5325_s13 = sld [smem:[%s8826_s0 + %s6415_s9]]   ;;  %s6418_s17 = smov 13  }
   0xb   :  { %v205_v9 = vpack.c.bf16 %v140_v8, %v139_v7  ;;  %v137_v10 = vld [vmem:[%s1_s21] sm:$0xff]  ;;  %v138_v11 = vld [vmem:[%s1_s21 + $0x8] sm:$0xff]  ;;  %v258_v50 = vsub.f32 1.0, %v257_v49  ;;  %s6518_s16 = sld [smem:[%s8826_s0 + %s6417_s6]]   ;;  %s6419_s21 = smov 4  }
   0xc   :  { %v187_v12 = vsel %vm185_vm1, %v5358_v6, 0  ;;  %v169_v13 = vpack.c.bf16 %v138_v11, %v137_v10  ;;  %v5942_v15 = vld [vmem:[%s6472_s25] ss:$0 sm:$0xff]  ;;  %s6525_s20 = sld [smem:[%s8826_s0 + %s6418_s17]]   ;;  %s6420_s26 = smov 14  }
   0xd   :  { %196 = vmatpush.bf16.msra.mxu0 %v187_v12  ;;  %5360 = vmatmul.msk.bf16.vlgmr.msra.gmra.mxu1 %vm211_vm2, %v205_v9  ;;  %v5943_v16 = vld [vmem:[%s5329_s29] ss:$0 sm:$0xff]  ;;  %v259_v51 = vmul.f32 %v5977_v48, %v258_v50  ;;  %s6556_s25 = sld [smem:[%s8826_s0 + %s6419_s21]]   ;;  %s6421_s30 = smov 15  }
   0xe   :  { %v5944_v27 = vld [vmem:[%s6481_s3] ss:$0 sm:$0xff]  ;;  %s6631_s29 = sld [smem:[%s8826_s0 + %s6420_s26]]   ;;  %s6422_s4 = smov 17  }
   0xf   :  { %v5945_v31 = vld [vmem:[%s6486_s8] ss:$0 sm:$0xff]  ;;  %v260_v52 = vadd.f32 %v5977_v48, %v259_v51  ;;  %s6638_s3 = sld [smem:[%s8826_s0 + %s6421_s30]]   ;;  %s6423_s9 = smov 16  }
  0x10   :  { %5359 = vmatmul.msk.bf16.vlgmr.msra.gmra.mxu0 %vm181_vm3, %v169_v13  ;;  %153 = vperm.xlu0 %5806, %v142_v14   ;;  %v143_v19 = vld [vmem:[%s5325_s13] sm:$0xff]  ;;  %v144_v25 = vld [vmem:[%s5325_s13 + $0x8] sm:$0xff]  ;;  %s6670_s8 = sld [smem:[%s8826_s0 + %s6422_s4]]   ;;  %s6424_s6 = smov 104  }
  0x11   :  { %v6502_v53 = vsel %vm261_vm5, %v5977_v48, %v260_v52  ;;  %s6676_s13 = sld [smem:[%s8826_s0 + %s6423_s9]]   ;;  %s6425_s14 = smov 112  }
  0x12   :  { %s6426_s15 = smov 120   ;;  %s6428_s17 = smov 64  }
  0x13   :  { %s6429_s18 = smov 5   ;;  %s6430_s23 = smov 24  }
  0x14   :  { %s6819_s21 = sld [smem:[%s8826_s0 + %s6429_s18]]   ;;  %s6431_s24 = smov 18  }
  0x15   :  { %s7148_s27 = sld [smem:[%s8826_s0 + %s6431_s24]]   ;;  %s6432_s28 = smov 19  }
  0x16   :  { %s7157_s2 = sld [smem:[%s8826_s0 + %s6432_s28]]   ;;  %s6433_s4 = smov 20  }
  0x17   :  { %s7210_s10 = sld [smem:[%s8826_s0 + %s6433_s4]]   ;;  %s6434_s12 = smov 21  }
  0x18   :  { %s6435_s24 = smov 22   ;;  %s6436_s30 = smov 23  }
  0x19   :  { %s7266_s28 = sld [smem:[%s8826_s0 + %s6435_s24]]   ;;  %s6437_s19 = smov 25  }
  0x1a   :  { %s7276_s5 = sld [smem:[%s8826_s0 + %s6436_s30]]   ;;  %s6443_s4 = smov 31  }
  0x1b   :  { %s7306_s18 = sld [smem:[%s8826_s0 + %s6430_s23]]  }
  0x1c   :  { %s7331_s26 = sld [smem:[%s8826_s0 + %s6437_s19]]  }
  0x7a   :  { %v149_v17 = vpop.permute.xlu0 %148 }
  0x7b   :  { %v159_v18 = vmul.f32 %v5942_v15, %v149_v17 }
  0x7d   :  { %v165_v20 = vadd.f32 %v5943_v16, %v159_v18 }
  0x7f   :  { %v167_v21 = vadd.f32 %v165_v20, %v143_v19 }
  0x81   :  { %v238_v22 = vsel %vm237_vm4, %v167_v21, 0.0 }
  0x82   :  { %239 = vadd.xlane.f32.xlu1 %v238_v22  ;;  %v154_v23 = vpop.permute.xlu0 %153 }
  0x83   :  { %v160_v24 = vmul.f32 %v5942_v15, %v154_v23 }
  0x85   :  { %v166_v26 = vadd.f32 %v5943_v16, %v160_v24 }
  0x87   :  { %v168_v28 = vadd.f32 %v166_v26, %v144_v25 }
  0x89   :  { %v241_v29 = vsel %vm237_vm4, %v168_v28, 0.0 }
  0x8a   :  { %v228_v30 = vpop.f32.mrf.mxu1  ;;  %242 = vadd.xlane.f32.xlu1 %v241_v29 }
  0x8b   :  { %v229_v32 = vadd.f32 %v5944_v27, %v228_v30 }
  0x8d   :  { %v198_v33 = vpop.f32.mrf.mxu0  ;;  %v233_v34 = vadd.f32 %v229_v32, %v143_v19 }
  0x8e   :  { %v199_v35 = vadd.f32 %v5945_v31, %v198_v33 }
  0x8f   :  { %v250_v36 = vsel %vm237_vm4, %v233_v34, 0.0 }
  0x90   :  { %251 = vadd.xlane.f32.xlu2 %v250_v36  ;;  %v203_v37 = vadd.f32 %v199_v35, %v143_v19 }
  0x92   :  { %v230_v38 = vpop.f32.mrf.mxu1  ;;  %v244_v39 = vsel %vm237_vm4, %v203_v37, 0.0 }
  0x93   :  { %v231_v40 = vadd.f32 %v5944_v27, %v230_v38  ;;  %245 = vadd.xlane.f32.xlu0 %v244_v39 }
  0x95   :  { %v200_v41 = vpop.f32.mrf.mxu0  ;;  %v234_v42 = vadd.f32 %v231_v40, %v144_v25 }
  0x96   :  { %v201_v43 = vadd.f32 %v5945_v31, %v200_v41 }
  0x97   :  { %v253_v44 = vsel %vm237_vm4, %v234_v42, 0.0 }
  0x98   :  { %254 = vadd.xlane.f32.xlu2 %v253_v44  ;;  %v204_v45 = vadd.f32 %v201_v43, %v144_v25 }
  0x9a   :  { %v247_v46 = vsel %vm237_vm4, %v204_v45, 0.0 }
  0x9b   :  { %248 = vadd.xlane.f32.xlu1 %v247_v46 }
  0xf5   :  { %v240_v54 = vpop.xlane.xlu1 %239 }
  0xf6   :  { %v263_v55 = vmul.f32 %v6502_v53, %v240_v54  ;;  %v395_v54 = vld [vmem:[%s6556_s25] sm:$0xff] }
  0xf8   :  { %v6505_v56 = vsub.f32 %v167_v21, %v263_v55 }
  0xfa   :  { %v275_v57 = vmul.f32 %v6505_v56, %v6505_v56 }
  0xfc   :  { %v281_v58 = vsel %vm237_vm4, %v275_v57, 0.0 }
  0xfd   :  { %v243_v59 = vpop.xlane.xlu1 %242  ;;  %282 = vadd.xlane.f32.xlu2 %v281_v58 }
  0xfe   :  { %v264_v60 = vmul.f32 %v6502_v53, %v243_v59 }
 0x100   :  { %v6511_v61 = vsub.f32 %v168_v28, %v264_v60 }
 0x102   :  { %v276_v62 = vmul.f32 %v6511_v61, %v6511_v61 }
 0x103   :  { %v252_v63 = vpop.xlane.xlu2 %251 }
 0x104   :  { %v267_v0 = vmul.f32 %v6502_v53, %v252_v63  ;;  %v284_v1 = vsel %vm237_vm4, %v276_v62, 0.0 }
 0x105   :  { %285 = vadd.xlane.f32.xlu1 %v284_v1 }
 0x106   :  { %v6527_v2 = vsub.f32 %v233_v34, %v267_v0  ;;  %v246_v3 = vpop.xlane.xlu0 %245 }
 0x107   :  { %v265_v4 = vmul.f32 %v6502_v53, %v246_v3 }
 0x108   :  { %v279_v5 = vmul.f32 %v6527_v2, %v6527_v2 }
 0x109   :  { %v6532_v6 = vsub.f32 %v203_v37, %v265_v4  ;;  %v6559_v37 = vld [vmem:[%s6518_s16] ss:$0 sm:$0xff]  ;;  %s6427_s16 = smov 96  }
 0x10a   :  { %v293_v7 = vsel %vm237_vm4, %v279_v5, 0.0 }
 0x10b   :  { %294 = vadd.xlane.f32.xlu2 %v293_v7  ;;  %v255_v8 = vpop.xlane.xlu2 %254  ;;  %v277_v12 = vmul.f32 %v6532_v6, %v6532_v6 }
 0x10c   :  { %v268_v9 = vmul.f32 %v6502_v53, %v255_v8 }
 0x10d   :  { %v287_v17 = vsel %vm237_vm4, %v277_v12, 0.0 }
 0x10e   :  { %v6536_v10 = vsub.f32 %v234_v42, %v268_v9  ;;  %v249_v11 = vpop.xlane.xlu1 %248 }
 0x10f   :  { %v266_v13 = vmul.f32 %v6502_v53, %v249_v11 }
 0x110   :  { %v280_v14 = vmul.f32 %v6536_v10, %v6536_v10 }
 0x111   :  { %v6543_v15 = vsub.f32 %v204_v45, %v266_v13  ;;  %v6565_v45 = vld [vmem:[%s6525_s20] ss:$0 sm:$0xff]  ;;  %v396_v13 = vld [vmem:[%s6556_s25 + $0x8] sm:$0xff]  ;;  %s7234_s20 = sld [smem:[%s8826_s0 + %s6434_s12]]  }
 0x112   :  { %v296_v16 = vsel %vm237_vm4, %v280_v14, 0.0  ;;  %s5353_s12 = sld [smem:[%s8826_s0 + %s6443_s4]]  }
 0x113   :  { %297 = vadd.xlane.f32.xlu1 %v296_v16  ;;  %288 = vadd.xlane.f32.xlu2 %v287_v17  ;;  %v278_v18 = vmul.f32 %v6543_v15, %v6543_v15 }
 0x115   :  { %v290_v19 = vsel %vm237_vm4, %v278_v18, 0.0 }
 0x11b   :  { %291 = vadd.xlane.f32.xlu1 %v290_v19 }
 0x170   :  { %v283_v20 = vpop.xlane.xlu2 %282 }
 0x171   :  { %v299_v21 = vmul.f32 %v283_v20, %v6502_v53 }
 0x173   :  { %v305_v22 = vadd.f32 1e-05, %v299_v21 }
 0x175   :  { %5978 = vrsqrt.f32 %v305_v22  ;;  %vm317_vm7 = vweird.f32 %v305_v22 }
 0x178   :  { %v286_v23 = vpop.xlane.xlu1 %285 }
 0x179   :  { %v300_v24 = vmul.f32 %v286_v23, %v6502_v53 }
 0x17b   :  { %v5979_v25 = vpop.eup %5978  ;;  %v306_v26 = vadd.f32 1e-05, %v300_v24 }
 0x17c   :  { %v312_v27 = vmul.f32 %v5979_v25, %v305_v22  ;;  %vm318_vm6 = vweird.f32 %v5979_v25 }
 0x17d   :  { %5980 = vrsqrt.f32 %v306_v26  ;;  %vm319_vm8 = vmor %vm317_vm7, %vm318_vm6  ;;  %vm327_vm10 = vweird.f32 %v306_v26 }
 0x17e   :  { %v313_v28 = vmul.f32 %v5979_v25, %v312_v27  ;;  %v295_v29 = vpop.xlane.xlu2 %294 }
 0x17f   :  { %v303_v30 = vmul.f32 %v295_v29, %v6502_v53 }
 0x180   :  { %v314_v31 = vmul.f32 0.5, %v313_v28 }
 0x181   :  { %v309_v32 = vadd.f32 1e-05, %v303_v30 }
 0x182   :  { %v315_v33 = vsub.f32 1.5, %v314_v31 }
 0x183   :  { %v5981_v34 = vpop.eup %5980  ;;  %5982 = vrsqrt.f32 %v309_v32  ;;  %vm357_vm13 = vweird.f32 %v309_v32 }
 0x184   :  { %v316_v35 = vmul.f32 %v5979_v25, %v315_v33  ;;  %v322_v36 = vmul.f32 %v5981_v34, %v306_v26  ;;  %vm328_vm9 = vweird.f32 %v5981_v34 }
 0x185   :  { %vm329_vm11 = vmor %vm327_vm10, %vm328_vm9 }
 0x186   :  { %v320_v38 = vsel %vm319_vm8, %v5979_v25, %v316_v35  ;;  %v323_v39 = vmul.f32 %v5981_v34, %v322_v36  ;;  %v298_v40 = vpop.xlane.xlu1 %297  ;;  %v289_v41 = vpop.xlane.xlu2 %288  ;;  %v399_v25 = vld [vmem:[%s6556_s25 + $0x20] sm:$0xff] }
 0x187   :  { %v304_v42 = vmul.f32 %v298_v40, %v6502_v53  ;;  %v301_v43 = vmul.f32 %v289_v41, %v6502_v53  ;;  %v371_v44 = vmul.f32 %v320_v38, %v6505_v56 }
 0x188   :  { %v324_v46 = vmul.f32 0.5, %v323_v39 }
 0x189   :  { %v5983_v47 = vpop.eup %5982  ;;  %v310_v48 = vadd.f32 1e-05, %v304_v42  ;;  %v307_v49 = vadd.f32 1e-05, %v301_v43  ;;  %v380_v50 = vmul.f32 %v6559_v37, %v371_v44  ;;  %v400_v42 = vld [vmem:[%s6556_s25 + $0x28] sm:$0xff] }
 0x18a   :  { %v325_v51 = vsub.f32 1.5, %v324_v46  ;;  %v352_v52 = vmul.f32 %v5983_v47, %v309_v32  ;;  %vm358_vm12 = vweird.f32 %v5983_v47  ;;  %v397_v46 = vld [vmem:[%s6556_s25 + $0x10] sm:$0xff] }
 0x18b   :  { %5984 = vrsqrt.f32 %v310_v48  ;;  %v389_v55 = vadd.f32 %v6565_v45, %v380_v50  ;;  %vm359_vm14 = vmor %vm357_vm13, %vm358_vm12  ;;  %vm367_vm1 = vweird.f32 %v310_v48  ;;  %vm337_vm5 = vweird.f32 %v307_v49 }
 0x18c   :  { %v326_v57 = vmul.f32 %v5981_v34, %v325_v51  ;;  %v353_v58 = vmul.f32 %v5983_v47, %v352_v52  ;;  %5986 = vrsqrt.f32 %v307_v49 }
 0x18d   :  { %v6570_v56 = vadd.f32 %v395_v54, %v389_v55  ;;  %v398_v55 = vld [vmem:[%s6556_s25 + $0x18] sm:$0xff] }
 0x18e   :  { %v330_v59 = vsel %vm329_vm11, %v5981_v34, %v326_v57  ;;  %v354_v60 = vmul.f32 0.5, %v353_v58  ;;  %v292_v62 = vpop.xlane.xlu1 %291 }
 0x18f   :  { %v302_v63 = vmul.f32 %v292_v62, %v6502_v53  ;;  %v415_v0 = vsel %vm237_vm4, %v6570_v56, 0.0  ;;  %v372_v1 = vmul.f32 %v330_v59, %v6511_v61 }
 0x190   :  { %v355_v3 = vsub.f32 1.5, %v354_v60  ;;  %416 = vadd.xlane.f32.xlu2 %v415_v0 }
 0x191   :  { %v5985_v4 = vpop.eup %5984  ;;  %v308_v5 = vadd.f32 1e-05, %v302_v63  ;;  %v381_v7 = vmul.f32 %v6559_v37, %v372_v1 }
 0x192   :  { %v5987_v8 = vpop.eup %5986  ;;  %v356_v9 = vmul.f32 %v5983_v47, %v355_v3  ;;  %v362_v11 = vmul.f32 %v5985_v4, %v310_v48  ;;  %vm368_vm15 = vweird.f32 %v5985_v4 }
 0x193   :  { %v332_v12 = vmul.f32 %v5987_v8, %v307_v49  ;;  %5988 = vrsqrt.f32 %v308_v5  ;;  %v390_v61 = vadd.f32 %v6565_v45, %v381_v7  ;;  %vm338_vm0 = vweird.f32 %v5987_v8  ;;  %vm369_vm3 = vmor %vm367_vm1, %vm368_vm15 }
 0x194   :  { %v360_v14 = vsel %vm359_vm14, %v5983_v47, %v356_v9  ;;  %v363_v16 = vmul.f32 %v5985_v4, %v362_v11  ;;  %vm339_vm6 = vmor %vm337_vm5, %vm338_vm0  ;;  %vm347_vm8 = vweird.f32 %v308_v5 }
 0x195   :  { %v333_v17 = vmul.f32 %v5987_v8, %v332_v12  ;;  %v375_v18 = vmul.f32 %v360_v14, %v6527_v2  ;;  %v6580_v20 = vadd.f32 %v396_v13, %v390_v61 }
 0x196   :  { %v364_v19 = vmul.f32 0.5, %v363_v16 }
 0x197   :  { %v334_v21 = vmul.f32 0.5, %v333_v17  ;;  %v384_v22 = vmul.f32 %v6559_v37, %v375_v18  ;;  %v418_v24 = vsel %vm237_vm4, %v6580_v20, 0.0 }
 0x198   :  { %v365_v23 = vsub.f32 1.5, %v364_v19  ;;  %419 = vadd.xlane.f32.xlu1 %v418_v24 }
 0x199   :  { %v5989_v26 = vpop.eup %5988  ;;  %v335_v27 = vsub.f32 1.5, %v334_v21  ;;  %v393_v28 = vadd.f32 %v6565_v45, %v384_v22 }
 0x19a   :  { %v366_v29 = vmul.f32 %v5985_v4, %v365_v23  ;;  %v342_v2 = vmul.f32 %v5989_v26, %v308_v5  ;;  %vm348_vm7 = vweird.f32 %v5989_v26 }
 0x19b   :  { %v336_v30 = vmul.f32 %v5987_v8, %v335_v27  ;;  %v6587_v31 = vadd.f32 %v399_v25, %v393_v28  ;;  %vm349_vm9 = vmor %vm347_vm8, %vm348_vm7 }
 0x19c   :  { %v370_v32 = vsel %vm369_vm3, %v5985_v4, %v366_v29  ;;  %v343_v33 = vmul.f32 %v5989_v26, %v342_v2  ;;  %v5720_v29 = vld [vmem:[%s6676_s13 + $0x8] sm:$0xff] }
 0x19d   :  { %v340_v34 = vsel %vm339_vm6, %v5987_v8, %v336_v30  ;;  %v427_v35 = vsel %vm237_vm4, %v6587_v31, 0.0  ;;  %v376_v36 = vmul.f32 %v370_v32, %v6536_v10  ;;  %603 = vmatpush.bf16.msra.mxu2 %v5720_v29  ;;  %5765 = vmatpush.bf16.msra.mxu3 %v5720_v29  ;;  %v5719_v32 = vld [vmem:[%s6676_s13] sm:$0xff] }
 0x19e   :  { %v344_v38 = vmul.f32 0.5, %v343_v33  ;;  %428 = vadd.xlane.f32.xlu2 %v427_v35  ;;  %v373_v39 = vmul.f32 %v340_v34, %v6532_v6 }
 0x19f   :  { %v385_v40 = vmul.f32 %v6559_v37, %v376_v36 }
 0x1a0   :  { %v345_v41 = vsub.f32 1.5, %v344_v38  ;;  %v382_v43 = vmul.f32 %v6559_v37, %v373_v39 }
 0x1a1   :  { %v394_v44 = vadd.f32 %v6565_v45, %v385_v40  ;;  %604 = vmatpush.bf16.msra.mxu2 %v5719_v32  ;;  %5766 = vmatpush.bf16.msra.mxu3 %v5719_v32 }
 0x1a2   :  { %v346_v47 = vmul.f32 %v5989_v26, %v345_v41  ;;  %v391_v48 = vadd.f32 %v6565_v45, %v382_v43 }
 0x1a3   :  { %v6599_v10 = vadd.f32 %v400_v42, %v394_v44 }
 0x1a4   :  { %v350_v49 = vsel %vm349_vm9, %v5989_v26, %v346_v47  ;;  %v6601_v6 = vadd.f32 %v397_v46, %v391_v48 }
 0x1a5   :  { %v430_v50 = vsel %vm237_vm4, %v6599_v10, 0.0  ;;  %v374_v51 = vmul.f32 %v350_v49, %v6543_v15 }
 0x1a6   :  { %431 = vadd.xlane.f32.xlu1 %v430_v50  ;;  %v421_v52 = vsel %vm237_vm4, %v6601_v6, 0.0 }
 0x1a7   :  { %422 = vadd.xlane.f32.xlu2 %v421_v52  ;;  %v383_v54 = vmul.f32 %v6559_v37, %v374_v51 }
 0x1a9   :  { %v392_v57 = vadd.f32 %v6565_v45, %v383_v54 }
 0x1ab   :  { %v6611_v58 = vadd.f32 %v398_v55, %v392_v57 }
 0x1ad   :  { %v424_v59 = vsel %vm237_vm4, %v6611_v58, 0.0 }
 0x1ae   :  { %425 = vadd.xlane.f32.xlu0 %v424_v59 }
 0x203   :  { %v417_v60 = vpop.xlane.xlu2 %416 }
 0x204   :  { %v433_v62 = vmul.f32 %v417_v60, %v6502_v53 }
 0x206   :  { %v6617_v15 = vsub.f32 %v6570_v56, %v433_v62 }
 0x208   :  { %v445_v63 = vmul.f32 %v6617_v15, %v6617_v15 }
 0x20a   :  { %v451_v37 = vsel %vm237_vm4, %v445_v63, 0.0 }
 0x20b   :  { %452 = vadd.xlane.f32.xlu1 %v451_v37  ;;  %v420_v0 = vpop.xlane.xlu1 %419 }
 0x20c   :  { %v434_v45 = vmul.f32 %v420_v0, %v6502_v53 }
 0x20e   :  { %v6624_v1 = vsub.f32 %v6580_v20, %v434_v45 }
 0x210   :  { %v446_v4 = vmul.f32 %v6624_v1, %v6624_v1 }
 0x211   :  { %v429_v3 = vpop.xlane.xlu2 %428 }
 0x212   :  { %v437_v5 = vmul.f32 %v429_v3, %v6502_v53  ;;  %v454_v7 = vsel %vm237_vm4, %v446_v4, 0.0  ;;  %v6687_v3 = vld [vmem:[%s6631_s29] ss:$0 sm:$0xff] }
 0x213   :  { %455 = vadd.xlane.f32.xlu2 %v454_v7 }
 0x214   :  { %v6641_v8 = vsub.f32 %v6587_v31, %v437_v5 }
 0x216   :  { %v449_v9 = vmul.f32 %v6641_v8, %v6641_v8 }
 0x218   :  { %v463_v11 = vsel %vm237_vm4, %v449_v9, 0.0 }
 0x219   :  { %v432_v12 = vpop.xlane.xlu1 %431  ;;  %464 = vadd.xlane.f32.xlu0 %v463_v11 }
 0x21a   :  { %v438_v13 = vmul.f32 %v432_v12, %v6502_v53  ;;  %v423_v14 = vpop.xlane.xlu2 %422 }
 0x21b   :  { %v435_v16 = vmul.f32 %v423_v14, %v6502_v53 }
 0x21c   :  { %v6649_v61 = vsub.f32 %v6599_v10, %v438_v13 }
 0x21d   :  { %v6652_v17 = vsub.f32 %v6601_v6, %v435_v16  ;;  %v5949_v16 = vld [vmem:[%s6638_s3] ss:$0 sm:$0xff] }
 0x21e   :  { %v450_v18 = vmul.f32 %v6649_v61, %v6649_v61 }
 0x21f   :  { %v447_v19 = vmul.f32 %v6652_v17, %v6652_v17 }
 0x220   :  { %v466_v21 = vsel %vm237_vm4, %v450_v18, 0.0 }
 0x221   :  { %467 = vadd.xlane.f32.xlu1 %v466_v21  ;;  %v457_v22 = vsel %vm237_vm4, %v447_v19, 0.0  ;;  %v426_v23 = vpop.xlane.xlu0 %425 }
 0x222   :  { %458 = vadd.xlane.f32.xlu2 %v457_v22  ;;  %v436_v24 = vmul.f32 %v426_v23, %v6502_v53 }
 0x224   :  { %v6662_v25 = vsub.f32 %v6611_v58, %v436_v24 }
 0x226   :  { %v448_v26 = vmul.f32 %v6662_v25, %v6662_v25 }
 0x228   :  { %v460_v27 = vsel %vm237_vm4, %v448_v26, 0.0 }
 0x229   :  { %461 = vadd.xlane.f32.xlu0 %v460_v27 }
 0x27e   :  { %v453_v28 = vpop.xlane.xlu1 %452 }
 0x27f   :  { %v469_v2 = vmul.f32 %v453_v28, %v6502_v53 }
 0x281   :  { %v475_v30 = vadd.f32 1e-05, %v469_v2 }
 0x283   :  { %5990 = vrsqrt.f32 %v475_v30  ;;  %vm487_vm11 = vweird.f32 %v475_v30 }
 0x286   :  { %v456_v33 = vpop.xlane.xlu2 %455 }
 0x287   :  { %v470_v34 = vmul.f32 %v456_v33, %v6502_v53 }
 0x289   :  { %v5991_v35 = vpop.eup %5990  ;;  %v476_v38 = vadd.f32 1e-05, %v470_v34 }
 0x28a   :  { %v482_v36 = vmul.f32 %v5991_v35, %v475_v30  ;;  %vm488_vm10 = vweird.f32 %v5991_v35 }
 0x28b   :  { %5992 = vrsqrt.f32 %v476_v38  ;;  %vm489_vm12 = vmor %vm487_vm11, %vm488_vm10  ;;  %vm497_vm14 = vweird.f32 %v476_v38 }
 0x28c   :  { %v483_v39 = vmul.f32 %v5991_v35, %v482_v36  ;;  %v465_v40 = vpop.xlane.xlu0 %464 }
 0x28d   :  { %v473_v41 = vmul.f32 %v465_v40, %v6502_v53 }
 0x28e   :  { %v484_v42 = vmul.f32 0.5, %v483_v39 }
 0x28f   :  { %v479_v43 = vadd.f32 1e-05, %v473_v41 }
 0x290   :  { %v485_v44 = vsub.f32 1.5, %v484_v42 }
 0x291   :  { %5994 = vrsqrt.f32 %v479_v43  ;;  %v5993_v46 = vpop.eup %5992  ;;  %vm527_vm1 = vweird.f32 %v479_v43 }
 0x292   :  { %v486_v47 = vmul.f32 %v5991_v35, %v485_v44  ;;  %v492_v48 = vmul.f32 %v5993_v46, %v476_v38  ;;  %vm498_vm13 = vweird.f32 %v5993_v46 }
 0x293   :  { %vm499_vm15 = vmor %vm497_vm14, %vm498_vm13  ;;  %vm684_vm14 = vcmask 64512  }
 0x294   :  { %v468_v49 = vpop.xlane.xlu1 %467  ;;  %v493_v50 = vmul.f32 %v5993_v46, %v492_v48  ;;  %v490_v57 = vsel %vm489_vm12, %v5991_v35, %v486_v47 }
 0x295   :  { %v474_v51 = vmul.f32 %v468_v49, %v6502_v53  ;;  %v459_v52 = vpop.xlane.xlu2 %458  ;;  %v541_v45 = vmul.f32 %v490_v57, %v6617_v15 }
 0x296   :  { %v471_v54 = vmul.f32 %v459_v52, %v6502_v53  ;;  %v494_v59 = vmul.f32 0.5, %v493_v50 }
 0x297   :  { %v5995_v55 = vpop.eup %5994  ;;  %v480_v60 = vadd.f32 1e-05, %v474_v51  ;;  %v550_v14 = vmul.f32 %v6687_v3, %v541_v45 }
 0x298   :  { %v522_v62 = vmul.f32 %v5995_v55, %v479_v43  ;;  %v477_v63 = vadd.f32 1e-05, %v471_v54  ;;  %v495_v37 = vsub.f32 1.5, %v494_v59  ;;  %vm528_vm0 = vweird.f32 %v5995_v55 }
 0x299   :  { %5996 = vrsqrt.f32 %v480_v60  ;;  %v559_v27 = vadd.f32 %v5949_v16, %v550_v14  ;;  %vm529_vm3 = vmor %vm527_vm1, %vm528_vm0  ;;  %vm537_vm6 = vweird.f32 %v480_v60  ;;  %vm1541_vm0 = vcmask 130048  }
 0x29a   :  { %v523_v0 = vmul.f32 %v5995_v55, %v522_v62  ;;  %5998 = vrsqrt.f32 %v477_v63  ;;  %v496_v4 = vmul.f32 %v5993_v46, %v495_v37  ;;  %vm507_vm9 = vweird.f32 %v477_v63  ;;  %v5950_v37 = vld [vmem:[%s6670_s8] ss:$0 sm:$0xff] }
 0x29b   :  { %vm1548_vm1 = vcmask 195584  }
 0x29c   :  { %v524_v5 = vmul.f32 0.5, %v523_v0  ;;  %v462_v7 = vpop.xlane.xlu0 %461  ;;  %v500_v9 = vsel %vm499_vm15, %v5993_v46, %v496_v4  ;;  %vm946_vm15 = vcmask 392192  }
 0x29d   :  { %v472_v11 = vmul.f32 %v462_v7, %v6502_v53  ;;  %v542_v13 = vmul.f32 %v500_v9, %v6624_v1 }
 0x29e   :  { %v525_v12 = vsub.f32 1.5, %v524_v5 }
 0x29f   :  { %v5997_v18 = vpop.eup %5996  ;;  %v478_v19 = vadd.f32 1e-05, %v472_v11  ;;  %v551_v23 = vmul.f32 %v6687_v3, %v542_v13 }
 0x2a0   :  { %v5999_v21 = vpop.eup %5998  ;;  %v526_v15 = vmul.f32 %v5995_v55, %v525_v12  ;;  %v532_v22 = vmul.f32 %v5997_v18, %v480_v60  ;;  %vm538_vm5 = vweird.f32 %v5997_v18 }
 0x2a1   :  { %v502_v24 = vmul.f32 %v5999_v21, %v477_v63  ;;  %6000 = vrsqrt.f32 %v478_v19  ;;  %v560_v28 = vadd.f32 %v5949_v16, %v551_v23  ;;  %vm508_vm7 = vweird.f32 %v5999_v21  ;;  %vm539_vm8 = vmor %vm537_vm6, %vm538_vm5 }
 0x2a2   :  { %v533_v26 = vmul.f32 %v5997_v18, %v532_v22  ;;  %v530_v1 = vsel %vm529_vm3, %v5995_v55, %v526_v15  ;;  %vm509_vm10 = vmor %vm507_vm9, %vm508_vm7  ;;  %vm517_vm12 = vweird.f32 %v478_v19 }
 0x2a3   :  { %v503_v29 = vmul.f32 %v5999_v21, %v502_v24  ;;  %v565_v30 = vpack.c.bf16 %v560_v28, %v559_v27  ;;  %v545_v36 = vmul.f32 %v530_v1, %v6641_v8 }
 0x2a4   :  { %v534_v2 = vmul.f32 0.5, %v533_v26 }
 0x2a5   :  { %v504_v32 = vmul.f32 0.5, %v503_v29  ;;  %5369 = vmatmul.msk.bf16.vlgmr.msra.gmra.mxu2 %vm237_vm4, %v565_v30  ;;  %v554_v44 = vmul.f32 %v6687_v3, %v545_v36 }
 0x2a6   :  { %v535_v33 = vsub.f32 1.5, %v534_v2 }
 0x2a7   :  { %v6001_v34 = vpop.eup %6000  ;;  %v505_v35 = vsub.f32 1.5, %v504_v32  ;;  %v563_v8 = vadd.f32 %v5949_v16, %v554_v44 }
 0x2a8   :  { %v536_v38 = vmul.f32 %v5997_v18, %v535_v33  ;;  %v512_v39 = vmul.f32 %v6001_v34, %v478_v19  ;;  %vm518_vm11 = vweird.f32 %v6001_v34 }
 0x2a9   :  { %v506_v40 = vmul.f32 %v5999_v21, %v505_v35  ;;  %vm519_vm13 = vmor %vm517_vm12, %vm518_vm11 }
 0x2aa   :  { %v540_v41 = vsel %vm539_vm8, %v5997_v18, %v536_v38  ;;  %v513_v42 = vmul.f32 %v6001_v34, %v512_v39 }
 0x2ab   :  { %v546_v43 = vmul.f32 %v540_v41, %v6649_v61  ;;  %v510_v46 = vsel %vm509_vm10, %v5999_v21, %v506_v40 }
 0x2ac   :  { %v514_v47 = vmul.f32 0.5, %v513_v42  ;;  %v543_v51 = vmul.f32 %v510_v46, %v6652_v17 }
 0x2ad   :  { %v555_v48 = vmul.f32 %v6687_v3, %v546_v43 }
 0x2ae   :  { %v515_v49 = vsub.f32 1.5, %v514_v47  ;;  %v552_v57 = vmul.f32 %v6687_v3, %v543_v51 }
 0x2af   :  { %v564_v50 = vadd.f32 %v5949_v16, %v555_v48 }
 0x2b0   :  { %v516_v52 = vmul.f32 %v6001_v34, %v515_v49  ;;  %v561_v60 = vadd.f32 %v5949_v16, %v552_v57 }
 0x2b1   :  { %v567_v54 = vpack.c.bf16 %v564_v50, %v563_v8 }
 0x2b2   :  { %v520_v55 = vsel %vm519_vm13, %v6001_v34, %v516_v52 }
 0x2b3   :  { %5371 = vmatmul.msk.bf16.vlgmr.msra.gmra.mxu3 %vm237_vm4, %v567_v54  ;;  %v544_v61 = vmul.f32 %v520_v55, %v6662_v25 }
 0x2b5   :  { %v553_v59 = vmul.f32 %v6687_v3, %v544_v61 }
 0x2b7   :  { %v562_v62 = vadd.f32 %v5949_v16, %v553_v59 }
 0x2b9   :  { %v566_v63 = vpack.c.bf16 %v562_v62, %v561_v60 }
 0x2bb   :  { %5370 = vmatmul.msk.bf16.gmra.mxu2 %vm237_vm4, %v566_v63 }
 0x328   :  { %v606_v17 = vpop.f32.mrf.mxu2 }
 0x329   :  { %v607_v0 = vadd.f32 %v5950_v37, %v606_v17 }
 0x32b   :  { %v621_v45 = vpack.c.bf16 %v607_v0, %v607_v0 }
 0x32d   :  { %657 = vrot.lane.b32.xlu1 %v621_v45, %s6424_s6  ;;  %v669_v9 = vunpack.c.l.b16 %v621_v45 }
 0x330   :  { %v608_v4 = vpop.f32.mrf.mxu2 }
 0x331   :  { %v609_v5 = vadd.f32 %v5950_v37, %v608_v4 }
 0x333   :  { %v622_v7 = vpack.c.bf16 %v609_v5, %v609_v5 }
 0x335   :  { %v670_v11 = vunpack.c.l.b16 %v622_v7 }
 0x336   :  { %v616_v25 = vpop.f32.mrf.mxu3 }
 0x337   :  { %v617_v12 = vadd.f32 %v5950_v37, %v616_v25  ;;  %v6707_v3 = vpack.c.b16 %v670_v11, %v669_v9 }
 0x339   :  { %v625_v13 = vpack.c.bf16 %v617_v12, %v617_v12 }
 0x33b   :  { %653 = vrot.lane.b32.xlu0 %v625_v13, %s6425_s14  ;;  %641 = vrot.lane.b32.xlu2 %v625_v13, %s6426_s15  ;;  %v673_v22 = vunpack.c.l.b16 %v625_v13 }
 0x33c   :  { %665 = vrot.lane.b32.xlu1 %v625_v13, %s6424_s6 }
 0x33e   :  { %v611_v14 = vpop.f32.mrf.mxu2  ;;  %v618_v16 = vpop.f32.mrf.mxu3 }
 0x33f   :  { %v612_v18 = vadd.f32 %v5950_v37, %v611_v14  ;;  %v619_v19 = vadd.f32 %v5950_v37, %v618_v16 }
 0x341   :  { %v623_v21 = vpack.c.bf16 %v612_v18, %v612_v18  ;;  %v626_v15 = vpack.c.bf16 %v619_v19, %v619_v19 }
 0x343   :  { %667 = vrot.lane.b32.xlu2 %v626_v15, %s6424_s6  ;;  %661 = vrot.lane.b32.xlu0 %v623_v21, %s6424_s6  ;;  %v674_v23 = vunpack.c.l.b16 %v626_v15  ;;  %v671_v29 = vunpack.c.l.b16 %v623_v21 }
 0x344   :  { %643 = vrot.lane.b32.xlu1 %v626_v15, %s6426_s15 }
 0x345   :  { %v6715_v24 = vpack.c.b16 %v674_v23, %v673_v22 }
 0x346   :  { %v613_v26 = vpop.f32.mrf.mxu2 }
 0x347   :  { %v614_v27 = vadd.f32 %v5950_v37, %v613_v26 }
 0x349   :  { %v624_v28 = vpack.c.bf16 %v614_v27, %v614_v27 }
 0x34b   :  { %655 = vrot.lane.b32.xlu2 %v626_v15, %s6425_s14  ;;  %663 = vrot.lane.b32.xlu0 %v624_v28, %s6424_s6  ;;  %v672_v1 = vunpack.c.l.b16 %v624_v28 }
 0x34c   :  { %639 = vrot.lane.b32.xlu1 %v624_v28, %s6426_s15 }
 0x34d   :  { %v6720_v2 = vpack.c.b16 %v672_v1, %v671_v29 }
 0x353   :  { %637 = vrot.lane.b32.xlu2 %v623_v21, %s6426_s15  ;;  %659 = vrot.lane.b32.xlu0 %v622_v7, %s6424_s6 }
 0x354   :  { %633 = vrot.lane.b32.xlu1 %v621_v45, %s6426_s15 }
 0x35b   :  { %651 = vrot.lane.b32.xlu2 %v624_v28, %s6425_s14  ;;  %649 = vrot.lane.b32.xlu0 %v623_v21, %s6425_s14 }
 0x35c   :  { %647 = vrot.lane.b32.xlu1 %v622_v7, %s6425_s14 }
 0x363   :  { %645 = vrot.lane.b32.xlu2 %v621_v45, %s6425_s14  ;;  %635 = vrot.lane.b32.xlu0 %v622_v7, %s6426_s15 }
 0x395   :  { %v642_v30 = vpop.permute.xlu2 %641 }
 0x396   :  { %v731_v44 = vunpack.c.l.b16 %v642_v30 }
 0x39d   :  { %v668_v32 = vpop.permute.xlu2 %667 }
 0x39e   :  { %v846_v38 = vunpack.c.l.b16 %v668_v32 }
 0x39f   :  { %v658_v33 = vpop.permute.xlu1 %657 }
 0x3a0   :  { %v841_v63 = vunpack.c.l.b16 %v658_v33 }
 0x3a5   :  { %v656_v35 = vpop.permute.xlu2 %655 }
 0x3a6   :  { %v789_v46 = vunpack.c.l.b16 %v656_v35 }
 0x3ad   :  { %v654_v34 = vpop.permute.xlu0 %653  ;;  %v638_v48 = vpop.permute.xlu2 %637 }
 0x3ae   :  { %v666_v36 = vpop.permute.xlu1 %665  ;;  %v788_v41 = vunpack.c.l.b16 %v654_v34  ;;  %v729_v55 = vunpack.c.l.b16 %v638_v48 }
 0x3af   :  { %v845_v39 = vunpack.c.l.b16 %v666_v36 }
 0x3b0   :  { %v6734_v49 = vpack.c.b16 %v789_v46, %v788_v41 }
 0x3b1   :  { %v6730_v40 = vpack.c.b16 %v846_v38, %v845_v39 }
 0x3b3   :  { %854 = vrot.lane.b32.xlu0 %v6730_v40, %s6427_s16 }
 0x3b5   :  { %v662_v42 = vpop.permute.xlu0 %661  ;;  %v652_v60 = vpop.permute.xlu2 %651 }
 0x3b6   :  { %v644_v43 = vpop.permute.xlu1 %643  ;;  %v843_v51 = vunpack.c.l.b16 %v662_v42  ;;  %v787_v5 = vunpack.c.l.b16 %v652_v60 }
 0x3b7   :  { %v732_v47 = vunpack.c.l.b16 %v644_v43 }
 0x3b9   :  { %v6736_v8 = vpack.c.b16 %v732_v47, %v731_v44 }
 0x3bb   :  { %740 = vrot.lane.b32.xlu1 %v6736_v8, %s6427_s16  ;;  %797 = vrot.lane.b32.xlu0 %v6734_v49, %s6427_s16 }
 0x3bd   :  { %v664_v50 = vpop.permute.xlu0 %663  ;;  %v646_v45 = vpop.permute.xlu2 %645 }
 0x3be   :  { %v640_v52 = vpop.permute.xlu1 %639  ;;  %v844_v54 = vunpack.c.l.b16 %v664_v50  ;;  %v784_v9 = vunpack.c.l.b16 %v646_v45 }
 0x3bf   :  { %v730_v61 = vunpack.c.l.b16 %v640_v52 }
 0x3c0   :  { %v6742_v57 = vpack.c.b16 %v844_v54, %v843_v51 }
 0x3c1   :  { %v6744_v59 = vpack.c.b16 %v730_v61, %v729_v55 }
 0x3c2   :  { %852 = vrot.lane.b32.xlu2 %v6742_v57, %s6427_s16 }
 0x3c3   :  { %738 = vrot.lane.b32.xlu1 %v6744_v59, %s6427_s16 }
 0x3c5   :  { %v660_v62 = vpop.permute.xlu0 %659 }
 0x3c6   :  { %v634_v37 = vpop.permute.xlu1 %633  ;;  %v842_v17 = vunpack.c.l.b16 %v660_v62 }
 0x3c7   :  { %v727_v16 = vunpack.c.l.b16 %v634_v37 }
 0x3c8   :  { %v847_v0 = vpack.c.b16 %v842_v17, %v841_v63 }
 0x3ca   :  { %850 = vrot.lane.b32.xlu2 %v847_v0, %s6427_s16 }
 0x3cd   :  { %v650_v4 = vpop.permute.xlu0 %649 }
 0x3ce   :  { %v648_v7 = vpop.permute.xlu1 %647  ;;  %v786_v25 = vunpack.c.l.b16 %v650_v4 }
 0x3cf   :  { %v785_v11 = vunpack.c.l.b16 %v648_v7 }
 0x3d0   :  { %v6751_v12 = vpack.c.b16 %v787_v5, %v786_v25 }
 0x3d1   :  { %v6753_v13 = vpack.c.b16 %v785_v11, %v784_v9  ;;  %v6838_v11 = vld [vmem:[%s6819_s21 + $0x10] sm:$0xff] }
 0x3d2   :  { %795 = vrot.lane.b32.xlu0 %v6751_v12, %s6427_s16 }
 0x3d3   :  { %793 = vrot.lane.b32.xlu1 %v6753_v13, %s6427_s16 }
 0x3d5   :  { %v636_v14 = vpop.permute.xlu0 %635 }
 0x3d6   :  { %v728_v18 = vunpack.c.l.b16 %v636_v14 }
 0x3d8   :  { %v733_v19 = vpack.c.b16 %v728_v18, %v727_v16 }
 0x3da   :  { %682 = vrot.lane.b32.xlu0 %v6715_v24, %s6427_s16  ;;  %736 = vrot.lane.b32.xlu2 %v733_v19, %s6427_s16 }
 0x3db   :  { %678 = vrot.lane.b32.xlu1 %v6707_v3, %s6427_s16 }
 0x3e2   :  { %1423 = vrot.lane.b32.xlu0 %v6742_v57, %s6428_s17  ;;  %680 = vrot.lane.b32.xlu2 %v6720_v2, %s6427_s16 }
 0x3e3   :  { %1311 = vrot.lane.b32.xlu1 %v6736_v8, %s6428_s17 }
 0x3ea   :  { %1309 = vrot.lane.b32.xlu0 %v6744_v59, %s6428_s17  ;;  %1425 = vrot.lane.b32.xlu2 %v6730_v40, %s6428_s17 }
 0x3eb   :  { %1421 = vrot.lane.b32.xlu1 %v847_v0, %s6428_s17 }
 0x3f2   :  { %1368 = vrot.lane.b32.xlu2 %v6734_v49, %s6428_s17 }
 0x3f3   :  { %1307 = vrot.lane.b32.xlu1 %v733_v19, %s6428_s17 }
 0x3fa   :  { %1364 = vrot.lane.b32.xlu2 %v6753_v13, %s6428_s17 }
 0x402   :  { %1366 = vrot.lane.b32.xlu2 %v6751_v12, %s6428_s17 }
 0x41c   :  { %v853_v21 = vpop.permute.xlu2 %852 }
 0x41d   :  { %v869_v1 = vsel %vm684_vm14, %v853_v21, 0  ;;  %v6846_v21 = vld [vmem:[%s6819_s21 + $0x18] sm:$0xff] }
 0x424   :  { %v851_v23 = vpop.permute.xlu2 %850 }
 0x425   :  { %v855_v15 = vpop.permute.xlu0 %854  ;;  %v866_v34 = vsel %vm684_vm14, %v851_v23, 0 }
 0x426   :  { %v872_v22 = vsel %vm684_vm14, %v855_v15, 0 }
 0x427   :  { %879 = vmatpush.bf16.xpose.msrb.mxu2 %v872_v22 }
 0x42d   :  { %v741_v26 = vpop.permute.xlu1 %740  ;;  %v798_v27 = vpop.permute.xlu0 %797 }
 0x42e   :  { %v758_v28 = vsel %vm684_vm14, %v741_v26, 0  ;;  %v815_v29 = vsel %vm684_vm14, %v798_v27, 0 }
 0x42f   :  { %765 = vmatpush.bf16.xpose.msrb.mxu0 %v758_v28  ;;  %822 = vmatpush.bf16.xpose.msrb.mxu1 %v815_v29 }
 0x430   :  { %880 = vmatpush.bf16.xpose.msrb.mxu2 %v869_v1 }
 0x434   :  { %v737_v30 = vpop.permute.xlu2 %736 }
 0x435   :  { %v739_v32 = vpop.permute.xlu1 %738  ;;  %v752_v36 = vsel %vm684_vm14, %v737_v30, 0  ;;  %v6857_v30 = vld [vmem:[%s6819_s21 + $0x20] sm:$0xff] }
 0x436   :  { %v755_v33 = vsel %vm684_vm14, %v739_v32, 0 }
 0x437   :  { %766 = vmatpush.bf16.xpose.msrb.mxu0 %v755_v33 }
 0x438   :  { %881 = vmatpush.bf16.xpose.msrb.mxu2 %v866_v34 }
 0x43c   :  { %v681_v35 = vpop.permute.xlu2 %680 }
 0x43d   :  { %v698_v54 = vsel %vm684_vm14, %v681_v35, 0 }
 0x43f   :  { %5381 = vmatmul.msk.bf16.vlgmr.msrb.gmra.mxu2 %vm684_vm14, %v847_v0  ;;  %767 = vmatpush.bf16.xpose.msrb.mxu0 %v752_v36  ;;  %v6830_v0 = vld [vmem:[%s6819_s21 + $0x8] sm:$0xff] }
 0x444   :  { %v1426_v38 = vpop.permute.xlu2 %1425  ;;  %v796_v39 = vpop.permute.xlu0 %795 }
 0x445   :  { %v794_v41 = vpop.permute.xlu1 %793  ;;  %1444 = vmatpush.bf16.msra.mxu2 %v1426_v38  ;;  %v812_v42 = vsel %vm684_vm14, %v796_v39, 0 }
 0x446   :  { %5375 = vmatmul.msk.bf16.vlgmr.msrb.gmra.mxu0 %vm684_vm14, %v733_v19  ;;  %823 = vmatpush.bf16.xpose.msrb.mxu1 %v812_v42  ;;  %v809_v48 = vsel %vm684_vm14, %v794_v41, 0 }
 0x44c   :  { %v1369_v43 = vpop.permute.xlu2 %1368  ;;  %v683_v44 = vpop.permute.xlu0 %682 }
 0x44d   :  { %v679_v46 = vpop.permute.xlu1 %678  ;;  %v701_v47 = vsel %vm684_vm14, %v683_v44, 0 }
 0x44e   :  { %708 = vmatpush.bf16.xpose.msrb.mxu3 %v701_v47  ;;  %824 = vmatpush.bf16.xpose.msrb.mxu1 %v809_v48 }
 0x44f   :  { %5382 = vmatmul.msk.bf16.gmra.mxu2 %vm684_vm14, %v6742_v57  ;;  %v695_v57 = vsel %vm684_vm14, %v679_v46, 0  ;;  %v6873_v46 = vld [vmem:[%s6819_s21 + $0x28] sm:$0xff] }
 0x454   :  { %v1365_v50 = vpop.permute.xlu2 %1364  ;;  %v1424_v51 = vpop.permute.xlu0 %1423 }
 0x455   :  { %v1312_v52 = vpop.permute.xlu1 %1311  ;;  %5378 = vmatmul.msk.bf16.vlgmr.msrb.gmra.mxu1 %vm684_vm14, %v6753_v13  ;;  %1445 = vmatpush.bf16.msra.mxu2 %v1424_v51 }
 0x456   :  { %1387 = vmatpush.bf16.msra.mxu1 %v1369_v43  ;;  %5376 = vmatmul.msk.bf16.gmra.mxu0 %vm684_vm14, %v6744_v59  ;;  %v6822_v59 = vld [vmem:[%s6819_s21] sm:$0xff] }
 0x457   :  { %709 = vmatpush.bf16.xpose.msrb.mxu3 %v698_v54  ;;  %1330 = vmatpush.bf16.msra.mxu0 %v1312_v52 }
 0x45c   :  { %v1367_v55 = vpop.permute.xlu2 %1366  ;;  %v1310_v61 = vpop.permute.xlu0 %1309 }
 0x45d   :  { %v1422_v60 = vpop.permute.xlu1 %1421  ;;  %1331 = vmatpush.bf16.msra.mxu0 %v1310_v61  ;;  %1388 = vmatpush.bf16.msra.mxu1 %v1367_v55 }
 0x45e   :  { %1446 = vmatpush.bf16.msra.mxu2 %v1422_v60 }
 0x45f   :  { %710 = vmatpush.bf16.xpose.msrb.mxu3 %v695_v57  ;;  %5383 = vmatmul.msk.bf16.gmra.mxu2 %vm684_vm14, %v6730_v40 }
 0x461   :  { %1389 = vmatpush.bf16.msra.mxu1 %v1365_v50 }
 0x465   :  { %v1308_v62 = vpop.permute.xlu1 %1307  ;;  %5379 = vmatmul.msk.bf16.gmra.mxu1 %vm684_vm14, %v6751_v12 }
 0x466   :  { %5372 = vmatmul.msk.bf16.vlgmr.msrb.gmra.mxu3 %vm684_vm14, %v6707_v3  ;;  %5377 = vmatmul.msk.bf16.gmra.mxu0 %vm684_vm14, %v6736_v8 }
 0x467   :  { %1332 = vmatpush.bf16.msra.mxu0 %v1308_v62 }
 0x475   :  { %5380 = vmatmul.msk.bf16.gmra.mxu1 %vm684_vm14, %v6734_v49 }
 0x476   :  { %5373 = vmatmul.msk.bf16.gmra.mxu3 %vm684_vm14, %v6720_v2 }
 0x486   :  { %5374 = vmatmul.msk.bf16.gmra.mxu3 %vm684_vm14, %v6715_v24 }
 0x4c2   :  { %v883_v14 = vpop.f32.mrf.mxu2 }
 0x4c3   :  { %v769_v9 = vpop.f32.mrf.mxu0  ;;  %v916_v61 = vmul.f32 0.35355338, %v883_v14 }
 0x4c4   :  { %v904_v23 = vmul.f32 0.35355338, %v769_v9 }
 0x4c6   :  { %v6854_v29 = vadd.f32 %v904_v23, %v6822_v59 }
 0x4c8   :  { %v965_v36 = vsel %vm946_vm15, %v6854_v29, -inf }
 0x4ca   :  { %v885_v1 = vpop.f32.mrf.mxu2 }
 0x4cb   :  { %v771_v22 = vpop.f32.mrf.mxu0  ;;  %v917_v48 = vmul.f32 0.35355338, %v885_v1 }
 0x4d2   :  { %v826_v5 = vpop.f32.mrf.mxu1  ;;  %v888_v50 = vpop.f32.mrf.mxu2 }
 0x4d3   :  { %v910_v34 = vmul.f32 0.35355338, %v826_v5  ;;  %v774_v39 = vpop.f32.mrf.mxu0  ;;  %v905_v5 = vmul.f32 0.35355338, %v771_v22 }
 0x4d4   :  { %v906_v51 = vmul.f32 0.35355338, %v774_v39 }
 0x4d5   :  { %v6870_v44 = vadd.f32 %v910_v34, %v6822_v59 }
 0x4d6   :  { %v6885_v62 = vadd.f32 %v906_v51, %v6838_v11 }
 0x4d7   :  { %v983_v54 = vsel %vm946_vm15, %v6870_v44, -inf }
 0x4da   :  { %v828_v19 = vpop.f32.mrf.mxu1 }
 0x4db   :  { %v911_v35 = vmul.f32 0.35355338, %v828_v19  ;;  %v776_v57 = vpop.f32.mrf.mxu0 }
 0x4dd   :  { %v6867_v43 = vadd.f32 %v911_v35, %v6830_v0 }
 0x4df   :  { %v986_v52 = vsel %vm946_vm15, %v6867_v43, -inf }
 0x4e2   :  { %v831_v33 = vpop.f32.mrf.mxu1 }
 0x4e3   :  { %v779_v14 = vpop.f32.mrf.mxu0 }
 0x4e4   :  { %v908_v19 = vmul.f32 0.35355338, %v779_v14 }
 0x4e9   :  { %v712_v40 = vpop.f32.mrf.mxu3 }
 0x4ea   :  { %v898_v8 = vmul.f32 0.35355338, %v712_v40  ;;  %v833_v60 = vpop.f32.mrf.mxu1  ;;  %v6888_v40 = vadd.f32 %v917_v48, %v6830_v0 }
 0x4ec   :  { %v6825_v63 = vadd.f32 %v898_v8, %v6822_v59  ;;  %v6891_v8 = vadd.f32 %v916_v61, %v6822_v59  ;;  %v918_v61 = vmul.f32 0.35355338, %v888_v50 }
 0x4ee   :  { %v947_v49 = vsel %vm946_vm15, %v6825_v63, -inf }
 0x4ef   :  { %948 = vmax.xlane.f32.xlu2 %v947_v49  ;;  %v912_v49 = vmul.f32 0.35355338, %v831_v33 }
 0x4f1   :  { %v714_v37 = vpop.f32.mrf.mxu3 }
 0x4f2   :  { %v899_v17 = vmul.f32 0.35355338, %v714_v37  ;;  %v913_v37 = vmul.f32 0.35355338, %v833_v60  ;;  %v836_v9 = vpop.f32.mrf.mxu1 }
 0x4f4   :  { %v6833_v45 = vadd.f32 %v899_v17, %v6830_v0  ;;  %v971_v17 = vsel %vm946_vm15, %v6885_v62, -inf  ;;  %v6900_v59 = vadd.f32 %v913_v37, %v6846_v21  ;;  %v6940_v37 = vadd.f32 %v918_v61, %v6838_v11 }
 0x4f6   :  { %v950_v4 = vsel %vm946_vm15, %v6833_v45, -inf  ;;  %v992_v22 = vsel %vm946_vm15, %v6900_v59, -inf }
 0x4f7   :  { %951 = vmax.xlane.f32.xlu1 %v950_v4  ;;  %v1004_v4 = vsel %vm946_vm15, %v6888_v40, -inf }
 0x4f9   :  { %v717_v7 = vpop.f32.mrf.mxu3 }
 0x4fa   :  { %v900_v25 = vmul.f32 0.35355338, %v717_v7  ;;  %v890_v7 = vpop.f32.mrf.mxu2  ;;  %v838_v1 = vpop.f32.mrf.mxu1 }
 0x4fb   :  { %v915_v33 = vmul.f32 0.35355338, %v838_v1 }
 0x4fc   :  { %v6841_v12 = vadd.f32 %v900_v25, %v6838_v11  ;;  %v1001_v25 = vsel %vm946_vm15, %v6891_v8, -inf }
 0x4fe   :  { %v953_v13 = vsel %vm946_vm15, %v6841_v12, -inf }
 0x4ff   :  { %954 = vmax.xlane.f32.xlu2 %v953_v13  ;;  %v6903_v13 = vadd.f32 %v912_v49, %v6838_v11 }
 0x501   :  { %v719_v16 = vpop.f32.mrf.mxu3  ;;  %v989_v23 = vsel %vm946_vm15, %v6903_v13, -inf }
 0x502   :  { %v901_v18 = vmul.f32 0.35355338, %v719_v16  ;;  %v6906_v16 = vadd.f32 %v905_v5, %v6830_v0  ;;  %v1007_v5 = vsel %vm946_vm15, %v6940_v37, -inf }
 0x504   :  { %v6849_v15 = vadd.f32 %v901_v18, %v6846_v21  ;;  %v919_v18 = vmul.f32 0.35355338, %v890_v7 }
 0x506   :  { %v956_v26 = vsel %vm946_vm15, %v6849_v15, -inf  ;;  %v6918_v0 = vadd.f32 %v919_v18, %v6846_v21  ;;  %v914_v18 = vmul.f32 0.35355338, %v836_v9 }
 0x507   :  { %957 = vmax.xlane.f32.xlu1 %v956_v26  ;;  %v968_v26 = vsel %vm946_vm15, %v6906_v16, -inf }
 0x508   :  { %v1010_v35 = vsel %vm946_vm15, %v6918_v0, -inf }
 0x509   :  { %v722_v27 = vpop.f32.mrf.mxu3 }
 0x50a   :  { %v902_v28 = vmul.f32 0.35355338, %v722_v27  ;;  %v893_v27 = vpop.f32.mrf.mxu2 }
 0x50c   :  { %v6860_v32 = vadd.f32 %v902_v28, %v6857_v30  ;;  %v6915_v28 = vadd.f32 %v908_v19, %v6857_v30 }
 0x50e   :  { %v959_v38 = vsel %vm946_vm15, %v6860_v32, -inf  ;;  %v977_v34 = vsel %vm946_vm15, %v6915_v28, -inf }
 0x50f   :  { %966 = vmax.xlane.f32.xlu1 %v965_v36  ;;  %960 = vmax.xlane.f32.xlu2 %v959_v38  ;;  %v6925_v36 = vadd.f32 %v915_v33, %v6873_v46 }
 0x511   :  { %v724_v41 = vpop.f32.mrf.mxu3 }
 0x512   :  { %v903_v42 = vmul.f32 0.35355338, %v724_v41  ;;  %v895_v38 = vpop.f32.mrf.mxu2  ;;  %v998_v41 = vsel %vm946_vm15, %v6925_v36, -inf }
 0x513   :  { %v921_v39 = vmul.f32 0.35355338, %v895_v38 }
 0x514   :  { %v6876_v47 = vadd.f32 %v903_v42, %v6873_v46 }
 0x515   :  { %v6930_v42 = vadd.f32 %v921_v39, %v6873_v46 }
 0x516   :  { %v962_v55 = vsel %vm946_vm15, %v6876_v47, -inf }
 0x517   :  { %987 = vmax.xlane.f32.xlu1 %v986_v52  ;;  %984 = vmax.xlane.f32.xlu2 %v983_v54  ;;  %v1016_v48 = vsel %vm946_vm15, %v6930_v42, -inf }
 0x518   :  { %963 = vmax.xlane.f32.xlu0 %v962_v55 }
 0x51f   :  { %972 = vmax.xlane.f32.xlu1 %v971_v17  ;;  %1005 = vmax.xlane.f32.xlu2 %v1004_v4  ;;  %v907_v4 = vmul.f32 0.35355338, %v776_v57 }
 0x520   :  { %1002 = vmax.xlane.f32.xlu0 %v1001_v25 }
 0x521   :  { %v6950_v50 = vadd.f32 %v907_v4, %v6846_v21  ;;  %v6961_v21 = vadd.f32 %v914_v18, %v6857_v30 }
 0x523   :  { %v974_v11 = vsel %vm946_vm15, %v6950_v50, -inf }
 0x527   :  { %993 = vmax.xlane.f32.xlu1 %v992_v22  ;;  %990 = vmax.xlane.f32.xlu2 %v989_v23 }
 0x528   :  { %969 = vmax.xlane.f32.xlu0 %v968_v26 }
 0x52f   :  { %978 = vmax.xlane.f32.xlu1 %v977_v34  ;;  %1011 = vmax.xlane.f32.xlu2 %v1010_v35  ;;  %v920_v34 = vmul.f32 0.35355338, %v893_v27  ;;  %v995_v35 = vsel %vm946_vm15, %v6961_v21, -inf }
 0x531   :  { %v6969_v39 = vadd.f32 %v920_v34, %v6857_v30 }
 0x533   :  { %v1013_v61 = vsel %vm946_vm15, %v6969_v39, -inf }
 0x537   :  { %999 = vmax.xlane.f32.xlu2 %v998_v41  ;;  %v781_v41 = vpop.f32.mrf.mxu0 }
 0x53f   :  { %1017 = vmax.xlane.f32.xlu2 %v1016_v48 }
 0x562   :  { %v949_v51 = vpop.xlane.xlu2 %948 }
 0x563   :  { %v1019_v52 = vsub.f32 %v6825_v63, %v949_v51 }
 0x565   :  { %v1043_v54 = vmul.f32 1.442695, %v1019_v52 }
 0x567   :  { %6002 = vpow2.f32 %v1043_v54  ;;  %v909_v54 = vmul.f32 0.35355338, %v781_v41 }
 0x56a   :  { %v952_v49 = vpop.xlane.xlu1 %951 }
 0x56b   :  { %v1020_v17 = vsub.f32 %v6833_v45, %v952_v49 }
 0x56d   :  { %v6935_v55 = vpop.eup %6002  ;;  %v1045_v63 = vmul.f32 1.442695, %v1020_v17 }
 0x56e   :  { %v1091_v60 = vsel %vm946_vm15, %v6935_v55, 0.0 }
 0x56f   :  { %1092 = vadd.xlane.f32.xlu0 %v1091_v60  ;;  %6004 = vpow2.f32 %v1045_v63 }
 0x572   :  { %v6945_v7 = vpop.xlane.xlu2 %954 }
 0x575   :  { %v6956_v57 = vpop.eup %6004 }
 0x576   :  { %v1094_v19 = vsel %vm946_vm15, %v6956_v57, 0.0 }
 0x577   :  { %1008 = vmax.xlane.f32.xlu0 %v1007_v5 }
 0x57a   :  { %v6947_v25 = vpop.xlane.xlu1 %957 }
 0x57f   :  { %975 = vmax.xlane.f32.xlu0 %v974_v11 }
 0x582   :  { %v967_v14 = vpop.xlane.xlu1 %966  ;;  %v6954_v45 = vpop.xlane.xlu2 %960 }
 0x587   :  { %1095 = vadd.xlane.f32.xlu0 %v1094_v19 }
 0x58a   :  { %v988_v22 = vpop.xlane.xlu1 %987  ;;  %v985_v23 = vpop.xlane.xlu2 %984 }
 0x58b   :  { %v1031_v26 = vsub.f32 %v6870_v44, %v985_v23  ;;  %v6964_v1 = vpop.xlane.xlu0 %963  ;;  %v1025_v44 = vsub.f32 %v6854_v29, %v967_v14  ;;  %v1032_v63 = vsub.f32 %v6867_v43, %v988_v22 }
 0x58d   :  { %v1067_v33 = vmul.f32 1.442695, %v1031_v26  ;;  %v1055_v30 = vmul.f32 1.442695, %v1025_v44  ;;  %v1069_v23 = vmul.f32 1.442695, %v1032_v63 }
 0x58f   :  { %996 = vmax.xlane.f32.xlu0 %v995_v35  ;;  %6006 = vpow2.f32 %v1067_v33 }
 0x592   :  { %v973_v9 = vpop.xlane.xlu1 %972  ;;  %v1006_v38 = vpop.xlane.xlu2 %1005 }
 0x593   :  { %v1003_v48 = vpop.xlane.xlu0 %1002  ;;  %v1038_v26 = vsub.f32 %v6888_v40, %v1006_v38  ;;  %v1027_v40 = vsub.f32 %v6885_v62, %v973_v9 }
 0x594   :  { %v1037_v51 = vsub.f32 %v6891_v8, %v1003_v48  ;;  %v6980_v8 = vadd.f32 %v909_v54, %v6873_v46 }
 0x595   :  { %v6973_v52 = vpop.eup %6006 }
 0x596   :  { %v1079_v27 = vmul.f32 1.442695, %v1037_v51  ;;  %v1127_v60 = vsel %vm946_vm15, %v6973_v52, 0.0  ;;  %v980_v18 = vsel %vm946_vm15, %v6980_v8, -inf }
 0x597   :  { %1014 = vmax.xlane.f32.xlu0 %v1013_v61  ;;  %1128 = vadd.xlane.f32.xlu1 %v1127_v60 }
 0x598   :  { %6008 = vpow2.f32 %v1079_v27  ;;  %v1059_v27 = vmul.f32 1.442695, %v1027_v40 }
 0x599   :  { %6010 = vpow2.f32 %v1055_v30 }
 0x59a   :  { %v994_v49 = vpop.xlane.xlu1 %993  ;;  %v991_v17 = vpop.xlane.xlu2 %990 }
 0x59b   :  { %v1034_v29 = vsub.f32 %v6900_v59, %v994_v49  ;;  %v970_v4 = vpop.xlane.xlu0 %969  ;;  %v1033_v60 = vsub.f32 %v6903_v13, %v991_v17 }
 0x59c   :  { %v1026_v5 = vsub.f32 %v6906_v16, %v970_v4 }
 0x59d   :  { %v1073_v11 = vmul.f32 1.442695, %v1034_v29  ;;  %v1071_v9 = vmul.f32 1.442695, %v1033_v60 }
 0x59e   :  { %v1057_v14 = vmul.f32 1.442695, %v1026_v5  ;;  %v6987_v19 = vpop.eup %6008 }
 0x59f   :  { %6012 = vpow2.f32 %v1073_v11  ;;  %981 = vmax.xlane.f32.xlu0 %v980_v18  ;;  %v1145_v46 = vsel %vm946_vm15, %v6987_v19, 0.0  ;;  %v6991_v16 = vpop.eup %6010 }
 0x5a0   :  { %6014 = vpow2.f32 %v1057_v14  ;;  %1146 = vadd.xlane.f32.xlu1 %v1145_v46  ;;  %v1109_v34 = vsel %vm946_vm15, %v6991_v16, 0.0 }
 0x5a1   :  { %6016 = vpow2.f32 %v1069_v23 }
 0x5a2   :  { %v1012_v59 = vpop.xlane.xlu2 %1011  ;;  %v979_v11 = vpop.xlane.xlu1 %978 }
 0x5a3   :  { %v1040_v43 = vsub.f32 %v6918_v0, %v1012_v59  ;;  %v1081_v0 = vmul.f32 1.442695, %v1038_v26  ;;  %v1029_v23 = vsub.f32 %v6915_v28, %v979_v11 }
 0x5a5   :  { %v6994_v22 = vpop.eup %6012  ;;  %v1085_v33 = vmul.f32 1.442695, %v1040_v43  ;;  %v1063_v26 = vmul.f32 1.442695, %v1029_v23 }
 0x5a6   :  { %v1136_v35 = vsel %vm946_vm15, %v6994_v22, 0.0  ;;  %v7001_v41 = vpop.eup %6014 }
 0x5a7   :  { %1110 = vadd.xlane.f32.xlu0 %v1109_v34  ;;  %6018 = vpow2.f32 %v1085_v33  ;;  %v1112_v48 = vsel %vm946_vm15, %v7001_v41, 0.0  ;;  %v7005_v51 = vpop.eup %6016 }
 0x5a8   :  { %1137 = vadd.xlane.f32.xlu1 %v1136_v35  ;;  %1113 = vadd.xlane.f32.xlu2 %v1112_v48  ;;  %6020 = vpow2.f32 %v1081_v0  ;;  %v1130_v44 = vsel %vm946_vm15, %v7005_v51, 0.0 }
 0x5a9   :  { %6022 = vpow2.f32 %v1059_v27 }
 0x5aa   :  { %6024 = vpow2.f32 %v1071_v9  ;;  %v1000_v40 = vpop.xlane.xlu2 %999 }
 0x5ab   :  { %v1036_v60 = vsub.f32 %v6925_v36, %v1000_v40 }
 0x5ad   :  { %v7008_v38 = vpop.eup %6018 }
 0x5ae   :  { %v1154_v54 = vsel %vm946_vm15, %v7008_v38, 0.0  ;;  %v7014_v61 = vpop.eup %6020 }
 0x5af   :  { %1131 = vadd.xlane.f32.xlu0 %v1130_v44  ;;  %v1148_v62 = vsel %vm946_vm15, %v7014_v61, 0.0  ;;  %v7019_v30 = vpop.eup %6022 }
 0x5b0   :  { %1155 = vadd.xlane.f32.xlu1 %v1154_v54  ;;  %v1115_v49 = vsel %vm946_vm15, %v7019_v30, 0.0  ;;  %v7023_v29 = vpop.eup %6024 }
 0x5b1   :  { %v1133_v4 = vsel %vm946_vm15, %v7023_v29, 0.0 }
 0x5b7   :  { %1149 = vadd.xlane.f32.xlu0 %v1148_v62 }
 0x5bf   :  { %1116 = vadd.xlane.f32.xlu0 %v1115_v49  ;;  %v1018_v49 = vpop.xlane.xlu2 %1017 }
 0x5c7   :  { %1134 = vadd.xlane.f32.xlu0 %v1133_v4 }
 0x5e2   :  { %v7027_v5 = vpop.xlane.xlu0 %1092 }
 0x5ea   :  { %v1009_v13 = vpop.xlane.xlu0 %1008 }
 0x5eb   :  { %v1039_v17 = vsub.f32 %v6940_v37, %v1009_v13 }
 0x5ed   :  { %v1083_v63 = vmul.f32 1.442695, %v1039_v17  ;;  %v1042_v17 = vsub.f32 %v6930_v42, %v1018_v49 }
 0x5ef   :  { %6026 = vpow2.f32 %v1083_v63  ;;  %v1089_v11 = vmul.f32 1.442695, %v1042_v17 }
 0x5f2   :  { %v976_v14 = vpop.xlane.xlu0 %975 }
 0x5f3   :  { %v1028_v18 = vsub.f32 %v6950_v50, %v976_v14 }
 0x5f5   :  { %v7031_v46 = vpop.eup %6026  ;;  %v1061_v59 = vmul.f32 1.442695, %v1028_v18 }
 0x5f6   :  { %v1151_v43 = vsel %vm946_vm15, %v7031_v46, 0.0 }
 0x5f7   :  { %6028 = vpow2.f32 %v1061_v59  ;;  %1152 = vadd.xlane.f32.xlu0 %v1151_v43 }
 0x5f8   :  { %6030 = vpow2.f32 %v1063_v26 }
 0x5fa   :  { %v7036_v33 = vpop.xlane.xlu0 %1095 }
 0x5fd   :  { %v7038_v37 = vpop.eup %6028 }
 0x5fe   :  { %v1118_v34 = vsel %vm946_vm15, %v7038_v37, 0.0  ;;  %v7042_v35 = vpop.eup %6030 }
 0x5ff   :  { %1119 = vadd.xlane.f32.xlu0 %v1118_v34  ;;  %v1121_v0 = vsel %vm946_vm15, %v7042_v35, 0.0 }
 0x602   :  { %v997_v50 = vpop.xlane.xlu0 %996 }
 0x603   :  { %v1035_v28 = vsub.f32 %v6961_v21, %v997_v50  ;;  %v1077_v21 = vmul.f32 1.442695, %v1036_v60 }
 0x605   :  { %v1075_v48 = vmul.f32 1.442695, %v1035_v28 }
 0x607   :  { %6032 = vpow2.f32 %v1075_v48  ;;  %1122 = vadd.xlane.f32.xlu0 %v1121_v0 }
 0x60a   :  { %v1015_v44 = vpop.xlane.xlu0 %1014  ;;  %v1129_v14 = vpop.xlane.xlu1 %1128 }
 0x60b   :  { %v1041_v54 = vsub.f32 %v6969_v39, %v1015_v44 }
 0x60d   :  { %v7048_v27 = vpop.eup %6032  ;;  %v1087_v62 = vmul.f32 1.442695, %v1041_v54 }
 0x60e   :  { %v1139_v9 = vsel %vm946_vm15, %v7048_v27, 0.0 }
 0x60f   :  { %6034 = vpow2.f32 %v1087_v62  ;;  %1140 = vadd.xlane.f32.xlu1 %v1139_v9 }
 0x610   :  { %6036 = vpow2.f32 %v1077_v21 }
 0x612   :  { %v982_v4 = vpop.xlane.xlu0 %981 }
 0x613   :  { %v1030_v13 = vsub.f32 %v6980_v8, %v982_v4  ;;  %v1147_v50 = vpop.xlane.xlu1 %1146 }
 0x615   :  { %v7055_v63 = vpop.eup %6034  ;;  %v1065_v39 = vmul.f32 1.442695, %v1030_v13 }
 0x616   :  { %v1157_v36 = vsel %vm946_vm15, %v7055_v63, 0.0  ;;  %v7059_v23 = vpop.eup %6036 }
 0x617   :  { %6038 = vpow2.f32 %v1065_v39  ;;  %1158 = vadd.xlane.f32.xlu2 %v1157_v36  ;;  %v1142_v42 = vsel %vm946_vm15, %v7059_v23, 0.0 }
 0x61a   :  { %v1111_v18 = vpop.xlane.xlu0 %1110 }
 0x61b   :  { %6040 = vrcp.f32 %v1111_v18  ;;  %v1114_v59 = vpop.xlane.xlu2 %1113 }
 0x61c   :  { %6042 = vpow2.f32 %v1089_v11 }
 0x61d   :  { %v7061_v8 = vpop.eup %6038  ;;  %6044 = vrcp.f32 %v1129_v14 }
 0x61e   :  { %6046 = vrcp.f32 %v1114_v59  ;;  %v1124_v43 = vsel %vm946_vm15, %v7061_v8, 0.0 }
 0x61f   :  { %1143 = vadd.xlane.f32.xlu2 %v1142_v42  ;;  %1125 = vadd.xlane.f32.xlu0 %v1124_v43 }
 0x621   :  { %v6041_v26 = vpop.eup %6040 }
 0x622   :  { %v7067_v34 = vpop.eup %6042  ;;  %v1193_v28 = vmul.f32 %v6041_v26, %v6991_v16  ;;  %v1132_v48 = vpop.xlane.xlu0 %1131 }
 0x623   :  { %v6045_v0 = vpop.eup %6044  ;;  %6048 = vrcp.f32 %v1132_v48  ;;  %v1160_v62 = vsel %vm946_vm15, %v7067_v34, 0.0 }
 0x624   :  { %v6047_v40 = vpop.eup %6046  ;;  %v1217_v44 = vpack.c.bf16 %v1193_v28, %v1193_v28  ;;  %6050 = vrcp.f32 %v1147_v50  ;;  %v1199_v60 = vmul.f32 %v6045_v0, %v6973_v52 }
 0x625   :  { %v1194_v54 = vmul.f32 %v6047_v40, %v7001_v41  ;;  %v1022_v40 = vsub.f32 %v6849_v15, %v6947_v25 }
 0x626   :  { %v1298_v21 = vunpack.c.l.b16 %v1217_v44  ;;  %v1223_v4 = vpack.c.bf16 %v1199_v60, %v1199_v60 }
 0x627   :  { %v1218_v9 = vpack.c.bf16 %v1194_v54, %v1194_v54  ;;  %1161 = vadd.xlane.f32.xlu0 %v1160_v62  ;;  %v1049_v62 = vmul.f32 1.442695, %v1022_v40 }
 0x628   :  { %1252 = vrot.lane.b32.xlu1 %v6720_v2, %s6428_s17  ;;  %v1355_v52 = vunpack.c.l.b16 %v1223_v4  ;;  %v1138_v2 = vpop.xlane.xlu1 %1137  ;;  %v1024_v4 = vsub.f32 %v6876_v47, %v6964_v1 }
 0x629   :  { %v6049_v16 = vpop.eup %6048  ;;  %v1299_v49 = vunpack.c.l.b16 %v1218_v9 }
 0x62a   :  { %v1200_v13 = vmul.f32 %v6049_v16, %v7005_v51  ;;  %v1150_v17 = vpop.xlane.xlu0 %1149  ;;  %v6051_v39 = vpop.eup %6050 }
 0x62b   :  { %v1304_v36 = vpack.c.b16 %v1299_v49, %v1298_v21  ;;  %6052 = vrcp.f32 %v1150_v17  ;;  %v1205_v11 = vmul.f32 %v6051_v39, %v6987_v19  ;;  %v1053_v17 = vmul.f32 1.442695, %v1024_v4 }
 0x62c   :  { %v1224_v41 = vpack.c.bf16 %v1200_v13, %v1200_v13  ;;  %6054 = vrcp.f32 %v1138_v2 }
 0x62d   :  { %5387 = vmatmul.msk.bf16.vlgmr.msra.gmra.mxu0 %vm946_vm15, %v1304_v36  ;;  %v1229_v42 = vpack.c.bf16 %v1205_v11, %v1205_v11 }
 0x62e   :  { %v1356_v14 = vunpack.c.l.b16 %v1224_v41 }
 0x62f   :  { %v1412_v50 = vunpack.c.l.b16 %v1229_v42 }
 0x630   :  { %v1361_v18 = vpack.c.b16 %v1356_v14, %v1355_v52  ;;  %v1156_v39 = vpop.xlane.xlu1 %1155 }
 0x631   :  { %v6053_v59 = vpop.eup %6052 }
 0x632   :  { %v1206_v43 = vmul.f32 %v6053_v59, %v7014_v61  ;;  %5390 = vmatmul.msk.bf16.vlgmr.msra.gmra.mxu1 %vm946_vm15, %v1361_v18  ;;  %v1117_v51 = vpop.xlane.xlu0 %1116  ;;  %v6055_v0 = vpop.eup %6054 }
 0x633   :  { %v1202_v61 = vmul.f32 %v6055_v0, %v6994_v22  ;;  %v1021_v22 = vsub.f32 %v6841_v12, %v6945_v7 }
 0x634   :  { %v1230_v26 = vpack.c.bf16 %v1206_v43, %v1206_v43 }
 0x635   :  { %v1226_v60 = vpack.c.bf16 %v1202_v61, %v1202_v61 }
 0x636   :  { %v1413_v28 = vunpack.c.l.b16 %v1230_v26 }
 0x637   :  { %1250 = vrot.lane.b32.xlu2 %v6707_v3, %s6428_s17  ;;  %v1358_v21 = vunpack.c.l.b16 %v1226_v60 }
 0x638   :  { %v1418_v48 = vpack.c.b16 %v1413_v28, %v1412_v50 }
 0x63a   :  { %5393 = vmatmul.msk.bf16.vlgmr.msra.gmra.mxu2 %vm946_vm15, %v1418_v48  ;;  %v1135_v19 = vpop.xlane.xlu0 %1134 }
 0x63b   :  { %6056 = vrcp.f32 %v1135_v19  ;;  %1254 = vrot.lane.b32.xlu0 %v6715_v24, %s6428_s17  ;;  %v1023_v24 = vsub.f32 %v6860_v32, %v6954_v45 }
 0x63c   :  { %6058 = vpow2.f32 %v1049_v62 }
 0x63d   :  { %v1051_v25 = vmul.f32 1.442695, %v1023_v24 }
 0x63f   :  { %6060 = vpow2.f32 %v1051_v25 }
 0x641   :  { %v6057_v44 = vpop.eup %6056 }
 0x642   :  { %v1201_v54 = vmul.f32 %v6057_v44, %v7023_v29  ;;  %v7091_v49 = vpop.eup %6058  ;;  %v1047_v29 = vmul.f32 1.442695, %v1021_v22 }
 0x643   :  { %v1100_v15 = vsel %vm946_vm15, %v7091_v49, 0.0 }
 0x644   :  { %v1225_v3 = vpack.c.bf16 %v1201_v54, %v1201_v54  ;;  %6062 = vpow2.f32 %v1047_v29 }
 0x645   :  { %v7101_v13 = vpop.eup %6060  ;;  %6064 = vpow2.f32 %v1053_v17 }
 0x646   :  { %v1357_v9 = vunpack.c.l.b16 %v1225_v3  ;;  %v1103_v32 = vsel %vm946_vm15, %v7101_v13, 0.0  ;;  %6066 = vrcp.f32 %v1156_v39 }
 0x648   :  { %v1362_v16 = vpack.c.b16 %v1358_v21, %v1357_v9 }
 0x64a   :  { %5391 = vmatmul.msk.bf16.gmra.mxu1 %vm946_vm15, %v1362_v16  ;;  %v7105_v45 = vpop.eup %6062 }
 0x64b   :  { %v1097_v12 = vsel %vm946_vm15, %v7105_v45, 0.0  ;;  %v7109_v7 = vpop.eup %6064 }
 0x64c   :  { %v6067_v47 = vpop.eup %6066  ;;  %v1106_v1 = vsel %vm946_vm15, %v7109_v7, 0.0 }
 0x64d   :  { %v1208_v41 = vmul.f32 %v6067_v47, %v7008_v38 }
 0x64f   :  { %v1232_v18 = vpack.c.bf16 %v1208_v41, %v1208_v41 }
 0x651   :  { %v1415_v43 = vunpack.c.l.b16 %v1232_v18 }
 0x652   :  { %1101 = vadd.xlane.f32.xlu1 %v1100_v15 }
 0x660   :  { %1104 = vadd.xlane.f32.xlu2 %v1103_v32 }
 0x665   :  { %1098 = vadd.xlane.f32.xlu0 %v1097_v12 }
 0x66a   :  { %v1153_v36 = vpop.xlane.xlu0 %1152 }
 0x66b   :  { %6068 = vrcp.f32 %v1153_v36 }
 0x66c   :  { %6070 = vrcp.f32 %v1117_v51 }
 0x66d   :  { %1107 = vadd.xlane.f32.xlu0 %v1106_v1 }
 0x671   :  { %v6069_v52 = vpop.eup %6068 }
 0x672   :  { %v1120_v11 = vpop.xlane.xlu0 %1119  ;;  %v1207_v14 = vmul.f32 %v6069_v52, %v7031_v46  ;;  %v6071_v59 = vpop.eup %6070 }
 0x673   :  { %6072 = vrcp.f32 %v1120_v11  ;;  %v1195_v26 = vmul.f32 %v6071_v59, %v7019_v30 }
 0x674   :  { %v1231_v42 = vpack.c.bf16 %v1207_v14, %v1207_v14 }
 0x675   :  { %v1219_v48 = vpack.c.bf16 %v1195_v26, %v1195_v26 }
 0x676   :  { %v1414_v2 = vunpack.c.l.b16 %v1231_v42 }
 0x677   :  { %v1300_v19 = vunpack.c.l.b16 %v1219_v48 }
 0x678   :  { %v1419_v50 = vpack.c.b16 %v1415_v43, %v1414_v2 }
 0x679   :  { %v6073_v28 = vpop.eup %6072 }
 0x67a   :  { %5394 = vmatmul.msk.bf16.gmra.mxu2 %vm946_vm15, %v1419_v50  ;;  %v1196_v51 = vmul.f32 %v6073_v28, %v7038_v37  ;;  %v1123_v46 = vpop.xlane.xlu0 %1122 }
 0x67c   :  { %v1220_v38 = vpack.c.bf16 %v1196_v51, %v1196_v51 }
 0x67e   :  { %v1301_v0 = vunpack.c.l.b16 %v1220_v38 }
 0x680   :  { %v1305_v61 = vpack.c.b16 %v1301_v0, %v1300_v19 }
 0x682   :  { %5388 = vmatmul.msk.bf16.gmra.mxu0 %vm946_vm15, %v1305_v61  ;;  %v1141_v40 = vpop.xlane.xlu1 %1140 }
 0x683   :  { %6074 = vrcp.f32 %v1141_v40 }
 0x684   :  { %6076 = vrcp.f32 %v1123_v46 }
 0x689   :  { %v6075_v60 = vpop.eup %6074 }
 0x68a   :  { %v1159_v44 = vpop.xlane.xlu2 %1158  ;;  %v6077_v62 = vpop.eup %6076  ;;  %v1203_v37 = vmul.f32 %v6075_v60, %v7048_v27 }
 0x68b   :  { %v1197_v3 = vmul.f32 %v6077_v62, %v7042_v35 }
 0x68c   :  { %v1227_v24 = vpack.c.bf16 %v1203_v37, %v1203_v37 }
 0x68d   :  { %v1221_v22 = vpack.c.bf16 %v1197_v3, %v1197_v3 }
 0x68e   :  { %v1359_v32 = vunpack.c.l.b16 %v1227_v24 }
 0x68f   :  { %v1302_v12 = vunpack.c.l.b16 %v1221_v22 }
 0x692   :  { %v1144_v54 = vpop.xlane.xlu2 %1143  ;;  %v1126_v30 = vpop.xlane.xlu0 %1125 }
 0x693   :  { %6078 = vrcp.f32 %v1144_v54 }
 0x694   :  { %6080 = vrcp.f32 %v1126_v30 }
 0x695   :  { %6082 = vrcp.f32 %v1159_v44 }
 0x699   :  { %v6079_v9 = vpop.eup %6078 }
 0x69a   :  { %v6081_v21 = vpop.eup %6080  ;;  %v1204_v16 = vmul.f32 %v6079_v9, %v7059_v23  ;;  %v1162_v15 = vpop.xlane.xlu0 %1161 }
 0x69b   :  { %v1198_v25 = vmul.f32 %v6081_v21, %v7061_v8  ;;  %v6083_v29 = vpop.eup %6082  ;;  %6084 = vrcp.f32 %v1162_v15  ;;  %v1253_v50 = vpop.permute.xlu1 %1252 }
 0x69c   :  { %v1228_v4 = vpack.c.bf16 %v1204_v16, %v1204_v16  ;;  %v1209_v27 = vmul.f32 %v6083_v29, %v7055_v63  ;;  %6086 = vrcp.f32 %v7036_v33  ;;  %v1251_v38 = vpop.permute.xlu2 %1250 }
 0x69d   :  { %v1222_v17 = vpack.c.bf16 %v1198_v25, %v1198_v25  ;;  %6088 = vrcp.f32 %v7027_v5 }
 0x69e   :  { %v1360_v39 = vunpack.c.l.b16 %v1228_v4  ;;  %v1233_v8 = vpack.c.bf16 %v1209_v27, %v1209_v27 }
 0x69f   :  { %v1303_v36 = vunpack.c.l.b16 %v1222_v17 }
 0x6a0   :  { %v1363_v35 = vpack.c.b16 %v1360_v39, %v1359_v32  ;;  %v1416_v52 = vunpack.c.l.b16 %v1233_v8 }
 0x6a1   :  { %v1306_v47 = vpack.c.b16 %v1303_v36, %v1302_v12  ;;  %v6085_v1 = vpop.eup %6084 }
 0x6a2   :  { %5392 = vmatmul.msk.bf16.gmra.mxu1 %vm946_vm15, %v1363_v35  ;;  %v1210_v23 = vmul.f32 %v6085_v1, %v7067_v34  ;;  %v6087_v14 = vpop.eup %6086 }
 0x6a3   :  { %5389 = vmatmul.msk.bf16.gmra.mxu0 %vm946_vm15, %v1306_v47  ;;  %v6089_v63 = vpop.eup %6088  ;;  %v1188_v42 = vmul.f32 %v6087_v14, %v6956_v57 }
 0x6a4   :  { %v1234_v41 = vpack.c.bf16 %v1210_v23, %v1210_v23  ;;  %v1187_v33 = vmul.f32 %v6089_v63, %v6935_v55  ;;  %v5721_v63 = vld [vmem:[%s7148_s27] sm:$0xff] }
 0x6a5   :  { %v1212_v43 = vpack.c.bf16 %v1188_v42, %v1188_v42 }
 0x6a6   :  { %v1417_v11 = vunpack.c.l.b16 %v1234_v41  ;;  %v1211_v26 = vpack.c.bf16 %v1187_v33, %v1187_v33 }
 0x6a7   :  { %v1242_v28 = vunpack.c.l.b16 %v1212_v43 }
 0x6a8   :  { %v1420_v18 = vpack.c.b16 %v1417_v11, %v1416_v52  ;;  %v1241_v48 = vunpack.c.l.b16 %v1211_v26 }
 0x6aa   :  { %v1334_v59 = vpop.f32.mrf.mxu0  ;;  %5395 = vmatmul.msk.bf16.gmra.mxu2 %vm946_vm15, %v1420_v18  ;;  %v1247_v57 = vpack.c.b16 %v1242_v28, %v1241_v48 }
 0x6ad   :  { %v1255_v2 = vpop.permute.xlu0 %1254 }
 0x6ae   :  { %1273 = vmatpush.bf16.msra.mxu3 %v1255_v2 }
 0x6af   :  { %v1391_v34 = vpop.f32.mrf.mxu1 }
 0x6b2   :  { %v1336_v5 = vpop.f32.mrf.mxu0  ;;  %1274 = vmatpush.bf16.msra.mxu3 %v1253_v50 }
 0x6b3   :  { %v5807_v51 = vpack.i.bf16 %v1336_v5, %v1334_v59 }
 0x6b5   :  { %5808 = vrot.lane.b32.xlu0 %v5807_v51, %s6409_s11 }
 0x6b6   :  { %1275 = vmatpush.bf16.msra.mxu3 %v1251_v38 }
 0x6b7   :  { %v1393_v19 = vpop.f32.mrf.mxu1 }
 0x6b8   :  { %v5812_v0 = vpack.i.bf16 %v1393_v19, %v1391_v34 }
 0x6b9   :  { %5384 = vmatmul.msk.bf16.vlgmr.msra.gmra.mxu3 %vm946_vm15, %v1247_v57 }
 0x6ba   :  { %5813 = vrot.lane.b32.xlu1 %v5812_v0, %s6423_s9 }
 0x6bd   :  { %v1448_v55 = vpop.f32.mrf.mxu2 }
 0x6c5   :  { %v1450_v61 = vpop.f32.mrf.mxu2  ;;  %v1102_v54 = vpop.xlane.xlu1 %1101 }
 0x6c6   :  { %v5817_v46 = vpack.i.bf16 %v1450_v61, %v1448_v55  ;;  %6090 = vrcp.f32 %v1102_v54 }
 0x6c7   :  { %v1396_v40 = vpop.f32.mrf.mxu1 }
 0x6c8   :  { %5818 = vrot.lane.b32.xlu2 %v5817_v46, %s6430_s23 }
 0x6cc   :  { %v6091_v62 = vpop.eup %6090 }
 0x6cd   :  { %v1190_v37 = vmul.f32 %v6091_v62, %v7091_v49 }
 0x6cf   :  { %v1398_v44 = vpop.f32.mrf.mxu1  ;;  %v1214_v24 = vpack.c.bf16 %v1190_v37, %v1190_v37 }
 0x6d0   :  { %v5827_v30 = vpack.i.bf16 %v1398_v44, %v1396_v40 }
 0x6d1   :  { %v1244_v22 = vunpack.c.l.b16 %v1214_v24 }
 0x6d2   :  { %5828 = vrot.lane.b32.xlu2 %v5827_v30, %s6423_s9 }
 0x6d3   :  { %v1105_v9 = vpop.xlane.xlu2 %1104 }
 0x6d8   :  { %v1099_v60 = vpop.xlane.xlu0 %1098 }
 0x6d9   :  { %6092 = vrcp.f32 %v1099_v60 }
 0x6df   :  { %v6093_v3 = vpop.eup %6092 }
 0x6e0   :  { %v1108_v21 = vpop.xlane.xlu0 %1107  ;;  %v1189_v16 = vmul.f32 %v6093_v3, %v7105_v45 }
 0x6e1   :  { %6094 = vrcp.f32 %v1108_v21 }
 0x6e2   :  { %v1213_v15 = vpack.c.bf16 %v1189_v16, %v1189_v16  ;;  %6096 = vrcp.f32 %v1105_v9 }
 0x6e4   :  { %v1243_v25 = vunpack.c.l.b16 %v1213_v15 }
 0x6e6   :  { %v1248_v29 = vpack.c.b16 %v1244_v22, %v1243_v25 }
 0x6e7   :  { %v6095_v4 = vpop.eup %6094 }
 0x6e8   :  { %5385 = vmatmul.msk.bf16.gmra.mxu3 %vm946_vm15, %v1248_v29  ;;  %v6097_v17 = vpop.eup %6096  ;;  %v1192_v32 = vmul.f32 %v6095_v4, %v7109_v7  ;;  %v5722_v7 = vld [vmem:[%s7148_s27 + $0x8] sm:$0xff] }
 0x6e9   :  { %v1191_v49 = vmul.f32 %v6097_v17, %v7101_v13  ;;  %1593 = vmatpush.bf16.msrb.mxu3 %v5722_v7 }
 0x6ea   :  { %v1216_v39 = vpack.c.bf16 %v1192_v32, %v1192_v32 }
 0x6eb   :  { %v1215_v12 = vpack.c.bf16 %v1191_v49, %v1191_v49 }
 0x6ec   :  { %v1246_v36 = vunpack.c.l.b16 %v1216_v39 }
 0x6ed   :  { %v1245_v27 = vunpack.c.l.b16 %v1215_v12  ;;  %1594 = vmatpush.bf16.msrb.mxu3 %v5721_v63 }
 0x6ef   :  { %v1249_v45 = vpack.c.b16 %v1246_v36, %v1245_v27 }
 0x6f8   :  { %5386 = vmatmul.msk.bf16.gmra.mxu3 %vm946_vm15, %v1249_v45 }
 0x6fd   :  { %v1453_v35 = vpop.f32.mrf.mxu2 }
 0x6ff   :  { %v1339_v47 = vpop.f32.mrf.mxu0 }
 0x705   :  { %v1455_v1 = vpop.f32.mrf.mxu2 }
 0x706   :  { %v5832_v23 = vpack.i.bf16 %v1455_v1, %v1453_v35 }
 0x707   :  { %v1341_v8 = vpop.f32.mrf.mxu0 }
 0x708   :  { %v5822_v41 = vpack.i.bf16 %v1341_v8, %v1339_v47  ;;  %5833 = vrot.lane.b32.xlu1 %v5832_v23, %s6430_s23 }
 0x70a   :  { %5823 = vrot.lane.b32.xlu0 %v5822_v41, %s6409_s11 }
 0x71f   :  { %v1401_v13 = vpop.f32.mrf.mxu1 }
 0x720   :  { %v1344_v52 = vpop.f32.mrf.mxu0 }
 0x722   :  { %v5819_v28 = vpop.permute.xlu2 %5818 }
 0x723   :  { %v5821_v0 = vunpack.i.h.bf16 %v5819_v28  ;;  %v5820_v55 = vunpack.i.l.bf16 %v5819_v28 }
 0x727   :  { %v1403_v11 = vpop.f32.mrf.mxu1  ;;  %v5809_v43 = vpop.permute.xlu0 %5808 }
 0x728   :  { %v1346_v14 = vpop.f32.mrf.mxu0  ;;  %v5842_v18 = vpack.i.bf16 %v1403_v11, %v1401_v13  ;;  %v5810_v26 = vunpack.i.l.bf16 %v5809_v43  ;;  %v5811_v48 = vunpack.i.h.bf16 %v5809_v43 }
 0x729   :  { %v5837_v59 = vpack.i.bf16 %v1346_v14, %v1344_v52 }
 0x72a   :  { %5843 = vrot.lane.b32.xlu2 %v5842_v18, %s6423_s9 }
 0x72b   :  { %5838 = vrot.lane.b32.xlu0 %v5837_v59, %s6409_s11 }
 0x72c   :  { %v5814_v50 = vpop.permute.xlu1 %5813  ;;  %v5829_v60 = vpop.permute.xlu2 %5828 }
 0x72d   :  { %v1458_v42 = vpop.f32.mrf.mxu2  ;;  %v5815_v51 = vunpack.i.l.bf16 %v5814_v50  ;;  %v5816_v38 = vunpack.i.h.bf16 %v5814_v50  ;;  %v5831_v21 = vunpack.i.h.bf16 %v5829_v60  ;;  %v5830_v16 = vunpack.i.l.bf16 %v5829_v60 }
 0x735   :  { %v1460_v33 = vpop.f32.mrf.mxu2 }
 0x736   :  { %v5847_v2 = vpack.i.bf16 %v1460_v33, %v1458_v42  ;;  %v5951_v42 = vld [vmem:[%s7157_s2] ss:$0 sm:$0xff] }
 0x738   :  { %5848 = vrot.lane.b32.xlu1 %v5847_v2, %s6430_s23 }
 0x73c   :  { %v1277_v34 = vpop.f32.mrf.mxu3 }
 0x73d   :  { %v1535_v5 = vsel %vm684_vm14, %v1277_v34, %v5810_v26 }
 0x73e   :  { %v1542_v57 = vsel %vm1541_vm0, %v1535_v5, %v5815_v51 }
 0x73f   :  { %v1549_v40 = vsel %vm1548_vm1, %v1542_v57, %v5820_v55 }
 0x744   :  { %v1279_v19 = vpop.f32.mrf.mxu3 }
 0x745   :  { %v1536_v61 = vsel %vm684_vm14, %v1279_v19, %v5811_v48 }
 0x746   :  { %v1543_v46 = vsel %vm1541_vm0, %v1536_v61, %v5816_v38 }
 0x747   :  { %v1550_v44 = vsel %vm1548_vm1, %v1543_v46, %v5821_v0 }
 0x748   :  { %v1555_v54 = vpack.c.bf16 %v1550_v44, %v1549_v40 }
 0x74a   :  { %5404 = vmatmul.msk.bf16.vlgmr.msrb.gmra.mxu3 %vm237_vm4, %v1555_v54 }
 0x76b   :  { %v1282_v30 = vpop.f32.mrf.mxu3 }
 0x773   :  { %v1284_v24 = vpop.f32.mrf.mxu3 }
 0x77a   :  { %v5834_v62 = vpop.permute.xlu1 %5833 }
 0x77b   :  { %v5836_v15 = vunpack.i.h.bf16 %v5834_v62  ;;  %v5835_v25 = vunpack.i.l.bf16 %v5834_v62  ;;  %v1287_v12 = vpop.f32.mrf.mxu3 }
 0x77c   :  { %v5824_v37 = vpop.permute.xlu0 %5823 }
 0x77d   :  { %v5826_v3 = vunpack.i.h.bf16 %v5824_v37  ;;  %v5825_v9 = vunpack.i.l.bf16 %v5824_v37 }
 0x77f   :  { %v1538_v22 = vsel %vm684_vm14, %v1284_v24, %v5826_v3  ;;  %v1537_v29 = vsel %vm684_vm14, %v1282_v30, %v5825_v9 }
 0x780   :  { %v1544_v4 = vsel %vm1541_vm0, %v1537_v29, %v5830_v16  ;;  %v1545_v17 = vsel %vm1541_vm0, %v1538_v22, %v5831_v21 }
 0x781   :  { %v1551_v32 = vsel %vm1548_vm1, %v1544_v4, %v5835_v25  ;;  %v1552_v49 = vsel %vm1548_vm1, %v1545_v17, %v5836_v15 }
 0x782   :  { %v1556_v39 = vpack.c.bf16 %v1552_v49, %v1551_v32 }
 0x783   :  { %v1289_v47 = vpop.f32.mrf.mxu3 }
 0x784   :  { %5405 = vmatmul.msk.bf16.gmra.mxu3 %vm237_vm4, %v1556_v39  ;;  %v5844_v35 = vpop.permute.xlu2 %5843 }
 0x785   :  { %v5846_v8 = vunpack.i.h.bf16 %v5844_v35  ;;  %v5845_v41 = vunpack.i.l.bf16 %v5844_v35 }
 0x79d   :  { %v5839_v36 = vpop.permute.xlu0 %5838 }
 0x79e   :  { %v5841_v27 = vunpack.i.h.bf16 %v5839_v36  ;;  %v5840_v45 = vunpack.i.l.bf16 %v5839_v36 }
 0x7a0   :  { %v1540_v1 = vsel %vm684_vm14, %v1289_v47, %v5841_v27  ;;  %v1539_v23 = vsel %vm684_vm14, %v1287_v12, %v5840_v45 }
 0x7a1   :  { %v1546_v11 = vsel %vm1541_vm0, %v1539_v23, %v5845_v41  ;;  %v1547_v14 = vsel %vm1541_vm0, %v1540_v1, %v5846_v8 }
 0x7aa   :  { %v5849_v13 = vpop.permute.xlu1 %5848 }
 0x7ab   :  { %v5851_v7 = vunpack.i.h.bf16 %v5849_v13  ;;  %v5850_v52 = vunpack.i.l.bf16 %v5849_v13 }
 0x7ad   :  { %v1553_v18 = vsel %vm1548_vm1, %v1546_v11, %v5850_v52  ;;  %v1554_v63 = vsel %vm1548_vm1, %v1547_v14, %v5851_v7  ;;  %v5724_v52 = vld [vmem:[%s7266_s28 + $0x8] sm:$0xff]  ;;  %v5723_v14 = vld [vmem:[%s7266_s28] sm:$0xff] }
 0x7ae   :  { %v1557_v59 = vpack.c.bf16 %v1554_v63, %v1553_v18  ;;  %1807 = vmatpush.bf16.msrb.mxu0 %v5724_v52 }
 0x7b0   :  { %5406 = vmatmul.msk.bf16.gmra.mxu3 %vm237_vm4, %v1557_v59 }
 0x7b2   :  { %1808 = vmatpush.bf16.msrb.mxu0 %v5723_v14 }
 0x7cd   :  { %v1596_v33 = vpop.f32.mrf.mxu3 }
 0x7ce   :  { %v1597_v2 = vadd.f32 %v5951_v42, %v1596_v33 }
 0x7d0   :  { %v7183_v43 = vadd.f32 %v1597_v2, %v6570_v56 }
 0x7d2   :  { %v1619_v34 = vsel %vm237_vm4, %v7183_v43, 0.0 }
 0x7d3   :  { %1620 = vadd.xlane.f32.xlu0 %v1619_v34 }
 0x7d5   :  { %v1598_v26 = vpop.f32.mrf.mxu3 }
 0x7d6   :  { %v1599_v50 = vadd.f32 %v5951_v42, %v1598_v26 }
 0x7d8   :  { %v7188_v5 = vadd.f32 %v1599_v50, %v6580_v20 }
 0x7da   :  { %v1622_v28 = vsel %vm237_vm4, %v7188_v5, 0.0 }
 0x7db   :  { %1623 = vadd.xlane.f32.xlu2 %v1622_v28 }
 0x807   :  { %v1601_v51 = vpop.f32.mrf.mxu3 }
 0x808   :  { %v1602_v48 = vadd.f32 %v5951_v42, %v1601_v51 }
 0x80a   :  { %v7193_v38 = vadd.f32 %v1602_v48, %v6601_v6 }
 0x80c   :  { %v1625_v56 = vsel %vm237_vm4, %v7193_v38, 0.0 }
 0x80d   :  { %1626 = vadd.xlane.f32.xlu1 %v1625_v56 }
 0x80f   :  { %v1603_v57 = vpop.f32.mrf.mxu3 }
 0x810   :  { %v1604_v19 = vadd.f32 %v5951_v42, %v1603_v57 }
 0x812   :  { %v7198_v0 = vadd.f32 %v1604_v19, %v6611_v58 }
 0x814   :  { %v1628_v20 = vsel %vm237_vm4, %v7198_v0, 0.0 }
 0x815   :  { %1629 = vadd.xlane.f32.xlu0 %v1628_v20  ;;  %v7279_v20 = vld [vmem:[%s7210_s10] ss:$0 sm:$0xff] }
 0x833   :  { %v1606_v55 = vpop.f32.mrf.mxu3 }
 0x834   :  { %v1607_v61 = vadd.f32 %v5951_v42, %v1606_v55 }
 0x836   :  { %v7203_v46 = vadd.f32 %v1607_v61, %v6587_v31 }
 0x838   :  { %v1631_v6 = vsel %vm237_vm4, %v7203_v46, 0.0 }
 0x839   :  { %1632 = vadd.xlane.f32.xlu2 %v1631_v6 }
 0x83b   :  { %v1608_v40 = vpop.f32.mrf.mxu3 }
 0x83c   :  { %v1609_v44 = vadd.f32 %v5951_v42, %v1608_v40 }
 0x83e   :  { %v7213_v58 = vadd.f32 %v1609_v44, %v6599_v10 }
 0x840   :  { %v1634_v54 = vsel %vm237_vm4, %v7213_v58, 0.0 }
 0x841   :  { %1635 = vadd.xlane.f32.xlu1 %v1634_v54  ;;  %v7285_v54 = vld [vmem:[%s7234_s20] ss:$0 sm:$0xff] }
 0x846   :  { %v1621_v31 = vpop.xlane.xlu0 %1620 }
 0x847   :  { %v1637_v30 = vmul.f32 %v1621_v31, %v6502_v53 }
 0x849   :  { %v7219_v60 = vsub.f32 %v7183_v43, %v1637_v30 }
 0x84b   :  { %v1649_v62 = vmul.f32 %v7219_v60, %v7219_v60 }
 0x84d   :  { %v1655_v37 = vsel %vm237_vm4, %v1649_v62, 0.0 }
 0x84e   :  { %v1624_v3 = vpop.xlane.xlu2 %1623  ;;  %1656 = vadd.xlane.f32.xlu0 %v1655_v37 }
 0x84f   :  { %v1638_v10 = vmul.f32 %v1624_v3, %v6502_v53 }
 0x851   :  { %v7226_v9 = vsub.f32 %v7188_v5, %v1638_v10 }
 0x853   :  { %v1650_v21 = vmul.f32 %v7226_v9, %v7226_v9 }
 0x855   :  { %v1658_v16 = vsel %vm237_vm4, %v1650_v21, 0.0 }
 0x856   :  { %1659 = vadd.xlane.f32.xlu2 %v1658_v16 }
 0x880   :  { %v1627_v24 = vpop.xlane.xlu1 %1626 }
 0x881   :  { %v1639_v15 = vmul.f32 %v1627_v24, %v6502_v53 }
 0x883   :  { %v7238_v25 = vsub.f32 %v7193_v38, %v1639_v15 }
 0x885   :  { %v1651_v22 = vmul.f32 %v7238_v25, %v7238_v25 }
 0x887   :  { %v1661_v29 = vsel %vm237_vm4, %v1651_v22, 0.0 }
 0x888   :  { %1662 = vadd.xlane.f32.xlu1 %v1661_v29  ;;  %v1630_v4 = vpop.xlane.xlu0 %1629 }
 0x889   :  { %v1640_v17 = vmul.f32 %v1630_v4, %v6502_v53 }
 0x88b   :  { %v7245_v32 = vsub.f32 %v7198_v0, %v1640_v17 }
 0x88d   :  { %v1652_v49 = vmul.f32 %v7245_v32, %v7245_v32 }
 0x88f   :  { %v1664_v39 = vsel %vm237_vm4, %v1652_v49, 0.0 }
 0x890   :  { %1665 = vadd.xlane.f32.xlu0 %v1664_v39 }
 0x8ac   :  { %v1633_v12 = vpop.xlane.xlu2 %1632 }
 0x8ad   :  { %v1641_v36 = vmul.f32 %v1633_v12, %v6502_v53 }
 0x8af   :  { %v7252_v27 = vsub.f32 %v7203_v46, %v1641_v36 }
 0x8b1   :  { %v1653_v45 = vmul.f32 %v7252_v27, %v7252_v27 }
 0x8b3   :  { %v1667_v35 = vsel %vm237_vm4, %v1653_v45, 0.0 }
 0x8b4   :  { %v1636_v47 = vpop.xlane.xlu1 %1635  ;;  %1668 = vadd.xlane.f32.xlu2 %v1667_v35 }
 0x8b5   :  { %v1642_v1 = vmul.f32 %v1636_v47, %v6502_v53 }
 0x8b7   :  { %v7259_v23 = vsub.f32 %v7213_v58, %v1642_v1 }
 0x8b9   :  { %v1654_v8 = vmul.f32 %v7259_v23, %v7259_v23 }
 0x8bb   :  { %v1670_v41 = vsel %vm237_vm4, %v1654_v8, 0.0 }
 0x8bc   :  { %1671 = vadd.xlane.f32.xlu1 %v1670_v41 }
 0x8c1   :  { %v1657_v13 = vpop.xlane.xlu0 %1656 }
 0x8c2   :  { %v1673_v7 = vmul.f32 %v1657_v13, %v6502_v53 }
 0x8c4   :  { %v1679_v11 = vadd.f32 1e-05, %v1673_v7 }
 0x8c6   :  { %6098 = vrsqrt.f32 %v1679_v11  ;;  %vm1691_vm5 = vweird.f32 %v1679_v11 }
 0x8c9   :  { %v1660_v18 = vpop.xlane.xlu2 %1659 }
 0x8ca   :  { %v1674_v63 = vmul.f32 %v1660_v18, %v6502_v53 }
 0x8cc   :  { %v6099_v59 = vpop.eup %6098  ;;  %v1680_v42 = vadd.f32 1e-05, %v1674_v63 }
 0x8cd   :  { %v1686_v33 = vmul.f32 %v6099_v59, %v1679_v11  ;;  %vm1692_vm3 = vweird.f32 %v6099_v59 }
 0x8ce   :  { %6100 = vrsqrt.f32 %v1680_v42  ;;  %vm1693_vm6 = vmor %vm1691_vm5, %vm1692_vm3  ;;  %vm1701_vm8 = vweird.f32 %v1680_v42 }
 0x8cf   :  { %v1687_v2 = vmul.f32 %v6099_v59, %v1686_v33 }
 0x8d1   :  { %v1688_v34 = vmul.f32 0.5, %v1687_v2 }
 0x8d3   :  { %v1689_v26 = vsub.f32 1.5, %v1688_v34 }
 0x8d4   :  { %v6101_v50 = vpop.eup %6100 }
 0x8d5   :  { %v1690_v28 = vmul.f32 %v6099_v59, %v1689_v26  ;;  %v1696_v51 = vmul.f32 %v6101_v50, %v1680_v42  ;;  %vm1702_vm7 = vweird.f32 %v6101_v50 }
 0x8d6   :  { %vm1703_vm9 = vmor %vm1701_vm8, %vm1702_vm7 }
 0x8d7   :  { %v1697_v48 = vmul.f32 %v6101_v50, %v1696_v51  ;;  %v1694_v56 = vsel %vm1693_vm6, %v6099_v59, %v1690_v28 }
 0x8d8   :  { %v1745_v55 = vmul.f32 %v1694_v56, %v7219_v60 }
 0x8d9   :  { %v1698_v57 = vmul.f32 0.5, %v1697_v48 }
 0x8da   :  { %v1754_v40 = vmul.f32 %v7279_v20, %v1745_v55 }
 0x8db   :  { %v1699_v19 = vsub.f32 1.5, %v1698_v57 }
 0x8dc   :  { %v1763_v30 = vadd.f32 %v7285_v54, %v1754_v40 }
 0x8dd   :  { %v1700_v61 = vmul.f32 %v6101_v50, %v1699_v19 }
 0x8df   :  { %v1704_v6 = vsel %vm1703_vm9, %v6101_v50, %v1700_v61 }
 0x8e0   :  { %v1746_v44 = vmul.f32 %v1704_v6, %v7226_v9 }
 0x8e2   :  { %v1755_v31 = vmul.f32 %v7279_v20, %v1746_v44 }
 0x8e4   :  { %v1764_v62 = vadd.f32 %v7285_v54, %v1755_v31 }
 0x8e6   :  { %v1769_v37 = vpack.c.bf16 %v1764_v62, %v1763_v30  ;;  %v5732_v62 = vld [vmem:[%s7306_s18 + $0x38] sm:$0xff] }
 0x8e7   :  { %1950 = vmatpush.bf16.msrb.mxu1 %v5732_v62 }
 0x8e8   :  { %5415 = vmatmul.msk.bf16.vlgmr.msrb.gmra.mxu0 %vm237_vm4, %v1769_v37 }
 0x8fb   :  { %v1663_v60 = vpop.xlane.xlu1 %1662 }
 0x8fc   :  { %v1675_v3 = vmul.f32 %v1663_v60, %v6502_v53 }
 0x8fe   :  { %v1681_v10 = vadd.f32 1e-05, %v1675_v3  ;;  %v5731_v3 = vld [vmem:[%s7306_s18 + $0x30] sm:$0xff] }
 0x8ff   :  { %1951 = vmatpush.bf16.msrb.mxu1 %v5731_v3 }
 0x900   :  { %6102 = vrsqrt.f32 %v1681_v10  ;;  %vm1711_vm11 = vweird.f32 %v1681_v10 }
 0x903   :  { %v1666_v21 = vpop.xlane.xlu0 %1665 }
 0x904   :  { %v1676_v16 = vmul.f32 %v1666_v21, %v6502_v53  ;;  %v5728_v21 = vld [vmem:[%s7306_s18 + $0x18] sm:$0xff] }
 0x906   :  { %v6103_v9 = vpop.eup %6102  ;;  %v1682_v24 = vadd.f32 1e-05, %v1676_v16  ;;  %v5726_v16 = vld [vmem:[%s7306_s18 + $0x8] sm:$0xff] }
 0x907   :  { %v1706_v15 = vmul.f32 %v6103_v9, %v1681_v10  ;;  %vm1712_vm10 = vweird.f32 %v6103_v9  ;;  %v5729_v10 = vld [vmem:[%s7306_s18 + $0x20] sm:$0xff] }
 0x908   :  { %6104 = vrsqrt.f32 %v1682_v24  ;;  %vm1713_vm12 = vmor %vm1711_vm11, %vm1712_vm10  ;;  %vm1721_vm3 = vweird.f32 %v1682_v24 }
 0x909   :  { %v1707_v22 = vmul.f32 %v6103_v9, %v1706_v15 }
 0x90b   :  { %v1708_v29 = vmul.f32 0.5, %v1707_v22 }
 0x90d   :  { %v1709_v4 = vsub.f32 1.5, %v1708_v29 }
 0x90e   :  { %v6105_v17 = vpop.eup %6104 }
 0x90f   :  { %v1710_v49 = vmul.f32 %v6103_v9, %v1709_v4  ;;  %v1716_v39 = vmul.f32 %v6105_v17, %v1682_v24  ;;  %vm1722_vm13 = vweird.f32 %v6105_v17 }
 0x910   :  { %vm1723_vm5 = vmor %vm1721_vm3, %vm1722_vm13 }
 0x911   :  { %v1717_v12 = vmul.f32 %v6105_v17, %v1716_v39  ;;  %v1714_v36 = vsel %vm1713_vm12, %v6103_v9, %v1710_v49  ;;  %v7323_v9 = vld [vmem:[%s7276_s5] ss:$0 sm:$0xff] }
 0x912   :  { %v1747_v47 = vmul.f32 %v1714_v36, %v7238_v25 }
 0x913   :  { %v1718_v45 = vmul.f32 0.5, %v1717_v12 }
 0x914   :  { %v1756_v13 = vmul.f32 %v7279_v20, %v1747_v47 }
 0x915   :  { %v1719_v35 = vsub.f32 1.5, %v1718_v45 }
 0x916   :  { %v1765_v52 = vadd.f32 %v7285_v54, %v1756_v13 }
 0x917   :  { %v1720_v1 = vmul.f32 %v6105_v17, %v1719_v35 }
 0x919   :  { %v1724_v8 = vsel %vm1723_vm5, %v6105_v17, %v1720_v1 }
 0x91a   :  { %v1748_v41 = vmul.f32 %v1724_v8, %v7245_v32 }
 0x91c   :  { %v1757_v7 = vmul.f32 %v7279_v20, %v1748_v41 }
 0x91e   :  { %v1766_v11 = vadd.f32 %v7285_v54, %v1757_v7 }
 0x920   :  { %v1770_v14 = vpack.c.bf16 %v1766_v11, %v1765_v52 }
 0x922   :  { %5416 = vmatmul.msk.bf16.gmra.mxu0 %vm237_vm4, %v1770_v14 }
 0x927   :  { %v1669_v18 = vpop.xlane.xlu2 %1668 }
 0x928   :  { %v1677_v25 = vmul.f32 %v1669_v18, %v6502_v53 }
 0x92a   :  { %v1683_v63 = vadd.f32 1e-05, %v1677_v25 }
 0x92c   :  { %6106 = vrsqrt.f32 %v1683_v63  ;;  %vm1731_vm7 = vweird.f32 %v1683_v63 }
 0x92f   :  { %v1672_v59 = vpop.xlane.xlu1 %1671 }
 0x930   :  { %v1678_v42 = vmul.f32 %v1672_v59, %v6502_v53 }
 0x932   :  { %v6107_v32 = vpop.eup %6106  ;;  %v1684_v33 = vadd.f32 1e-05, %v1678_v42 }
 0x933   :  { %v1726_v2 = vmul.f32 %v6107_v32, %v1683_v63  ;;  %vm1732_vm6 = vweird.f32 %v6107_v32 }
 0x934   :  { %6108 = vrsqrt.f32 %v1684_v33  ;;  %vm1733_vm8 = vmor %vm1731_vm7, %vm1732_vm6  ;;  %vm1741_vm10 = vweird.f32 %v1684_v33 }
 0x935   :  { %v1727_v34 = vmul.f32 %v6107_v32, %v1726_v2 }
 0x937   :  { %v1728_v26 = vmul.f32 0.5, %v1727_v34 }
 0x939   :  { %v1729_v50 = vsub.f32 1.5, %v1728_v26 }
 0x93a   :  { %v6109_v28 = vpop.eup %6108 }
 0x93b   :  { %v1730_v51 = vmul.f32 %v6107_v32, %v1729_v50  ;;  %v1736_v48 = vmul.f32 %v6109_v28, %v1684_v33  ;;  %vm1742_vm9 = vweird.f32 %v6109_v28 }
 0x93c   :  { %vm1743_vm11 = vmor %vm1741_vm10, %vm1742_vm9 }
 0x93d   :  { %v1737_v56 = vmul.f32 %v6109_v28, %v1736_v48  ;;  %v1734_v57 = vsel %vm1733_vm8, %v6107_v32, %v1730_v51 }
 0x93e   :  { %v1749_v61 = vmul.f32 %v1734_v57, %v7252_v27 }
 0x93f   :  { %v1738_v19 = vmul.f32 0.5, %v1737_v56 }
 0x940   :  { %v1758_v31 = vmul.f32 %v7279_v20, %v1749_v61 }
 0x941   :  { %v1739_v55 = vsub.f32 1.5, %v1738_v19 }
 0x942   :  { %v1767_v37 = vadd.f32 %v7285_v54, %v1758_v31 }
 0x943   :  { %v1740_v6 = vmul.f32 %v6109_v28, %v1739_v55 }
 0x945   :  { %v1744_v40 = vsel %vm1743_vm11, %v6109_v28, %v1740_v6 }
 0x946   :  { %v1750_v44 = vmul.f32 %v1744_v40, %v7259_v23  ;;  %v5730_v23 = vld [vmem:[%s7306_s18 + $0x28] sm:$0xff] }
 0x947   :  { %1952 = vmatpush.bf16.msrb.mxu1 %v5730_v23 }
 0x948   :  { %v1759_v30 = vmul.f32 %v7279_v20, %v1750_v44  ;;  %v5727_v20 = vld [vmem:[%s7306_s18 + $0x10] sm:$0xff] }
 0x94a   :  { %v1768_v27 = vadd.f32 %v7285_v54, %v1759_v30  ;;  %v5725_v54 = vld [vmem:[%s7306_s18] sm:$0xff] }
 0x94b   :  { %1953 = vmatpush.bf16.msrb.mxu1 %v5729_v10 }
 0x94c   :  { %v1771_v60 = vpack.c.bf16 %v1768_v27, %v1767_v37 }
 0x94e   :  { %5417 = vmatmul.msk.bf16.gmra.mxu0 %vm237_vm4, %v1771_v60 }
 0x94f   :  { %1954 = vmatpush.bf16.msrb.mxu1 %v5728_v21 }
 0x953   :  { %1955 = vmatpush.bf16.msrb.mxu1 %v5727_v20 }
 0x957   :  { %1956 = vmatpush.bf16.msrb.mxu1 %v5726_v16 }
 0x95b   :  { %1957 = vmatpush.bf16.msrb.mxu1 %v5725_v54 }
 0x965   :  { %v1810_v24 = vpop.f32.mrf.mxu0 }
 0x966   :  { %v1811_v15 = vadd.f32 %v7323_v9, %v1810_v24 }
 0x968   :  { %v1831_v22 = vmul.f32 0.044715, %v1811_v15  ;;  %v1825_v7 = vmul.f32 0.5, %v1811_v15 }
 0x96a   :  { %v1837_v29 = vmul.f32 %v1831_v22, %v1811_v15 }
 0x96c   :  { %v1843_v4 = vmul.f32 %v1837_v29, %v1811_v15 }
 0x96d   :  { %v1812_v17 = vpop.f32.mrf.mxu0 }
 0x96e   :  { %v1849_v49 = vadd.f32 %v1843_v4, %v1811_v15  ;;  %v1813_v39 = vadd.f32 %v7323_v9, %v1812_v17 }
 0x970   :  { %v1832_v12 = vmul.f32 0.044715, %v1813_v39  ;;  %v1855_v36 = vmul.f32 0.7978846, %v1849_v49  ;;  %v1826_v52 = vmul.f32 0.5, %v1813_v39 }
 0x972   :  { %v1838_v45 = vmul.f32 %v1832_v12, %v1813_v39  ;;  %6110 = vtanh.f32 %v1855_v36 }
 0x974   :  { %v1844_v35 = vmul.f32 %v1838_v45, %v1813_v39 }
 0x976   :  { %v1850_v47 = vadd.f32 %v1844_v35, %v1813_v39 }
 0x978   :  { %v1856_v1 = vmul.f32 0.7978846, %v1850_v47  ;;  %v6111_v8 = vpop.eup %6110 }
 0x979   :  { %v1867_v41 = vadd.f32 1.0, %v6111_v8 }
 0x97a   :  { %6112 = vtanh.f32 %v1856_v1 }
 0x97b   :  { %v1873_v14 = vmul.f32 %v1867_v41, %v1825_v7 }
 0x980   :  { %v6113_v13 = vpop.eup %6112 }
 0x981   :  { %v1868_v11 = vadd.f32 1.0, %v6113_v13 }
 0x983   :  { %v1874_v18 = vmul.f32 %v1868_v11, %v1826_v52 }
 0x985   :  { %v1879_v25 = vpack.c.bf16 %v1874_v18, %v1873_v14 }
 0x987   :  { %1958 = vmatmul.bf16.vlgmr.msrb.gmra.mxu1 %v1879_v25 }
 0x99f   :  { %v1815_v63 = vpop.f32.mrf.mxu0 }
 0x9a0   :  { %v1816_v59 = vadd.f32 %v7323_v9, %v1815_v63 }
 0x9a2   :  { %v1833_v42 = vmul.f32 0.044715, %v1816_v59  ;;  %v1827_v6 = vmul.f32 0.5, %v1816_v59 }
 0x9a4   :  { %v1839_v32 = vmul.f32 %v1833_v42, %v1816_v59 }
 0x9a6   :  { %v1845_v33 = vmul.f32 %v1839_v32, %v1816_v59 }
 0x9a7   :  { %v1817_v2 = vpop.f32.mrf.mxu0 }
 0x9a8   :  { %v1818_v34 = vadd.f32 %v7323_v9, %v1817_v2  ;;  %v1851_v26 = vadd.f32 %v1845_v33, %v1816_v59 }
 0x9aa   :  { %v1834_v50 = vmul.f32 0.044715, %v1818_v34  ;;  %v1857_v51 = vmul.f32 0.7978846, %v1851_v26  ;;  %v1828_v40 = vmul.f32 0.5, %v1818_v34 }
 0x9ac   :  { %v1840_v28 = vmul.f32 %v1834_v50, %v1818_v34  ;;  %6114 = vtanh.f32 %v1857_v51 }
 0x9ae   :  { %v1846_v48 = vmul.f32 %v1840_v28, %v1818_v34 }
 0x9b0   :  { %v1852_v56 = vadd.f32 %v1846_v48, %v1818_v34 }
 0x9b2   :  { %v1858_v57 = vmul.f32 0.7978846, %v1852_v56  ;;  %v6115_v19 = vpop.eup %6114 }
 0x9b3   :  { %v1869_v55 = vadd.f32 1.0, %v6115_v19 }
 0x9b4   :  { %6116 = vtanh.f32 %v1858_v57 }
 0x9b5   :  { %v1875_v31 = vmul.f32 %v1869_v55, %v1827_v6 }
 0x9ba   :  { %v6117_v61 = vpop.eup %6116 }
 0x9bb   :  { %v1870_v44 = vadd.f32 1.0, %v6117_v61 }
 0x9bd   :  { %v1876_v30 = vmul.f32 %v1870_v44, %v1828_v40 }
 0x9bf   :  { %v1880_v62 = vpack.c.bf16 %v1876_v30, %v1875_v31 }
 0x9c1   :  { %1963 = vmatmul.bf16.gmra.mxu1 %v1880_v62 }
 0x9cb   :  { %v1820_v37 = vpop.f32.mrf.mxu0 }
 0x9cc   :  { %v1821_v27 = vadd.f32 %v7323_v9, %v1820_v37 }
 0x9ce   :  { %v1835_v60 = vmul.f32 0.044715, %v1821_v27  ;;  %v1829_v39 = vmul.f32 0.5, %v1821_v27 }
 0x9d0   :  { %v1841_v3 = vmul.f32 %v1835_v60, %v1821_v27 }
 0x9d2   :  { %v1847_v23 = vmul.f32 %v1841_v3, %v1821_v27 }
 0x9d3   :  { %v1822_v10 = vpop.f32.mrf.mxu0 }
 0x9d4   :  { %v1823_v21 = vadd.f32 %v7323_v9, %v1822_v10  ;;  %v1853_v20 = vadd.f32 %v1847_v23, %v1821_v27  ;;  %v5955_v9 = vld [vmem:[%s7331_s26] ss:$0 sm:$0xff] }
 0x9d6   :  { %v1836_v16 = vmul.f32 0.044715, %v1823_v21  ;;  %v1859_v24 = vmul.f32 0.7978846, %v1853_v20  ;;  %v1830_v12 = vmul.f32 0.5, %v1823_v21 }
 0x9d8   :  { %v1842_v54 = vmul.f32 %v1836_v16, %v1823_v21  ;;  %6118 = vtanh.f32 %v1859_v24 }
 0x9da   :  { %v1848_v15 = vmul.f32 %v1842_v54, %v1823_v21 }
 0x9dc   :  { %v1854_v22 = vadd.f32 %v1848_v15, %v1823_v21 }
 0x9de   :  { %v1860_v29 = vmul.f32 0.7978846, %v1854_v22  ;;  %v6119_v4 = vpop.eup %6118 }
 0x9df   :  { %v1871_v17 = vadd.f32 1.0, %v6119_v4 }
 0x9e0   :  { %6120 = vtanh.f32 %v1860_v29 }
 0x9e1   :  { %v1877_v45 = vmul.f32 %v1871_v17, %v1829_v39  ;;  %v5734_v39 = vld [vmem:[%s6676_s13 + $0x18] sm:$0xff] }
 0x9e2   :  { %2174 = vmatpush.bf16.msrb.mxu2 %v5734_v39 }
 0x9e6   :  { %v6121_v49 = vpop.eup %6120 }
 0x9e7   :  { %v1872_v36 = vadd.f32 1.0, %v6121_v49 }
 0x9e9   :  { %v1878_v35 = vmul.f32 %v1872_v36, %v1830_v12  ;;  %v5733_v36 = vld [vmem:[%s6676_s13 + $0x10] sm:$0xff] }
 0x9ea   :  { %2175 = vmatpush.bf16.msrb.mxu2 %v5733_v36 }
 0x9eb   :  { %v1881_v47 = vpack.c.bf16 %v1878_v35, %v1877_v45 }
 0x9ed   :  { %1968 = vmatmul.bf16.gmra.mxu1 %v1881_v47 }
 0xa04   :  { %v1959_v1 = vpop.f32.mrf.mxu1 }
 0xa05   :  { %v1960_v8 = vadd.f32 %v5955_v9, %v1959_v1 }
 0xa07   :  { %v7339_v41 = vadd.f32 %v1960_v8, %v7183_v43 }
 0xa09   :  { %v1984_v13 = vsel %vm237_vm4, %v7339_v41, 0.0 }
 0xa0a   :  { %1985 = vadd.xlane.f32.xlu0 %v1984_v13 }
 0xa0c   :  { %v1961_v7 = vpop.f32.mrf.mxu1 }
 0xa0d   :  { %v1962_v52 = vadd.f32 %v5955_v9, %v1961_v7 }
 0xa0f   :  { %v7344_v11 = vadd.f32 %v1962_v52, %v7188_v5 }
 0xa11   :  { %v1987_v14 = vsel %vm237_vm4, %v7344_v11, 0.0 }
 0xa12   :  { %1988 = vadd.xlane.f32.xlu2 %v1987_v14 }
 0xa3e   :  { %v1964_v18 = vpop.f32.mrf.mxu1 }
 0xa3f   :  { %v1965_v25 = vadd.f32 %v5955_v9, %v1964_v18 }
 0xa41   :  { %v7349_v63 = vadd.f32 %v1965_v25, %v7193_v38 }
 0xa43   :  { %v1990_v43 = vsel %vm237_vm4, %v7349_v63, 0.0 }
 0xa44   :  { %1991 = vadd.xlane.f32.xlu1 %v1990_v43 }
 0xa46   :  { %v1966_v59 = vpop.f32.mrf.mxu1 }
 0xa47   :  { %v1967_v42 = vadd.f32 %v5955_v9, %v1966_v59 }
 0xa49   :  { %v7354_v32 = vadd.f32 %v1967_v42, %v7198_v0 }
 0xa4b   :  { %v1993_v5 = vsel %vm237_vm4, %v7354_v32, 0.0 }
 0xa4c   :  { %1994 = vadd.xlane.f32.xlu0 %v1993_v5  ;;  %v7415_v5 = vld [vmem:[%s6631_s29 + $0x1] ss:$0 sm:$0xff] }
 0xa6a   :  { %v1969_v33 = vpop.f32.mrf.mxu1 }
 0xa6b   :  { %v1970_v2 = vadd.f32 %v5955_v9, %v1969_v33 }
 0xa6d   :  { %v7359_v34 = vadd.f32 %v1970_v2, %v7203_v46 }
 0xa6f   :  { %v1996_v38 = vsel %vm237_vm4, %v7359_v34, 0.0 }
 0xa70   :  { %1997 = vadd.xlane.f32.xlu2 %v1996_v38 }
 0xa72   :  { %v1971_v26 = vpop.f32.mrf.mxu1 }
 0xa73   :  { %v1972_v50 = vadd.f32 %v5955_v9, %v1971_v26 }
 0xa75   :  { %v7364_v28 = vadd.f32 %v1972_v50, %v7213_v58 }
 0xa77   :  { %v1999_v0 = vsel %vm237_vm4, %v7364_v28, 0.0 }
 0xa78   :  { %2000 = vadd.xlane.f32.xlu1 %v1999_v0  ;;  %v7421_v0 = vld [vmem:[%s6638_s3 + $0x1] ss:$0 sm:$0xff] }
 0xa7d   :  { %v1986_v51 = vpop.xlane.xlu0 %1985 }
 0xa7e   :  { %v2002_v48 = vmul.f32 %v1986_v51, %v6502_v53 }
 0xa80   :  { %v7370_v56 = vsub.f32 %v7339_v41, %v2002_v48 }
 0xa82   :  { %v2014_v46 = vmul.f32 %v7370_v56, %v7370_v56 }
 0xa84   :  { %v2020_v57 = vsel %vm237_vm4, %v2014_v46, 0.0 }
 0xa85   :  { %v1989_v19 = vpop.xlane.xlu2 %1988  ;;  %2021 = vadd.xlane.f32.xlu0 %v2020_v57 }
 0xa86   :  { %v2003_v58 = vmul.f32 %v1989_v19, %v6502_v53 }
 0xa88   :  { %v7377_v55 = vsub.f32 %v7344_v11, %v2003_v58 }
 0xa8a   :  { %v2015_v61 = vmul.f32 %v7377_v55, %v7377_v55 }
 0xa8c   :  { %v2023_v6 = vsel %vm237_vm4, %v2015_v61, 0.0 }
 0xa8d   :  { %2024 = vadd.xlane.f32.xlu2 %v2023_v6 }
 0xab7   :  { %v1992_v40 = vpop.xlane.xlu1 %1991 }
 0xab8   :  { %v2004_v44 = vmul.f32 %v1992_v40, %v6502_v53 }
 0xaba   :  { %v7384_v31 = vsub.f32 %v7349_v63, %v2004_v44 }
 0xabc   :  { %v2016_v30 = vmul.f32 %v7384_v31, %v7384_v31 }
 0xabe   :  { %v2026_v62 = vsel %vm237_vm4, %v2016_v30, 0.0 }
 0xabf   :  { %2027 = vadd.xlane.f32.xlu1 %v2026_v62  ;;  %v1995_v37 = vpop.xlane.xlu0 %1994 }
 0xac0   :  { %v2005_v27 = vmul.f32 %v1995_v37, %v6502_v53 }
 0xac2   :  { %v7391_v60 = vsub.f32 %v7354_v32, %v2005_v27 }
 0xac4   :  { %v2017_v3 = vmul.f32 %v7391_v60, %v7391_v60 }
 0xac6   :  { %v2029_v23 = vsel %vm237_vm4, %v2017_v3, 0.0 }
 0xac7   :  { %2030 = vadd.xlane.f32.xlu0 %v2029_v23 }
 0xae3   :  { %v1998_v10 = vpop.xlane.xlu2 %1997 }
 0xae4   :  { %v2006_v21 = vmul.f32 %v1998_v10, %v6502_v53 }
 0xae6   :  { %v7398_v20 = vsub.f32 %v7359_v34, %v2006_v21 }
 0xae8   :  { %v2018_v16 = vmul.f32 %v7398_v20, %v7398_v20 }
 0xaea   :  { %v2032_v54 = vsel %vm237_vm4, %v2018_v16, 0.0 }
 0xaeb   :  { %2033 = vadd.xlane.f32.xlu2 %v2032_v54  ;;  %v2001_v24 = vpop.xlane.xlu1 %2000 }
 0xaec   :  { %v2007_v15 = vmul.f32 %v2001_v24, %v6502_v53 }
 0xaee   :  { %v7405_v22 = vsub.f32 %v7364_v28, %v2007_v15 }
 0xaf0   :  { %v2019_v29 = vmul.f32 %v7405_v22, %v7405_v22 }
 0xaf2   :  { %v2035_v4 = vsel %vm237_vm4, %v2019_v29, 0.0 }
 0xaf3   :  { %2036 = vadd.xlane.f32.xlu1 %v2035_v4 }
 0xaf8   :  { %v2022_v17 = vpop.xlane.xlu0 %2021 }
 0xaf9   :  { %v2038_v49 = vmul.f32 %v2022_v17, %v6502_v53 }
 0xafb   :  { %v2044_v12 = vadd.f32 1e-05, %v2038_v49 }
 0xafd   :  { %6122 = vrsqrt.f32 %v2044_v12  ;;  %vm2056_vm13 = vweird.f32 %v2044_v12 }
 0xb00   :  { %v2025_v45 = vpop.xlane.xlu2 %2024 }
 0xb01   :  { %v2039_v35 = vmul.f32 %v2025_v45, %v6502_v53 }
 0xb03   :  { %v6123_v47 = vpop.eup %6122  ;;  %v2045_v9 = vadd.f32 1e-05, %v2039_v35 }
 0xb04   :  { %v2051_v1 = vmul.f32 %v6123_v47, %v2044_v12  ;;  %vm2057_vm12 = vweird.f32 %v6123_v47 }
 0xb05   :  { %6124 = vrsqrt.f32 %v2045_v9  ;;  %vm2058_vm3 = vmor %vm2056_vm13, %vm2057_vm12  ;;  %vm2066_vm6 = vweird.f32 %v2045_v9 }
 0xb06   :  { %v2052_v8 = vmul.f32 %v6123_v47, %v2051_v1 }
 0xb08   :  { %v2053_v13 = vmul.f32 0.5, %v2052_v8 }
 0xb0a   :  { %v2054_v7 = vsub.f32 1.5, %v2053_v13 }
 0xb0b   :  { %v6125_v52 = vpop.eup %6124 }
 0xb0c   :  { %v2055_v14 = vmul.f32 %v6123_v47, %v2054_v7  ;;  %v2061_v18 = vmul.f32 %v6125_v52, %v2045_v9  ;;  %vm2067_vm5 = vweird.f32 %v6125_v52 }
 0xb0d   :  { %vm2068_vm7 = vmor %vm2066_vm6, %vm2067_vm5 }
 0xb0e   :  { %v2062_v25 = vmul.f32 %v6125_v52, %v2061_v18  ;;  %v2059_v43 = vsel %vm2058_vm3, %v6123_v47, %v2055_v14 }
 0xb0f   :  { %v2110_v33 = vmul.f32 %v2059_v43, %v7370_v56 }
 0xb10   :  { %v2063_v59 = vmul.f32 0.5, %v2062_v25 }
 0xb11   :  { %v2119_v26 = vmul.f32 %v7415_v5, %v2110_v33 }
 0xb12   :  { %v2064_v42 = vsub.f32 1.5, %v2063_v59 }
 0xb13   :  { %v2128_v48 = vadd.f32 %v7421_v0, %v2119_v26 }
 0xb14   :  { %v2065_v2 = vmul.f32 %v6125_v52, %v2064_v42 }
 0xb16   :  { %v2069_v38 = vsel %vm2068_vm7, %v6125_v52, %v2065_v2 }
 0xb17   :  { %v2111_v50 = vmul.f32 %v2069_v38, %v7377_v55 }
 0xb19   :  { %v2120_v51 = vmul.f32 %v7415_v5, %v2111_v50 }
 0xb1b   :  { %v2129_v46 = vadd.f32 %v7421_v0, %v2120_v51 }
 0xb1d   :  { %v2134_v57 = vpack.c.bf16 %v2129_v46, %v2128_v48 }
 0xb1f   :  { %5465 = vmatmul.msk.bf16.vlgmr.msrb.gmra.mxu2 %vm237_vm4, %v2134_v57 }
 0xb32   :  { %v2028_v56 = vpop.xlane.xlu1 %2027 }
 0xb33   :  { %v2040_v19 = vmul.f32 %v2028_v56, %v6502_v53 }
 0xb35   :  { %v2046_v58 = vadd.f32 1e-05, %v2040_v19  ;;  %v5958_v19 = vld [vmem:[%s6670_s8 + $0x1] ss:$0 sm:$0xff] }
 0xb37   :  { %6126 = vrsqrt.f32 %v2046_v58  ;;  %vm2076_vm9 = vweird.f32 %v2046_v58 }
 0xb3a   :  { %v2031_v61 = vpop.xlane.xlu0 %2030 }
 0xb3b   :  { %v2041_v6 = vmul.f32 %v2031_v61, %v6502_v53 }
 0xb3d   :  { %v6127_v55 = vpop.eup %6126  ;;  %v2047_v40 = vadd.f32 1e-05, %v2041_v6 }
 0xb3e   :  { %v2071_v44 = vmul.f32 %v6127_v55, %v2046_v58  ;;  %vm2077_vm8 = vweird.f32 %v6127_v55 }
 0xb3f   :  { %6128 = vrsqrt.f32 %v2047_v40  ;;  %vm2078_vm10 = vmor %vm2076_vm9, %vm2077_vm8  ;;  %vm2086_vm12 = vweird.f32 %v2047_v40 }
 0xb40   :  { %v2072_v30 = vmul.f32 %v6127_v55, %v2071_v44 }
 0xb42   :  { %v2073_v62 = vmul.f32 0.5, %v2072_v30 }
 0xb44   :  { %v2074_v37 = vsub.f32 1.5, %v2073_v62 }
 0xb45   :  { %v6129_v27 = vpop.eup %6128 }
 0xb46   :  { %v2075_v3 = vmul.f32 %v6127_v55, %v2074_v37  ;;  %v2081_v23 = vmul.f32 %v6129_v27, %v2047_v40  ;;  %vm2087_vm11 = vweird.f32 %v6129_v27 }
 0xb47   :  { %vm2088_vm13 = vmor %vm2086_vm12, %vm2087_vm11 }
 0xb48   :  { %v2082_v10 = vmul.f32 %v6129_v27, %v2081_v23  ;;  %v2079_v21 = vsel %vm2078_vm10, %v6127_v55, %v2075_v3 }
 0xb49   :  { %v2112_v24 = vmul.f32 %v2079_v21, %v7384_v31 }
 0xb4a   :  { %v2083_v16 = vmul.f32 0.5, %v2082_v10 }
 0xb4b   :  { %v2121_v17 = vmul.f32 %v7415_v5, %v2112_v24 }
 0xb4c   :  { %v2084_v54 = vsub.f32 1.5, %v2083_v16 }
 0xb4d   :  { %v2130_v39 = vadd.f32 %v7421_v0, %v2121_v17 }
 0xb4e   :  { %v2085_v15 = vmul.f32 %v6129_v27, %v2084_v54 }
 0xb50   :  { %v2089_v29 = vsel %vm2088_vm13, %v6129_v27, %v2085_v15 }
 0xb51   :  { %v2113_v4 = vmul.f32 %v2089_v29, %v7391_v60 }
 0xb53   :  { %v2122_v49 = vmul.f32 %v7415_v5, %v2113_v4 }
 0xb55   :  { %v2131_v12 = vadd.f32 %v7421_v0, %v2122_v49 }
 0xb57   :  { %v2135_v36 = vpack.c.bf16 %v2131_v12, %v2130_v39 }
 0xb59   :  { %5466 = vmatmul.msk.bf16.gmra.mxu2 %vm237_vm4, %v2135_v36 }
 0xb5e   :  { %v2034_v45 = vpop.xlane.xlu2 %2033 }
 0xb5f   :  { %v2042_v31 = vmul.f32 %v2034_v45, %v6502_v53 }
 0xb61   :  { %v2048_v35 = vadd.f32 1e-05, %v2042_v31 }
 0xb63   :  { %6130 = vrsqrt.f32 %v2048_v35  ;;  %vm2096_vm5 = vweird.f32 %v2048_v35 }
 0xb66   :  { %v2037_v47 = vpop.xlane.xlu1 %2036 }
 0xb67   :  { %v2043_v9 = vmul.f32 %v2037_v47, %v6502_v53 }
 0xb69   :  { %v6131_v60 = vpop.eup %6130  ;;  %v2049_v1 = vadd.f32 1e-05, %v2043_v9 }
 0xb6a   :  { %v2091_v8 = vmul.f32 %v6131_v60, %v2048_v35  ;;  %vm2097_vm3 = vweird.f32 %v6131_v60 }
 0xb6b   :  { %6132 = vrsqrt.f32 %v2049_v1  ;;  %vm2098_vm6 = vmor %vm2096_vm5, %vm2097_vm3  ;;  %vm2106_vm8 = vweird.f32 %v2049_v1 }
 0xb6c   :  { %v2092_v13 = vmul.f32 %v6131_v60, %v2091_v8 }
 0xb6e   :  { %v2093_v7 = vmul.f32 0.5, %v2092_v13 }
 0xb70   :  { %v2094_v52 = vsub.f32 1.5, %v2093_v7 }
 0xb71   :  { %v6133_v14 = vpop.eup %6132 }
 0xb72   :  { %v2095_v18 = vmul.f32 %v6131_v60, %v2094_v52  ;;  %v2101_v25 = vmul.f32 %v6133_v14, %v2049_v1  ;;  %vm2107_vm7 = vweird.f32 %v6133_v14 }
 0xb73   :  { %vm2108_vm9 = vmor %vm2106_vm8, %vm2107_vm7 }
 0xb74   :  { %v2102_v43 = vmul.f32 %v6133_v14, %v2101_v25  ;;  %v2099_v59 = vsel %vm2098_vm6, %v6131_v60, %v2095_v18 }
 0xb75   :  { %v2114_v2 = vmul.f32 %v2099_v59, %v7398_v20 }
 0xb76   :  { %v2103_v42 = vmul.f32 0.5, %v2102_v43 }
 0xb77   :  { %v2123_v51 = vmul.f32 %v7415_v5, %v2114_v2 }
 0xb78   :  { %v2104_v33 = vsub.f32 1.5, %v2103_v42 }
 0xb79   :  { %v2132_v46 = vadd.f32 %v7421_v0, %v2123_v51 }
 0xb7a   :  { %v2105_v38 = vmul.f32 %v6133_v14, %v2104_v33 }
 0xb7c   :  { %v2109_v26 = vsel %vm2108_vm9, %v6133_v14, %v2105_v38 }
 0xb7d   :  { %v2115_v50 = vmul.f32 %v2109_v26, %v7405_v22 }
 0xb7f   :  { %v2124_v48 = vmul.f32 %v7415_v5, %v2115_v50 }
 0xb81   :  { %v2133_v57 = vadd.f32 %v7421_v0, %v2124_v48 }
 0xb83   :  { %v2136_v56 = vpack.c.bf16 %v2133_v57, %v2132_v46 }
 0xb85   :  { %5467 = vmatmul.msk.bf16.gmra.mxu2 %vm237_vm4, %v2136_v56 }
 0xba2   :  { %v2177_v58 = vpop.f32.mrf.mxu2 }
 0xba3   :  { %v2178_v20 = vadd.f32 %v5958_v19, %v2177_v58 }
 0xba5   :  { %v7446_v61 = vpack.c.bf16 %v2178_v20, %v2178_v20 }
 0xba7   :  { %2228 = vrot.lane.b32.xlu0 %v7446_v61, %s6424_s6 }
 0xbaa   :  { %v2179_v22 = vpop.f32.mrf.mxu2 }
 0xbab   :  { %v2180_v6 = vadd.f32 %v5958_v19, %v2179_v22 }
 0xbad   :  { %v7450_v55 = vpack.c.bf16 %v2180_v6, %v2180_v6 }
 0xbaf   :  { %2230 = vrot.lane.b32.xlu1 %v7450_v55, %s6424_s6 }
 0xbdc   :  { %v2182_v5 = vpop.f32.mrf.mxu2 }
 0xbdd   :  { %v2183_v0 = vadd.f32 %v5958_v19, %v2182_v5 }
 0xbdf   :  { %v7454_v40 = vpack.c.bf16 %v2183_v0, %v2183_v0 }
 0xbe1   :  { %2232 = vrot.lane.b32.xlu1 %v7454_v40, %s6424_s6 }
 0xbe4   :  { %v2184_v44 = vpop.f32.mrf.mxu2 }
 0xbe5   :  { %v2185_v30 = vadd.f32 %v5958_v19, %v2184_v44 }
 0xbe7   :  { %v7458_v62 = vpack.c.bf16 %v2185_v30, %v2185_v30  ;;  %v2242_v30 = vunpack.c.l.b16 %v7454_v40 }
 0xbe9   :  { %2234 = vrot.lane.b32.xlu0 %v7458_v62, %s6424_s6  ;;  %v2243_v0 = vunpack.c.l.b16 %v7458_v62 }
 0xc08   :  { %v2187_v37 = vpop.f32.mrf.mxu2 }
 0xc09   :  { %v2188_v27 = vadd.f32 %v5958_v19, %v2187_v37 }
 0xc0b   :  { %v2196_v3 = vpack.c.bf16 %v2188_v27, %v2188_v27 }
 0xc0d   :  { %2212 = vrot.lane.b32.xlu2 %v2196_v3, %s6426_s15  ;;  %2236 = vrot.lane.b32.xlu0 %v2196_v3, %s6424_s6  ;;  %v2244_v16 = vunpack.c.l.b16 %v2196_v3 }
 0xc0e   :  { %2224 = vrot.lane.b32.xlu1 %v2196_v3, %s6425_s14 }
 0xc10   :  { %v2189_v23 = vpop.f32.mrf.mxu2 }
 0xc11   :  { %v2190_v10 = vadd.f32 %v5958_v19, %v2189_v23  ;;  %v7519_v23 = vpack.c.b16 %v2243_v0, %v2242_v30 }
 0xc13   :  { %v2197_v21 = vpack.c.bf16 %v2190_v10, %v2190_v10  ;;  %v2241_v10 = vunpack.c.l.b16 %v7450_v55 }
 0xc15   :  { %2238 = vrot.lane.b32.xlu2 %v2197_v21, %s6424_s6  ;;  %2214 = vrot.lane.b32.xlu0 %v2197_v21, %s6426_s15  ;;  %v2245_v54 = vunpack.c.l.b16 %v2197_v21 }
 0xc16   :  { %2220 = vrot.lane.b32.xlu1 %v7454_v40, %s6425_s14 }
 0xc17   :  { %v7469_v24 = vpack.c.b16 %v2245_v54, %v2244_v16 }
 0xc19   :  { %v2229_v29 = vpop.permute.xlu0 %2228 }
 0xc1a   :  { %v2411_v45 = vunpack.c.l.b16 %v2229_v29 }
 0xc1d   :  { %2210 = vrot.lane.b32.xlu0 %v7458_v62, %s6426_s15  ;;  %2208 = vrot.lane.b32.xlu2 %v7454_v40, %s6426_s15 }
 0xc1e   :  { %2206 = vrot.lane.b32.xlu1 %v7450_v55, %s6426_s15 }
 0xc21   :  { %v2231_v15 = vpop.permute.xlu1 %2230 }
 0xc22   :  { %v2412_v36 = vunpack.c.l.b16 %v2231_v15 }
 0xc24   :  { %v7490_v31 = vpack.c.b16 %v2412_v36, %v2411_v45 }
 0xc25   :  { %2204 = vrot.lane.b32.xlu0 %v7446_v61, %s6426_s15  ;;  %2226 = vrot.lane.b32.xlu2 %v2197_v21, %s6425_s14 }
 0xc2d   :  { %2218 = vrot.lane.b32.xlu0 %v7450_v55, %s6425_s14  ;;  %2222 = vrot.lane.b32.xlu2 %v7458_v62, %s6425_s14  ;;  %v2240_v62 = vunpack.c.l.b16 %v7446_v61 }
 0xc2f   :  { %v7528_v21 = vpack.c.b16 %v2241_v10, %v2240_v62 }
 0xc35   :  { %2216 = vrot.lane.b32.xlu2 %v7446_v61, %s6425_s14 }
 0xc53   :  { %v2233_v4 = vpop.permute.xlu1 %2232 }
 0xc54   :  { %v2413_v49 = vunpack.c.l.b16 %v2233_v4 }
 0xc5b   :  { %v2235_v17 = vpop.permute.xlu0 %2234 }
 0xc5c   :  { %v2414_v39 = vunpack.c.l.b16 %v2235_v17 }
 0xc5e   :  { %v7486_v12 = vpack.c.b16 %v2414_v39, %v2413_v49 }
 0xc60   :  { %2422 = vrot.lane.b32.xlu2 %v7486_v12, %s6427_s16 }
 0xc67   :  { %v2213_v35 = vpop.permute.xlu2 %2212 }
 0xc68   :  { %2420 = vrot.lane.b32.xlu2 %v7490_v31, %s6427_s16  ;;  %v2301_v43 = vunpack.c.l.b16 %v2213_v35 }
 0xc6f   :  { %v2239_v47 = vpop.permute.xlu2 %2238 }
 0xc70   :  { %v2416_v1 = vunpack.c.l.b16 %v2239_v47 }
 0xc77   :  { %v2209_v9 = vpop.permute.xlu2 %2208 }
 0xc78   :  { %v2299_v48 = vunpack.c.l.b16 %v2209_v9 }
 0xc7f   :  { %v2237_v60 = vpop.permute.xlu0 %2236  ;;  %v2227_v13 = vpop.permute.xlu2 %2226 }
 0xc80   :  { %v2415_v8 = vunpack.c.l.b16 %v2237_v60  ;;  %v2225_v7 = vpop.permute.xlu1 %2224  ;;  %v2359_v14 = vunpack.c.l.b16 %v2227_v13 }
 0xc81   :  { %v2358_v18 = vunpack.c.l.b16 %v2225_v7 }
 0xc82   :  { %v7494_v52 = vpack.c.b16 %v2416_v1, %v2415_v8 }
 0xc83   :  { %v7498_v42 = vpack.c.b16 %v2359_v14, %v2358_v18 }
 0xc84   :  { %2424 = vrot.lane.b32.xlu1 %v7494_v52, %s6427_s16 }
 0xc87   :  { %v2215_v25 = vpop.permute.xlu0 %2214  ;;  %v2223_v2 = vpop.permute.xlu2 %2222 }
 0xc88   :  { %v2302_v59 = vunpack.c.l.b16 %v2215_v25  ;;  %v2221_v38 = vpop.permute.xlu1 %2220  ;;  %v2357_v26 = vunpack.c.l.b16 %v2223_v2 }
 0xc89   :  { %v2356_v50 = vunpack.c.l.b16 %v2221_v38 }
 0xc8a   :  { %v7500_v33 = vpack.c.b16 %v2302_v59, %v2301_v43 }
 0xc8b   :  { %v7506_v57 = vpack.c.b16 %v2357_v26, %v2356_v50 }
 0xc8c   :  { %2367 = vrot.lane.b32.xlu1 %v7498_v42, %s6427_s16  ;;  %2310 = vrot.lane.b32.xlu0 %v7500_v33, %s6427_s16 }
 0xc8f   :  { %v2211_v51 = vpop.permute.xlu0 %2210  ;;  %v2217_v5 = vpop.permute.xlu2 %2216 }
 0xc90   :  { %v2300_v46 = vunpack.c.l.b16 %v2211_v51  ;;  %v2207_v19 = vpop.permute.xlu1 %2206  ;;  %v2354_v37 = vunpack.c.l.b16 %v2217_v5 }
 0xc91   :  { %v2298_v20 = vunpack.c.l.b16 %v2207_v19 }
 0xc92   :  { %v7508_v56 = vpack.c.b16 %v2300_v46, %v2299_v48  ;;  %v7581_v46 = vld [vmem:[%s6819_s21] sm:$0xff] }
 0xc94   :  { %2365 = vrot.lane.b32.xlu1 %v7506_v57, %s6427_s16  ;;  %2308 = vrot.lane.b32.xlu0 %v7508_v56, %s6427_s16 }
 0xc97   :  { %v2205_v58 = vpop.permute.xlu0 %2204 }
 0xc98   :  { %v2297_v22 = vunpack.c.l.b16 %v2205_v58 }
 0xc9a   :  { %v2303_v6 = vpack.c.b16 %v2298_v20, %v2297_v22  ;;  %v7595_v22 = vld [vmem:[%s6819_s21 + $0x8] sm:$0xff] }
 0xc9c   :  { %2253 = vrot.lane.b32.xlu1 %v7469_v24, %s6427_s16  ;;  %2306 = vrot.lane.b32.xlu2 %v2303_v6, %s6427_s16 }
 0xc9f   :  { %v2219_v44 = vpop.permute.xlu0 %2218 }
 0xca0   :  { %v2355_v27 = vunpack.c.l.b16 %v2219_v44 }
 0xca2   :  { %v2360_v3 = vpack.c.b16 %v2355_v27, %v2354_v37  ;;  %v7605_v27 = vld [vmem:[%s6819_s21 + $0x10] sm:$0xff] }
 0xca4   :  { %2992 = vrot.lane.b32.xlu1 %v7486_v12, %s6428_s17  ;;  %2251 = vrot.lane.b32.xlu2 %v7519_v23, %s6427_s16 }
 0xca5   :  { %2363 = vrot.lane.b32.xlu0 %v2360_v3, %s6427_s16 }
 0xcac   :  { %2990 = vrot.lane.b32.xlu1 %v7490_v31, %s6428_s17  ;;  %2878 = vrot.lane.b32.xlu2 %v7508_v56, %s6428_s17 }
 0xcad   :  { %2249 = vrot.lane.b32.xlu0 %v7528_v21, %s6427_s16 }
 0xcb4   :  { %2876 = vrot.lane.b32.xlu1 %v2303_v6, %s6428_s17  ;;  %2994 = vrot.lane.b32.xlu2 %v7494_v52, %s6428_s17 }
 0xcb5   :  { %2935 = vrot.lane.b32.xlu0 %v7506_v57, %s6428_s17 }
 0xcba   :  { %v2423_v61 = vpop.permute.xlu2 %2422 }
 0xcbb   :  { %v2439_v49 = vsel %vm684_vm14, %v2423_v61, 0 }
 0xcbd   :  { %2933 = vrot.lane.b32.xlu0 %v2360_v3, %s6428_s17 }
 0xcc2   :  { %v2421_v55 = vpop.permute.xlu2 %2420 }
 0xcc3   :  { %v2436_v9 = vsel %vm684_vm14, %v2421_v55, 0 }
 0xcc5   :  { %2880 = vrot.lane.b32.xlu0 %v7500_v33, %s6428_s17 }
 0xccd   :  { %2937 = vrot.lane.b32.xlu0 %v7498_v42, %s6428_s17 }
 0xcf6   :  { %v2425_v40 = vpop.permute.xlu1 %2424  ;;  %v2307_v16 = vpop.permute.xlu2 %2306 }
 0xcf7   :  { %v2442_v54 = vsel %vm684_vm14, %v2425_v40, 0  ;;  %v2322_v7 = vsel %vm684_vm14, %v2307_v16, 0 }
 0xcf8   :  { %2449 = vmatpush.bf16.xpose.msra.mxu2 %v2442_v54 }
 0xcfe   :  { %v2368_v15 = vpop.permute.xlu1 %2367  ;;  %v2252_v29 = vpop.permute.xlu2 %2251 }
 0xcff   :  { %v2385_v4 = vsel %vm684_vm14, %v2368_v15, 0  ;;  %v2311_v17 = vpop.permute.xlu0 %2310  ;;  %v2268_v25 = vsel %vm684_vm14, %v2252_v29, 0  ;;  %v7620_v29 = vld [vmem:[%s6819_s21 + $0x18] sm:$0xff] }
 0xd00   :  { %v2328_v39 = vsel %vm684_vm14, %v2311_v17, 0  ;;  %2392 = vmatpush.bf16.xpose.msra.mxu1 %v2385_v4  ;;  %2450 = vmatpush.bf16.xpose.msra.mxu2 %v2439_v49 }
 0xd01   :  { %2335 = vmatpush.bf16.xpose.msra.mxu0 %v2328_v39 }
 0xd06   :  { %v2366_v36 = vpop.permute.xlu1 %2365  ;;  %v2879_v45 = vpop.permute.xlu2 %2878 }
 0xd07   :  { %v2309_v35 = vpop.permute.xlu0 %2308  ;;  %v2382_v47 = vsel %vm684_vm14, %v2366_v36, 0 }
 0xd08   :  { %v2325_v60 = vsel %vm684_vm14, %v2309_v35, 0  ;;  %2393 = vmatpush.bf16.xpose.msra.mxu1 %v2382_v47  ;;  %2451 = vmatpush.bf16.xpose.msra.mxu2 %v2436_v9 }
 0xd09   :  { %2336 = vmatpush.bf16.xpose.msra.mxu0 %v2325_v60 }
 0xd0e   :  { %v2254_v1 = vpop.permute.xlu1 %2253  ;;  %v2995_v8 = vpop.permute.xlu2 %2994 }
 0xd0f   :  { %v2271_v13 = vsel %vm684_vm14, %v2254_v1, 0  ;;  %5477 = vmatmul.msk.bf16.vlgmr.msra.gmra.mxu2 %vm684_vm14, %v7490_v31 }
 0xd10   :  { %3013 = vmatpush.bf16.msrb.mxu2 %v2995_v8  ;;  %2278 = vmatpush.bf16.xpose.msra.mxu3 %v2271_v13 }
 0xd11   :  { %2337 = vmatpush.bf16.xpose.msra.mxu0 %v2322_v7 }
 0xd16   :  { %v2993_v14 = vpop.permute.xlu1 %2992 }
 0xd17   :  { %v2364_v18 = vpop.permute.xlu0 %2363  ;;  %3014 = vmatpush.bf16.msrb.mxu2 %v2993_v14 }
 0xd18   :  { %5471 = vmatmul.msk.bf16.vlgmr.msra.gmra.mxu0 %vm684_vm14, %v2303_v6  ;;  %2279 = vmatpush.bf16.xpose.msra.mxu3 %v2268_v25  ;;  %v2379_v43 = vsel %vm684_vm14, %v2364_v18, 0  ;;  %v6398_v18 = vld [vmem:[%s6819_s21 + $0x20] sm:$0xff] }
 0xd19   :  { %2394 = vmatpush.bf16.xpose.msra.mxu1 %v2379_v43 }
 0xd1e   :  { %v2991_v59 = vpop.permute.xlu1 %2990 }
 0xd1f   :  { %v2250_v2 = vpop.permute.xlu0 %2249  ;;  %5478 = vmatmul.msk.bf16.gmra.mxu2 %vm684_vm14, %v7486_v12 }
 0xd20   :  { %5474 = vmatmul.msk.bf16.vlgmr.msra.gmra.mxu1 %vm684_vm14, %v2360_v3  ;;  %3015 = vmatpush.bf16.msrb.mxu2 %v2991_v59  ;;  %v2265_v31 = vsel %vm684_vm14, %v2250_v2, 0 }
 0xd21   :  { %2280 = vmatpush.bf16.xpose.msra.mxu3 %v2265_v31 }
 0xd26   :  { %v2877_v51 = vpop.permute.xlu1 %2876 }
 0xd27   :  { %v2936_v38 = vpop.permute.xlu0 %2935 }
 0xd28   :  { %5468 = vmatmul.msk.bf16.vlgmr.msra.gmra.mxu3 %vm684_vm14, %v7528_v21  ;;  %5472 = vmatmul.msk.bf16.gmra.mxu0 %vm684_vm14, %v7508_v56 }
 0xd2f   :  { %v2934_v26 = vpop.permute.xlu0 %2933  ;;  %5479 = vmatmul.msk.bf16.gmra.mxu2 %vm684_vm14, %v7494_v52 }
 0xd30   :  { %5475 = vmatmul.msk.bf16.gmra.mxu1 %vm684_vm14, %v7506_v57 }
 0xd37   :  { %v2881_v12 = vpop.permute.xlu0 %2880 }
 0xd38   :  { %5469 = vmatmul.msk.bf16.gmra.mxu3 %vm684_vm14, %v7519_v23  ;;  %5473 = vmatmul.msk.bf16.gmra.mxu0 %vm684_vm14, %v7500_v33 }
 0xd39   :  { %2899 = vmatpush.bf16.msrb.mxu0 %v2881_v12 }
 0xd3d   :  { %2900 = vmatpush.bf16.msrb.mxu0 %v2879_v45 }
 0xd3f   :  { %v2938_v50 = vpop.permute.xlu0 %2937 }
 0xd40   :  { %5476 = vmatmul.msk.bf16.gmra.mxu1 %vm684_vm14, %v7498_v42 }
 0xd41   :  { %2901 = vmatpush.bf16.msrb.mxu0 %v2877_v51  ;;  %2956 = vmatpush.bf16.msrb.mxu1 %v2938_v50 }
 0xd45   :  { %2957 = vmatpush.bf16.msrb.mxu1 %v2936_v38 }
 0xd48   :  { %5470 = vmatmul.msk.bf16.gmra.mxu3 %vm684_vm14, %v7469_v24 }
 0xd49   :  { %2958 = vmatpush.bf16.msrb.mxu1 %v2934_v26 }
 0xd92   :  { %v2453_v52 = vpop.f32.mrf.mxu2 }
 0xd93   :  { %v2486_v48 = vmul.f32 0.35355338, %v2453_v52 }
 0xd95   :  { %v7584_v33 = vadd.f32 %v7581_v46, %v2486_v48  ;;  %v7586_v57 = vpop.f32.mrf.mxu0 }
 0xd97   :  { %v2570_v42 = vsel %vm946_vm15, %v7584_v33, -inf }
 0xd98   :  { %2571 = vmax.xlane.f32.xlu1 %v2570_v42 }
 0xd9a   :  { %v7590_v56 = vpop.f32.mrf.mxu2 }
 0xd9d   :  { %v2341_v19 = vpop.f32.mrf.mxu0  ;;  %v7592_v58 = vpop.f32.mrf.mxu1 }
 0xd9e   :  { %v2475_v20 = vmul.f32 0.35355338, %v2341_v19 }
 0xda0   :  { %v7598_v6 = vadd.f32 %v7595_v22, %v2475_v20 }
 0xda2   :  { %v2458_v5 = vpop.f32.mrf.mxu2  ;;  %v2537_v0 = vsel %vm946_vm15, %v7598_v6, -inf }
 0xda3   :  { %v2488_v44 = vmul.f32 0.35355338, %v2458_v5  ;;  %2538 = vmax.xlane.f32.xlu1 %v2537_v0  ;;  %v7656_v5 = vld [vmem:[%s6819_s21 + $0x28] sm:$0xff] }
 0xda5   :  { %v7602_v30 = vpop.f32.mrf.mxu0  ;;  %v2398_v37 = vpop.f32.mrf.mxu1  ;;  %v7608_v3 = vadd.f32 %v7605_v27, %v2488_v44  ;;  %v2474_v44 = vmul.f32 0.35355338, %v7586_v57 }
 0xda7   :  { %v2576_v10 = vsel %vm946_vm15, %v7608_v3, -inf }
 0xdaa   :  { %v7627_v36 = vpop.f32.mrf.mxu2 }
 0xdab   :  { %2577 = vmax.xlane.f32.xlu1 %v2576_v10  ;;  %v2282_v62 = vpop.f32.mrf.mxu3 }
 0xdac   :  { %v2468_v61 = vmul.f32 0.35355338, %v2282_v62 }
 0xdad   :  { %v2346_v55 = vpop.f32.mrf.mxu0  ;;  %v7612_v40 = vpop.f32.mrf.mxu1 }
 0xdae   :  { %v7615_v16 = vadd.f32 %v7581_v46, %v2468_v61  ;;  %v2477_v54 = vmul.f32 0.35355338, %v2346_v55  ;;  %v7667_v55 = vadd.f32 %v7581_v46, %v2474_v44  ;;  %v2489_v44 = vmul.f32 0.35355338, %v7627_v36 }
 0xdb0   :  { %v2516_v15 = vsel %vm946_vm15, %v7615_v16, -inf  ;;  %v7623_v4 = vadd.f32 %v7620_v29, %v2477_v54  ;;  %v2534_v57 = vsel %vm946_vm15, %v7667_v55, -inf }
 0xdb1   :  { %2517 = vmax.xlane.f32.xlu2 %v2516_v15 }
 0xdb2   :  { %v2543_v17 = vsel %vm946_vm15, %v7623_v4, -inf  ;;  %v2463_v14 = vpop.f32.mrf.mxu2 }
 0xdb3   :  { %2544 = vmax.xlane.f32.xlu1 %v2543_v17  ;;  %v2284_v49 = vpop.f32.mrf.mxu3  ;;  %v2490_v59 = vmul.f32 0.35355338, %v2463_v14  ;;  %v2480_v17 = vmul.f32 0.35355338, %v7592_v58  ;;  %v2482_v14 = vmul.f32 0.35355338, %v7612_v40 }
 0xdb4   :  { %v2469_v39 = vmul.f32 0.35355338, %v2284_v49  ;;  %v2481_v49 = vmul.f32 0.35355338, %v2398_v37 }
 0xdb5   :  { %v2403_v45 = vpop.f32.mrf.mxu1  ;;  %v2349_v1 = vpop.f32.mrf.mxu0  ;;  %v7644_v26 = vadd.f32 %v6398_v18, %v2490_v59  ;;  %v7701_v59 = vadd.f32 %v7605_v27, %v2482_v14 }
 0xdb6   :  { %v7630_v35 = vadd.f32 %v7595_v22, %v2469_v39 }
 0xdb7   :  { %v2582_v48 = vsel %vm946_vm15, %v7644_v26, -inf  ;;  %v2558_v40 = vsel %vm946_vm15, %v7701_v59, -inf }
 0xdb8   :  { %v2519_v47 = vsel %vm946_vm15, %v7630_v35, -inf }
 0xdb9   :  { %2520 = vmax.xlane.f32.xlu0 %v2519_v47  ;;  %v7678_v47 = vadd.f32 %v7581_v46, %v2480_v17 }
 0xdbb   :  { %v2287_v9 = vpop.f32.mrf.mxu3  ;;  %v2552_v37 = vsel %vm946_vm15, %v7678_v47, -inf }
 0xdbc   :  { %v2470_v60 = vmul.f32 0.35355338, %v2287_v9  ;;  %v7681_v9 = vadd.f32 %v7595_v22, %v2481_v49 }
 0xdbd   :  { %v2406_v8 = vpop.f32.mrf.mxu1  ;;  %v2351_v50 = vpop.f32.mrf.mxu0 }
 0xdbe   :  { %v7635_v13 = vadd.f32 %v7605_v27, %v2470_v60  ;;  %v2484_v7 = vmul.f32 0.35355338, %v2406_v8  ;;  %v2479_v52 = vmul.f32 0.35355338, %v2351_v50  ;;  %v2487_v60 = vmul.f32 0.35355338, %v7590_v56 }
 0xdbf   :  { %v2476_v8 = vmul.f32 0.35355338, %v7602_v30  ;;  %v2555_v58 = vsel %vm946_vm15, %v7681_v9, -inf }
 0xdc0   :  { %v7638_v25 = vadd.f32 %v6398_v18, %v2484_v7  ;;  %v2522_v43 = vsel %vm946_vm15, %v7635_v13, -inf  ;;  %v7659_v0 = vadd.f32 %v7656_v5, %v2479_v52  ;;  %v7693_v46 = vadd.f32 %v7595_v22, %v2487_v60  ;;  %v2465_v60 = vpop.f32.mrf.mxu2 }
 0xdc1   :  { %2523 = vmax.xlane.f32.xlu2 %v2522_v43  ;;  %v7690_v7 = vadd.f32 %v7605_v27, %v2476_v8  ;;  %v2483_v43 = vmul.f32 0.35355338, %v2403_v45 }
 0xdc2   :  { %v2564_v2 = vsel %vm946_vm15, %v7638_v25, -inf  ;;  %v2549_v62 = vsel %vm946_vm15, %v7659_v0, -inf  ;;  %v2573_v30 = vsel %vm946_vm15, %v7693_v46, -inf }
 0xdc3   :  { %2565 = vmax.xlane.f32.xlu1 %v2564_v2  ;;  %v2289_v31 = vpop.f32.mrf.mxu3  ;;  %v2540_v56 = vsel %vm946_vm15, %v7690_v7, -inf  ;;  %v7704_v2 = vadd.f32 %v7620_v29, %v2483_v43 }
 0xdc4   :  { %v2471_v38 = vmul.f32 0.35355338, %v2289_v31  ;;  %v2478_v31 = vmul.f32 0.35355338, %v2349_v1 }
 0xdc5   :  { %v2561_v22 = vsel %vm946_vm15, %v7704_v2, -inf }
 0xdc6   :  { %v7647_v12 = vadd.f32 %v7620_v29, %v2471_v38  ;;  %v7710_v45 = vadd.f32 %v6398_v18, %v2478_v31 }
 0xdc8   :  { %v2525_v51 = vsel %vm946_vm15, %v7647_v12, -inf  ;;  %v2546_v38 = vsel %vm946_vm15, %v7710_v45, -inf }
 0xdc9   :  { %2526 = vmax.xlane.f32.xlu0 %v2525_v51 }
 0xdcb   :  { %2583 = vmax.xlane.f32.xlu1 %v2582_v48  ;;  %v2292_v42 = vpop.f32.mrf.mxu3 }
 0xdcc   :  { %v2472_v19 = vmul.f32 0.35355338, %v2292_v42 }
 0xdce   :  { %v7653_v20 = vadd.f32 %v6398_v18, %v2472_v19 }
 0xdd0   :  { %v2528_v10 = vsel %vm946_vm15, %v7653_v20, -inf }
 0xdd1   :  { %2529 = vmax.xlane.f32.xlu0 %v2528_v10 }
 0xdd3   :  { %2550 = vmax.xlane.f32.xlu1 %v2549_v62  ;;  %v2294_v61 = vpop.f32.mrf.mxu3 }
 0xdd4   :  { %v2473_v54 = vmul.f32 0.35355338, %v2294_v61  ;;  %v2408_v61 = vpop.f32.mrf.mxu1 }
 0xdd6   :  { %v7670_v15 = vadd.f32 %v7656_v5, %v2473_v54  ;;  %v2485_v54 = vmul.f32 0.35355338, %v2408_v61 }
 0xdd8   :  { %v2531_v39 = vsel %vm946_vm15, %v7670_v15, -inf }
 0xdd9   :  { %2535 = vmax.xlane.f32.xlu0 %v2534_v57  ;;  %2532 = vmax.xlane.f32.xlu2 %v2531_v39  ;;  %v7737_v39 = vadd.f32 %v7656_v5, %v2485_v54 }
 0xde1   :  { %2556 = vmax.xlane.f32.xlu0 %v2555_v58  ;;  %2553 = vmax.xlane.f32.xlu2 %v2552_v37  ;;  %v2491_v58 = vmul.f32 0.35355338, %v2465_v60 }
 0xde9   :  { %2541 = vmax.xlane.f32.xlu0 %v2540_v56  ;;  %2574 = vmax.xlane.f32.xlu2 %v2573_v30  ;;  %v7745_v56 = vadd.f32 %v7656_v5, %v2491_v58 }
 0xdf1   :  { %2562 = vmax.xlane.f32.xlu0 %v2561_v22  ;;  %2559 = vmax.xlane.f32.xlu2 %v2558_v40  ;;  %v2585_v22 = vsel %vm946_vm15, %v7745_v56, -inf }
 0xdf9   :  { %2547 = vmax.xlane.f32.xlu0 %v2546_v38 }
 0xe0b   :  { %v2572_v10 = vpop.xlane.xlu1 %2571 }
 0xe0c   :  { %v2606_v5 = vsub.f32 %v7584_v33, %v2572_v10 }
 0xe16   :  { %v2539_v49 = vpop.xlane.xlu1 %2538 }
 0xe17   :  { %v2595_v8 = vsub.f32 %v7598_v6, %v2539_v49 }
 0xe19   :  { %v2626_v37 = vmul.f32 1.442695, %v2595_v8 }
 0xe1e   :  { %v2578_v6 = vpop.xlane.xlu1 %2577 }
 0xe24   :  { %v2518_v27 = vpop.xlane.xlu2 %2517 }
 0xe25   :  { %v2588_v50 = vsub.f32 %v7615_v16, %v2518_v27 }
 0xe27   :  { %v2612_v51 = vmul.f32 1.442695, %v2588_v50 }
 0xe29   :  { %6134 = vpow2.f32 %v2612_v51 }
 0xe2c   :  { %v2521_v1 = vpop.xlane.xlu0 %2520 }
 0xe2d   :  { %v2589_v52 = vsub.f32 %v7630_v35, %v2521_v1  ;;  %v7728_v35 = vadd.f32 %v7620_v29, %v2489_v44  ;;  %v2567_v29 = vsel %vm946_vm15, %v7737_v39, -inf  ;;  %v2648_v44 = vmul.f32 1.442695, %v2606_v5 }
 0xe2f   :  { %v7716_v48 = vpop.eup %6134  ;;  %v2614_v42 = vmul.f32 1.442695, %v2589_v52  ;;  %v2579_v17 = vsel %vm946_vm15, %v7728_v35, -inf }
 0xe30   :  { %v2660_v19 = vsel %vm946_vm15, %v7716_v48, 0.0 }
 0xe31   :  { %6136 = vpow2.f32 %v2614_v42  ;;  %2661 = vadd.xlane.f32.xlu2 %v2660_v19 }
 0xe32   :  { %6138 = vpow2.f32 %v2626_v37 }
 0xe34   :  { %v7732_v57 = vpop.xlane.xlu2 %2523 }
 0xe37   :  { %v7720_v18 = vpop.eup %6136 }
 0xe38   :  { %v2663_v16 = vsel %vm946_vm15, %v7720_v18, 0.0  ;;  %v7750_v27 = vpop.eup %6138 }
 0xe39   :  { %2664 = vadd.xlane.f32.xlu2 %v2663_v16  ;;  %v2681_v42 = vsel %vm946_vm15, %v7750_v27, 0.0 }
 0xe3c   :  { %v7725_v62 = vpop.xlane.xlu0 %2526 }
 0xe41   :  { %2580 = vmax.xlane.f32.xlu2 %v2579_v17 }
 0xe44   :  { %v7734_v36 = vpop.xlane.xlu0 %2529 }
 0xe49   :  { %2568 = vmax.xlane.f32.xlu2 %v2567_v29 }
 0xe4c   :  { %v7742_v14 = vpop.xlane.xlu2 %2532  ;;  %v2536_v43 = vpop.xlane.xlu0 %2535 }
 0xe4d   :  { %v2594_v30 = vsub.f32 %v7667_v55, %v2536_v43 }
 0xe4f   :  { %v2624_v31 = vmul.f32 1.442695, %v2594_v30 }
 0xe51   :  { %2586 = vmax.xlane.f32.xlu2 %v2585_v22  ;;  %6140 = vpow2.f32 %v2624_v31  ;;  %v2608_v31 = vsub.f32 %v7608_v3, %v2578_v6 }
 0xe53   :  { %v2652_v3 = vmul.f32 1.442695, %v2608_v31  ;;  %v2590_v31 = vsub.f32 %v7635_v13, %v7732_v57 }
 0xe54   :  { %v2554_v40 = vpop.xlane.xlu2 %2553  ;;  %v2557_v38 = vpop.xlane.xlu0 %2556 }
 0xe55   :  { %v2600_v50 = vsub.f32 %v7678_v47, %v2554_v40  ;;  %v2601_v51 = vsub.f32 %v7681_v9, %v2557_v38  ;;  %v2545_v9 = vpop.xlane.xlu1 %2544 }
 0xe57   :  { %v2636_v1 = vmul.f32 1.442695, %v2600_v50  ;;  %v2638_v55 = vmul.f32 1.442695, %v2601_v51  ;;  %v7755_v52 = vpop.eup %6140 }
 0xe58   :  { %v2678_v19 = vsel %vm946_vm15, %v7755_v52, 0.0 }
 0xe59   :  { %6142 = vpow2.f32 %v2636_v1  ;;  %2682 = vadd.xlane.f32.xlu2 %v2681_v42  ;;  %2679 = vadd.xlane.f32.xlu1 %v2678_v19  ;;  %v2597_v1 = vsub.f32 %v7623_v4, %v2545_v9 }
 0xe5a   :  { %6144 = vpow2.f32 %v2638_v55 }
 0xe5b   :  { %6146 = vpow2.f32 %v2648_v44  ;;  %v2630_v44 = vmul.f32 1.442695, %v2597_v1 }
 0xe5c   :  { %v2575_v47 = vpop.xlane.xlu2 %2574  ;;  %v2542_v16 = vpop.xlane.xlu0 %2541 }
 0xe5d   :  { %v2607_v33 = vsub.f32 %v7693_v46, %v2575_v47  ;;  %v2596_v10 = vsub.f32 %v7690_v7, %v2542_v16  ;;  %v2566_v29 = vpop.xlane.xlu1 %2565 }
 0xe5e   :  { %v2604_v50 = vsub.f32 %v7638_v25, %v2566_v29 }
 0xe5f   :  { %v7763_v61 = vpop.eup %6142  ;;  %v2650_v54 = vmul.f32 1.442695, %v2607_v33  ;;  %v2628_v17 = vmul.f32 1.442695, %v2596_v10 }
 0xe60   :  { %v7765_v49 = vpop.eup %6144  ;;  %v2696_v60 = vsel %vm946_vm15, %v7763_v61, 0.0 }
 0xe61   :  { %6148 = vpow2.f32 %v2650_v54  ;;  %2697 = vadd.xlane.f32.xlu0 %v2696_v60  ;;  %v2699_v8 = vsel %vm946_vm15, %v7765_v49, 0.0  ;;  %v7771_v7 = vpop.eup %6146 }
 0xe62   :  { %6150 = vpow2.f32 %v2628_v17  ;;  %2700 = vadd.xlane.f32.xlu1 %v2699_v8  ;;  %v2714_v51 = vsel %vm946_vm15, %v7771_v7, 0.0 }
 0xe64   :  { %v2560_v46 = vpop.xlane.xlu2 %2559  ;;  %v2563_v58 = vpop.xlane.xlu0 %2562 }
 0xe65   :  { %v2602_v37 = vsub.f32 %v7701_v59, %v2560_v46  ;;  %v2603_v43 = vsub.f32 %v7704_v2, %v2563_v58  ;;  %v2644_v2 = vmul.f32 1.442695, %v2604_v50  ;;  %v2584_v19 = vpop.xlane.xlu1 %2583  ;;  %v2593_v50 = vsub.f32 %v7670_v15, %v7742_v14 }
 0xe67   :  { %v7775_v30 = vpop.eup %6148  ;;  %v2640_v22 = vmul.f32 1.442695, %v2602_v37  ;;  %v2642_v40 = vmul.f32 1.442695, %v2603_v43 }
 0xe68   :  { %v7778_v38 = vpop.eup %6150  ;;  %v2717_v5 = vsel %vm946_vm15, %v7775_v30, 0.0 }
 0xe69   :  { %6152 = vpow2.f32 %v2640_v22  ;;  %2715 = vadd.xlane.f32.xlu0 %v2714_v51  ;;  %v2684_v59 = vsel %vm946_vm15, %v7778_v38, 0.0  ;;  %v2616_v22 = vmul.f32 1.442695, %v2590_v31  ;;  %v2622_v51 = vmul.f32 1.442695, %v2593_v50 }
 0xe6a   :  { %6154 = vpow2.f32 %v2642_v40  ;;  %2718 = vadd.xlane.f32.xlu1 %v2717_v5  ;;  %2685 = vadd.xlane.f32.xlu2 %v2684_v59 }
 0xe6b   :  { %6156 = vpow2.f32 %v2652_v3  ;;  %v2610_v3 = vsub.f32 %v7644_v26, %v2584_v19 }
 0xe6c   :  { %6158 = vpow2.f32 %v2644_v2  ;;  %v2548_v16 = vpop.xlane.xlu0 %2547 }
 0xe6d   :  { %6160 = vpow2.f32 %v2630_v44  ;;  %v2598_v10 = vsub.f32 %v7710_v45, %v2548_v16  ;;  %v2551_v17 = vpop.xlane.xlu1 %2550  ;;  %v2656_v57 = vmul.f32 1.442695, %v2610_v3 }
 0xe6e   :  { %v2599_v8 = vsub.f32 %v7659_v0, %v2551_v17 }
 0xe6f   :  { %v7787_v6 = vpop.eup %6152  ;;  %v2632_v54 = vmul.f32 1.442695, %v2598_v10 }
 0xe70   :  { %v7789_v25 = vpop.eup %6154  ;;  %v2702_v55 = vsel %vm946_vm15, %v7787_v6, 0.0  ;;  %v2634_v45 = vmul.f32 1.442695, %v2599_v8 }
 0xe71   :  { %v2705_v42 = vsel %vm946_vm15, %v7789_v25, 0.0  ;;  %v7796_v47 = vpop.eup %6156  ;;  %6162 = vpow2.f32 %v2632_v54 }
 0xe72   :  { %2703 = vadd.xlane.f32.xlu2 %v2702_v55  ;;  %2706 = vadd.xlane.f32.xlu0 %v2705_v42  ;;  %v7798_v33 = vpop.eup %6158  ;;  %v2720_v4 = vsel %vm946_vm15, %v7796_v47, 0.0  ;;  %6164 = vpow2.f32 %v2634_v45 }
 0xe73   :  { %v2708_v9 = vsel %vm946_vm15, %v7798_v33, 0.0  ;;  %v7805_v60 = vpop.eup %6160  ;;  %6166 = vpow2.f32 %v2616_v22 }
 0xe74   :  { %v2687_v46 = vsel %vm946_vm15, %v7805_v60, 0.0  ;;  %6168 = vpow2.f32 %v2622_v51 }
 0xe77   :  { %v7810_v58 = vpop.eup %6162 }
 0xe78   :  { %v2690_v29 = vsel %vm946_vm15, %v7810_v58, 0.0  ;;  %v7814_v37 = vpop.eup %6164 }
 0xe79   :  { %v2693_v0 = vsel %vm946_vm15, %v7814_v37, 0.0  ;;  %v7828_v5 = vpop.eup %6166 }
 0xe7a   :  { %2721 = vadd.xlane.f32.xlu2 %v2720_v4  ;;  %2709 = vadd.xlane.f32.xlu0 %v2708_v9  ;;  %v2666_v13 = vsel %vm946_vm15, %v7828_v5, 0.0  ;;  %v7834_v1 = vpop.eup %6168 }
 0xe82   :  { %2688 = vadd.xlane.f32.xlu2 %v2687_v46 }
 0xe8a   :  { %2691 = vadd.xlane.f32.xlu2 %v2690_v29 }
 0xe8e   :  { %2821 = vrot.lane.b32.xlu0 %v7519_v23, %s6428_s17 }
 0xe92   :  { %2694 = vadd.xlane.f32.xlu2 %v2693_v0 }
 0xea4   :  { %v7820_v43 = vpop.xlane.xlu2 %2661 }
 0xeac   :  { %v7824_v40 = vpop.xlane.xlu2 %2664 }
 0xeb4   :  { %v2581_v23 = vpop.xlane.xlu2 %2580 }
 0xeb5   :  { %v2609_v59 = vsub.f32 %v7728_v35, %v2581_v23  ;;  %v2675_v35 = vsel %vm946_vm15, %v7834_v1, 0.0 }
 0xeb7   :  { %v2654_v2 = vmul.f32 1.442695, %v2609_v59 }
 0xeb8   :  { %2667 = vadd.xlane.f32.xlu0 %v2666_v13 }
 0xeb9   :  { %6170 = vpow2.f32 %v2654_v2 }
 0xeba   :  { %6172 = vpow2.f32 %v2656_v57 }
 0xebc   :  { %v2569_v55 = vpop.xlane.xlu2 %2568 }
 0xebd   :  { %v2605_v15 = vsub.f32 %v7737_v39, %v2569_v55 }
 0xebf   :  { %v7837_v14 = vpop.eup %6170  ;;  %v2646_v42 = vmul.f32 1.442695, %v2605_v15 }
 0xec0   :  { %2676 = vadd.xlane.f32.xlu0 %v2675_v35  ;;  %v2723_v26 = vsel %vm946_vm15, %v7837_v14, 0.0  ;;  %v7843_v44 = vpop.eup %6172 }
 0xec1   :  { %6174 = vpow2.f32 %v2646_v42  ;;  %2724 = vadd.xlane.f32.xlu1 %v2723_v26  ;;  %v2726_v4 = vsel %vm946_vm15, %v7843_v44, 0.0 }
 0xec4   :  { %v2587_v19 = vpop.xlane.xlu2 %2586 }
 0xec5   :  { %v2611_v16 = vsub.f32 %v7745_v56, %v2587_v19 }
 0xec7   :  { %v7846_v10 = vpop.eup %6174  ;;  %v2658_v39 = vmul.f32 1.442695, %v2611_v16 }
 0xec8   :  { %v2711_v9 = vsel %vm946_vm15, %v7846_v10, 0.0 }
 0xec9   :  { %6176 = vpow2.f32 %v2658_v39  ;;  %2727 = vadd.xlane.f32.xlu1 %v2726_v4  ;;  %2712 = vadd.xlane.f32.xlu2 %v2711_v9 }
 0xecc   :  { %v2683_v54 = vpop.xlane.xlu2 %2682  ;;  %v2680_v17 = vpop.xlane.xlu1 %2679 }
 0xecd   :  { %6178 = vrcp.f32 %v2683_v54 }
 0xece   :  { %6180 = vrcp.f32 %v2680_v17 }
 0xecf   :  { %v7852_v8 = vpop.eup %6176 }
 0xed0   :  { %v2729_v56 = vsel %vm946_vm15, %v7852_v8, 0.0 }
 0xed1   :  { %2730 = vadd.xlane.f32.xlu2 %v2729_v56 }
 0xed3   :  { %v6179_v46 = vpop.eup %6178 }
 0xed4   :  { %v6181_v45 = vpop.eup %6180  ;;  %v2763_v29 = vmul.f32 %v6179_v46, %v7750_v27  ;;  %v2698_v0 = vpop.xlane.xlu0 %2697 }
 0xed5   :  { %v2762_v31 = vmul.f32 %v6181_v45, %v7755_v52  ;;  %v2701_v22 = vpop.xlane.xlu1 %2700  ;;  %6182 = vrcp.f32 %v2698_v0 }
 0xed6   :  { %v2787_v50 = vpack.c.bf16 %v2763_v29, %v2763_v29  ;;  %6184 = vrcp.f32 %v2701_v22 }
 0xed7   :  { %v2786_v51 = vpack.c.bf16 %v2762_v31, %v2762_v31 }
 0xed8   :  { %v2868_v23 = vunpack.c.l.b16 %v2787_v50 }
 0xed9   :  { %v2867_v59 = vunpack.c.l.b16 %v2786_v51 }
 0xedb   :  { %v6183_v3 = vpop.eup %6182  ;;  %v2873_v2 = vpack.c.b16 %v2868_v23, %v2867_v59 }
 0xedc   :  { %v6185_v13 = vpop.eup %6184  ;;  %v2768_v57 = vmul.f32 %v6183_v3, %v7763_v61  ;;  %v2716_v55 = vpop.xlane.xlu0 %2715 }
 0xedd   :  { %v2769_v15 = vmul.f32 %v6185_v13, %v7765_v49  ;;  %5483 = vmatmul.msk.bf16.vlgmr.msrb.gmra.mxu0 %vm946_vm15, %v2873_v2  ;;  %v2719_v27 = vpop.xlane.xlu1 %2718  ;;  %v2686_v42 = vpop.xlane.xlu2 %2685  ;;  %6186 = vrcp.f32 %v2716_v55 }
 0xede   :  { %v2792_v52 = vpack.c.bf16 %v2768_v57, %v2768_v57  ;;  %6188 = vrcp.f32 %v2719_v27 }
 0xedf   :  { %v2793_v35 = vpack.c.bf16 %v2769_v15, %v2769_v15 }
 0xee0   :  { %v2924_v26 = vunpack.c.l.b16 %v2792_v52 }
 0xee1   :  { %v2925_v19 = vunpack.c.l.b16 %v2793_v35 }
 0xee2   :  { %2823 = vrot.lane.b32.xlu1 %v7469_v24, %s6428_s17 }
 0xee3   :  { %v6187_v16 = vpop.eup %6186  ;;  %v2930_v39 = vpack.c.b16 %v2925_v19, %v2924_v26 }
 0xee4   :  { %v6189_v4 = vpop.eup %6188  ;;  %v2774_v61 = vmul.f32 %v6187_v16, %v7771_v7 }
 0xee5   :  { %v2775_v49 = vmul.f32 %v6189_v4, %v7775_v30  ;;  %v2704_v9 = vpop.xlane.xlu2 %2703  ;;  %5486 = vmatmul.msk.bf16.vlgmr.msrb.gmra.mxu1 %vm946_vm15, %v2930_v39  ;;  %v2707_v54 = vpop.xlane.xlu0 %2706 }
 0xee6   :  { %v2798_v17 = vpack.c.bf16 %v2774_v61, %v2774_v61  ;;  %6190 = vrcp.f32 %v2704_v9 }
 0xee7   :  { %v2799_v56 = vpack.c.bf16 %v2775_v49, %v2775_v49  ;;  %6192 = vrcp.f32 %v2707_v54 }
 0xee8   :  { %v2981_v46 = vunpack.c.l.b16 %v2798_v17  ;;  %6194 = vrcp.f32 %v2686_v42  ;;  %v2592_v42 = vsub.f32 %v7653_v20, %v7734_v36 }
 0xee9   :  { %v2982_v45 = vunpack.c.l.b16 %v2799_v56  ;;  %2819 = vrot.lane.b32.xlu2 %v7528_v21, %s6428_s17 }
 0xeea   :  { %v2620_v19 = vmul.f32 1.442695, %v2592_v42 }
 0xeeb   :  { %v2987_v24 = vpack.c.b16 %v2982_v45, %v2981_v46 }
 0xeec   :  { %v6191_v29 = vpop.eup %6190 }
 0xeed   :  { %v6193_v0 = vpop.eup %6192  ;;  %v2770_v7 = vmul.f32 %v6191_v29, %v7787_v6  ;;  %v2722_v31 = vpop.xlane.xlu2 %2721  ;;  %5489 = vmatmul.msk.bf16.vlgmr.msrb.gmra.mxu2 %vm946_vm15, %v2987_v24  ;;  %v2591_v6 = vsub.f32 %v7647_v12, %v7725_v62 }
 0xeee   :  { %v2771_v30 = vmul.f32 %v6193_v0, %v7789_v25  ;;  %v6195_v2 = vpop.eup %6194  ;;  %v2710_v46 = vpop.xlane.xlu0 %2709 }
 0xeef   :  { %v2794_v22 = vpack.c.bf16 %v2770_v7, %v2770_v7  ;;  %v2764_v21 = vmul.f32 %v6195_v2, %v7778_v38  ;;  %v2618_v15 = vmul.f32 1.442695, %v2591_v6 }
 0xef0   :  { %v2795_v50 = vpack.c.bf16 %v2771_v30, %v2771_v30 }
 0xef1   :  { %v2926_v51 = vunpack.c.l.b16 %v2794_v22  ;;  %v2788_v57 = vpack.c.bf16 %v2764_v21, %v2764_v21 }
 0xef2   :  { %v2927_v23 = vunpack.c.l.b16 %v2795_v50 }
 0xef3   :  { %v2869_v52 = vunpack.c.l.b16 %v2788_v57 }
 0xef4   :  { %v2931_v59 = vpack.c.b16 %v2927_v23, %v2926_v51 }
 0xef5   :  { %v2689_v3 = vpop.xlane.xlu2 %2688 }
 0xef6   :  { %6196 = vrcp.f32 %v2689_v3  ;;  %5487 = vmatmul.msk.bf16.gmra.mxu1 %vm946_vm15, %v2931_v59 }
 0xefc   :  { %v6197_v13 = vpop.eup %6196 }
 0xefd   :  { %v2765_v25 = vmul.f32 %v6197_v13, %v7805_v60  ;;  %v2692_v55 = vpop.xlane.xlu2 %2691 }
 0xefe   :  { %6198 = vrcp.f32 %v2692_v55 }
 0xeff   :  { %v2789_v27 = vpack.c.bf16 %v2765_v25, %v2765_v25  ;;  %6200 = vpow2.f32 %v2618_v15 }
 0xf01   :  { %v2870_v35 = vunpack.c.l.b16 %v2789_v27 }
 0xf03   :  { %v2874_v26 = vpack.c.b16 %v2870_v35, %v2869_v52 }
 0xf04   :  { %v6199_v12 = vpop.eup %6198 }
 0xf05   :  { %5484 = vmatmul.msk.bf16.gmra.mxu0 %vm946_vm15, %v2874_v26  ;;  %v2695_v38 = vpop.xlane.xlu2 %2694  ;;  %v7879_v62 = vpop.eup %6200  ;;  %v2766_v60 = vmul.f32 %v6199_v12, %v7810_v58 }
 0xf06   :  { %6202 = vrcp.f32 %v2695_v38  ;;  %v2669_v16 = vsel %vm946_vm15, %v7879_v62, 0.0  ;;  %v2822_v12 = vpop.permute.xlu0 %2821 }
 0xf07   :  { %6204 = vpow2.f32 %v2620_v19  ;;  %v2790_v36 = vpack.c.bf16 %v2766_v60, %v2766_v60 }
 0xf08   :  { %6206 = vrcp.f32 %v2722_v31 }
 0xf09   :  { %v2871_v9 = vunpack.c.l.b16 %v2790_v36 }
 0xf0c   :  { %v6203_v20 = vpop.eup %6202  ;;  %2670 = vadd.xlane.f32.xlu1 %v2669_v16 }
 0xf0d   :  { %v2767_v39 = vmul.f32 %v6203_v20, %v7814_v37  ;;  %v7885_v4 = vpop.eup %6204 }
 0xf0e   :  { %v2672_v49 = vsel %vm946_vm15, %v7885_v4, 0.0  ;;  %v6207_v56 = vpop.eup %6206 }
 0xf0f   :  { %v2791_v61 = vpack.c.bf16 %v2767_v39, %v2767_v39  ;;  %v2776_v45 = vmul.f32 %v6207_v56, %v7796_v47 }
 0xf11   :  { %v2872_v54 = vunpack.c.l.b16 %v2791_v61  ;;  %v2800_v24 = vpack.c.bf16 %v2776_v45, %v2776_v45 }
 0xf12   :  { %2673 = vadd.xlane.f32.xlu2 %v2672_v49 }
 0xf13   :  { %v2875_v17 = vpack.c.b16 %v2872_v54, %v2871_v9  ;;  %v2983_v50 = vunpack.c.l.b16 %v2800_v24 }
 0xf15   :  { %5485 = vmatmul.msk.bf16.gmra.mxu0 %vm946_vm15, %v2875_v17 }
 0xf2b   :  { %v2668_v17 = vpop.xlane.xlu0 %2667 }
 0xf34   :  { %v2725_v58 = vpop.xlane.xlu1 %2724 }
 0xf35   :  { %6208 = vrcp.f32 %v2725_v58 }
 0xf36   :  { %6210 = vrcp.f32 %v2710_v46 }
 0xf3b   :  { %v6209_v37 = vpop.eup %6208 }
 0xf3c   :  { %v2777_v29 = vmul.f32 %v6209_v37, %v7837_v14  ;;  %v2728_v0 = vpop.xlane.xlu1 %2727  ;;  %v2713_v7 = vpop.xlane.xlu2 %2712 }
 0xf3d   :  { %v6211_v30 = vpop.eup %6210  ;;  %6212 = vrcp.f32 %v2713_v7 }
 0xf3e   :  { %v2801_v22 = vpack.c.bf16 %v2777_v29, %v2777_v29  ;;  %6214 = vrcp.f32 %v2728_v0  ;;  %v2772_v31 = vmul.f32 %v6211_v30, %v7798_v33 }
 0xf40   :  { %v2984_v51 = vunpack.c.l.b16 %v2801_v22  ;;  %v2796_v2 = vpack.c.bf16 %v2772_v31, %v2772_v31 }
 0xf42   :  { %v2988_v23 = vpack.c.b16 %v2984_v51, %v2983_v50  ;;  %v2928_v13 = vunpack.c.l.b16 %v2796_v2  ;;  %v2677_v50 = vpop.xlane.xlu0 %2676 }
 0xf43   :  { %v6213_v59 = vpop.eup %6212 }
 0xf44   :  { %v2731_v3 = vpop.xlane.xlu2 %2730  ;;  %5490 = vmatmul.msk.bf16.gmra.mxu2 %vm946_vm15, %v2988_v23  ;;  %v6215_v47 = vpop.eup %6214  ;;  %v2773_v21 = vmul.f32 %v6213_v59, %v7846_v10 }
 0xf45   :  { %6216 = vrcp.f32 %v2731_v3  ;;  %v2778_v6 = vmul.f32 %v6215_v47, %v7843_v44 }
 0xf46   :  { %v2797_v14 = vpack.c.bf16 %v2773_v21, %v2773_v21  ;;  %6218 = vrcp.f32 %v7824_v40 }
 0xf47   :  { %6220 = vrcp.f32 %v7820_v43  ;;  %v2802_v55 = vpack.c.bf16 %v2778_v6, %v2778_v6 }
 0xf48   :  { %v2929_v57 = vunpack.c.l.b16 %v2797_v14  ;;  %6222 = vrcp.f32 %v2668_v17 }
 0xf49   :  { %v2985_v10 = vunpack.c.l.b16 %v2802_v55 }
 0xf4a   :  { %v2932_v33 = vpack.c.b16 %v2929_v57, %v2928_v13 }
 0xf4b   :  { %v6217_v25 = vpop.eup %6216 }
 0xf4c   :  { %v2779_v15 = vmul.f32 %v6217_v25, %v7852_v8  ;;  %5488 = vmatmul.msk.bf16.gmra.mxu1 %vm946_vm15, %v2932_v33  ;;  %v6219_v42 = vpop.eup %6218  ;;  %v2820_v20 = vpop.permute.xlu2 %2819 }
 0xf4d   :  { %v6221_v35 = vpop.eup %6220  ;;  %v2757_v44 = vmul.f32 %v6219_v42, %v7720_v18 }
 0xf4e   :  { %v2803_v27 = vpack.c.bf16 %v2779_v15, %v2779_v15  ;;  %v2756_v40 = vmul.f32 %v6221_v35, %v7716_v48  ;;  %v6223_v37 = vpop.eup %6222  ;;  %v5735_v35 = vld [vmem:[%s7148_s27 + $0x10] sm:$0xff] }
 0xf4f   :  { %v2781_v43 = vpack.c.bf16 %v2757_v44, %v2757_v44  ;;  %v2758_v0 = vmul.f32 %v6223_v37, %v7828_v5 }
 0xf50   :  { %v2986_v52 = vunpack.c.l.b16 %v2803_v27  ;;  %v2780_v38 = vpack.c.bf16 %v2756_v40, %v2756_v40 }
 0xf51   :  { %v2811_v8 = vunpack.c.l.b16 %v2781_v43  ;;  %v2782_v22 = vpack.c.bf16 %v2758_v0, %v2758_v0 }
 0xf52   :  { %v2989_v26 = vpack.c.b16 %v2986_v52, %v2985_v10  ;;  %v2810_v16 = vunpack.c.l.b16 %v2780_v38  ;;  %v5736_v52 = vld [vmem:[%s7148_s27 + $0x18] sm:$0xff] }
 0xf53   :  { %v2812_v47 = vunpack.c.l.b16 %v2782_v22 }
 0xf54   :  { %v2824_v19 = vpop.permute.xlu1 %2823  ;;  %5491 = vmatmul.msk.bf16.gmra.mxu2 %vm946_vm15, %v2989_v26  ;;  %v2816_v36 = vpack.c.b16 %v2811_v8, %v2810_v16 }
 0xf55   :  { %2842 = vmatpush.bf16.msrb.mxu3 %v2824_v19 }
 0xf59   :  { %2843 = vmatpush.bf16.msrb.mxu3 %v2822_v12 }
 0xf5a   :  { %v2903_v60 = vpop.f32.mrf.mxu0 }
 0xf5d   :  { %2844 = vmatpush.bf16.msrb.mxu3 %v2820_v20 }
 0xf60   :  { %5480 = vmatmul.msk.bf16.vlgmr.msrb.gmra.mxu3 %vm946_vm15, %v2816_v36 }
 0xf61   :  { %3162 = vmatpush.bf16.msra.mxu3 %v5736_v52 }
 0xf62   :  { %v2905_v18 = vpop.f32.mrf.mxu0  ;;  %v2960_v39 = vpop.f32.mrf.mxu1 }
 0xf63   :  { %v5852_v61 = vpack.i.bf16 %v2905_v18, %v2903_v60 }
 0xf65   :  { %5853 = vrot.lane.b32.xlu1 %v5852_v61, %s6409_s11  ;;  %3163 = vmatpush.bf16.msra.mxu3 %v5735_v35 }
 0xf6a   :  { %v2962_v48 = vpop.f32.mrf.mxu1 }
 0xf6b   :  { %v5857_v49 = vpack.i.bf16 %v2962_v48, %v2960_v39 }
 0xf6d   :  { %5858 = vrot.lane.b32.xlu2 %v5857_v49, %s6423_s9 }
 0xf70   :  { %v3017_v9 = vpop.f32.mrf.mxu2 }
 0xf73   :  { %v2965_v54 = vpop.f32.mrf.mxu1 }
 0xf78   :  { %v3019_v58 = vpop.f32.mrf.mxu2 }
 0xf79   :  { %v5862_v56 = vpack.i.bf16 %v3019_v58, %v3017_v9 }
 0xf7b   :  { %5863 = vrot.lane.b32.xlu0 %v5862_v56, %s6430_s23  ;;  %v2967_v46 = vpop.f32.mrf.mxu1 }
 0xf7c   :  { %v5872_v24 = vpack.i.bf16 %v2967_v46, %v2965_v54 }
 0xf7f   :  { %v2671_v45 = vpop.xlane.xlu1 %2670 }
 0xf80   :  { %6224 = vrcp.f32 %v2671_v45 }
 0xf82   :  { %v2908_v29 = vpop.f32.mrf.mxu0 }
 0xf83   :  { %5873 = vrot.lane.b32.xlu0 %v5872_v24, %s6423_s9 }
 0xf85   :  { %v2674_v7 = vpop.xlane.xlu2 %2673 }
 0xf86   :  { %v6225_v30 = vpop.eup %6224  ;;  %6226 = vrcp.f32 %v2674_v7 }
 0xf87   :  { %v2759_v51 = vmul.f32 %v6225_v30, %v7879_v62  ;;  %6228 = vrcp.f32 %v2677_v50 }
 0xf89   :  { %v2783_v31 = vpack.c.bf16 %v2759_v51, %v2759_v51 }
 0xf8a   :  { %v2910_v23 = vpop.f32.mrf.mxu0 }
 0xf8b   :  { %v2813_v59 = vunpack.c.l.b16 %v2783_v31  ;;  %v5867_v3 = vpack.i.bf16 %v2910_v23, %v2908_v29 }
 0xf8c   :  { %v6227_v21 = vpop.eup %6226 }
 0xf8d   :  { %5868 = vrot.lane.b32.xlu1 %v5867_v3, %s6409_s11  ;;  %v2817_v2 = vpack.c.b16 %v2813_v59, %v2812_v47  ;;  %v6229_v5 = vpop.eup %6228  ;;  %v2760_v14 = vmul.f32 %v6227_v21, %v7885_v4 }
 0xf8e   :  { %v2761_v62 = vmul.f32 %v6229_v5, %v7834_v1 }
 0xf8f   :  { %5481 = vmatmul.msk.bf16.gmra.mxu3 %vm946_vm15, %v2817_v2  ;;  %v2784_v13 = vpack.c.bf16 %v2760_v14, %v2760_v14 }
 0xf90   :  { %v2785_v57 = vpack.c.bf16 %v2761_v62, %v2761_v62 }
 0xf91   :  { %v2814_v25 = vunpack.c.l.b16 %v2784_v13 }
 0xf92   :  { %v2913_v6 = vpop.f32.mrf.mxu0  ;;  %v2815_v15 = vunpack.c.l.b16 %v2785_v57 }
 0xf94   :  { %v2818_v27 = vpack.c.b16 %v2815_v15, %v2814_v25 }
 0xf9a   :  { %v2915_v33 = vpop.f32.mrf.mxu0 }
 0xf9b   :  { %v5882_v55 = vpack.i.bf16 %v2915_v33, %v2913_v6 }
 0xf9d   :  { %5883 = vrot.lane.b32.xlu1 %v5882_v55, %s6409_s11 }
 0xf9f   :  { %5482 = vmatmul.msk.bf16.gmra.mxu3 %vm946_vm15, %v2818_v27 }
 0xfc7   :  { %v3022_v42 = vpop.f32.mrf.mxu2  ;;  %v5859_v8 = vpop.permute.xlu2 %5858 }
 0xfc8   :  { %v5861_v20 = vunpack.i.h.bf16 %v5859_v8  ;;  %v5860_v61 = vunpack.i.l.bf16 %v5859_v8 }
 0xfc9   :  { %v2970_v10 = vpop.f32.mrf.mxu1 }
 0xfcf   :  { %v3024_v4 = vpop.f32.mrf.mxu2 }
 0xfd0   :  { %v5877_v44 = vpack.i.bf16 %v3024_v4, %v3022_v42 }
 0xfd1   :  { %v2972_v1 = vpop.f32.mrf.mxu1 }
 0xfd2   :  { %5878 = vrot.lane.b32.xlu2 %v5877_v44, %s6430_s23  ;;  %v5887_v26 = vpack.i.bf16 %v2972_v1, %v2970_v10 }
 0xfd4   :  { %5888 = vrot.lane.b32.xlu0 %v5887_v26, %s6423_s9 }
 0xfd7   :  { %v3027_v40 = vpop.f32.mrf.mxu2  ;;  %v5854_v12 = vpop.permute.xlu1 %5853 }
 0xfd8   :  { %v5856_v60 = vunpack.i.h.bf16 %v5854_v12  ;;  %v5855_v16 = vunpack.i.l.bf16 %v5854_v12 }
 0xfdf   :  { %v3029_v19 = vpop.f32.mrf.mxu2 }
 0xfe0   :  { %v5892_v43 = vpack.i.bf16 %v3029_v19, %v3027_v40  ;;  %v5959_v40 = vld [vmem:[%s7157_s2 + $0x1] ss:$0 sm:$0xff] }
 0xfe2   :  { %5893 = vrot.lane.b32.xlu2 %v5892_v43, %s6430_s23 }
 0xfe3   :  { %v2846_v38 = vpop.f32.mrf.mxu3 }
 0xfe4   :  { %v3104_v18 = vsel %vm684_vm14, %v2846_v38, %v5855_v16 }
 0xfe5   :  { %v3110_v17 = vsel %vm1541_vm0, %v3104_v18, %v5860_v61 }
 0xfeb   :  { %v2848_v36 = vpop.f32.mrf.mxu3 }
 0xfec   :  { %v3105_v39 = vsel %vm684_vm14, %v2848_v36, %v5856_v60 }
 0xfed   :  { %v3111_v48 = vsel %vm1541_vm0, %v3105_v39, %v5861_v20  ;;  %v5864_v49 = vpop.permute.xlu0 %5863 }
 0xfee   :  { %v5866_v9 = vunpack.i.h.bf16 %v5864_v49  ;;  %v5865_v54 = vunpack.i.l.bf16 %v5864_v49 }
 0xff0   :  { %v3117_v58 = vsel %vm1548_vm1, %v3111_v48, %v5866_v9  ;;  %v3116_v56 = vsel %vm1548_vm1, %v3110_v17, %v5865_v54 }
 0xff1   :  { %v3122_v46 = vpack.c.bf16 %v3117_v58, %v3116_v56 }
 0xff3   :  { %5505 = vmatmul.msk.bf16.vlgmr.msra.gmra.mxu3 %vm237_vm4, %v3122_v46 }
 0xff5   :  { %v5874_v29 = vpop.permute.xlu0 %5873 }
 0xff6   :  { %v5876_v50 = vunpack.i.h.bf16 %v5874_v29  ;;  %v5875_v51 = vunpack.i.l.bf16 %v5874_v29 }
 0xfff   :  { %v5869_v37 = vpop.permute.xlu1 %5868 }
0x1000   :  { %v5871_v0 = vunpack.i.h.bf16 %v5869_v37  ;;  %v5870_v7 = vunpack.i.l.bf16 %v5869_v37 }
0x100f   :  { %v5884_v6 = vpop.permute.xlu1 %5883 }
0x1010   :  { %v5886_v57 = vunpack.i.h.bf16 %v5884_v6  ;;  %v5885_v25 = vunpack.i.l.bf16 %v5884_v6 }
0x1012   :  { %v2851_v45 = vpop.f32.mrf.mxu3 }
0x1013   :  { %v3106_v30 = vsel %vm684_vm14, %v2851_v45, %v5870_v7 }
0x1014   :  { %v3112_v3 = vsel %vm1541_vm0, %v3106_v30, %v5875_v51 }
0x101a   :  { %v2853_v24 = vpop.f32.mrf.mxu3 }
0x101b   :  { %v3107_v22 = vsel %vm684_vm14, %v2853_v24, %v5871_v0 }
0x101c   :  { %v3113_v47 = vsel %vm1541_vm0, %v3107_v22, %v5876_v50 }
0x1022   :  { %v2856_v14 = vpop.f32.mrf.mxu3 }
0x1023   :  { %v3108_v27 = vsel %vm684_vm14, %v2856_v14, %v5885_v25 }
0x102a   :  { %v2858_v62 = vpop.f32.mrf.mxu3 }
0x102b   :  { %v3109_v42 = vsel %vm684_vm14, %v2858_v62, %v5886_v57 }
0x102c   :  { %v5879_v31 = vpop.permute.xlu2 %5878 }
0x102d   :  { %v5881_v23 = vunpack.i.h.bf16 %v5879_v31  ;;  %v5880_v59 = vunpack.i.l.bf16 %v5879_v31 }
0x102f   :  { %v3118_v2 = vsel %vm1548_vm1, %v3112_v3, %v5880_v59  ;;  %v3119_v21 = vsel %vm1548_vm1, %v3113_v47, %v5881_v23 }
0x1030   :  { %v3123_v5 = vpack.c.bf16 %v3119_v21, %v3118_v2 }
0x1032   :  { %5506 = vmatmul.msk.bf16.gmra.mxu3 %vm237_vm4, %v3123_v5 }
0x103c   :  { %v5894_v13 = vpop.permute.xlu2 %5893 }
0x103d   :  { %v5896_v10 = vunpack.i.h.bf16 %v5894_v13  ;;  %v5895_v52 = vunpack.i.l.bf16 %v5894_v13 }
0x1046   :  { %v5889_v33 = vpop.permute.xlu0 %5888 }
0x1047   :  { %v5891_v55 = vunpack.i.h.bf16 %v5889_v33  ;;  %v5890_v15 = vunpack.i.l.bf16 %v5889_v33 }
0x1049   :  { %v3115_v4 = vsel %vm1541_vm0, %v3109_v42, %v5891_v55  ;;  %v3114_v35 = vsel %vm1541_vm0, %v3108_v27, %v5890_v15  ;;  %v5738_v42 = vld [vmem:[%s7266_s28 + $0x18] sm:$0xff] }
0x104a   :  { %v3120_v44 = vsel %vm1548_vm1, %v3114_v35, %v5895_v52  ;;  %v3121_v1 = vsel %vm1548_vm1, %v3115_v4, %v5896_v10  ;;  %3380 = vmatpush.bf16.msra.mxu0 %v5738_v42  ;;  %v5737_v35 = vld [vmem:[%s7266_s28 + $0x10] sm:$0xff] }
0x104b   :  { %v3124_v26 = vpack.c.bf16 %v3121_v1, %v3120_v44 }
0x104d   :  { %5507 = vmatmul.msk.bf16.gmra.mxu3 %vm237_vm4, %v3124_v26 }
0x104e   :  { %3381 = vmatpush.bf16.msra.mxu0 %v5737_v35 }
0x1076   :  { %v3165_v19 = vpop.f32.mrf.mxu3 }
0x1077   :  { %v3166_v43 = vadd.f32 %v5959_v40, %v3165_v19 }
0x1079   :  { %v7944_v38 = vadd.f32 %v3166_v43, %v7339_v41 }
0x107b   :  { %v3190_v12 = vsel %vm237_vm4, %v7944_v38, 0.0 }
0x107c   :  { %3191 = vadd.xlane.f32.xlu1 %v3190_v12 }
0x107e   :  { %v3167_v8 = vpop.f32.mrf.mxu3 }
0x107f   :  { %v3168_v60 = vadd.f32 %v5959_v40, %v3167_v8 }
0x1081   :  { %v7949_v16 = vadd.f32 %v3168_v60, %v7344_v11 }
0x1083   :  { %v3193_v20 = vsel %vm237_vm4, %v7949_v16, 0.0 }
0x1084   :  { %3194 = vadd.xlane.f32.xlu0 %v3193_v20 }
0x10b5   :  { %v3170_v36 = vpop.f32.mrf.mxu3 }
0x10b6   :  { %v3171_v18 = vadd.f32 %v5959_v40, %v3170_v36 }
0x10b8   :  { %v7954_v39 = vadd.f32 %v3171_v18, %v7349_v63 }
0x10ba   :  { %v3196_v41 = vsel %vm237_vm4, %v7954_v39, 0.0 }
0x10bb   :  { %3197 = vadd.xlane.f32.xlu2 %v3196_v41 }
0x10bd   :  { %v3172_v61 = vpop.f32.mrf.mxu3 }
0x10be   :  { %v3173_v48 = vadd.f32 %v5959_v40, %v3172_v61 }
0x10c0   :  { %v7959_v49 = vadd.f32 %v3173_v48, %v7354_v32 }
0x10c2   :  { %v3199_v11 = vsel %vm237_vm4, %v7959_v49, 0.0 }
0x10c3   :  { %3200 = vadd.xlane.f32.xlu1 %v3199_v11  ;;  %v8020_v11 = vld [vmem:[%s7210_s10 + $0x1] ss:$0 sm:$0xff] }
0x10d0   :  { %v3175_v9 = vpop.f32.mrf.mxu3 }
0x10d1   :  { %v3176_v54 = vadd.f32 %v5959_v40, %v3175_v9 }
0x10d3   :  { %v7964_v17 = vadd.f32 %v3176_v54, %v7359_v34 }
0x10d5   :  { %v3202_v63 = vsel %vm237_vm4, %v7964_v17, 0.0 }
0x10d6   :  { %3203 = vadd.xlane.f32.xlu0 %v3202_v63 }
0x10d8   :  { %v3177_v58 = vpop.f32.mrf.mxu3 }
0x10d9   :  { %v3178_v56 = vadd.f32 %v5959_v40, %v3177_v58  ;;  %v8024_v58 = vld [vmem:[%s7234_s20 + $0x1] ss:$0 sm:$0xff] }
0x10db   :  { %v7969_v46 = vadd.f32 %v3178_v56, %v7364_v28 }
0x10dd   :  { %v3205_v32 = vsel %vm237_vm4, %v7969_v46, 0.0 }
0x10de   :  { %3206 = vadd.xlane.f32.xlu2 %v3205_v32 }
0x10ef   :  { %v3192_v45 = vpop.xlane.xlu1 %3191 }
0x10f0   :  { %v3208_v37 = vmul.f32 %v3192_v45, %v6502_v53 }
0x10f2   :  { %v7975_v24 = vsub.f32 %v7944_v38, %v3208_v37 }
0x10f4   :  { %v3220_v34 = vmul.f32 %v7975_v24, %v7975_v24 }
0x10f6   :  { %v3226_v29 = vsel %vm237_vm4, %v3220_v34, 0.0 }
0x10f7   :  { %v3195_v0 = vpop.xlane.xlu0 %3194  ;;  %3227 = vadd.xlane.f32.xlu1 %v3226_v29 }
0x10f8   :  { %v3209_v28 = vmul.f32 %v3195_v0, %v6502_v53 }
0x10fa   :  { %v7982_v7 = vsub.f32 %v7949_v16, %v3209_v28 }
0x10fc   :  { %v3221_v30 = vmul.f32 %v7982_v7, %v7982_v7 }
0x10fe   :  { %v3229_v22 = vsel %vm237_vm4, %v3221_v30, 0.0 }
0x10ff   :  { %3230 = vadd.xlane.f32.xlu0 %v3229_v22 }
0x112e   :  { %v3198_v50 = vpop.xlane.xlu2 %3197 }
0x112f   :  { %v3210_v51 = vmul.f32 %v3198_v50, %v6502_v53 }
0x1131   :  { %v7989_v31 = vsub.f32 %v7954_v39, %v3210_v51 }
0x1133   :  { %v3222_v23 = vmul.f32 %v7989_v31, %v7989_v31 }
0x1135   :  { %v3232_v59 = vsel %vm237_vm4, %v3222_v23, 0.0 }
0x1136   :  { %3233 = vadd.xlane.f32.xlu2 %v3232_v59  ;;  %v3201_v3 = vpop.xlane.xlu1 %3200 }
0x1137   :  { %v3211_v47 = vmul.f32 %v3201_v3, %v6502_v53 }
0x1139   :  { %v7996_v2 = vsub.f32 %v7959_v49, %v3211_v47 }
0x113b   :  { %v3223_v21 = vmul.f32 %v7996_v2, %v7996_v2 }
0x113d   :  { %v3235_v5 = vsel %vm237_vm4, %v3223_v21, 0.0 }
0x113e   :  { %3236 = vadd.xlane.f32.xlu1 %v3235_v5 }
0x1149   :  { %v3204_v14 = vpop.xlane.xlu0 %3203 }
0x114a   :  { %v3212_v6 = vmul.f32 %v3204_v14, %v6502_v53 }
0x114c   :  { %v8003_v62 = vsub.f32 %v7964_v17, %v3212_v6 }
0x114e   :  { %v3224_v13 = vmul.f32 %v8003_v62, %v8003_v62 }
0x1150   :  { %v3238_v57 = vsel %vm237_vm4, %v3224_v13, 0.0 }
0x1151   :  { %v3207_v25 = vpop.xlane.xlu2 %3206  ;;  %3239 = vadd.xlane.f32.xlu0 %v3238_v57 }
0x1152   :  { %v3213_v33 = vmul.f32 %v3207_v25, %v6502_v53 }
0x1154   :  { %v8010_v55 = vsub.f32 %v7969_v46, %v3213_v33 }
0x1156   :  { %v3225_v15 = vmul.f32 %v8010_v55, %v8010_v55 }
0x1158   :  { %v3241_v27 = vsel %vm237_vm4, %v3225_v15, 0.0 }
0x1159   :  { %3242 = vadd.xlane.f32.xlu2 %v3241_v27 }
0x116a   :  { %v3228_v10 = vpop.xlane.xlu1 %3227 }
0x116b   :  { %v3244_v52 = vmul.f32 %v3228_v10, %v6502_v53 }
0x116d   :  { %v3250_v4 = vadd.f32 1e-05, %v3244_v52 }
0x116f   :  { %6230 = vrsqrt.f32 %v3250_v4  ;;  %vm3262_vm11 = vweird.f32 %v3250_v4 }
0x1172   :  { %v3231_v44 = vpop.xlane.xlu0 %3230 }
0x1173   :  { %v3245_v1 = vmul.f32 %v3231_v44, %v6502_v53 }
0x1175   :  { %v6231_v26 = vpop.eup %6230  ;;  %v3251_v40 = vadd.f32 1e-05, %v3245_v1 }
0x1176   :  { %v3257_v19 = vmul.f32 %v6231_v26, %v3250_v4  ;;  %vm3263_vm10 = vweird.f32 %v6231_v26 }
0x1177   :  { %6232 = vrsqrt.f32 %v3251_v40  ;;  %vm3264_vm12 = vmor %vm3262_vm11, %vm3263_vm10  ;;  %vm3272_vm3 = vweird.f32 %v3251_v40 }
0x1178   :  { %v3258_v43 = vmul.f32 %v6231_v26, %v3257_v19 }
0x117a   :  { %v3259_v12 = vmul.f32 0.5, %v3258_v43 }
0x117c   :  { %v3260_v8 = vsub.f32 1.5, %v3259_v12 }
0x117d   :  { %v6233_v60 = vpop.eup %6232 }
0x117e   :  { %v3261_v20 = vmul.f32 %v6231_v26, %v3260_v8  ;;  %v3267_v36 = vmul.f32 %v6233_v60, %v3251_v40  ;;  %vm3273_vm13 = vweird.f32 %v6233_v60 }
0x117f   :  { %vm3274_vm5 = vmor %vm3272_vm3, %vm3273_vm13 }
0x1180   :  { %v3268_v18 = vmul.f32 %v6233_v60, %v3267_v36  ;;  %v3265_v41 = vsel %vm3264_vm12, %v6231_v26, %v3261_v20 }
0x1181   :  { %v3316_v9 = vmul.f32 %v3265_v41, %v7975_v24 }
0x1182   :  { %v3269_v61 = vmul.f32 0.5, %v3268_v18 }
0x1183   :  { %v3325_v56 = vmul.f32 %v8020_v11, %v3316_v9 }
0x1184   :  { %v3270_v48 = vsub.f32 1.5, %v3269_v61 }
0x1185   :  { %v3334_v37 = vadd.f32 %v8024_v58, %v3325_v56 }
0x1186   :  { %v3271_v54 = vmul.f32 %v6233_v60, %v3270_v48 }
0x1188   :  { %v3275_v63 = vsel %vm3274_vm5, %v6233_v60, %v3271_v54 }
0x1189   :  { %v3317_v32 = vmul.f32 %v3275_v63, %v7982_v7 }
0x118b   :  { %v3326_v45 = vmul.f32 %v8020_v11, %v3317_v32 }
0x118d   :  { %v3335_v34 = vadd.f32 %v8024_v58, %v3326_v45 }
0x118f   :  { %v3340_v29 = vpack.c.bf16 %v3335_v34, %v3334_v37 }
0x1191   :  { %5523 = vmatmul.msk.bf16.vlgmr.msra.gmra.mxu0 %vm237_vm4, %v3340_v29 }
0x11a9   :  { %v3234_v24 = vpop.xlane.xlu2 %3233 }
0x11aa   :  { %v3246_v0 = vmul.f32 %v3234_v24, %v6502_v53  ;;  %v5746_v24 = vld [vmem:[%s7306_s18 + $0x78] sm:$0xff] }
0x11ab   :  { %3525 = vmatpush.bf16.msra.mxu1 %v5746_v24 }
0x11ac   :  { %v3252_v28 = vadd.f32 1e-05, %v3246_v0  ;;  %v5745_v0 = vld [vmem:[%s7306_s18 + $0x70] sm:$0xff] }
0x11ae   :  { %6234 = vrsqrt.f32 %v3252_v28  ;;  %vm3282_vm7 = vweird.f32 %v3252_v28 }
0x11af   :  { %3526 = vmatpush.bf16.msra.mxu1 %v5745_v0 }
0x11b1   :  { %v3237_v30 = vpop.xlane.xlu1 %3236 }
0x11b2   :  { %v3247_v22 = vmul.f32 %v3237_v30, %v6502_v53  ;;  %v5742_v30 = vld [vmem:[%s7306_s18 + $0x58] sm:$0xff] }
0x11b4   :  { %v6235_v50 = vpop.eup %6234  ;;  %v3253_v51 = vadd.f32 1e-05, %v3247_v22  ;;  %v5740_v22 = vld [vmem:[%s7306_s18 + $0x48] sm:$0xff] }
0x11b5   :  { %v3277_v7 = vmul.f32 %v6235_v50, %v3252_v28  ;;  %vm3283_vm6 = vweird.f32 %v6235_v50  ;;  %v5743_v28 = vld [vmem:[%s7306_s18 + $0x60] sm:$0xff] }
0x11b6   :  { %6236 = vrsqrt.f32 %v3253_v51  ;;  %vm3284_vm8 = vmor %vm3282_vm7, %vm3283_vm6  ;;  %vm3292_vm10 = vweird.f32 %v3253_v51 }
0x11b7   :  { %v3278_v23 = vmul.f32 %v6235_v50, %v3277_v7 }
0x11b9   :  { %v3279_v59 = vmul.f32 0.5, %v3278_v23 }
0x11bb   :  { %v3280_v3 = vsub.f32 1.5, %v3279_v59 }
0x11bc   :  { %v6237_v47 = vpop.eup %6236 }
0x11bd   :  { %v3281_v21 = vmul.f32 %v6235_v50, %v3280_v3  ;;  %v3287_v5 = vmul.f32 %v6237_v47, %v3253_v51  ;;  %vm3293_vm9 = vweird.f32 %v6237_v47 }
0x11be   :  { %vm3294_vm11 = vmor %vm3292_vm10, %vm3293_vm9 }
0x11bf   :  { %v3288_v14 = vmul.f32 %v6237_v47, %v3287_v5  ;;  %v3285_v6 = vsel %vm3284_vm8, %v6235_v50, %v3281_v21  ;;  %v5962_v50 = vld [vmem:[%s7276_s5 + $0x1] ss:$0 sm:$0xff] }
0x11c0   :  { %v3318_v25 = vmul.f32 %v3285_v6, %v7989_v31 }
0x11c1   :  { %v3289_v13 = vmul.f32 0.5, %v3288_v14 }
0x11c2   :  { %v3327_v4 = vmul.f32 %v8020_v11, %v3318_v25 }
0x11c3   :  { %v3290_v57 = vsub.f32 1.5, %v3289_v13 }
0x11c4   :  { %v3240_v15 = vpop.xlane.xlu0 %3239  ;;  %v3336_v44 = vadd.f32 %v8024_v58, %v3327_v4 }
0x11c5   :  { %v3291_v33 = vmul.f32 %v6237_v47, %v3290_v57  ;;  %v3248_v27 = vmul.f32 %v3240_v15, %v6502_v53 }
0x11c7   :  { %v3295_v42 = vsel %vm3294_vm11, %v6237_v47, %v3291_v33  ;;  %v3254_v52 = vadd.f32 1e-05, %v3248_v27 }
0x11c8   :  { %v3319_v10 = vmul.f32 %v3295_v42, %v7996_v2 }
0x11c9   :  { %6238 = vrsqrt.f32 %v3254_v52  ;;  %vm3302_vm13 = vweird.f32 %v3254_v52 }
0x11ca   :  { %v3328_v35 = vmul.f32 %v8020_v11, %v3319_v10 }
0x11cc   :  { %v3337_v1 = vadd.f32 %v8024_v58, %v3328_v35  ;;  %v3243_v31 = vpop.xlane.xlu2 %3242 }
0x11cd   :  { %v3249_v26 = vmul.f32 %v3243_v31, %v6502_v53 }
0x11ce   :  { %v3341_v40 = vpack.c.bf16 %v3337_v1, %v3336_v44 }
0x11cf   :  { %v6239_v19 = vpop.eup %6238  ;;  %v3255_v43 = vadd.f32 1e-05, %v3249_v26 }
0x11d0   :  { %5524 = vmatmul.msk.bf16.gmra.mxu0 %vm237_vm4, %v3341_v40  ;;  %v3297_v12 = vmul.f32 %v6239_v19, %v3254_v52  ;;  %vm3303_vm12 = vweird.f32 %v6239_v19 }
0x11d1   :  { %6240 = vrsqrt.f32 %v3255_v43  ;;  %vm3304_vm3 = vmor %vm3302_vm13, %vm3303_vm12  ;;  %vm3312_vm6 = vweird.f32 %v3255_v43 }
0x11d2   :  { %v3298_v2 = vmul.f32 %v6239_v19, %v3297_v12 }
0x11d4   :  { %v3299_v8 = vmul.f32 0.5, %v3298_v2 }
0x11d6   :  { %v3300_v60 = vsub.f32 1.5, %v3299_v8 }
0x11d7   :  { %v6241_v20 = vpop.eup %6240 }
0x11d8   :  { %v3301_v36 = vmul.f32 %v6239_v19, %v3300_v60  ;;  %v3307_v18 = vmul.f32 %v6241_v20, %v3255_v43  ;;  %vm3313_vm5 = vweird.f32 %v6241_v20 }
0x11d9   :  { %vm3314_vm7 = vmor %vm3312_vm6, %vm3313_vm5 }
0x11da   :  { %v3308_v41 = vmul.f32 %v6241_v20, %v3307_v18  ;;  %v3305_v61 = vsel %vm3304_vm3, %v6239_v19, %v3301_v36 }
0x11db   :  { %v3320_v54 = vmul.f32 %v3305_v61, %v8003_v62 }
0x11dc   :  { %v3309_v48 = vmul.f32 0.5, %v3308_v41 }
0x11dd   :  { %v3329_v45 = vmul.f32 %v8020_v11, %v3320_v54 }
0x11de   :  { %v3310_v9 = vsub.f32 1.5, %v3309_v48 }
0x11df   :  { %v3338_v34 = vadd.f32 %v8024_v58, %v3329_v45 }
0x11e0   :  { %v3311_v63 = vmul.f32 %v6241_v20, %v3310_v9 }
0x11e2   :  { %v3315_v56 = vsel %vm3314_vm7, %v6241_v20, %v3311_v63 }
0x11e3   :  { %v3321_v32 = vmul.f32 %v3315_v56, %v8010_v55  ;;  %v5744_v55 = vld [vmem:[%s7306_s18 + $0x68] sm:$0xff] }
0x11e4   :  { %3527 = vmatpush.bf16.msra.mxu1 %v5744_v55 }
0x11e5   :  { %v3330_v37 = vmul.f32 %v8020_v11, %v3321_v32  ;;  %v5741_v11 = vld [vmem:[%s7306_s18 + $0x50] sm:$0xff] }
0x11e7   :  { %v3339_v29 = vadd.f32 %v8024_v58, %v3330_v37  ;;  %v5739_v58 = vld [vmem:[%s7306_s18 + $0x40] sm:$0xff] }
0x11e8   :  { %3528 = vmatpush.bf16.msra.mxu1 %v5743_v28 }
0x11e9   :  { %v3342_v62 = vpack.c.bf16 %v3339_v29, %v3338_v34 }
0x11eb   :  { %5525 = vmatmul.msk.bf16.gmra.mxu0 %vm237_vm4, %v3342_v62 }
0x11ec   :  { %3529 = vmatpush.bf16.msra.mxu1 %v5742_v30 }
0x11f0   :  { %3530 = vmatpush.bf16.msra.mxu1 %v5741_v11 }
0x11f4   :  { %3531 = vmatpush.bf16.msra.mxu1 %v5740_v22 }
0x11f8   :  { %3532 = vmatpush.bf16.msra.mxu1 %v5739_v58 }
0x120e   :  { %v3383_v51 = vpop.f32.mrf.mxu0 }
0x120f   :  { %v3384_v7 = vadd.f32 %v5962_v50, %v3383_v51 }
0x1211   :  { %v3404_v23 = vmul.f32 0.044715, %v3384_v7  ;;  %v3398_v10 = vmul.f32 0.5, %v3384_v7 }
0x1213   :  { %v3410_v59 = vmul.f32 %v3404_v23, %v3384_v7 }
0x1215   :  { %v3416_v3 = vmul.f32 %v3410_v59, %v3384_v7 }
0x1216   :  { %v3385_v47 = vpop.f32.mrf.mxu0 }
0x1217   :  { %v3422_v21 = vadd.f32 %v3416_v3, %v3384_v7  ;;  %v3386_v5 = vadd.f32 %v5962_v50, %v3385_v47 }
0x1219   :  { %v3405_v14 = vmul.f32 0.044715, %v3386_v5  ;;  %v3428_v6 = vmul.f32 0.7978846, %v3422_v21  ;;  %v3399_v52 = vmul.f32 0.5, %v3386_v5 }
0x121b   :  { %v3411_v13 = vmul.f32 %v3405_v14, %v3386_v5  ;;  %6242 = vtanh.f32 %v3428_v6 }
0x121d   :  { %v3417_v57 = vmul.f32 %v3411_v13, %v3386_v5 }
0x121f   :  { %v3423_v25 = vadd.f32 %v3417_v57, %v3386_v5 }
0x1221   :  { %v3429_v33 = vmul.f32 0.7978846, %v3423_v25  ;;  %v6243_v15 = vpop.eup %6242 }
0x1222   :  { %v3440_v27 = vadd.f32 1.0, %v6243_v15 }
0x1223   :  { %6244 = vtanh.f32 %v3429_v33 }
0x1224   :  { %v3446_v35 = vmul.f32 %v3440_v27, %v3398_v10 }
0x1229   :  { %v6245_v42 = vpop.eup %6244 }
0x122a   :  { %v3441_v4 = vadd.f32 1.0, %v6245_v42 }
0x122c   :  { %v3447_v44 = vmul.f32 %v3441_v4, %v3399_v52 }
0x122e   :  { %v3452_v1 = vpack.c.bf16 %v3447_v44, %v3446_v35 }
0x1230   :  { %3533 = vmatmul.bf16.vlgmr.msra.gmra.mxu1 %v3452_v1 }
0x124d   :  { %v3388_v31 = vpop.f32.mrf.mxu0 }
0x124e   :  { %v3389_v26 = vadd.f32 %v5962_v50, %v3388_v31 }
0x1250   :  { %v3406_v40 = vmul.f32 0.044715, %v3389_v26  ;;  %v3400_v56 = vmul.f32 0.5, %v3389_v26 }
0x1252   :  { %v3412_v19 = vmul.f32 %v3406_v40, %v3389_v26 }
0x1254   :  { %v3418_v43 = vmul.f32 %v3412_v19, %v3389_v26 }
0x1255   :  { %v3390_v12 = vpop.f32.mrf.mxu0 }
0x1256   :  { %v3391_v2 = vadd.f32 %v5962_v50, %v3390_v12  ;;  %v3424_v8 = vadd.f32 %v3418_v43, %v3389_v26 }
0x1258   :  { %v3407_v60 = vmul.f32 0.044715, %v3391_v2  ;;  %v3430_v36 = vmul.f32 0.7978846, %v3424_v8  ;;  %v3401_v32 = vmul.f32 0.5, %v3391_v2 }
0x125a   :  { %v3413_v20 = vmul.f32 %v3407_v60, %v3391_v2  ;;  %6246 = vtanh.f32 %v3430_v36 }
0x125c   :  { %v3419_v18 = vmul.f32 %v3413_v20, %v3391_v2 }
0x125e   :  { %v3425_v41 = vadd.f32 %v3419_v18, %v3391_v2 }
0x1260   :  { %v3431_v61 = vmul.f32 0.7978846, %v3425_v41  ;;  %v6247_v48 = vpop.eup %6246 }
0x1261   :  { %v3442_v9 = vadd.f32 1.0, %v6247_v48 }
0x1262   :  { %6248 = vtanh.f32 %v3431_v61 }
0x1263   :  { %v3448_v34 = vmul.f32 %v3442_v9, %v3400_v56 }
0x1268   :  { %v6249_v54 = vpop.eup %6248  ;;  %v3393_v63 = vpop.f32.mrf.mxu0 }
0x1269   :  { %v3443_v45 = vadd.f32 1.0, %v6249_v54  ;;  %v3394_v37 = vadd.f32 %v5962_v50, %v3393_v63 }
0x126b   :  { %v3449_v29 = vmul.f32 %v3443_v45, %v3401_v32  ;;  %v3408_v62 = vmul.f32 0.044715, %v3394_v37  ;;  %v3402_v5 = vmul.f32 0.5, %v3394_v37 }
0x126d   :  { %v3453_v24 = vpack.c.bf16 %v3449_v29, %v3448_v34  ;;  %v3414_v0 = vmul.f32 %v3408_v62, %v3394_v37 }
0x126f   :  { %3538 = vmatmul.bf16.gmra.mxu1 %v3453_v24  ;;  %v3420_v55 = vmul.f32 %v3414_v0, %v3394_v37 }
0x1270   :  { %v3395_v28 = vpop.f32.mrf.mxu0 }
0x1271   :  { %v3396_v30 = vadd.f32 %v5962_v50, %v3395_v28  ;;  %v3426_v11 = vadd.f32 %v3420_v55, %v3394_v37  ;;  %v5963_v50 = vld [vmem:[%s7331_s26 + $0x1] ss:$0 sm:$0xff] }
0x1273   :  { %v3409_v22 = vmul.f32 0.044715, %v3396_v30  ;;  %v3432_v51 = vmul.f32 0.7978846, %v3426_v11  ;;  %v3403_v14 = vmul.f32 0.5, %v3396_v30 }
0x1275   :  { %v3415_v58 = vmul.f32 %v3409_v22, %v3396_v30  ;;  %6250 = vtanh.f32 %v3432_v51 }
0x1277   :  { %v3421_v7 = vmul.f32 %v3415_v58, %v3396_v30 }
0x1279   :  { %v3427_v23 = vadd.f32 %v3421_v7, %v3396_v30 }
0x127b   :  { %v3433_v59 = vmul.f32 0.7978846, %v3427_v23  ;;  %v6251_v3 = vpop.eup %6250 }
0x127c   :  { %v3444_v47 = vadd.f32 1.0, %v6251_v3 }
0x127d   :  { %6252 = vtanh.f32 %v3433_v59 }
0x127e   :  { %v3450_v13 = vmul.f32 %v3444_v47, %v3402_v5  ;;  %v5748_v47 = vld [vmem:[%s6676_s13 + $0x28] sm:$0xff] }
0x127f   :  { %3749 = vmatpush.bf16.msra.mxu2 %v5748_v47 }
0x1283   :  { %v6253_v21 = vpop.eup %6252 }
0x1284   :  { %v3445_v6 = vadd.f32 1.0, %v6253_v21 }
0x1286   :  { %v3451_v57 = vmul.f32 %v3445_v6, %v3403_v14  ;;  %v5747_v6 = vld [vmem:[%s6676_s13 + $0x20] sm:$0xff] }
0x1287   :  { %3750 = vmatpush.bf16.msra.mxu2 %v5747_v6 }
0x1288   :  { %v3454_v25 = vpack.c.bf16 %v3451_v57, %v3450_v13 }
0x128a   :  { %3543 = vmatmul.bf16.gmra.mxu1 %v3454_v25 }
0x12ad   :  { %v3534_v33 = vpop.f32.mrf.mxu1 }
0x12ae   :  { %v3535_v15 = vadd.f32 %v5963_v50, %v3534_v33 }
0x12b0   :  { %v8061_v27 = vadd.f32 %v3535_v15, %v7944_v38 }
0x12b2   :  { %v3559_v42 = vsel %vm237_vm4, %v8061_v27, 0.0 }
0x12b3   :  { %3560 = vadd.xlane.f32.xlu1 %v3559_v42 }
0x12b5   :  { %v3536_v10 = vpop.f32.mrf.mxu1 }
0x12b6   :  { %v3537_v52 = vadd.f32 %v5963_v50, %v3536_v10 }
0x12b8   :  { %v8066_v4 = vadd.f32 %v3537_v52, %v7949_v16 }
0x12ba   :  { %v3562_v35 = vsel %vm237_vm4, %v8066_v4, 0.0 }
0x12bb   :  { %3563 = vadd.xlane.f32.xlu0 %v3562_v35 }
0x12ec   :  { %v3539_v44 = vpop.f32.mrf.mxu1 }
0x12ed   :  { %v3540_v1 = vadd.f32 %v5963_v50, %v3539_v44 }
0x12ef   :  { %v8071_v31 = vadd.f32 %v3540_v1, %v7954_v39 }
0x12f1   :  { %v3565_v38 = vsel %vm237_vm4, %v8071_v31, 0.0 }
0x12f2   :  { %3566 = vadd.xlane.f32.xlu2 %v3565_v38 }
0x12f4   :  { %v3541_v26 = vpop.f32.mrf.mxu1 }
0x12f5   :  { %v3542_v40 = vadd.f32 %v5963_v50, %v3541_v26 }
0x12f7   :  { %v8076_v19 = vadd.f32 %v3542_v40, %v7959_v49 }
0x12f9   :  { %v3568_v16 = vsel %vm237_vm4, %v8076_v19, 0.0 }
0x12fa   :  { %3569 = vadd.xlane.f32.xlu1 %v3568_v16  ;;  %v8137_v16 = vld [vmem:[%s6631_s29 + $0x2] ss:$0 sm:$0xff] }
0x1307   :  { %v3544_v43 = vpop.f32.mrf.mxu1 }
0x1308   :  { %v3545_v12 = vadd.f32 %v5963_v50, %v3544_v43 }
0x130a   :  { %v8081_v2 = vadd.f32 %v3545_v12, %v7964_v17 }
0x130c   :  { %v3571_v39 = vsel %vm237_vm4, %v8081_v2, 0.0 }
0x130d   :  { %3572 = vadd.xlane.f32.xlu0 %v3571_v39 }
0x130f   :  { %v3546_v8 = vpop.f32.mrf.mxu1 }
0x1310   :  { %v3547_v60 = vadd.f32 %v5963_v50, %v3546_v8  ;;  %v8141_v8 = vld [vmem:[%s6638_s3 + $0x2] ss:$0 sm:$0xff] }
0x1312   :  { %v8086_v20 = vadd.f32 %v3547_v60, %v7969_v46 }
0x1314   :  { %v3574_v49 = vsel %vm237_vm4, %v8086_v20, 0.0 }
0x1315   :  { %3575 = vadd.xlane.f32.xlu2 %v3574_v49 }
0x1326   :  { %v3561_v36 = vpop.xlane.xlu1 %3560 }
0x1327   :  { %v3577_v18 = vmul.f32 %v3561_v36, %v6502_v53 }
0x1329   :  { %v8092_v41 = vsub.f32 %v8061_v27, %v3577_v18 }
0x132b   :  { %v3589_v17 = vmul.f32 %v8092_v41, %v8092_v41 }
0x132d   :  { %v3595_v61 = vsel %vm237_vm4, %v3589_v17, 0.0 }
0x132e   :  { %v3564_v48 = vpop.xlane.xlu0 %3563  ;;  %3596 = vadd.xlane.f32.xlu1 %v3595_v61 }
0x132f   :  { %v3578_v46 = vmul.f32 %v3564_v48, %v6502_v53 }
0x1331   :  { %v8099_v9 = vsub.f32 %v8066_v4, %v3578_v46 }
0x1333   :  { %v3590_v54 = vmul.f32 %v8099_v9, %v8099_v9 }
0x1335   :  { %v3598_v63 = vsel %vm237_vm4, %v3590_v54, 0.0 }
0x1336   :  { %3599 = vadd.xlane.f32.xlu0 %v3598_v63 }
0x1365   :  { %v3567_v56 = vpop.xlane.xlu2 %3566 }
0x1366   :  { %v3579_v32 = vmul.f32 %v3567_v56, %v6502_v53 }
0x1368   :  { %v8106_v45 = vsub.f32 %v8071_v31, %v3579_v32 }
0x136a   :  { %v3591_v37 = vmul.f32 %v8106_v45, %v8106_v45 }
0x136c   :  { %v3601_v34 = vsel %vm237_vm4, %v3591_v37, 0.0 }
0x136d   :  { %3602 = vadd.xlane.f32.xlu2 %v3601_v34  ;;  %v3570_v29 = vpop.xlane.xlu1 %3569 }
0x136e   :  { %v3580_v62 = vmul.f32 %v3570_v29, %v6502_v53 }
0x1370   :  { %v8113_v24 = vsub.f32 %v8076_v19, %v3580_v62 }
0x1372   :  { %v3592_v0 = vmul.f32 %v8113_v24, %v8113_v24 }
0x1374   :  { %v3604_v55 = vsel %vm237_vm4, %v3592_v0, 0.0 }
0x1375   :  { %3605 = vadd.xlane.f32.xlu1 %v3604_v55 }
0x1380   :  { %v3573_v28 = vpop.xlane.xlu0 %3572 }
0x1381   :  { %v3581_v30 = vmul.f32 %v3573_v28, %v6502_v53 }
0x1383   :  { %v8120_v11 = vsub.f32 %v8081_v2, %v3581_v30 }
0x1385   :  { %v3593_v22 = vmul.f32 %v8120_v11, %v8120_v11 }
0x1387   :  { %v3607_v58 = vsel %vm237_vm4, %v3593_v22, 0.0 }
0x1388   :  { %3608 = vadd.xlane.f32.xlu0 %v3607_v58  ;;  %v3576_v51 = vpop.xlane.xlu2 %3575 }
0x1389   :  { %v3582_v7 = vmul.f32 %v3576_v51, %v6502_v53 }
0x138b   :  { %v8127_v23 = vsub.f32 %v8086_v20, %v3582_v7 }
0x138d   :  { %v3594_v59 = vmul.f32 %v8127_v23, %v8127_v23 }
0x138f   :  { %v3610_v3 = vsel %vm237_vm4, %v3594_v59, 0.0 }
0x1390   :  { %3611 = vadd.xlane.f32.xlu2 %v3610_v3 }
0x13a1   :  { %v3597_v21 = vpop.xlane.xlu1 %3596 }
0x13a2   :  { %v3613_v5 = vmul.f32 %v3597_v21, %v6502_v53 }
0x13a4   :  { %v3619_v14 = vadd.f32 1e-05, %v3613_v5 }
0x13a6   :  { %6254 = vrsqrt.f32 %v3619_v14  ;;  %vm3631_vm9 = vweird.f32 %v3619_v14 }
0x13a9   :  { %v3600_v13 = vpop.xlane.xlu0 %3599 }
0x13aa   :  { %v3614_v57 = vmul.f32 %v3600_v13, %v6502_v53 }
0x13ac   :  { %v6255_v25 = vpop.eup %6254  ;;  %v3620_v50 = vadd.f32 1e-05, %v3614_v57 }
0x13ad   :  { %v3626_v33 = vmul.f32 %v6255_v25, %v3619_v14  ;;  %vm3632_vm8 = vweird.f32 %v6255_v25 }
0x13ae   :  { %6256 = vrsqrt.f32 %v3620_v50  ;;  %vm3633_vm10 = vmor %vm3631_vm9, %vm3632_vm8  ;;  %vm3641_vm12 = vweird.f32 %v3620_v50 }
0x13af   :  { %v3627_v15 = vmul.f32 %v6255_v25, %v3626_v33 }
0x13b1   :  { %v3628_v42 = vmul.f32 0.5, %v3627_v15 }
0x13b3   :  { %v3629_v10 = vsub.f32 1.5, %v3628_v42 }
0x13b4   :  { %v6257_v52 = vpop.eup %6256 }
0x13b5   :  { %v3630_v35 = vmul.f32 %v6255_v25, %v3629_v10  ;;  %v3636_v44 = vmul.f32 %v6257_v52, %v3620_v50  ;;  %vm3642_vm11 = vweird.f32 %v6257_v52 }
0x13b6   :  { %vm3643_vm13 = vmor %vm3641_vm12, %vm3642_vm11 }
0x13b7   :  { %v3637_v1 = vmul.f32 %v6257_v52, %v3636_v44  ;;  %v3634_v38 = vsel %vm3633_vm10, %v6255_v25, %v3630_v35 }
0x13b8   :  { %v3685_v43 = vmul.f32 %v3634_v38, %v8092_v41 }
0x13b9   :  { %v3638_v26 = vmul.f32 0.5, %v3637_v1 }
0x13ba   :  { %v3694_v60 = vmul.f32 %v8137_v16, %v3685_v43 }
0x13bb   :  { %v3639_v40 = vsub.f32 1.5, %v3638_v26 }
0x13bc   :  { %v3703_v18 = vadd.f32 %v8141_v8, %v3694_v60 }
0x13bd   :  { %v3640_v12 = vmul.f32 %v6257_v52, %v3639_v40 }
0x13bf   :  { %v3644_v39 = vsel %vm3643_vm13, %v6257_v52, %v3640_v12 }
0x13c0   :  { %v3686_v49 = vmul.f32 %v3644_v39, %v8099_v9 }
0x13c2   :  { %v3695_v36 = vmul.f32 %v8137_v16, %v3686_v49 }
0x13c4   :  { %v3704_v17 = vadd.f32 %v8141_v8, %v3695_v36 }
0x13c6   :  { %v3709_v61 = vpack.c.bf16 %v3704_v17, %v3703_v18 }
0x13c8   :  { %5590 = vmatmul.msk.bf16.vlgmr.msra.gmra.mxu2 %vm237_vm4, %v3709_v61 }
0x13e0   :  { %v3603_v41 = vpop.xlane.xlu2 %3602 }
0x13e1   :  { %v3615_v48 = vmul.f32 %v3603_v41, %v6502_v53 }
0x13e3   :  { %v3621_v46 = vadd.f32 1e-05, %v3615_v48 }
0x13e5   :  { %6258 = vrsqrt.f32 %v3621_v46  ;;  %vm3651_vm5 = vweird.f32 %v3621_v46 }
0x13e8   :  { %v3606_v54 = vpop.xlane.xlu1 %3605 }
0x13e9   :  { %v3616_v63 = vmul.f32 %v3606_v54, %v6502_v53 }
0x13eb   :  { %v6259_v56 = vpop.eup %6258  ;;  %v3622_v32 = vadd.f32 1e-05, %v3616_v63 }
0x13ec   :  { %v3646_v9 = vmul.f32 %v6259_v56, %v3621_v46  ;;  %vm3652_vm3 = vweird.f32 %v6259_v56 }
0x13ed   :  { %6260 = vrsqrt.f32 %v3622_v32  ;;  %vm3653_vm6 = vmor %vm3651_vm5, %vm3652_vm3  ;;  %vm3661_vm8 = vweird.f32 %v3622_v32 }
0x13ee   :  { %v3647_v37 = vmul.f32 %v6259_v56, %v3646_v9 }
0x13f0   :  { %v3648_v34 = vmul.f32 0.5, %v3647_v37 }
0x13f2   :  { %v3649_v29 = vsub.f32 1.5, %v3648_v34 }
0x13f3   :  { %v6261_v62 = vpop.eup %6260 }
0x13f4   :  { %v3650_v0 = vmul.f32 %v6259_v56, %v3649_v29  ;;  %v3656_v55 = vmul.f32 %v6261_v62, %v3622_v32  ;;  %vm3662_vm7 = vweird.f32 %v6261_v62 }
0x13f5   :  { %vm3663_vm9 = vmor %vm3661_vm8, %vm3662_vm7 }
0x13f6   :  { %v3657_v28 = vmul.f32 %v6261_v62, %v3656_v55  ;;  %v3654_v30 = vsel %vm3653_vm6, %v6259_v56, %v3650_v0 }
0x13f7   :  { %v3687_v51 = vmul.f32 %v3654_v30, %v8106_v45 }
0x13f8   :  { %v3658_v22 = vmul.f32 0.5, %v3657_v28 }
0x13f9   :  { %v3696_v14 = vmul.f32 %v8137_v16, %v3687_v51 }
0x13fa   :  { %v3659_v58 = vsub.f32 1.5, %v3658_v22 }
0x13fb   :  { %v3609_v59 = vpop.xlane.xlu0 %3608  ;;  %v3705_v13 = vadd.f32 %v8141_v8, %v3696_v14 }
0x13fc   :  { %v3660_v7 = vmul.f32 %v6261_v62, %v3659_v58  ;;  %v3617_v3 = vmul.f32 %v3609_v59, %v6502_v53 }
0x13fe   :  { %v3664_v47 = vsel %vm3663_vm9, %v6261_v62, %v3660_v7  ;;  %v3623_v5 = vadd.f32 1e-05, %v3617_v3 }
0x13ff   :  { %v3688_v21 = vmul.f32 %v3664_v47, %v8113_v24 }
0x1400   :  { %6262 = vrsqrt.f32 %v3623_v5  ;;  %vm3671_vm11 = vweird.f32 %v3623_v5 }
0x1401   :  { %v3697_v6 = vmul.f32 %v8137_v16, %v3688_v21 }
0x1403   :  { %v3706_v57 = vadd.f32 %v8141_v8, %v3697_v6  ;;  %v3612_v45 = vpop.xlane.xlu2 %3611 }
0x1404   :  { %v3618_v25 = vmul.f32 %v3612_v45, %v6502_v53 }
0x1405   :  { %v3710_v50 = vpack.c.bf16 %v3706_v57, %v3705_v13 }
0x1406   :  { %v6263_v33 = vpop.eup %6262  ;;  %v3624_v15 = vadd.f32 1e-05, %v3618_v25 }
0x1407   :  { %5591 = vmatmul.msk.bf16.gmra.mxu2 %vm237_vm4, %v3710_v50  ;;  %v3666_v42 = vmul.f32 %v6263_v33, %v3623_v5  ;;  %vm3672_vm10 = vweird.f32 %v6263_v33 }
0x1408   :  { %6264 = vrsqrt.f32 %v3624_v15  ;;  %vm3673_vm12 = vmor %vm3671_vm11, %vm3672_vm10  ;;  %vm3681_vm3 = vweird.f32 %v3624_v15 }
0x1409   :  { %v3667_v24 = vmul.f32 %v6263_v33, %v3666_v42 }
0x140b   :  { %v3668_v10 = vmul.f32 0.5, %v3667_v24 }
0x140d   :  { %v3669_v52 = vsub.f32 1.5, %v3668_v10 }
0x140e   :  { %v6265_v35 = vpop.eup %6264 }
0x140f   :  { %v3670_v44 = vmul.f32 %v6263_v33, %v3669_v52  ;;  %v3676_v1 = vmul.f32 %v6265_v35, %v3624_v15  ;;  %vm3682_vm13 = vweird.f32 %v6265_v35 }
0x1410   :  { %vm3683_vm5 = vmor %vm3681_vm3, %vm3682_vm13 }
0x1411   :  { %v3677_v38 = vmul.f32 %v6265_v35, %v3676_v1  ;;  %v3674_v26 = vsel %vm3673_vm12, %v6263_v33, %v3670_v44 }
0x1412   :  { %v3689_v12 = vmul.f32 %v3674_v26, %v8120_v11  ;;  %v5966_v11 = vld [vmem:[%s6670_s8 + $0x2] ss:$0 sm:$0xff] }
0x1413   :  { %v3678_v40 = vmul.f32 0.5, %v3677_v38 }
0x1414   :  { %v3698_v36 = vmul.f32 %v8137_v16, %v3689_v12 }
0x1415   :  { %v3679_v43 = vsub.f32 1.5, %v3678_v40 }
0x1416   :  { %v3707_v17 = vadd.f32 %v8141_v8, %v3698_v36 }
0x1417   :  { %v3680_v39 = vmul.f32 %v6265_v35, %v3679_v43 }
0x1419   :  { %v3684_v60 = vsel %vm3683_vm5, %v6265_v35, %v3680_v39 }
0x141a   :  { %v3690_v49 = vmul.f32 %v3684_v60, %v8127_v23 }
0x141c   :  { %v3699_v18 = vmul.f32 %v8137_v16, %v3690_v49 }
0x141e   :  { %v3708_v61 = vadd.f32 %v8141_v8, %v3699_v18 }
0x1420   :  { %v3711_v41 = vpack.c.bf16 %v3708_v61, %v3707_v17 }
0x1422   :  { %5592 = vmatmul.msk.bf16.gmra.mxu2 %vm237_vm4, %v3711_v41 }
0x144b   :  { %v3752_v48 = vpop.f32.mrf.mxu2 }
0x144c   :  { %v3753_v23 = vadd.f32 %v5966_v11, %v3752_v48 }
0x144e   :  { %v8169_v37 = vpack.c.bf16 %v3753_v23, %v3753_v23 }
0x1453   :  { %v3754_v46 = vpop.f32.mrf.mxu2 }
0x1454   :  { %v3755_v59 = vadd.f32 %v5966_v11, %v3754_v46 }
0x1456   :  { %v8185_v3 = vpack.c.bf16 %v3755_v59, %v3755_v59 }
0x148a   :  { %v3757_v54 = vpop.f32.mrf.mxu2 }
0x148b   :  { %v3758_v63 = vadd.f32 %v5966_v11, %v3757_v54 }
0x148d   :  { %v3769_v56 = vpack.c.bf16 %v3758_v63, %v3758_v63 }
0x148f   :  { %3807 = vrot.lane.b32.xlu2 %v3769_v56, %s6424_s6  ;;  %v3817_v34 = vunpack.c.l.b16 %v3769_v56 }
0x1492   :  { %v3759_v32 = vpop.f32.mrf.mxu2 }
0x1493   :  { %v3760_v9 = vadd.f32 %v5966_v11, %v3759_v32 }
0x1495   :  { %v3770_v16 = vpack.c.bf16 %v3760_v9, %v3760_v9 }
0x1497   :  { %v3818_v29 = vunpack.c.l.b16 %v3770_v16  ;;  %3809 = vrot.lane.b32.xlu0 %v3770_v16, %s6424_s6  ;;  %3803 = vrot.lane.b32.xlu2 %v8169_v37, %s6424_s6 }
0x1499   :  { %v8174_v8 = vpack.c.b16 %v3818_v29, %v3817_v34 }
0x14a5   :  { %v3762_v62 = vpop.f32.mrf.mxu2 }
0x14a6   :  { %v3763_v0 = vadd.f32 %v5966_v11, %v3762_v62 }
0x14a8   :  { %v3771_v55 = vpack.c.bf16 %v3763_v0, %v3763_v0  ;;  %v3816_v0 = vunpack.c.l.b16 %v8185_v3 }
0x14aa   :  { %3811 = vrot.lane.b32.xlu1 %v3771_v55, %s6424_s6  ;;  %v3819_v58 = vunpack.c.l.b16 %v3771_v55 }
0x14ad   :  { %v3764_v28 = vpop.f32.mrf.mxu2 }
0x14ae   :  { %v3765_v30 = vadd.f32 %v5966_v11, %v3764_v28 }
0x14b0   :  { %v3772_v22 = vpack.c.bf16 %v3765_v30, %v3765_v30 }
0x14b2   :  { %v3820_v51 = vunpack.c.l.b16 %v3772_v22  ;;  %3787 = vrot.lane.b32.xlu1 %v3771_v55, %s6426_s15  ;;  %3813 = vrot.lane.b32.xlu0 %v3772_v22, %s6424_s6 }
0x14b3   :  { %3789 = vrot.lane.b32.xlu2 %v3772_v22, %s6426_s15 }
0x14b4   :  { %v8180_v7 = vpack.c.b16 %v3820_v51, %v3819_v58 }
0x14ba   :  { %3799 = vrot.lane.b32.xlu0 %v3771_v55, %s6425_s14  ;;  %3783 = vrot.lane.b32.xlu1 %v3769_v56, %s6426_s15  ;;  %v3815_v55 = vunpack.c.l.b16 %v8169_v37 }
0x14bb   :  { %3785 = vrot.lane.b32.xlu2 %v3770_v16, %s6426_s15 }
0x14bc   :  { %v8231_v28 = vpack.c.b16 %v3816_v0, %v3815_v55 }
0x14c2   :  { %3805 = vrot.lane.b32.xlu0 %v8185_v3, %s6424_s6  ;;  %3801 = vrot.lane.b32.xlu1 %v3772_v22, %s6425_s14 }
0x14c3   :  { %3779 = vrot.lane.b32.xlu2 %v8169_v37, %s6426_s15 }
0x14ca   :  { %3795 = vrot.lane.b32.xlu0 %v3769_v56, %s6425_s14  ;;  %3797 = vrot.lane.b32.xlu1 %v3770_v16, %s6425_s14 }
0x14cb   :  { %3793 = vrot.lane.b32.xlu2 %v8185_v3, %s6425_s14 }
0x14d2   :  { %3781 = vrot.lane.b32.xlu0 %v8185_v3, %s6426_s15  ;;  %3791 = vrot.lane.b32.xlu1 %v8169_v37, %s6425_s14  ;;  %s6440_s15 = smov 29  }
0x14e9   :  { %v3808_v47 = vpop.permute.xlu2 %3807 }
0x14ea   :  { %v3988_v5 = vunpack.c.l.b16 %v3808_v47 }
0x14f1   :  { %v3804_v13 = vpop.permute.xlu2 %3803 }
0x14f2   :  { %v3986_v39 = vunpack.c.l.b16 %v3804_v13 }
0x1509   :  { %v3810_v21 = vpop.permute.xlu0 %3809 }
0x150a   :  { %v3989_v14 = vunpack.c.l.b16 %v3810_v21 }
0x150c   :  { %v8200_v6 = vpack.c.b16 %v3989_v14, %v3988_v5 }
0x150d   :  { %v3790_v45 = vpop.permute.xlu2 %3789 }
0x150e   :  { %3997 = vrot.lane.b32.xlu1 %v8200_v6, %s6427_s16  ;;  %v3877_v33 = vunpack.c.l.b16 %v3790_v45 }
0x1515   :  { %v3786_v35 = vpop.permute.xlu2 %3785 }
0x1516   :  { %v3875_v38 = vunpack.c.l.b16 %v3786_v35 }
0x151c   :  { %v3812_v57 = vpop.permute.xlu1 %3811 }
0x151d   :  { %v3990_v15 = vunpack.c.l.b16 %v3812_v57  ;;  %v3780_v61 = vpop.permute.xlu2 %3779 }
0x151e   :  { %v3872_v32 = vunpack.c.l.b16 %v3780_v61 }
0x1524   :  { %v3788_v25 = vpop.permute.xlu1 %3787  ;;  %v3814_v50 = vpop.permute.xlu0 %3813 }
0x1525   :  { %v3876_v42 = vunpack.c.l.b16 %v3788_v25  ;;  %v3991_v24 = vunpack.c.l.b16 %v3814_v50  ;;  %v3794_v63 = vpop.permute.xlu2 %3793 }
0x1526   :  { %v3930_v9 = vunpack.c.l.b16 %v3794_v63  ;;  %v8296_v63 = vld [vmem:[%s6819_s21 + $0x8] sm:$0xff] }
0x1527   :  { %v8204_v10 = vpack.c.b16 %v3877_v33, %v3876_v42  ;;  %v8206_v52 = vpack.c.b16 %v3991_v24, %v3990_v15 }
0x1529   :  { %3999 = vrot.lane.b32.xlu0 %v8206_v52, %s6427_s16  ;;  %3885 = vrot.lane.b32.xlu2 %v8204_v10, %s6427_s16 }
0x152c   :  { %v3800_v44 = vpop.permute.xlu0 %3799  ;;  %v3784_v1 = vpop.permute.xlu1 %3783 }
0x152d   :  { %v3874_v26 = vunpack.c.l.b16 %v3784_v1  ;;  %v3933_v60 = vunpack.c.l.b16 %v3800_v44 }
0x152f   :  { %v8212_v40 = vpack.c.b16 %v3875_v38, %v3874_v26 }
0x1531   :  { %3883 = vrot.lane.b32.xlu2 %v8212_v40, %s6427_s16 }
0x1534   :  { %v3806_v43 = vpop.permute.xlu0 %3805  ;;  %v3802_v12 = vpop.permute.xlu1 %3801 }
0x1535   :  { %v3987_v49 = vunpack.c.l.b16 %v3806_v43  ;;  %v3934_v36 = vunpack.c.l.b16 %v3802_v12 }
0x1537   :  { %v3992_v18 = vpack.c.b16 %v3987_v49, %v3986_v39  ;;  %v8216_v17 = vpack.c.b16 %v3934_v36, %v3933_v60 }
0x1539   :  { %3942 = vrot.lane.b32.xlu0 %v8216_v17, %s6427_s16  ;;  %3995 = vrot.lane.b32.xlu1 %v3992_v18, %s6427_s16 }
0x153c   :  { %v3796_v41 = vpop.permute.xlu0 %3795  ;;  %v3798_v48 = vpop.permute.xlu1 %3797 }
0x153d   :  { %v3931_v46 = vunpack.c.l.b16 %v3796_v41  ;;  %v3932_v11 = vunpack.c.l.b16 %v3798_v48  ;;  %v8286_v41 = vld [vmem:[%s6819_s21] sm:$0xff] }
0x153f   :  { %v8221_v54 = vpack.c.b16 %v3932_v11, %v3931_v46 }
0x1541   :  { %3940 = vrot.lane.b32.xlu0 %v8221_v54, %s6427_s16 }
0x1544   :  { %v3782_v56 = vpop.permute.xlu0 %3781  ;;  %v3792_v23 = vpop.permute.xlu1 %3791 }
0x1545   :  { %v3873_v16 = vunpack.c.l.b16 %v3782_v56  ;;  %v3929_v34 = vunpack.c.l.b16 %v3792_v23 }
0x1547   :  { %v3878_v29 = vpack.c.b16 %v3873_v16, %v3872_v32  ;;  %v3935_v62 = vpack.c.b16 %v3930_v9, %v3929_v34  ;;  %v8304_v34 = vld [vmem:[%s6819_s21 + $0x10] sm:$0xff] }
0x1549   :  { %3828 = vrot.lane.b32.xlu0 %v8180_v7, %s6427_s16  ;;  %3881 = vrot.lane.b32.xlu1 %v3878_v29, %s6427_s16 }
0x154a   :  { %3938 = vrot.lane.b32.xlu2 %v3935_v62, %s6427_s16 }
0x1551   :  { %4567 = vrot.lane.b32.xlu0 %v8200_v6, %s6428_s17  ;;  %3826 = vrot.lane.b32.xlu1 %v8174_v8, %s6427_s16 }
0x1552   :  { %3824 = vrot.lane.b32.xlu2 %v8231_v28, %s6427_s16 }
0x1559   :  { %4510 = vrot.lane.b32.xlu0 %v8221_v54, %s6428_s17  ;;  %4453 = vrot.lane.b32.xlu1 %v8212_v40, %s6428_s17 }
0x155a   :  { %4565 = vrot.lane.b32.xlu2 %v3992_v18, %s6428_s17 }
0x1561   :  { %4512 = vrot.lane.b32.xlu0 %v8216_v17, %s6428_s17  ;;  %4451 = vrot.lane.b32.xlu1 %v3878_v29, %s6428_s17 }
0x1562   :  { %4508 = vrot.lane.b32.xlu2 %v3935_v62, %s6428_s17 }
0x1569   :  { %4569 = vrot.lane.b32.xlu1 %v8206_v52, %s6428_s17 }
0x156a   :  { %4455 = vrot.lane.b32.xlu2 %v8204_v10, %s6428_s17 }
0x1580   :  { %v3998_v3 = vpop.permute.xlu1 %3997 }
0x1581   :  { %v4014_v47 = vsel %vm684_vm14, %v3998_v3, 0 }
0x1583   :  { %v3886_v37 = vpop.permute.xlu2 %3885 }
0x1584   :  { %v3903_v30 = vsel %vm684_vm14, %v3886_v37, 0 }
0x1585   :  { %3910 = vmatpush.bf16.xpose.msrb.mxu0 %v3903_v30 }
0x158b   :  { %v3884_v22 = vpop.permute.xlu2 %3883 }
0x158c   :  { %v3900_v58 = vsel %vm684_vm14, %v3884_v22, 0 }
0x158d   :  { %3911 = vmatpush.bf16.xpose.msrb.mxu0 %v3900_v58  ;;  %v8315_v58 = vld [vmem:[%s6819_s21 + $0x18] sm:$0xff] }
0x159b   :  { %v4000_v51 = vpop.permute.xlu0 %3999 }
0x159c   :  { %v4017_v59 = vsel %vm684_vm14, %v4000_v51, 0 }
0x159d   :  { %4024 = vmatpush.bf16.xpose.msrb.mxu2 %v4017_v59 }
0x15a4   :  { %v3939_v21 = vpop.permute.xlu2 %3938 }
0x15a5   :  { %4025 = vmatpush.bf16.xpose.msrb.mxu2 %v4014_v47  ;;  %v3954_v1 = vsel %vm684_vm14, %v3939_v21, 0 }
0x15ab   :  { %v3943_v5 = vpop.permute.xlu0 %3942  ;;  %v3996_v14 = vpop.permute.xlu1 %3995 }
0x15ac   :  { %v3960_v13 = vsel %vm684_vm14, %v3943_v5, 0  ;;  %v4011_v57 = vsel %vm684_vm14, %v3996_v14, 0  ;;  %v3825_v45 = vpop.permute.xlu2 %3824 }
0x15ad   :  { %3967 = vmatpush.bf16.xpose.msrb.mxu1 %v3960_v13  ;;  %4026 = vmatpush.bf16.xpose.msrb.mxu2 %v4011_v57  ;;  %v3840_v49 = vsel %vm684_vm14, %v3825_v45, 0 }
0x15b3   :  { %v3941_v25 = vpop.permute.xlu0 %3940 }
0x15b4   :  { %v3957_v50 = vsel %vm684_vm14, %v3941_v25, 0  ;;  %v4566_v33 = vpop.permute.xlu2 %4565  ;;  %5602 = vmatmul.msk.bf16.vlgmr.msrb.gmra.mxu2 %vm684_vm14, %v3992_v18  ;;  %v8330_v25 = vld [vmem:[%s6819_s21 + $0x20] sm:$0xff] }
0x15b5   :  { %3968 = vmatpush.bf16.xpose.msrb.mxu1 %v3957_v50 }
0x15bb   :  { %v3829_v15 = vpop.permute.xlu0 %3828  ;;  %v3882_v42 = vpop.permute.xlu1 %3881 }
0x15bc   :  { %v3846_v24 = vsel %vm684_vm14, %v3829_v15, 0  ;;  %v3897_v35 = vsel %vm684_vm14, %v3882_v42, 0  ;;  %v4509_v44 = vpop.permute.xlu2 %4508 }
0x15bd   :  { %3853 = vmatpush.bf16.xpose.msrb.mxu3 %v3846_v24  ;;  %3912 = vmatpush.bf16.xpose.msrb.mxu0 %v3897_v35 }
0x15be   :  { %3969 = vmatpush.bf16.xpose.msrb.mxu1 %v3954_v1 }
0x15c3   :  { %v4568_v38 = vpop.permute.xlu0 %4567  ;;  %v3827_v26 = vpop.permute.xlu1 %3826 }
0x15c4   :  { %v4456_v43 = vpop.permute.xlu2 %4455  ;;  %v3843_v12 = vsel %vm684_vm14, %v3827_v26, 0  ;;  %5596 = vmatmul.msk.bf16.vlgmr.msrb.gmra.mxu0 %vm684_vm14, %v3878_v29  ;;  %5603 = vmatmul.msk.bf16.gmra.mxu2 %vm684_vm14, %v8200_v6 }
0x15c5   :  { %5599 = vmatmul.msk.bf16.vlgmr.msrb.gmra.mxu1 %vm684_vm14, %v3935_v62  ;;  %4474 = vmatpush.bf16.msra.mxu0 %v4456_v43 }
0x15c6   :  { %3854 = vmatpush.bf16.xpose.msrb.mxu3 %v3843_v12 }
0x15cb   :  { %v4511_v39 = vpop.permute.xlu0 %4510  ;;  %v4454_v60 = vpop.permute.xlu1 %4453 }
0x15cc   :  { %4475 = vmatpush.bf16.msra.mxu0 %v4454_v60 }
0x15ce   :  { %3855 = vmatpush.bf16.xpose.msrb.mxu3 %v3840_v49 }
0x15d3   :  { %v4513_v36 = vpop.permute.xlu0 %4512  ;;  %v4452_v18 = vpop.permute.xlu1 %4451 }
0x15d4   :  { %5597 = vmatmul.msk.bf16.gmra.mxu0 %vm684_vm14, %v8212_v40  ;;  %5604 = vmatmul.msk.bf16.gmra.mxu2 %vm684_vm14, %v8206_v52 }
0x15d5   :  { %5593 = vmatmul.msk.bf16.vlgmr.msrb.gmra.mxu3 %vm684_vm14, %v8231_v28  ;;  %5600 = vmatmul.msk.bf16.gmra.mxu1 %vm684_vm14, %v8221_v54 }
0x15d6   :  { %4476 = vmatpush.bf16.msra.mxu0 %v4452_v18  ;;  %4531 = vmatpush.bf16.msra.mxu1 %v4513_v36 }
0x15da   :  { %4532 = vmatpush.bf16.msra.mxu1 %v4511_v39  ;;  %v8348_v39 = vld [vmem:[%s6819_s21 + $0x28] sm:$0xff]  ;;  %s8797_s21 = sld [smem:[%s8826_s0 + %s6440_s15]]  }
0x15db   :  { %v4570_v6 = vpop.permute.xlu1 %4569 }
0x15dc   :  { %4588 = vmatpush.bf16.msra.mxu2 %v4570_v6 }
0x15de   :  { %4533 = vmatpush.bf16.msra.mxu1 %v4509_v44 }
0x15e0   :  { %4589 = vmatpush.bf16.msra.mxu2 %v4568_v38 }
0x15e4   :  { %5598 = vmatmul.msk.bf16.gmra.mxu0 %vm684_vm14, %v8204_v10  ;;  %4590 = vmatpush.bf16.msra.mxu2 %v4566_v33 }
0x15e5   :  { %5594 = vmatmul.msk.bf16.gmra.mxu3 %vm684_vm14, %v8174_v8  ;;  %5601 = vmatmul.msk.bf16.gmra.mxu1 %vm684_vm14, %v8216_v17 }
0x15f5   :  { %5595 = vmatmul.msk.bf16.gmra.mxu3 %vm684_vm14, %v8180_v7 }
0x1637   :  { %v4028_v46 = vpop.f32.mrf.mxu2 }
0x1638   :  { %v4061_v33 = vmul.f32 0.35355338, %v4028_v46 }
0x163a   :  { %v8340_v44 = vadd.f32 %v8286_v41, %v4061_v33 }
0x163c   :  { %v4145_v49 = vsel %vm946_vm15, %v8340_v44, -inf }
0x163f   :  { %v4030_v16 = vpop.f32.mrf.mxu2 }
0x1640   :  { %v4062_v3 = vmul.f32 0.35355338, %v4030_v16 }
0x1641   :  { %v3914_v14 = vpop.f32.mrf.mxu0 }
0x1642   :  { %v3971_v52 = vpop.f32.mrf.mxu1  ;;  %v8327_v57 = vadd.f32 %v8296_v63, %v4062_v3 }
0x1643   :  { %v4055_v0 = vmul.f32 0.35355338, %v3971_v52 }
0x1644   :  { %v4148_v42 = vsel %vm946_vm15, %v8327_v57, -inf }
0x1645   :  { %v8312_v30 = vadd.f32 %v8286_v41, %v4055_v0 }
0x1647   :  { %v8320_v59 = vpop.f32.mrf.mxu2  ;;  %v4127_v47 = vsel %vm946_vm15, %v8312_v30, -inf }
0x1649   :  { %v3916_v12 = vpop.f32.mrf.mxu0 }
0x164a   :  { %v8293_v17 = vpop.f32.mrf.mxu1  ;;  %v4050_v36 = vmul.f32 0.35355338, %v3916_v12 }
0x164b   :  { %v4056_v16 = vmul.f32 0.35355338, %v8293_v17 }
0x164f   :  { %v4035_v35 = vpop.f32.mrf.mxu2 }
0x1650   :  { %v4064_v18 = vmul.f32 0.35355338, %v4035_v35 }
0x1651   :  { %v3919_v0 = vpop.f32.mrf.mxu0 }
0x1652   :  { %v3976_v62 = vpop.f32.mrf.mxu1  ;;  %v8365_v46 = vadd.f32 %v8315_v58, %v4064_v18  ;;  %v4063_v18 = vmul.f32 0.35355338, %v8320_v59 }
0x1653   :  { %v4057_v15 = vmul.f32 0.35355338, %v3976_v62 }
0x1655   :  { %v8345_v26 = vadd.f32 %v8304_v34, %v4057_v15 }
0x1657   :  { %v4133_v6 = vsel %vm946_vm15, %v8345_v26, -inf }
0x1658   :  { %v3857_v40 = vpop.f32.mrf.mxu3 }
0x1659   :  { %v4043_v61 = vmul.f32 0.35355338, %v3857_v40  ;;  %v4049_v40 = vmul.f32 0.35355338, %v3914_v14 }
0x165a   :  { %v3978_v5 = vpop.f32.mrf.mxu1 }
0x165b   :  { %v8289_v48 = vadd.f32 %v8286_v41, %v4043_v61  ;;  %v8359_v61 = vpop.f32.mrf.mxu2 }
0x165d   :  { %v4091_v10 = vsel %vm946_vm15, %v8289_v48, -inf }
0x165e   :  { %4092 = vmax.xlane.f32.xlu1 %v4091_v10  ;;  %v8362_v10 = vadd.f32 %v8296_v63, %v4050_v36 }
0x1660   :  { %v3859_v11 = vpop.f32.mrf.mxu3 }
0x1661   :  { %v4044_v54 = vmul.f32 0.35355338, %v3859_v11  ;;  %v8368_v11 = vadd.f32 %v8286_v41, %v4049_v40 }
0x1662   :  { %v8342_v1 = vpop.f32.mrf.mxu1 }
0x1663   :  { %v8299_v56 = vadd.f32 %v8296_v63, %v4044_v54  ;;  %v4109_v62 = vsel %vm946_vm15, %v8368_v11, -inf }
0x1665   :  { %v4094_v23 = vsel %vm946_vm15, %v8299_v56, -inf }
0x1666   :  { %4095 = vmax.xlane.f32.xlu2 %v4094_v23 }
0x1668   :  { %v3862_v32 = vpop.f32.mrf.mxu3 }
0x1669   :  { %v4045_v9 = vmul.f32 0.35355338, %v3862_v32  ;;  %v4154_v32 = vsel %vm946_vm15, %v8365_v46, -inf }
0x166a   :  { %v3983_v54 = vpop.f32.mrf.mxu1 }
0x166b   :  { %v8307_v29 = vadd.f32 %v8304_v34, %v4045_v9  ;;  %v4060_v23 = vmul.f32 0.35355338, %v3983_v54  ;;  %v4112_v9 = vsel %vm946_vm15, %v8362_v10, -inf }
0x166d   :  { %v4097_v55 = vsel %vm946_vm15, %v8307_v29, -inf  ;;  %v8378_v41 = vadd.f32 %v8348_v39, %v4060_v23 }
0x166e   :  { %4098 = vmax.xlane.f32.xlu1 %v4097_v55  ;;  %v8381_v55 = vadd.f32 %v8296_v63, %v4056_v16 }
0x166f   :  { %v4142_v3 = vsel %vm946_vm15, %v8378_v41, -inf }
0x1670   :  { %v3864_v37 = vpop.f32.mrf.mxu3  ;;  %v4130_v17 = vsel %vm946_vm15, %v8381_v55, -inf }
0x1671   :  { %v4046_v22 = vmul.f32 0.35355338, %v3864_v37  ;;  %v4040_v37 = vpop.f32.mrf.mxu2 }
0x1673   :  { %v8318_v51 = vadd.f32 %v8315_v58, %v4046_v22  ;;  %v4066_v22 = vmul.f32 0.35355338, %v4040_v37 }
0x1675   :  { %v4100_v21 = vsel %vm946_vm15, %v8318_v51, -inf  ;;  %v8388_v14 = vadd.f32 %v8348_v39, %v4066_v22 }
0x1676   :  { %4128 = vmax.xlane.f32.xlu1 %v4127_v47  ;;  %4101 = vmax.xlane.f32.xlu2 %v4100_v21  ;;  %v4051_v47 = vmul.f32 0.35355338, %v3919_v0  ;;  %v3921_v21 = vpop.f32.mrf.mxu0 }
0x1677   :  { %v4160_v63 = vsel %vm946_vm15, %v8388_v14, -inf }
0x1678   :  { %v3867_v13 = vpop.f32.mrf.mxu3 }
0x1679   :  { %v4047_v45 = vmul.f32 0.35355338, %v3867_v13  ;;  %v8391_v13 = vadd.f32 %v8304_v34, %v4051_v47 }
0x167b   :  { %v8333_v50 = vadd.f32 %v8330_v25, %v4047_v45  ;;  %v4058_v45 = vmul.f32 0.35355338, %v3978_v5  ;;  %v4115_v33 = vsel %vm946_vm15, %v8391_v13, -inf }
0x167d   :  { %v4103_v24 = vsel %vm946_vm15, %v8333_v50, -inf  ;;  %v8398_v15 = vadd.f32 %v8315_v58, %v4058_v45 }
0x167e   :  { %4149 = vmax.xlane.f32.xlu1 %v4148_v42  ;;  %4104 = vmax.xlane.f32.xlu0 %v4103_v24  ;;  %v3924_v42 = vpop.f32.mrf.mxu0 }
0x167f   :  { %v4053_v24 = vmul.f32 0.35355338, %v3924_v42  ;;  %v4136_v35 = vsel %vm946_vm15, %v8398_v15, -inf }
0x1680   :  { %v3869_v38 = vpop.f32.mrf.mxu3 }
0x1681   :  { %v4048_v43 = vmul.f32 0.35355338, %v3869_v38  ;;  %v8403_v38 = vadd.f32 %v8330_v25, %v4053_v24 }
0x1683   :  { %v8351_v60 = vadd.f32 %v8348_v39, %v4048_v43  ;;  %v4121_v5 = vsel %vm946_vm15, %v8403_v38, -inf }
0x1685   :  { %v4106_v52 = vsel %vm946_vm15, %v8351_v60, -inf }
0x1686   :  { %4134 = vmax.xlane.f32.xlu1 %v4133_v6  ;;  %4146 = vmax.xlane.f32.xlu0 %v4145_v49 }
0x1687   :  { %4107 = vmax.xlane.f32.xlu2 %v4106_v52  ;;  %v8414_v52 = vadd.f32 %v8304_v34, %v4063_v18 }
0x168e   :  { %4155 = vmax.xlane.f32.xlu1 %v4154_v32  ;;  %4113 = vmax.xlane.f32.xlu0 %v4112_v9  ;;  %v4052_v32 = vmul.f32 0.35355338, %v3921_v21 }
0x168f   :  { %4110 = vmax.xlane.f32.xlu2 %v4109_v62 }
0x1690   :  { %v8422_v59 = vadd.f32 %v8315_v58, %v4052_v32  ;;  %v4059_v58 = vmul.f32 0.35355338, %v8342_v1  ;;  %v4065_v1 = vmul.f32 0.35355338, %v8359_v61 }
0x1692   :  { %v4118_v0 = vsel %vm946_vm15, %v8422_v59, -inf  ;;  %v8441_v21 = vadd.f32 %v8330_v25, %v4059_v58 }
0x1696   :  { %4143 = vmax.xlane.f32.xlu1 %v4142_v3 }
0x1697   :  { %4131 = vmax.xlane.f32.xlu2 %v4130_v17 }
0x169e   :  { %4161 = vmax.xlane.f32.xlu1 %v4160_v63 }
0x169f   :  { %4116 = vmax.xlane.f32.xlu2 %v4115_v33 }
0x16a7   :  { %4137 = vmax.xlane.f32.xlu2 %v4136_v35  ;;  %v4139_v35 = vsel %vm946_vm15, %v8441_v21, -inf }
0x16af   :  { %4122 = vmax.xlane.f32.xlu2 %v4121_v5  ;;  %v8450_v5 = vadd.f32 %v8330_v25, %v4065_v1 }
0x16d1   :  { %v4093_v43 = vpop.xlane.xlu1 %4092 }
0x16d2   :  { %v4163_v12 = vsub.f32 %v8289_v48, %v4093_v43  ;;  %v4151_v48 = vsel %vm946_vm15, %v8414_v52, -inf }
0x16d4   :  { %v4187_v49 = vmul.f32 1.442695, %v4163_v12 }
0x16d6   :  { %6266 = vpow2.f32 %v4187_v49  ;;  %v3926_v49 = vpop.f32.mrf.mxu0 }
0x16d9   :  { %v4096_v40 = vpop.xlane.xlu2 %4095 }
0x16da   :  { %v4164_v23 = vsub.f32 %v8299_v56, %v4096_v40 }
0x16dc   :  { %v8408_v36 = vpop.eup %6266  ;;  %v4189_v9 = vmul.f32 1.442695, %v4164_v23 }
0x16dd   :  { %v4235_v6 = vsel %vm946_vm15, %v8408_v36, 0.0 }
0x16de   :  { %4236 = vadd.xlane.f32.xlu0 %v4235_v6  ;;  %6268 = vpow2.f32 %v4189_v9  ;;  %v4157_v9 = vsel %vm946_vm15, %v8450_v5, -inf }
0x16e1   :  { %v8416_v54 = vpop.xlane.xlu1 %4098 }
0x16e4   :  { %v8429_v22 = vpop.eup %6268 }
0x16e6   :  { %4152 = vmax.xlane.f32.xlu0 %v4151_v48  ;;  %v4054_v48 = vmul.f32 0.35355338, %v3926_v49 }
0x16e9   :  { %v4129_v16 = vpop.xlane.xlu1 %4128  ;;  %v8431_v3 = vpop.xlane.xlu2 %4101 }
0x16ea   :  { %v4175_v62 = vsub.f32 %v8312_v30, %v4129_v16  ;;  %v4238_v30 = vsel %vm946_vm15, %v8429_v22, 0.0 }
0x16ec   :  { %v4211_v34 = vmul.f32 1.442695, %v4175_v62 }
0x16ee   :  { %4119 = vmax.xlane.f32.xlu0 %v4118_v0  ;;  %6270 = vpow2.f32 %v4211_v34 }
0x16f1   :  { %v8427_v56 = vpop.xlane.xlu0 %4104  ;;  %v4150_v37 = vpop.xlane.xlu1 %4149 }
0x16f4   :  { %v8433_v47 = vpop.eup %6270 }
0x16f5   :  { %v4271_v17 = vsel %vm946_vm15, %v8433_v47, 0.0 }
0x16f6   :  { %4239 = vadd.xlane.f32.xlu0 %v4238_v30  ;;  %4272 = vadd.xlane.f32.xlu2 %v4271_v17 }
0x16f9   :  { %v4147_v63 = vpop.xlane.xlu0 %4146  ;;  %v4135_v45 = vpop.xlane.xlu1 %4134 }
0x16fa   :  { %v4181_v33 = vsub.f32 %v8340_v44, %v4147_v63  ;;  %v8444_v42 = vpop.xlane.xlu2 %4107  ;;  %v4182_v63 = vsub.f32 %v8327_v57, %v4150_v37  ;;  %v4177_v57 = vsub.f32 %v8345_v26, %v4135_v45 }
0x16fc   :  { %v4223_v24 = vmul.f32 1.442695, %v4181_v33  ;;  %v4225_v33 = vmul.f32 1.442695, %v4182_v63 }
0x16fe   :  { %6272 = vpow2.f32 %v4223_v24  ;;  %4140 = vmax.xlane.f32.xlu0 %v4139_v35 }
0x1701   :  { %v4114_v43 = vpop.xlane.xlu0 %4113  ;;  %v4156_v12 = vpop.xlane.xlu1 %4155 }
0x1702   :  { %v4170_v18 = vsub.f32 %v8362_v10, %v4114_v43  ;;  %v4111_v6 = vpop.xlane.xlu2 %4110  ;;  %v4184_v44 = vsub.f32 %v8365_v46, %v4156_v12  ;;  %v8462_v46 = vadd.f32 %v8348_v39, %v4054_v48 }
0x1703   :  { %v4169_v61 = vsub.f32 %v8368_v11, %v4111_v6 }
0x1704   :  { %v8454_v40 = vpop.eup %6272  ;;  %v4201_v23 = vmul.f32 1.442695, %v4170_v18  ;;  %v4229_v32 = vmul.f32 1.442695, %v4184_v44  ;;  %v4124_v0 = vsel %vm946_vm15, %v8462_v46, -inf }
0x1705   :  { %v4289_v25 = vsel %vm946_vm15, %v8454_v40, 0.0  ;;  %v4199_v10 = vmul.f32 1.442695, %v4169_v61  ;;  %v4215_v18 = vmul.f32 1.442695, %v4177_v57 }
0x1706   :  { %6274 = vpow2.f32 %v4201_v23  ;;  %4158 = vmax.xlane.f32.xlu0 %v4157_v9  ;;  %4290 = vadd.xlane.f32.xlu2 %v4289_v25 }
0x1707   :  { %6276 = vpow2.f32 %v4229_v32 }
0x1708   :  { %6278 = vpow2.f32 %v4199_v10 }
0x170a   :  { %v4132_v16 = vpop.xlane.xlu2 %4131 }
0x170b   :  { %v4176_v11 = vsub.f32 %v8381_v55, %v4132_v16 }
0x170c   :  { %v8464_v62 = vpop.eup %6274 }
0x170d   :  { %v4256_v34 = vsel %vm946_vm15, %v8464_v62, 0.0  ;;  %v8471_v58 = vpop.eup %6276  ;;  %v4213_v30 = vmul.f32 1.442695, %v4176_v11 }
0x170e   :  { %4257 = vadd.xlane.f32.xlu1 %v4256_v34  ;;  %4125 = vmax.xlane.f32.xlu0 %v4124_v0  ;;  %v4298_v39 = vsel %vm946_vm15, %v8471_v58, 0.0  ;;  %v8475_v17 = vpop.eup %6278 }
0x170f   :  { %4299 = vadd.xlane.f32.xlu2 %v4298_v39  ;;  %6280 = vpow2.f32 %v4213_v30  ;;  %v4253_v55 = vsel %vm946_vm15, %v8475_v17, 0.0 }
0x1710   :  { %6282 = vpow2.f32 %v4225_v33 }
0x1712   :  { %v4117_v24 = vpop.xlane.xlu2 %4116 }
0x1713   :  { %v4171_v35 = vsub.f32 %v8391_v13, %v4117_v24 }
0x1715   :  { %v8480_v1 = vpop.eup %6280  ;;  %v4203_v12 = vmul.f32 1.442695, %v4171_v35  ;;  %v4144_v35 = vpop.xlane.xlu1 %4143 }
0x1716   :  { %4254 = vadd.xlane.f32.xlu0 %v4253_v55  ;;  %v4274_v43 = vsel %vm946_vm15, %v8480_v1, 0.0  ;;  %v8485_v49 = vpop.eup %6282 }
0x1717   :  { %6284 = vpow2.f32 %v4203_v12  ;;  %v4292_v37 = vsel %vm946_vm15, %v8485_v49, 0.0 }
0x1718   :  { %6286 = vpow2.f32 %v4215_v18 }
0x171a   :  { %v4138_v45 = vpop.xlane.xlu2 %4137 }
0x171b   :  { %v4178_v48 = vsub.f32 %v8398_v15, %v4138_v45 }
0x171d   :  { %v8490_v6 = vpop.eup %6284  ;;  %v4217_v25 = vmul.f32 1.442695, %v4178_v48 }
0x171e   :  { %4275 = vadd.xlane.f32.xlu0 %v4274_v43  ;;  %v4259_v13 = vsel %vm946_vm15, %v8490_v6, 0.0  ;;  %v8494_v44 = vpop.eup %6286 }
0x171f   :  { %v4277_v23 = vsel %vm946_vm15, %v8494_v44, 0.0 }
0x1722   :  { %v4123_v10 = vpop.xlane.xlu2 %4122 }
0x1723   :  { %v4173_v0 = vsub.f32 %v8403_v38, %v4123_v10 }
0x1725   :  { %v4207_v15 = vmul.f32 1.442695, %v4173_v0 }
0x1726   :  { %4293 = vadd.xlane.f32.xlu0 %v4292_v37 }
0x172e   :  { %4260 = vadd.xlane.f32.xlu0 %v4259_v13 }
0x1736   :  { %4278 = vadd.xlane.f32.xlu0 %v4277_v23 }
0x1751   :  { %v4237_v26 = vpop.xlane.xlu0 %4236 }
0x1759   :  { %v4153_v61 = vpop.xlane.xlu0 %4152 }
0x175a   :  { %v4183_v32 = vsub.f32 %v8414_v52, %v4153_v61 }
0x175c   :  { %v4227_v9 = vmul.f32 1.442695, %v4183_v32 }
0x175e   :  { %6288 = vpow2.f32 %v4227_v9 }
0x175f   :  { %6290 = vpow2.f32 %v4217_v25 }
0x1760   :  { %6292 = vrcp.f32 %v4237_v26 }
0x1761   :  { %v4120_v16 = vpop.xlane.xlu0 %4119 }
0x1762   :  { %v4172_v11 = vsub.f32 %v8422_v59, %v4120_v16 }
0x1764   :  { %v8501_v34 = vpop.eup %6288  ;;  %v4205_v39 = vmul.f32 1.442695, %v4172_v11 }
0x1765   :  { %v4295_v30 = vsel %vm946_vm15, %v8501_v34, 0.0  ;;  %v8506_v52 = vpop.eup %6290 }
0x1766   :  { %6294 = vpow2.f32 %v4205_v39  ;;  %4296 = vadd.xlane.f32.xlu1 %v4295_v30  ;;  %v6293_v55 = vpop.eup %6292  ;;  %v4280_v38 = vsel %vm946_vm15, %v8506_v52, 0.0  ;;  %v4180_v39 = vsub.f32 %v8378_v41, %v4144_v35 }
0x1767   :  { %v4331_v59 = vmul.f32 %v6293_v55, %v8408_v36 }
0x1769   :  { %v4240_v63 = vpop.xlane.xlu0 %4239  ;;  %v4355_v12 = vpack.c.bf16 %v4331_v59, %v4331_v59  ;;  %v4273_v55 = vpop.xlane.xlu2 %4272 }
0x176a   :  { %6296 = vrcp.f32 %v4240_v63  ;;  %v4221_v63 = vmul.f32 1.442695, %v4180_v39 }
0x176b   :  { %6298 = vpow2.f32 %v4207_v15  ;;  %v8519_v26 = vunpack.c.l.b16 %v4355_v12 }
0x176c   :  { %v8508_v33 = vpop.eup %6294 }
0x176d   :  { %v4262_v24 = vsel %vm946_vm15, %v8508_v33, 0.0 }
0x176e   :  { %4281 = vadd.xlane.f32.xlu1 %v4280_v38  ;;  %4263 = vadd.xlane.f32.xlu0 %v4262_v24 }
0x1770   :  { %v6297_v43 = vpop.eup %6296 }
0x1771   :  { %v4332_v57 = vmul.f32 %v6297_v43, %v8429_v22  ;;  %v4141_v37 = vpop.xlane.xlu0 %4140  ;;  %v8516_v18 = vpop.eup %6298 }
0x1772   :  { %v4179_v13 = vsub.f32 %v8441_v21, %v4141_v37  ;;  %v4265_v61 = vsel %vm946_vm15, %v8516_v18, 0.0  ;;  %v4162_v22 = vpop.xlane.xlu1 %4161 }
0x1773   :  { %v4356_v23 = vpack.c.bf16 %v4332_v57, %v4332_v57  ;;  %v4186_v24 = vsub.f32 %v8388_v14, %v4162_v22 }
0x1774   :  { %v4219_v36 = vmul.f32 1.442695, %v4179_v13 }
0x1775   :  { %v8521_v45 = vunpack.c.l.b16 %v4356_v23  ;;  %v4233_v43 = vmul.f32 1.442695, %v4186_v24 }
0x1776   :  { %6300 = vpow2.f32 %v4219_v36  ;;  %4266 = vadd.xlane.f32.xlu0 %v4265_v61 }
0x1777   :  { %v4391_v32 = vpack.c.b16 %v8521_v45, %v8519_v26 }
0x1779   :  { %v4159_v48 = vpop.xlane.xlu0 %4158  ;;  %v4291_v37 = vpop.xlane.xlu2 %4290 }
0x177a   :  { %v4185_v9 = vsub.f32 %v8450_v5, %v4159_v48 }
0x177c   :  { %v8528_v25 = vpop.eup %6300  ;;  %v4231_v21 = vmul.f32 1.442695, %v4185_v9 }
0x177d   :  { %v4283_v10 = vsel %vm946_vm15, %v8528_v25, 0.0 }
0x177e   :  { %6302 = vpow2.f32 %v4231_v21  ;;  %4284 = vadd.xlane.f32.xlu1 %v4283_v10 }
0x1781   :  { %v4126_v16 = vpop.xlane.xlu0 %4125  ;;  %v4258_v11 = vpop.xlane.xlu1 %4257 }
0x1782   :  { %v4174_v0 = vsub.f32 %v8462_v46, %v4126_v16  ;;  %6304 = vrcp.f32 %v4258_v11 }
0x1784   :  { %v8534_v30 = vpop.eup %6302  ;;  %v4209_v15 = vmul.f32 1.442695, %v4174_v0 }
0x1785   :  { %v4301_v5 = vsel %vm946_vm15, %v8534_v30, 0.0 }
0x1786   :  { %6306 = vpow2.f32 %v4209_v15  ;;  %4302 = vadd.xlane.f32.xlu2 %v4301_v5 }
0x1788   :  { %v6305_v38 = vpop.eup %6304 }
0x1789   :  { %v4255_v59 = vpop.xlane.xlu0 %4254  ;;  %v4338_v41 = vmul.f32 %v6305_v38, %v8464_v62 }
0x178a   :  { %6308 = vrcp.f32 %v4255_v59 }
0x178b   :  { %6310 = vpow2.f32 %v4221_v63  ;;  %v4362_v13 = vpack.c.bf16 %v4338_v41, %v4338_v41 }
0x178c   :  { %v8539_v46 = vpop.eup %6306  ;;  %6312 = vrcp.f32 %v4273_v55 }
0x178d   :  { %v4268_v35 = vsel %vm946_vm15, %v8539_v46, 0.0  ;;  %v4443_v22 = vunpack.c.l.b16 %v4362_v13  ;;  %v4168_v13 = vsub.f32 %v8351_v60, %v8444_v42 }
0x178e   :  { %4269 = vadd.xlane.f32.xlu0 %v4268_v35 }
0x1790   :  { %v6309_v12 = vpop.eup %6308 }
0x1791   :  { %v8544_v57 = vpop.eup %6310  ;;  %v4337_v23 = vmul.f32 %v6309_v12, %v8475_v17  ;;  %v4276_v36 = vpop.xlane.xlu0 %4275  ;;  %v4165_v12 = vsub.f32 %v8307_v29, %v8416_v54  ;;  %v4166_v29 = vsub.f32 %v8318_v51, %v8431_v3 }
0x1792   :  { %v6313_v61 = vpop.eup %6312  ;;  %6314 = vrcp.f32 %v4276_v36  ;;  %v4286_v9 = vsel %vm946_vm15, %v8544_v57, 0.0  ;;  %v4197_v36 = vmul.f32 1.442695, %v4168_v13 }
0x1793   :  { %6316 = vpow2.f32 %v4233_v43  ;;  %v4361_v14 = vpack.c.bf16 %v4337_v23, %v4337_v23  ;;  %v4343_v62 = vmul.f32 %v6313_v61, %v8433_v47  ;;  %v4300_v61 = vpop.xlane.xlu2 %4299 }
0x1794   :  { %6318 = vrcp.f32 %v4291_v37 }
0x1795   :  { %v4442_v48 = vunpack.c.l.b16 %v4361_v14  ;;  %v4367_v16 = vpack.c.bf16 %v4343_v62, %v4343_v62 }
0x1796   :  { %4287 = vadd.xlane.f32.xlu0 %v4286_v9 }
0x1797   :  { %v4448_v21 = vpack.c.b16 %v4443_v22, %v4442_v48  ;;  %4396 = vrot.lane.b32.xlu1 %v8174_v8, %s6428_s17  ;;  %v4499_v15 = vunpack.c.l.b16 %v4367_v16 }
0x1798   :  { %v6315_v10 = vpop.eup %6314 }
0x1799   :  { %v8552_v17 = vpop.eup %6316  ;;  %v4344_v11 = vmul.f32 %v6315_v10, %v8480_v1  ;;  %v4294_v0 = vpop.xlane.xlu0 %4293  ;;  %5608 = vmatmul.msk.bf16.vlgmr.msra.gmra.mxu0 %vm946_vm15, %v4448_v21 }
0x179a   :  { %v6319_v47 = vpop.eup %6318  ;;  %6320 = vrcp.f32 %v4294_v0  ;;  %v4304_v55 = vsel %vm946_vm15, %v8552_v17, 0.0 }
0x179b   :  { %v4368_v39 = vpack.c.bf16 %v4344_v11, %v4344_v11  ;;  %v4349_v5 = vmul.f32 %v6319_v47, %v8454_v40  ;;  %v4167_v40 = vsub.f32 %v8333_v50, %v8427_v56  ;;  %v4193_v56 = vmul.f32 1.442695, %v4166_v29 }
0x179d   :  { %v4500_v63 = vunpack.c.l.b16 %v4368_v39  ;;  %v4373_v1 = vpack.c.bf16 %v4349_v5, %v4349_v5 }
0x179e   :  { %4398 = vrot.lane.b32.xlu2 %v8180_v7, %s6428_s17  ;;  %4305 = vadd.xlane.f32.xlu0 %v4304_v55  ;;  %v4195_v7 = vmul.f32 1.442695, %v4167_v40 }
0x179f   :  { %v4505_v8 = vpack.c.b16 %v4500_v63, %v4499_v15  ;;  %v4556_v41 = vunpack.c.l.b16 %v4373_v1 }
0x17a0   :  { %v6321_v59 = vpop.eup %6320  ;;  %6322 = vpow2.f32 %v4195_v7 }
0x17a1   :  { %v4350_v38 = vmul.f32 %v6321_v59, %v8485_v49  ;;  %5611 = vmatmul.msk.bf16.vlgmr.msra.gmra.mxu1 %vm946_vm15, %v4505_v8  ;;  %v4191_v49 = vmul.f32 1.442695, %v4165_v12  ;;  %v4261_v42 = vpop.xlane.xlu0 %4260 }
0x17a3   :  { %v4374_v24 = vpack.c.bf16 %v4350_v38, %v4350_v38  ;;  %6324 = vpow2.f32 %v4191_v49 }
0x17a4   :  { %6326 = vpow2.f32 %v4197_v36 }
0x17a5   :  { %v4557_v35 = vunpack.c.l.b16 %v4374_v24  ;;  %6328 = vpow2.f32 %v4193_v56 }
0x17a6   :  { %v8570_v37 = vpop.eup %6322  ;;  %6330 = vrcp.f32 %v4300_v61 }
0x17a7   :  { %v4562_v43 = vpack.c.b16 %v4557_v35, %v4556_v41  ;;  %v4247_v23 = vsel %vm946_vm15, %v8570_v37, 0.0 }
0x17a9   :  { %5614 = vmatmul.msk.bf16.vlgmr.msra.gmra.mxu2 %vm946_vm15, %v4562_v43  ;;  %v8576_v50 = vpop.eup %6324  ;;  %v4279_v62 = vpop.xlane.xlu0 %4278 }
0x17aa   :  { %v8582_v54 = vpop.eup %6326 }
0x17ab   :  { %v4250_v60 = vsel %vm946_vm15, %v8582_v54, 0.0  ;;  %v8586_v14 = vpop.eup %6328 }
0x17ac   :  { %v6331_v48 = vpop.eup %6330  ;;  %v4244_v51 = vsel %vm946_vm15, %v8586_v14, 0.0 }
0x17ad   :  { %v4352_v3 = vmul.f32 %v6331_v48, %v8471_v58 }
0x17af   :  { %v4376_v21 = vpack.c.bf16 %v4352_v3, %v4352_v3 }
0x17b1   :  { %v4559_v15 = vunpack.c.l.b16 %v4376_v21 }
0x17b2   :  { %4394 = vrot.lane.b32.xlu0 %v8231_v28, %s6428_s17  ;;  %v4241_v28 = vsel %vm946_vm15, %v8576_v50, 0.0 }
0x17c1   :  { %4248 = vadd.xlane.f32.xlu1 %v4247_v23 }
0x17c7   :  { %4242 = vadd.xlane.f32.xlu2 %v4241_v28 }
0x17cf   :  { %4251 = vadd.xlane.f32.xlu2 %v4250_v60 }
0x17d9   :  { %v4297_v22 = vpop.xlane.xlu1 %4296 }
0x17da   :  { %6332 = vrcp.f32 %v4297_v22 }
0x17db   :  { %6334 = vrcp.f32 %v4261_v42 }
0x17dc   :  { %4245 = vadd.xlane.f32.xlu0 %v4244_v51  ;;  %6336 = vrcp.f32 %v4279_v62 }
0x17e0   :  { %v6333_v9 = vpop.eup %6332 }
0x17e1   :  { %v4351_v10 = vmul.f32 %v6333_v9, %v8501_v34  ;;  %v4264_v16 = vpop.xlane.xlu0 %4263  ;;  %v4282_v11 = vpop.xlane.xlu1 %4281 }
0x17e2   :  { %v6335_v0 = vpop.eup %6334  ;;  %6338 = vrcp.f32 %v4264_v16 }
0x17e3   :  { %v6337_v47 = vpop.eup %6336  ;;  %v4375_v39 = vpack.c.bf16 %v4351_v10, %v4351_v10  ;;  %6340 = vrcp.f32 %v4282_v11  ;;  %v4339_v5 = vmul.f32 %v6335_v0, %v8490_v6 }
0x17e4   :  { %v4345_v55 = vmul.f32 %v6337_v47, %v8494_v44 }
0x17e5   :  { %v4558_v63 = vunpack.c.l.b16 %v4375_v39  ;;  %v4363_v1 = vpack.c.bf16 %v4339_v5, %v4339_v5 }
0x17e6   :  { %v4369_v34 = vpack.c.bf16 %v4345_v55, %v4345_v55 }
0x17e7   :  { %v4563_v8 = vpack.c.b16 %v4559_v15, %v4558_v63  ;;  %v4444_v43 = vunpack.c.l.b16 %v4363_v1 }
0x17e8   :  { %v6339_v58 = vpop.eup %6338  ;;  %v4501_v7 = vunpack.c.l.b16 %v4369_v34 }
0x17e9   :  { %v6341_v59 = vpop.eup %6340  ;;  %v4340_v38 = vmul.f32 %v6339_v58, %v8508_v33  ;;  %5615 = vmatmul.msk.bf16.gmra.mxu2 %vm946_vm15, %v4563_v8  ;;  %v4267_v44 = vpop.xlane.xlu0 %4266 }
0x17ea   :  { %v4346_v24 = vmul.f32 %v6341_v59, %v8506_v52  ;;  %6342 = vrcp.f32 %v4267_v44 }
0x17eb   :  { %v4364_v41 = vpack.c.bf16 %v4340_v38, %v4340_v38 }
0x17ec   :  { %v4370_v35 = vpack.c.bf16 %v4346_v24, %v4346_v24 }
0x17ed   :  { %v4445_v40 = vunpack.c.l.b16 %v4364_v41 }
0x17ee   :  { %v4502_v6 = vunpack.c.l.b16 %v4370_v35 }
0x17ef   :  { %v4449_v12 = vpack.c.b16 %v4445_v40, %v4444_v43 }
0x17f0   :  { %v4506_v49 = vpack.c.b16 %v4502_v6, %v4501_v7  ;;  %v6343_v28 = vpop.eup %6342 }
0x17f1   :  { %5609 = vmatmul.msk.bf16.gmra.mxu0 %vm946_vm15, %v4449_v12  ;;  %v4285_v33 = vpop.xlane.xlu1 %4284  ;;  %v4341_v52 = vmul.f32 %v6343_v28, %v8516_v18 }
0x17f2   :  { %5612 = vmatmul.msk.bf16.gmra.mxu1 %vm946_vm15, %v4506_v49 }
0x17f3   :  { %v4365_v56 = vpack.c.bf16 %v4341_v52, %v4341_v52 }
0x17f5   :  { %v4446_v48 = vunpack.c.l.b16 %v4365_v56 }
0x17f9   :  { %v4303_v13 = vpop.xlane.xlu2 %4302 }
0x1801   :  { %v4270_v23 = vpop.xlane.xlu0 %4269  ;;  %v4399_v36 = vpop.permute.xlu2 %4398 }
0x1802   :  { %6344 = vrcp.f32 %v4270_v23  ;;  %4417 = vmatpush.bf16.msra.mxu3 %v4399_v36 }
0x1803   :  { %6346 = vrcp.f32 %v4285_v33 }
0x1808   :  { %v6345_v29 = vpop.eup %6344 }
0x1809   :  { %v4342_v60 = vmul.f32 %v6345_v29, %v8539_v46  ;;  %v4288_v42 = vpop.xlane.xlu0 %4287  ;;  %v4397_v61 = vpop.permute.xlu1 %4396 }
0x180a   :  { %v6347_v62 = vpop.eup %6346  ;;  %6348 = vrcp.f32 %v4288_v42  ;;  %4418 = vmatpush.bf16.msra.mxu3 %v4397_v61 }
0x180b   :  { %v4366_v22 = vpack.c.bf16 %v4342_v60, %v4342_v60  ;;  %6350 = vrcp.f32 %v4303_v13  ;;  %v4347_v51 = vmul.f32 %v6347_v62, %v8528_v25 }
0x180d   :  { %v4447_v3 = vunpack.c.l.b16 %v4366_v22  ;;  %v4371_v10 = vpack.c.bf16 %v4347_v51, %v4347_v51 }
0x180f   :  { %v4450_v9 = vpack.c.b16 %v4447_v3, %v4446_v48  ;;  %v4503_v0 = vunpack.c.l.b16 %v4371_v10 }
0x1810   :  { %v6349_v21 = vpop.eup %6348 }
0x1811   :  { %v4348_v18 = vmul.f32 %v6349_v21, %v8544_v57  ;;  %v4306_v16 = vpop.xlane.xlu0 %4305  ;;  %5610 = vmatmul.msk.bf16.gmra.mxu0 %vm946_vm15, %v4450_v9  ;;  %v6351_v46 = vpop.eup %6350 }
0x1812   :  { %6352 = vrcp.f32 %v4306_v16  ;;  %v4353_v47 = vmul.f32 %v6351_v46, %v8534_v30 }
0x1813   :  { %v4372_v11 = vpack.c.bf16 %v4348_v18, %v4348_v18  ;;  %v5750_v18 = vld [vmem:[%s7148_s27 + $0x28] sm:$0xff] }
0x1814   :  { %v4377_v25 = vpack.c.bf16 %v4353_v47, %v4353_v47 }
0x1815   :  { %v4504_v39 = vunpack.c.l.b16 %v4372_v11  ;;  %v5749_v11 = vld [vmem:[%s7148_s27 + $0x20] sm:$0xff] }
0x1816   :  { %v4478_v15 = vpop.f32.mrf.mxu0  ;;  %v4560_v57 = vunpack.c.l.b16 %v4377_v25 }
0x1817   :  { %v4507_v5 = vpack.c.b16 %v4504_v39, %v4503_v0 }
0x1818   :  { %v6353_v63 = vpop.eup %6352 }
0x1819   :  { %v4354_v55 = vmul.f32 %v6353_v63, %v8552_v17  ;;  %5613 = vmatmul.msk.bf16.gmra.mxu1 %vm946_vm15, %v4507_v5 }
0x181b   :  { %v4378_v8 = vpack.c.bf16 %v4354_v55, %v4354_v55 }
0x181d   :  { %v4561_v58 = vunpack.c.l.b16 %v4378_v8 }
0x181e   :  { %v4480_v59 = vpop.f32.mrf.mxu0  ;;  %v4535_v1 = vpop.f32.mrf.mxu1 }
0x181f   :  { %v5897_v38 = vpack.i.bf16 %v4480_v59, %v4478_v15  ;;  %v4564_v34 = vpack.c.b16 %v4561_v58, %v4560_v57 }
0x1821   :  { %5898 = vrot.lane.b32.xlu0 %v5897_v38, %s6409_s11  ;;  %5616 = vmatmul.msk.bf16.gmra.mxu2 %vm946_vm15, %v4564_v34 }
0x1824   :  { %v4395_v30 = vpop.permute.xlu0 %4394 }
0x1825   :  { %4419 = vmatpush.bf16.msra.mxu3 %v4395_v30 }
0x1826   :  { %v4537_v24 = vpop.f32.mrf.mxu1 }
0x1827   :  { %v5902_v41 = vpack.i.bf16 %v4537_v24, %v4535_v1 }
0x1828   :  { %5605 = vmatmul.msk.bf16.vlgmr.msra.gmra.mxu3 %vm946_vm15, %v4391_v32 }
0x1829   :  { %5903 = vrot.lane.b32.xlu1 %v5902_v41, %s6423_s9  ;;  %4737 = vmatpush.bf16.msrb.mxu3 %v5750_v18 }
0x182c   :  { %v4592_v17 = vpop.f32.mrf.mxu2 }
0x182d   :  { %4738 = vmatpush.bf16.msrb.mxu3 %v5749_v11 }
0x1834   :  { %v4594_v35 = vpop.f32.mrf.mxu2  ;;  %v4249_v13 = vpop.xlane.xlu1 %4248 }
0x1835   :  { %v5907_v43 = vpack.i.bf16 %v4594_v35, %v4592_v17 }
0x1837   :  { %5908 = vrot.lane.b32.xlu2 %v5907_v43, %s6430_s23 }
0x183a   :  { %v4243_v40 = vpop.xlane.xlu2 %4242 }
0x183b   :  { %6354 = vrcp.f32 %v4243_v40 }
0x1841   :  { %v6355_v6 = vpop.eup %6354 }
0x1842   :  { %v4333_v12 = vmul.f32 %v6355_v6, %v8576_v50  ;;  %v4252_v49 = vpop.xlane.xlu2 %4251 }
0x1844   :  { %v4357_v26 = vpack.c.bf16 %v4333_v12, %v4333_v12 }
0x1846   :  { %v4387_v33 = vunpack.c.l.b16 %v4357_v26 }
0x184f   :  { %v4246_v7 = vpop.xlane.xlu0 %4245 }
0x1850   :  { %6356 = vrcp.f32 %v4246_v7 }
0x1851   :  { %6358 = vrcp.f32 %v4252_v49 }
0x1852   :  { %6360 = vrcp.f32 %v4249_v13 }
0x1856   :  { %v6357_v44 = vpop.eup %6356 }
0x1857   :  { %v4334_v45 = vmul.f32 %v6357_v44, %v8586_v14  ;;  %v6359_v28 = vpop.eup %6358 }
0x1858   :  { %v6361_v52 = vpop.eup %6360  ;;  %v4336_v29 = vmul.f32 %v6359_v28, %v8582_v54 }
0x1859   :  { %v4358_v32 = vpack.c.bf16 %v4334_v45, %v4334_v45  ;;  %v4335_v50 = vmul.f32 %v6361_v52, %v8570_v37 }
0x185a   :  { %v4360_v56 = vpack.c.bf16 %v4336_v29, %v4336_v29 }
0x185b   :  { %v4388_v23 = vunpack.c.l.b16 %v4358_v32  ;;  %v4359_v60 = vpack.c.bf16 %v4335_v50, %v4335_v50 }
0x185c   :  { %v4390_v42 = vunpack.c.l.b16 %v4360_v56 }
0x185d   :  { %v4392_v36 = vpack.c.b16 %v4388_v23, %v4387_v33  ;;  %v4389_v61 = vunpack.c.l.b16 %v4359_v60 }
0x185f   :  { %5606 = vmatmul.msk.bf16.gmra.mxu3 %vm946_vm15, %v4392_v36  ;;  %v4393_v62 = vpack.c.b16 %v4390_v42, %v4389_v61 }
0x186c   :  { %v4597_v14 = vpop.f32.mrf.mxu2 }
0x186e   :  { %v4483_v22 = vpop.f32.mrf.mxu0 }
0x186f   :  { %v4540_v48 = vpop.f32.mrf.mxu1  ;;  %5607 = vmatmul.msk.bf16.gmra.mxu3 %vm946_vm15, %v4393_v62 }
0x1874   :  { %v4599_v51 = vpop.f32.mrf.mxu2 }
0x1875   :  { %v5922_v3 = vpack.i.bf16 %v4599_v51, %v4597_v14 }
0x1876   :  { %v4485_v9 = vpop.f32.mrf.mxu0 }
0x1877   :  { %v5912_v21 = vpack.i.bf16 %v4485_v9, %v4483_v22  ;;  %v4542_v10 = vpop.f32.mrf.mxu1  ;;  %5923 = vrot.lane.b32.xlu2 %v5922_v3, %s6430_s23 }
0x1878   :  { %v5917_v37 = vpack.i.bf16 %v4542_v10, %v4540_v48 }
0x1879   :  { %5913 = vrot.lane.b32.xlu0 %v5912_v21, %s6409_s11 }
0x187a   :  { %5918 = vrot.lane.b32.xlu1 %v5917_v37, %s6423_s9 }
0x188e   :  { %v4488_v54 = vpop.f32.mrf.mxu0 }
0x1891   :  { %v5909_v59 = vpop.permute.xlu2 %5908 }
0x1892   :  { %v5911_v41 = vunpack.i.h.bf16 %v5909_v59  ;;  %v5910_v17 = vunpack.i.l.bf16 %v5909_v59 }
0x1893   :  { %v5899_v5 = vpop.permute.xlu0 %5898 }
0x1894   :  { %v5900_v8 = vunpack.i.l.bf16 %v5899_v5  ;;  %v5901_v38 = vunpack.i.h.bf16 %v5899_v5 }
0x1896   :  { %v4490_v16 = vpop.f32.mrf.mxu0  ;;  %v4545_v46 = vpop.f32.mrf.mxu1 }
0x1897   :  { %v5927_v0 = vpack.i.bf16 %v4490_v16, %v4488_v54 }
0x1899   :  { %5928 = vrot.lane.b32.xlu0 %v5927_v0, %s6409_s11  ;;  %s6438_s11 = smov 26  }
0x189a   :  { %s8769_s8 = sld [smem:[%s8826_s0 + %s6438_s11]]  }
0x189b   :  { %v5904_v57 = vpop.permute.xlu1 %5903 }
0x189c   :  { %v5905_v1 = vunpack.i.l.bf16 %v5904_v57  ;;  %v5906_v34 = vunpack.i.h.bf16 %v5904_v57 }
0x189e   :  { %v4547_v47 = vpop.f32.mrf.mxu1 }
0x189f   :  { %v5932_v39 = vpack.i.bf16 %v4547_v47, %v4545_v46 }
0x18a1   :  { %5933 = vrot.lane.b32.xlu1 %v5932_v39, %s6423_s9  ;;  %s6439_s9 = smov 27  }
0x18a2   :  { %s8775_s14 = sld [smem:[%s8826_s0 + %s6439_s9]]  }
0x18a4   :  { %v4602_v15 = vpop.f32.mrf.mxu2 }
0x18ab   :  { %v4421_v63 = vpop.f32.mrf.mxu3 }
0x18ac   :  { %v4604_v25 = vpop.f32.mrf.mxu2  ;;  %v4679_v58 = vsel %vm684_vm14, %v4421_v63, %v5900_v8 }
0x18ad   :  { %v5937_v55 = vpack.i.bf16 %v4604_v25, %v4602_v15  ;;  %v4685_v30 = vsel %vm1541_vm0, %v4679_v58, %v5905_v1  ;;  %v5967_v15 = vld [vmem:[%s7157_s2 + $0x2] ss:$0 sm:$0xff] }
0x18ae   :  { %v4691_v40 = vsel %vm1548_vm1, %v4685_v30, %v5910_v17 }
0x18af   :  { %5938 = vrot.lane.b32.xlu2 %v5937_v55, %s6430_s23  ;;  %s6441_s23 = smov 28  }
0x18b3   :  { %v4423_v24 = vpop.f32.mrf.mxu3 }
0x18b4   :  { %v4680_v35 = vsel %vm684_vm14, %v4423_v24, %v5901_v38 }
0x18b5   :  { %v4686_v43 = vsel %vm1541_vm0, %v4680_v35, %v5906_v34 }
0x18b6   :  { %v4692_v7 = vsel %vm1548_vm1, %v4686_v43, %v5911_v41 }
0x18b7   :  { %v4697_v6 = vpack.c.bf16 %v4692_v7, %v4691_v40 }
0x18b9   :  { %5630 = vmatmul.msk.bf16.vlgmr.msrb.gmra.mxu3 %vm237_vm4, %v4697_v6 }
0x18d1   :  { %v5924_v49 = vpop.permute.xlu2 %5923 }
0x18d2   :  { %v5926_v36 = vunpack.i.h.bf16 %v5924_v49  ;;  %v5925_v28 = vunpack.i.l.bf16 %v5924_v49 }
0x18e2   :  { %v4426_v12 = vpop.f32.mrf.mxu3 }
0x18ea   :  { %v4428_v32 = vpop.f32.mrf.mxu3 }
0x18eb   :  { %v5914_v44 = vpop.permute.xlu0 %5913 }
0x18ec   :  { %v5916_v13 = vunpack.i.h.bf16 %v5914_v44  ;;  %v5915_v26 = vunpack.i.l.bf16 %v5914_v44  ;;  %v5919_v45 = vpop.permute.xlu1 %5918 }
0x18ed   :  { %v5921_v33 = vunpack.i.h.bf16 %v5919_v45  ;;  %v5920_v23 = vunpack.i.l.bf16 %v5919_v45 }
0x18ee   :  { %v4681_v52 = vsel %vm684_vm14, %v4426_v12, %v5915_v26  ;;  %v4682_v29 = vsel %vm684_vm14, %v4428_v32, %v5916_v13 }
0x18ef   :  { %v4688_v50 = vsel %vm1541_vm0, %v4682_v29, %v5921_v33  ;;  %v4687_v56 = vsel %vm1541_vm0, %v4681_v52, %v5920_v23 }
0x18f0   :  { %v4693_v60 = vsel %vm1548_vm1, %v4687_v56, %v5925_v28  ;;  %v4694_v42 = vsel %vm1548_vm1, %v4688_v50, %v5926_v36 }
0x18f1   :  { %v4698_v61 = vpack.c.bf16 %v4694_v42, %v4693_v60 }
0x18f2   :  { %v4431_v14 = vpop.f32.mrf.mxu3 }
0x18f3   :  { %5631 = vmatmul.msk.bf16.gmra.mxu3 %vm237_vm4, %v4698_v61 }
0x18fa   :  { %v4433_v9 = vpop.f32.mrf.mxu3 }
0x1909   :  { %v5939_v51 = vpop.permute.xlu2 %5938 }
0x190a   :  { %v5941_v37 = vunpack.i.h.bf16 %v5939_v51  ;;  %v5940_v54 = vunpack.i.l.bf16 %v5939_v51 }
0x190b   :  { %v5929_v62 = vpop.permute.xlu0 %5928 }
0x190c   :  { %v5931_v22 = vunpack.i.h.bf16 %v5929_v62  ;;  %v5930_v48 = vunpack.i.l.bf16 %v5929_v62 }
0x190e   :  { %v4683_v18 = vsel %vm684_vm14, %v4431_v14, %v5930_v48  ;;  %v4684_v16 = vsel %vm684_vm14, %v4433_v9, %v5931_v22 }
0x1913   :  { %v5934_v3 = vpop.permute.xlu1 %5933 }
0x1914   :  { %v5936_v21 = vunpack.i.h.bf16 %v5934_v3  ;;  %v5935_v10 = vunpack.i.l.bf16 %v5934_v3 }
0x1916   :  { %v4690_v46 = vsel %vm1541_vm0, %v4684_v16, %v5936_v21  ;;  %v4689_v11 = vsel %vm1541_vm0, %v4683_v18, %v5935_v10  ;;  %v5752_v18 = vld [vmem:[%s7266_s28 + $0x28] sm:$0xff] }
0x1917   :  { %v4695_v0 = vsel %vm1548_vm1, %v4689_v11, %v5940_v54  ;;  %v4696_v47 = vsel %vm1548_vm1, %v4690_v46, %v5941_v37  ;;  %4955 = vmatpush.bf16.msrb.mxu0 %v5752_v18  ;;  %v5751_v11 = vld [vmem:[%s7266_s28 + $0x20] sm:$0xff] }
0x1918   :  { %v4699_v39 = vpack.c.bf16 %v4696_v47, %v4695_v0 }
0x191a   :  { %5632 = vmatmul.msk.bf16.gmra.mxu3 %vm237_vm4, %v4699_v39 }
0x191b   :  { %4956 = vmatpush.bf16.msrb.mxu0 %v5751_v11 }
0x193c   :  { %v4740_v5 = vpop.f32.mrf.mxu3 }
0x193d   :  { %v4741_v63 = vadd.f32 %v5967_v15, %v4740_v5 }
0x193f   :  { %v4755_v25 = vadd.f32 %v4741_v63, %v8061_v27 }
0x1941   :  { %v4765_v55 = vsel %vm237_vm4, %v4755_v25, 0.0 }
0x1942   :  { %4766 = vadd.xlane.f32.xlu0 %v4765_v55 }
0x1944   :  { %v4742_v8 = vpop.f32.mrf.mxu3 }
0x1945   :  { %v4743_v57 = vadd.f32 %v5967_v15, %v4742_v8 }
0x1947   :  { %v4756_v58 = vadd.f32 %v4743_v57, %v8066_v4 }
0x1949   :  { %v4768_v59 = vsel %vm237_vm4, %v4756_v58, 0.0 }
0x194a   :  { %4769 = vadd.xlane.f32.xlu1 %v4768_v59 }
0x1976   :  { %v4745_v1 = vpop.f32.mrf.mxu3 }
0x1977   :  { %v4746_v38 = vadd.f32 %v5967_v15, %v4745_v1 }
0x1979   :  { %v8656_v34 = vadd.f32 %v4746_v38, %v8071_v31 }
0x197b   :  { %v4771_v30 = vsel %vm237_vm4, %v8656_v34, 0.0 }
0x197c   :  { %4772 = vadd.xlane.f32.xlu2 %v4771_v30 }
0x197e   :  { %v4747_v27 = vpop.f32.mrf.mxu3 }
0x197f   :  { %v4748_v24 = vadd.f32 %v5967_v15, %v4747_v27  ;;  %v8720_v27 = vld [vmem:[%s7210_s10 + $0x2] ss:$0 sm:$0xff]  ;;  %s5350_s10 = sld [smem:[%s8826_s0 + %s6441_s23]]  }
0x1981   :  { %v8661_v41 = vadd.f32 %v4748_v24, %v8076_v19 }
0x1983   :  { %v4774_v4 = vsel %vm237_vm4, %v8661_v41, 0.0 }
0x1984   :  { %4775 = vadd.xlane.f32.xlu0 %v4774_v4 }
0x199d   :  { %v4750_v17 = vpop.f32.mrf.mxu3 }
0x199e   :  { %v4751_v35 = vadd.f32 %v5967_v15, %v4750_v17 }
0x19a0   :  { %v8666_v43 = vadd.f32 %v4751_v35, %v8081_v2  ;;  %v8724_v35 = vld [vmem:[%s7234_s20 + $0x2] ss:$0 sm:$0xff]  ;;  %s6442_s20 = smov 30  }
0x19a1   :  { %s5352_s1 = sld [smem:[%s8826_s0 + %s6442_s20]]  }
0x19a2   :  { %v4777_v31 = vsel %vm237_vm4, %v8666_v43, 0.0 }
0x19a3   :  { %4778 = vadd.xlane.f32.xlu1 %v4777_v31 }
0x19a5   :  { %v4752_v40 = vpop.f32.mrf.mxu3 }
0x19a6   :  { %v4753_v7 = vadd.f32 %v5967_v15, %v4752_v40 }
0x19a8   :  { %v8671_v6 = vadd.f32 %v4753_v7, %v8086_v20 }
0x19aa   :  { %v4780_v19 = vsel %vm237_vm4, %v8671_v6, 0.0 }
0x19ab   :  { %4781 = vadd.xlane.f32.xlu2 %v4780_v19 }
0x19b5   :  { %v4767_v12 = vpop.xlane.xlu0 %4766 }
0x19b6   :  { %v4783_v49 = vmul.f32 %v4767_v12, %v6502_v53 }
0x19b8   :  { %v8676_v44 = vsub.f32 %v4755_v25, %v4783_v49 }
0x19ba   :  { %v4795_v2 = vmul.f32 %v8676_v44, %v8676_v44 }
0x19bc   :  { %v4801_v13 = vsel %vm237_vm4, %v4795_v2, 0.0 }
0x19bd   :  { %v4770_v26 = vpop.xlane.xlu1 %4769  ;;  %4802 = vadd.xlane.f32.xlu0 %v4801_v13 }
0x19be   :  { %v4784_v45 = vmul.f32 %v4770_v26, %v6502_v53 }
0x19c0   :  { %v8682_v20 = vsub.f32 %v4756_v58, %v4784_v45 }
0x19c2   :  { %v4796_v32 = vmul.f32 %v8682_v20, %v8682_v20 }
0x19c4   :  { %v4804_v33 = vsel %vm237_vm4, %v4796_v32, 0.0 }
0x19c5   :  { %4805 = vadd.xlane.f32.xlu1 %v4804_v33 }
0x19ef   :  { %v4773_v23 = vpop.xlane.xlu2 %4772 }
0x19f0   :  { %v4785_v36 = vmul.f32 %v4773_v23, %v6502_v53 }
0x19f2   :  { %v8689_v28 = vsub.f32 %v8656_v34, %v4785_v36 }
0x19f4   :  { %v4797_v52 = vmul.f32 %v8689_v28, %v8689_v28 }
0x19f6   :  { %v4807_v29 = vsel %vm237_vm4, %v4797_v52, 0.0 }
0x19f7   :  { %4808 = vadd.xlane.f32.xlu2 %v4807_v29  ;;  %v4776_v50 = vpop.xlane.xlu0 %4775 }
0x19f8   :  { %v4786_v56 = vmul.f32 %v4776_v50, %v6502_v53 }
0x19fa   :  { %v8696_v60 = vsub.f32 %v8661_v41, %v4786_v56 }
0x19fc   :  { %v4798_v42 = vmul.f32 %v8696_v60, %v8696_v60 }
0x19fe   :  { %v4810_v61 = vsel %vm237_vm4, %v4798_v42, 0.0 }
0x19ff   :  { %4811 = vadd.xlane.f32.xlu0 %v4810_v61 }
0x1a16   :  { %v4779_v14 = vpop.xlane.xlu1 %4778 }
0x1a17   :  { %v4787_v62 = vmul.f32 %v4779_v14, %v6502_v53 }
0x1a19   :  { %v8703_v22 = vsub.f32 %v8666_v43, %v4787_v62 }
0x1a1b   :  { %v4799_v48 = vmul.f32 %v8703_v22, %v8703_v22 }
0x1a1d   :  { %v4813_v51 = vsel %vm237_vm4, %v4799_v48, 0.0 }
0x1a1e   :  { %v4782_v3 = vpop.xlane.xlu2 %4781  ;;  %4814 = vadd.xlane.f32.xlu1 %v4813_v51 }
0x1a1f   :  { %v4788_v9 = vmul.f32 %v4782_v3, %v6502_v53 }
0x1a21   :  { %v8710_v21 = vsub.f32 %v8671_v6, %v4788_v9 }
0x1a23   :  { %v4800_v10 = vmul.f32 %v8710_v21, %v8710_v21 }
0x1a25   :  { %v4816_v37 = vsel %vm237_vm4, %v4800_v10, 0.0 }
0x1a26   :  { %4817 = vadd.xlane.f32.xlu2 %v4816_v37 }
0x1a30   :  { %v4803_v54 = vpop.xlane.xlu0 %4802 }
0x1a31   :  { %v4819_v16 = vmul.f32 %v4803_v54, %v6502_v53 }
0x1a33   :  { %v4825_v46 = vadd.f32 1e-05, %v4819_v16 }
0x1a35   :  { %6362 = vrsqrt.f32 %v4825_v46  ;;  %vm4837_vm15 = vweird.f32 %v4825_v46 }
0x1a38   :  { %v4806_v0 = vpop.xlane.xlu1 %4805 }
0x1a39   :  { %v4820_v47 = vmul.f32 %v4806_v0, %v6502_v53 }
0x1a3b   :  { %v6363_v39 = vpop.eup %6362  ;;  %v4826_v15 = vadd.f32 1e-05, %v4820_v47 }
0x1a3c   :  { %v4832_v5 = vmul.f32 %v6363_v39, %v4825_v46  ;;  %vm4838_vm14 = vweird.f32 %v6363_v39 }
0x1a3d   :  { %6364 = vrsqrt.f32 %v4826_v15  ;;  %vm4839_vm0 = vmor %vm4837_vm15, %vm4838_vm14  ;;  %vm4847_vm6 = vweird.f32 %v4826_v15 }
0x1a3e   :  { %v4833_v63 = vmul.f32 %v6363_v39, %v4832_v5 }
0x1a40   :  { %v4834_v25 = vmul.f32 0.5, %v4833_v63 }
0x1a42   :  { %v4835_v55 = vsub.f32 1.5, %v4834_v25 }
0x1a43   :  { %v6365_v8 = vpop.eup %6364 }
0x1a44   :  { %v4836_v57 = vmul.f32 %v6363_v39, %v4835_v55  ;;  %v4842_v58 = vmul.f32 %v6365_v8, %v4826_v15  ;;  %vm4848_vm1 = vweird.f32 %v6365_v8 }
0x1a45   :  { %vm4849_vm7 = vmor %vm4847_vm6, %vm4848_vm1 }
0x1a46   :  { %v4843_v59 = vmul.f32 %v6365_v8, %v4842_v58  ;;  %v4840_v1 = vsel %vm4839_vm0, %v6363_v39, %v4836_v57 }
0x1a47   :  { %v4891_v24 = vmul.f32 %v4840_v1, %v8676_v44 }
0x1a48   :  { %v4844_v38 = vmul.f32 0.5, %v4843_v59 }
0x1a49   :  { %v4900_v31 = vmul.f32 %v8720_v27, %v4891_v24 }
0x1a4a   :  { %v4845_v30 = vsub.f32 1.5, %v4844_v38 }
0x1a4b   :  { %v4909_v19 = vadd.f32 %v8724_v35, %v4900_v31 }
0x1a4c   :  { %v4846_v4 = vmul.f32 %v6365_v8, %v4845_v30 }
0x1a4e   :  { %v4850_v17 = vsel %vm4849_vm7, %v6365_v8, %v4846_v4 }
0x1a4f   :  { %v4892_v40 = vmul.f32 %v4850_v17, %v8682_v20 }
0x1a51   :  { %v4901_v7 = vmul.f32 %v8720_v27, %v4892_v40 }
0x1a53   :  { %v4910_v12 = vadd.f32 %v8724_v35, %v4901_v7 }
0x1a55   :  { %v4915_v49 = vpack.c.bf16 %v4910_v12, %v4909_v19  ;;  %v5760_v12 = vld [vmem:[%s7306_s18 + $0xb8] sm:$0xff] }
0x1a56   :  { %5100 = vmatpush.bf16.msrb.mxu1 %v5760_v12 }
0x1a57   :  { %5648 = vmatmul.msk.bf16.vlgmr.msrb.gmra.mxu0 %vm237_vm4, %v4915_v49  ;;  %v5759_v49 = vld [vmem:[%s7306_s18 + $0xb0] sm:$0xff] }
0x1a5a   :  { %5101 = vmatpush.bf16.msrb.mxu1 %v5759_v49 }
0x1a6a   :  { %v4809_v44 = vpop.xlane.xlu2 %4808 }
0x1a6b   :  { %v4821_v2 = vmul.f32 %v4809_v44, %v6502_v53  ;;  %v5757_v44 = vld [vmem:[%s7306_s18 + $0xa0] sm:$0xff] }
0x1a6d   :  { %v4827_v13 = vadd.f32 1e-05, %v4821_v2  ;;  %v5756_v2 = vld [vmem:[%s7306_s18 + $0x98] sm:$0xff] }
0x1a6f   :  { %6366 = vrsqrt.f32 %v4827_v13  ;;  %vm4857_vm9 = vweird.f32 %v4827_v13 }
0x1a72   :  { %v4812_v26 = vpop.xlane.xlu0 %4811 }
0x1a73   :  { %v4822_v45 = vmul.f32 %v4812_v26, %v6502_v53  ;;  %v5970_v26 = vld [vmem:[%s7276_s5 + $0x2] ss:$0 sm:$0xff] }
0x1a75   :  { %v6367_v32 = vpop.eup %6366  ;;  %v4828_v33 = vadd.f32 1e-05, %v4822_v45 }
0x1a76   :  { %v4852_v20 = vmul.f32 %v6367_v32, %v4827_v13  ;;  %vm4858_vm8 = vweird.f32 %v6367_v32  ;;  %v5754_v13 = vld [vmem:[%s7306_s18 + $0x88] sm:$0xff] }
0x1a77   :  { %6368 = vrsqrt.f32 %v4828_v33  ;;  %vm4859_vm10 = vmor %vm4857_vm9, %vm4858_vm8  ;;  %vm4867_vm12 = vweird.f32 %v4828_v33 }
0x1a78   :  { %v4853_v23 = vmul.f32 %v6367_v32, %v4852_v20 }
0x1a7a   :  { %v4854_v36 = vmul.f32 0.5, %v4853_v23 }
0x1a7c   :  { %v4855_v52 = vsub.f32 1.5, %v4854_v36 }
0x1a7d   :  { %v6369_v29 = vpop.eup %6368 }
0x1a7e   :  { %v4856_v50 = vmul.f32 %v6367_v32, %v4855_v52  ;;  %v4862_v56 = vmul.f32 %v6369_v29, %v4828_v33  ;;  %vm4868_vm11 = vweird.f32 %v6369_v29 }
0x1a7f   :  { %vm4869_vm13 = vmor %vm4867_vm12, %vm4868_vm11 }
0x1a80   :  { %v4863_v42 = vmul.f32 %v6369_v29, %v4862_v56  ;;  %v4860_v61 = vsel %vm4859_vm10, %v6367_v32, %v4856_v50 }
0x1a81   :  { %v4893_v48 = vmul.f32 %v4860_v61, %v8689_v28 }
0x1a82   :  { %v4864_v14 = vmul.f32 0.5, %v4863_v42 }
0x1a83   :  { %v4902_v10 = vmul.f32 %v8720_v27, %v4893_v48 }
0x1a84   :  { %v4865_v62 = vsub.f32 1.5, %v4864_v14 }
0x1a85   :  { %v4911_v54 = vadd.f32 %v8724_v35, %v4902_v10 }
0x1a86   :  { %v4866_v51 = vmul.f32 %v6369_v29, %v4865_v62 }
0x1a88   :  { %v4870_v3 = vsel %vm4869_vm13, %v6369_v29, %v4866_v51 }
0x1a89   :  { %v4894_v9 = vmul.f32 %v4870_v3, %v8696_v60 }
0x1a8b   :  { %v4903_v37 = vmul.f32 %v8720_v27, %v4894_v9 }
0x1a8d   :  { %v4912_v18 = vadd.f32 %v8724_v35, %v4903_v37 }
0x1a8f   :  { %v4916_v16 = vpack.c.bf16 %v4912_v18, %v4911_v54 }
0x1a91   :  { %v4815_v46 = vpop.xlane.xlu1 %4814  ;;  %5649 = vmatmul.msk.bf16.gmra.mxu0 %vm237_vm4, %v4916_v16 }
0x1a92   :  { %v4823_v28 = vmul.f32 %v4815_v46, %v6502_v53 }
0x1a94   :  { %v4829_v11 = vadd.f32 1e-05, %v4823_v28 }
0x1a96   :  { %6370 = vrsqrt.f32 %v4829_v11  ;;  %vm4877_vm5 = vweird.f32 %v4829_v11 }
0x1a99   :  { %v4818_v0 = vpop.xlane.xlu2 %4817 }
0x1a9a   :  { %v4824_v47 = vmul.f32 %v4818_v0, %v6502_v53 }
0x1a9c   :  { %v6371_v60 = vpop.eup %6370  ;;  %v4830_v39 = vadd.f32 1e-05, %v4824_v47 }
0x1a9d   :  { %v4872_v15 = vmul.f32 %v6371_v60, %v4829_v11  ;;  %vm4878_vm3 = vweird.f32 %v6371_v60 }
0x1a9e   :  { %6372 = vrsqrt.f32 %v4830_v39  ;;  %vm4879_vm14 = vmor %vm4877_vm5, %vm4878_vm3  ;;  %vm4887_vm0 = vweird.f32 %v4830_v39 }
0x1a9f   :  { %v4873_v5 = vmul.f32 %v6371_v60, %v4872_v15 }
0x1aa1   :  { %v4874_v63 = vmul.f32 0.5, %v4873_v5 }
0x1aa3   :  { %v4875_v25 = vsub.f32 1.5, %v4874_v63 }
0x1aa4   :  { %v6373_v55 = vpop.eup %6372 }
0x1aa5   :  { %v4876_v8 = vmul.f32 %v6371_v60, %v4875_v25  ;;  %v4882_v57 = vmul.f32 %v6373_v55, %v4830_v39  ;;  %vm4888_vm15 = vweird.f32 %v6373_v55 }
0x1aa6   :  { %vm4889_vm1 = vmor %vm4887_vm0, %vm4888_vm15 }
0x1aa7   :  { %v4883_v58 = vmul.f32 %v6373_v55, %v4882_v57  ;;  %v4880_v59 = vsel %vm4879_vm14, %v6371_v60, %v4876_v8 }
0x1aa8   :  { %v4895_v30 = vmul.f32 %v4880_v59, %v8703_v22 }
0x1aa9   :  { %v4884_v1 = vmul.f32 0.5, %v4883_v58 }
0x1aaa   :  { %v4904_v31 = vmul.f32 %v8720_v27, %v4895_v30 }
0x1aab   :  { %v4885_v38 = vsub.f32 1.5, %v4884_v1 }
0x1aac   :  { %v4913_v7 = vadd.f32 %v8724_v35, %v4904_v31 }
0x1aad   :  { %v4886_v24 = vmul.f32 %v6373_v55, %v4885_v38 }
0x1aaf   :  { %v4890_v4 = vsel %vm4889_vm1, %v6373_v55, %v4886_v24 }
0x1ab0   :  { %v4896_v17 = vmul.f32 %v4890_v4, %v8710_v21  ;;  %v5758_v21 = vld [vmem:[%s7306_s18 + $0xa8] sm:$0xff] }
0x1ab1   :  { %5102 = vmatpush.bf16.msrb.mxu1 %v5758_v21 }
0x1ab2   :  { %v4905_v40 = vmul.f32 %v8720_v27, %v4896_v17  ;;  %v5755_v27 = vld [vmem:[%s7306_s18 + $0x90] sm:$0xff] }
0x1ab4   :  { %v4914_v19 = vadd.f32 %v8724_v35, %v4905_v40  ;;  %v5753_v35 = vld [vmem:[%s7306_s18 + $0x80] sm:$0xff]  ;;  %s6444_s18 = smov 32  }
0x1ab5   :  { %5103 = vmatpush.bf16.msrb.mxu1 %v5757_v44  ;;  %s5354_s25 = sld [smem:[%s8826_s0 + %s6444_s18]]  }
0x1ab6   :  { %v4917_v22 = vpack.c.bf16 %v4914_v19, %v4913_v7 }
0x1ab8   :  { %5650 = vmatmul.msk.bf16.gmra.mxu0 %vm237_vm4, %v4917_v22 }
0x1ab9   :  { %5104 = vmatpush.bf16.msrb.mxu1 %v5756_v2 }
0x1abd   :  { %5105 = vmatpush.bf16.msrb.mxu1 %v5755_v27 }
0x1ac1   :  { %5106 = vmatpush.bf16.msrb.mxu1 %v5754_v13 }
0x1ac5   :  { %5107 = vmatpush.bf16.msrb.mxu1 %v5753_v35 }
0x1ad4   :  { %v4958_v45 = vpop.f32.mrf.mxu0 }
0x1ad5   :  { %v4959_v32 = vadd.f32 %v5970_v26, %v4958_v45 }
0x1ad7   :  { %v4979_v33 = vmul.f32 0.044715, %v4959_v32  ;;  %v4973_v9 = vmul.f32 0.5, %v4959_v32 }
0x1ad9   :  { %v4985_v20 = vmul.f32 %v4979_v33, %v4959_v32 }
0x1adb   :  { %v4991_v23 = vmul.f32 %v4985_v20, %v4959_v32 }
0x1adc   :  { %v4960_v36 = vpop.f32.mrf.mxu0 }
0x1add   :  { %v4997_v52 = vadd.f32 %v4991_v23, %v4959_v32  ;;  %v4961_v29 = vadd.f32 %v5970_v26, %v4960_v36 }
0x1adf   :  { %v4980_v50 = vmul.f32 0.044715, %v4961_v29  ;;  %v5003_v56 = vmul.f32 0.7978846, %v4997_v52  ;;  %v4974_v10 = vmul.f32 0.5, %v4961_v29 }
0x1ae1   :  { %v4986_v42 = vmul.f32 %v4980_v50, %v4961_v29  ;;  %6374 = vtanh.f32 %v5003_v56 }
0x1ae3   :  { %v4992_v61 = vmul.f32 %v4986_v42, %v4961_v29 }
0x1ae5   :  { %v4998_v14 = vadd.f32 %v4992_v61, %v4961_v29 }
0x1ae7   :  { %v5004_v62 = vmul.f32 0.7978846, %v4998_v14  ;;  %v6375_v48 = vpop.eup %6374  ;;  %v5971_v14 = vld [vmem:[%s7331_s26 + $0x2] ss:$0 sm:$0xff] }
0x1ae8   :  { %v5015_v51 = vadd.f32 1.0, %v6375_v48 }
0x1ae9   :  { %6376 = vtanh.f32 %v5004_v62 }
0x1aea   :  { %v5021_v54 = vmul.f32 %v5015_v51, %v4973_v9 }
0x1aef   :  { %v6377_v3 = vpop.eup %6376 }
0x1af0   :  { %v5016_v37 = vadd.f32 1.0, %v6377_v3 }
0x1af2   :  { %v5022_v18 = vmul.f32 %v5016_v37, %v4974_v10 }
0x1af4   :  { %v5027_v16 = vpack.c.bf16 %v5022_v18, %v5021_v54 }
0x1af6   :  { %5108 = vmatmul.bf16.vlgmr.msrb.gmra.mxu1 %v5027_v16 }
0x1b0e   :  { %v4963_v46 = vpop.f32.mrf.mxu0 }
0x1b0f   :  { %v4964_v28 = vadd.f32 %v5970_v26, %v4963_v46 }
0x1b11   :  { %v4981_v11 = vmul.f32 0.044715, %v4964_v28  ;;  %v4975_v38 = vmul.f32 0.5, %v4964_v28 }
0x1b13   :  { %v4987_v0 = vmul.f32 %v4981_v11, %v4964_v28 }
0x1b15   :  { %v4993_v47 = vmul.f32 %v4987_v0, %v4964_v28 }
0x1b16   :  { %v4965_v60 = vpop.f32.mrf.mxu0 }
0x1b17   :  { %v4966_v39 = vadd.f32 %v5970_v26, %v4965_v60  ;;  %v4999_v15 = vadd.f32 %v4993_v47, %v4964_v28 }
0x1b19   :  { %v4982_v5 = vmul.f32 0.044715, %v4966_v39  ;;  %v5005_v25 = vmul.f32 0.7978846, %v4999_v15  ;;  %v4976_v30 = vmul.f32 0.5, %v4966_v39 }
0x1b1b   :  { %v4988_v63 = vmul.f32 %v4982_v5, %v4966_v39  ;;  %6378 = vtanh.f32 %v5005_v25 }
0x1b1d   :  { %v4994_v55 = vmul.f32 %v4988_v63, %v4966_v39 }
0x1b1f   :  { %v5000_v8 = vadd.f32 %v4994_v55, %v4966_v39 }
0x1b21   :  { %v5006_v57 = vmul.f32 0.7978846, %v5000_v8  ;;  %v6379_v58 = vpop.eup %6378 }
0x1b22   :  { %v5017_v59 = vadd.f32 1.0, %v6379_v58 }
0x1b23   :  { %6380 = vtanh.f32 %v5006_v57 }
0x1b24   :  { %v5023_v4 = vmul.f32 %v5017_v59, %v4975_v38 }
0x1b29   :  { %v6381_v1 = vpop.eup %6380 }
0x1b2a   :  { %v5018_v24 = vadd.f32 1.0, %v6381_v1 }
0x1b2c   :  { %v5024_v17 = vmul.f32 %v5018_v24, %v4976_v30 }
0x1b2e   :  { %v5028_v31 = vpack.c.bf16 %v5024_v17, %v5023_v4 }
0x1b30   :  { %5111 = vmatmul.bf16.gmra.mxu1 %v5028_v31 }
0x1b35   :  { %v4968_v40 = vpop.f32.mrf.mxu0 }
0x1b36   :  { %v4969_v7 = vadd.f32 %v5970_v26, %v4968_v40  ;;  %v5762_v40 = vld [vmem:[%s5350_s10 + $0x8] sm:$0xff] }
0x1b37   :  { %5260 = vmatpush.bf16.msrb.mxu2 %v5762_v40 }
0x1b38   :  { %v4983_v19 = vmul.f32 0.044715, %v4969_v7  ;;  %v4977_v36 = vmul.f32 0.5, %v4969_v7 }
0x1b3a   :  { %v4989_v22 = vmul.f32 %v4983_v19, %v4969_v7 }
0x1b3c   :  { %v4995_v12 = vmul.f32 %v4989_v22, %v4969_v7  ;;  %v5761_v22 = vld [vmem:[%s5350_s10] sm:$0xff] }
0x1b3d   :  { %v4970_v49 = vpop.f32.mrf.mxu0  ;;  %5261 = vmatpush.bf16.msrb.mxu2 %v5761_v22  ;;  %v5974_v22 = vld [vmem:[%s8797_s21] ss:$0 sm:$0xff] }
0x1b3e   :  { %v4971_v21 = vadd.f32 %v5970_v26, %v4970_v49  ;;  %v5001_v44 = vadd.f32 %v4995_v12, %v4969_v7 }
0x1b40   :  { %v4984_v2 = vmul.f32 0.044715, %v4971_v21  ;;  %v5007_v13 = vmul.f32 0.7978846, %v5001_v44  ;;  %v4978_v52 = vmul.f32 0.5, %v4971_v21 }
0x1b42   :  { %v4990_v27 = vmul.f32 %v4984_v2, %v4971_v21  ;;  %6382 = vtanh.f32 %v5007_v13 }
0x1b44   :  { %v4996_v35 = vmul.f32 %v4990_v27, %v4971_v21 }
0x1b46   :  { %v5002_v45 = vadd.f32 %v4996_v35, %v4971_v21 }
0x1b48   :  { %v5008_v32 = vmul.f32 0.7978846, %v5002_v45  ;;  %v6383_v33 = vpop.eup %6382 }
0x1b49   :  { %v5019_v20 = vadd.f32 1.0, %v6383_v33 }
0x1b4a   :  { %6384 = vtanh.f32 %v5008_v32 }
0x1b4b   :  { %v5025_v50 = vmul.f32 %v5019_v20, %v4977_v36 }
0x1b50   :  { %v6385_v23 = vpop.eup %6384 }
0x1b51   :  { %v5020_v29 = vadd.f32 1.0, %v6385_v23 }
0x1b53   :  { %v5026_v56 = vmul.f32 %v5020_v29, %v4978_v52  ;;  %v5972_v29 = vld [vmem:[%s8769_s8] ss:$0 sm:$0xff] }
0x1b55   :  { %v5029_v42 = vpack.c.bf16 %v5026_v56, %v5025_v50 }
0x1b57   :  { %5116 = vmatmul.bf16.gmra.mxu1 %v5029_v42 }
0x1b73   :  { %v5109_v26 = vpop.f32.mrf.mxu1 }
0x1b74   :  { %v5973_v26 = vld [vmem:[%s8775_s14] ss:$0 sm:$0xff] }
0x1b7b   :  { %v5110_v61 = vpop.f32.mrf.mxu1 }
0x1bad   :  { %v5112_v62 = vpop.f32.mrf.mxu1 }
0x1bae   :  { %v5113_v48 = vadd.f32 %v5971_v14, %v5112_v62 }
0x1bb0   :  { %v5122_v51 = vadd.f32 %v5113_v48, %v8656_v34 }
0x1bb2   :  { %v5128_v3 = vsel %vm237_vm4, %v5122_v51, 0.0 }
0x1bb3   :  { %5129 = vadd.xlane.f32.xlu0 %v5128_v3 }
0x1bb5   :  { %v5114_v9 = vpop.f32.mrf.mxu1 }
0x1bb6   :  { %v5115_v10 = vadd.f32 %v5971_v14, %v5114_v9 }
0x1bb8   :  { %v5123_v37 = vadd.f32 %v5115_v10, %v8661_v41  ;;  %v5764_v10 = vld [vmem:[%s5352_s1 + $0x8] sm:$0xff] }
0x1bb9   :  { %5298 = vmatpush.bf16.msra.mxu2 %v5764_v10 }
0x1bba   :  { %v5131_v54 = vsel %vm237_vm4, %v5123_v37, 0.0 }
0x1bbb   :  { %5132 = vadd.xlane.f32.xlu1 %v5131_v54 }
0x1bd4   :  { %v5117_v18 = vpop.f32.mrf.mxu1 }
0x1bd5   :  { %v5118_v16 = vadd.f32 %v5971_v14, %v5117_v18  ;;  %v5763_v18 = vld [vmem:[%s5352_s1] sm:$0xff] }
0x1bd6   :  { %5299 = vmatpush.bf16.msra.mxu2 %v5763_v18 }
0x1bd7   :  { %v5124_v46 = vadd.f32 %v5118_v16, %v8666_v43 }
0x1bd9   :  { %v5134_v28 = vsel %vm237_vm4, %v5124_v46, 0.0 }
0x1bda   :  { %5135 = vadd.xlane.f32.xlu2 %v5134_v28 }
0x1bdc   :  { %v5119_v11 = vpop.f32.mrf.mxu1 }
0x1bdd   :  { %v5120_v0 = vadd.f32 %v5971_v14, %v5119_v11 }
0x1bdf   :  { %v5125_v34 = vadd.f32 %v5120_v0, %v8671_v6 }
0x1be1   :  { %v5137_v41 = vsel %vm237_vm4, %v5125_v34, 0.0 }
0x1be2   :  { %5138 = vadd.xlane.f32.xlu0 %v5137_v41 }
0x1c26   :  { %v5130_v43 = vpop.xlane.xlu0 %5129 }
0x1c27   :  { %v5140_v47 = vmul.f32 %v5130_v43, %v6502_v53 }
0x1c29   :  { %v5144_v60 = vsub.f32 %v5122_v51, %v5140_v47 }
0x1c2b   :  { %v5148_v39 = vmul.f32 %v5144_v60, %v5144_v60 }
0x1c2d   :  { %v5152_v15 = vsel %vm237_vm4, %v5148_v39, 0.0 }
0x1c2e   :  { %v5133_v5 = vpop.xlane.xlu1 %5132  ;;  %5153 = vadd.xlane.f32.xlu1 %v5152_v15 }
0x1c2f   :  { %v5141_v6 = vmul.f32 %v5133_v5, %v6502_v53 }
0x1c31   :  { %v5145_v63 = vsub.f32 %v5123_v37, %v5141_v6 }
0x1c33   :  { %v5149_v25 = vmul.f32 %v5145_v63, %v5145_v63 }
0x1c35   :  { %v5155_v55 = vsel %vm237_vm4, %v5149_v25, 0.0 }
0x1c36   :  { %5156 = vadd.xlane.f32.xlu2 %v5155_v55 }
0x1c4d   :  { %v5136_v8 = vpop.xlane.xlu2 %5135 }
0x1c4e   :  { %v5142_v57 = vmul.f32 %v5136_v8, %v6502_v53 }
0x1c50   :  { %v8783_v58 = vsub.f32 %v5124_v46, %v5142_v57 }
0x1c52   :  { %v5150_v59 = vmul.f32 %v8783_v58, %v8783_v58 }
0x1c54   :  { %v5158_v1 = vsel %vm237_vm4, %v5150_v59, 0.0 }
0x1c55   :  { %5159 = vadd.xlane.f32.xlu0 %v5158_v1  ;;  %v5139_v38 = vpop.xlane.xlu0 %5138 }
0x1c56   :  { %v5143_v30 = vmul.f32 %v5139_v38, %v6502_v53 }
0x1c58   :  { %v8789_v24 = vsub.f32 %v5125_v34, %v5143_v30 }
0x1c5a   :  { %v5151_v4 = vmul.f32 %v8789_v24, %v8789_v24 }
0x1c5c   :  { %v5161_v17 = vsel %vm237_vm4, %v5151_v4, 0.0 }
0x1c5d   :  { %5162 = vadd.xlane.f32.xlu1 %v5161_v17 }
0x1ca1   :  { %v5154_v31 = vpop.xlane.xlu1 %5153 }
0x1ca2   :  { %v5164_v7 = vmul.f32 %v5154_v31, %v6502_v53 }
0x1ca4   :  { %v5168_v19 = vadd.f32 1e-05, %v5164_v7 }
0x1ca6   :  { %6386 = vrsqrt.f32 %v5168_v19  ;;  %vm5178_vm7 = vweird.f32 %v5168_v19 }
0x1ca9   :  { %v5157_v12 = vpop.xlane.xlu2 %5156 }
0x1caa   :  { %v5165_v49 = vmul.f32 %v5157_v12, %v6502_v53 }
0x1cac   :  { %v6387_v21 = vpop.eup %6386  ;;  %v5169_v44 = vadd.f32 1e-05, %v5165_v49 }
0x1cad   :  { %v5173_v2 = vmul.f32 %v6387_v21, %v5168_v19  ;;  %vm5179_vm6 = vweird.f32 %v6387_v21 }
0x1cae   :  { %6388 = vrsqrt.f32 %v5169_v44  ;;  %vm5180_vm8 = vmor %vm5178_vm7, %vm5179_vm6  ;;  %vm5188_vm10 = vweird.f32 %v5169_v44 }
0x1caf   :  { %v5174_v27 = vmul.f32 %v6387_v21, %v5173_v2 }
0x1cb1   :  { %v5175_v13 = vmul.f32 0.5, %v5174_v27 }
0x1cb3   :  { %v5176_v35 = vsub.f32 1.5, %v5175_v13 }
0x1cb4   :  { %v6389_v45 = vpop.eup %6388 }
0x1cb5   :  { %v5177_v32 = vmul.f32 %v6387_v21, %v5176_v35  ;;  %v5183_v33 = vmul.f32 %v6389_v45, %v5169_v44  ;;  %vm5189_vm9 = vweird.f32 %v6389_v45 }
0x1cb6   :  { %vm5190_vm11 = vmor %vm5188_vm10, %vm5189_vm9 }
0x1cb7   :  { %v5184_v20 = vmul.f32 %v6389_v45, %v5183_v33  ;;  %v5181_v23 = vsel %vm5180_vm8, %v6387_v21, %v5177_v32 }
0x1cb8   :  { %v5212_v50 = vmul.f32 %v5181_v23, %v5144_v60 }
0x1cb9   :  { %v5185_v36 = vmul.f32 0.5, %v5184_v20 }
0x1cba   :  { %v5219_v61 = vmul.f32 %v5972_v29, %v5212_v50 }
0x1cbb   :  { %v5186_v52 = vsub.f32 1.5, %v5185_v36 }
0x1cbc   :  { %v5226_v48 = vadd.f32 %v5973_v26, %v5219_v61 }
0x1cbd   :  { %v5187_v56 = vmul.f32 %v6389_v45, %v5186_v52 }
0x1cbf   :  { %v5191_v42 = vsel %vm5190_vm11, %v6389_v45, %v5187_v56 }
0x1cc0   :  { %v5213_v14 = vmul.f32 %v5191_v42, %v5145_v63 }
0x1cc2   :  { %v5220_v62 = vmul.f32 %v5972_v29, %v5213_v14 }
0x1cc4   :  { %v5227_v51 = vadd.f32 %v5973_v26, %v5220_v62 }
0x1cc6   :  { %v5230_v3 = vpack.c.bf16 %v5227_v51, %v5226_v48 }
0x1cc8   :  { %5708 = vmatmul.msk.bf16.vlgmr.msrb.gmra.mxu2 %vm237_vm4, %v5230_v3  ;;  %v5160_v9 = vpop.xlane.xlu0 %5159 }
0x1cc9   :  { %v5166_v37 = vmul.f32 %v5160_v9, %v6502_v53 }
0x1ccb   :  { %v5170_v54 = vadd.f32 1e-05, %v5166_v37 }
0x1ccd   :  { %6390 = vrsqrt.f32 %v5170_v54  ;;  %vm5198_vm13 = vweird.f32 %v5170_v54 }
0x1cd0   :  { %v5163_v16 = vpop.xlane.xlu1 %5162 }
0x1cd1   :  { %v5167_v46 = vmul.f32 %v5163_v16, %v6502_v53 }
0x1cd3   :  { %v6391_v28 = vpop.eup %6390  ;;  %v5171_v11 = vadd.f32 1e-05, %v5167_v46 }
0x1cd4   :  { %v5193_v0 = vmul.f32 %v6391_v28, %v5170_v54  ;;  %vm5199_vm12 = vweird.f32 %v6391_v28 }
0x1cd5   :  { %6392 = vrsqrt.f32 %v5171_v11  ;;  %vm5200_vm3 = vmor %vm5198_vm13, %vm5199_vm12  ;;  %vm5208_vm14 = vweird.f32 %v5171_v11 }
0x1cd6   :  { %v5194_v34 = vmul.f32 %v6391_v28, %v5193_v0 }
0x1cd8   :  { %v5195_v41 = vmul.f32 0.5, %v5194_v34 }
0x1cda   :  { %v5196_v43 = vsub.f32 1.5, %v5195_v41 }
0x1cdb   :  { %v6393_v47 = vpop.eup %6392 }
0x1cdc   :  { %v5197_v60 = vmul.f32 %v6391_v28, %v5196_v43  ;;  %v5203_v39 = vmul.f32 %v6393_v47, %v5171_v11  ;;  %vm5209_vm5 = vweird.f32 %v6393_v47 }
0x1cdd   :  { %vm5210_vm15 = vmor %vm5208_vm14, %vm5209_vm5 }
0x1cde   :  { %v5204_v15 = vmul.f32 %v6393_v47, %v5203_v39  ;;  %v5201_v5 = vsel %vm5200_vm3, %v6391_v28, %v5197_v60 }
0x1cdf   :  { %v5214_v53 = vmul.f32 %v5201_v5, %v8783_v58  ;;  %v70_v58 = vstv %s5353_s12 }
0x1ce0   :  { %v5205_v6 = vmul.f32 0.5, %v5204_v15  ;;  %71 = vst [vmem:[#allocation2] sm:$0x1] %v70_v58 }
0x1ce1   :  { %v5221_v8 = vmul.f32 %v5972_v29, %v5214_v53 }
0x1ce2   :  { %v5206_v63 = vsub.f32 1.5, %v5205_v6 }
0x1ce3   :  { %v5228_v1 = vadd.f32 %v5973_v26, %v5221_v8 }
0x1ce4   :  { %v5207_v25 = vmul.f32 %v6393_v47, %v5206_v63 }
0x1ce6   :  { %v5211_v55 = vsel %vm5210_vm15, %v6393_v47, %v5207_v25 }
0x1ce7   :  { %v5215_v57 = vmul.f32 %v5211_v55, %v8789_v24  ;;  %v5975_v31 = vld [vmem:[#allocation2] ss:$0 sm:$0xff] }
0x1ce9   :  { %v5222_v59 = vmul.f32 %v5972_v29, %v5215_v57 }
0x1ceb   :  { %v5229_v38 = vadd.f32 %v5973_v26, %v5222_v59 }
0x1ced   :  { %v5268_v30 = vpack.c.bf16 %v5229_v38, %v5228_v1 }
0x1cef   :  { %5717 = vmatmul.msk.bf16.vlgmr.msra.gmra.mxu2 %vm237_vm4, %v5268_v30  ;;  %vm5316_vm4 = vcmask 56320  }
0x1d4b   :  { %v5263_v4 = vpop.f32.mrf.mxu2 }
0x1d4c   :  { %v5264_v12 = vadd.f32 %v5974_v22, %v5263_v4 }
0x1d53   :  { %v5265_v17 = vpop.f32.mrf.mxu2 }
0x1d54   :  { %v5266_v44 = vadd.f32 %v5974_v22, %v5265_v17 }
0x1d72   :  { %v5301_v40 = vpop.f32.mrf.mxu2 }
0x1d73   :  { %v5302_v7 = vadd.f32 %v5975_v31, %v5301_v40 }
0x1d75   :  { %5308 = vrot.lane.b32.xlu2 %v5302_v7, %s6411_s22 }
0x1d7a   :  { %v5303_v24 = vpop.f32.mrf.mxu2 }
0x1d7b   :  { %v5304_v19 = vadd.f32 %v5975_v31, %v5303_v24 }
0x1d7d   :  { %5310 = vrot.lane.b32.xlu0 %v5304_v19, %s6411_s22 }
0x1dcf   :  { %v5309_v49 = vpop.permute.xlu2 %5308 }
0x1dd0   :  { %v5314_v21 = vsel %vm211_vm2, %v5264_v12, %v5309_v49 }
0x1dd1   :  { %5317 = vst.msk [vmem:[%s5354_s25] sm:$0xff] %vm5316_vm4, %v5314_v21 }
0x1def   :  { %v5311_v2 = vpop.permute.xlu0 %5310 }
0x1df0   :  { %v5315_v27 = vsel %vm211_vm2, %v5266_v44, %v5311_v2 }
0x1df1   :  { %5318 = vst.msk [vmem:[%s5354_s25 + $0x8] sm:$0xff] %vm5316_vm4, %v5315_v27 }

</bundles_post_ra>
